<compile_context>
chip_gen: v7x
topology: tpu7x:2x2x1
jax: 0.10.0
libtpu: 0.0.40
codegen_flags: <defaults>
</compile_context>

<pallas_src>
import functools
import math

import jax
import jax.numpy as jnp
from jax.experimental import pallas as pl
from jax.experimental.pallas import tpu as pltpu

NUM_HEADS = 8


# ------------------------------ fused kernel ------------------------------- #

def _cross_attention_kernel(xq_ref, xkv_ref, wq_t_ref, bq_ref, wkv_t_ref,
                            bkv_ref, wp_t_ref, bp_ref, o_ref, *,
                            num_heads, head_batched):
    """One (batch, q-tile) grid step.  Channels-first layouts:
         xq_ref  : (1, C,  Tq)   query tokens (bf16, transposed)
         xkv_ref : (1, C,  Nkv)  key/value tokens (bf16, transposed)
         w*_t    : (C_out, C_in) transposed Linear weights (bf16, scale folded
                                 into wq_t / bq)
         b*      : (C_out, 1)    f32
         o_ref   : (1, C,  Tq)   f32
    """
    C = wq_t_ref.shape[0]
    H = num_heads
    d = C // H

    xq = xq_ref[0]                                             # (C, Tq)  bf16
    xkv = xkv_ref[0]                                           # (C, Nkv) bf16

    # Projections, channels-first:  Q^T = (scale * Wq)^T @ X  (scale pre-folded).
    q_t = jnp.dot(wq_t_ref[...], xq,
                  preferred_element_type=jnp.float32) + bq_ref[...]    # (C, Tq)  f32
    kv_t = jnp.dot(wkv_t_ref[...], xkv,
                   preferred_element_type=jnp.float32) + bkv_ref[...]  # (2C, Nkv) f32
    k_t = kv_t[:C]                                             # (C, Nkv)
    v_t = kv_t[C:]                                             # (C, Nkv)
    Tq = q_t.shape[-1]
    Nkv = k_t.shape[-1]

    if head_batched:
        # (H, d, N) reshapes are tile-aligned (d == 8) and free.
        qh = q_t.reshape(H, d, Tq).astype(jnp.bfloat16)
        kh = k_t.reshape(H, d, Nkv).astype(jnp.bfloat16)
        vh = v_t.reshape(H, d, Nkv).astype(jnp.bfloat16)

        # scores^T: (H, Nkv, Tq) -- single head-batched matmul, f32 accumulation.
        s_t = jnp.einsum("hdk,hdq->hkq", kh, qh,
                         preferred_element_type=jnp.float32)
        # softmax over the key axis (sublane axis); normalize after P@V.
        s_t = s_t - jnp.max(s_t, axis=1, keepdims=True)
        e = jnp.exp(s_t)                                       # (H, Nkv, Tq) f32
        denom = jnp.sum(e, axis=1, keepdims=True)              # (H, 1,   Tq)

        # head outputs^T: (H, d, Tq); contraction depth = Nkv (MXU-friendly).
        o_h = jnp.einsum("hdk,hkq->hdq", vh, e.astype(jnp.bfloat16),
                         preferred_element_type=jnp.float32)
        o_h = o_h * pl.reciprocal(denom, approx=True)          # post-PV normalize
        o_t = o_h.reshape(C, Tq).astype(jnp.bfloat16)          # (C, Tq)
    else:
        # Fallback: per-head 2-D matmuls (proven lowering path), same math.
        outs = []
        for h in range(H):
            q_h = q_t[h * d:(h + 1) * d].astype(jnp.bfloat16)  # (d, Tq)
            k_h = k_t[h * d:(h + 1) * d].astype(jnp.bfloat16)  # (d, Nkv)
            v_h = v_t[h * d:(h + 1) * d].astype(jnp.bfloat16)  # (d, Nkv)
            s = jax.lax.dot_general(k_h, q_h, (((0,), (0,)), ((), ())),
                                    preferred_element_type=jnp.float32)  # (Nkv, Tq)
            s = s - jnp.max(s, axis=0, keepdims=True)
            e = jnp.exp(s)
            denom = jnp.sum(e, axis=0, keepdims=True)
            o_h = jnp.dot(v_h, e.astype(jnp.bfloat16),
                          preferred_element_type=jnp.float32)            # (d, Tq)
            outs.append(o_h * pl.reciprocal(denom, approx=True))
        o_t = jnp.concatenate(outs, axis=0).astype(jnp.bfloat16)         # (C, Tq)

    # Output projection (transposed) + bias, f32 store.
    o_ref[0] = (jnp.dot(wp_t_ref[...], o_t,
                        preferred_element_type=jnp.float32) + bp_ref[...])


# ------------------------------ param prep --------------------------------- #

def prepare_cross_attention_params(params, num_heads=NUM_HEADS):
    """One-time layout/dtype prep (review item 7): transposed bf16 weights,
    (C,1) f32 biases, softmax scale folded into the q projection (item 1)."""
    C = params["wq"].shape[0]
    d = C // num_heads
    scale = d ** (-0.5)
    return dict(
        wq_t=(params["wq"].T * scale).astype(jnp.bfloat16),     # (C, C)
        bq=(params["bq"] * scale).reshape(C, 1).astype(jnp.float32),
        wkv_t=params["wkv"].T.astype(jnp.bfloat16),              # (2C, C)
        bkv=params["bkv"].reshape(2 * C, 1).astype(jnp.float32),
        wp_t=params["wp"].T.astype(jnp.bfloat16),                # (C, C)
        bp=params["bp"].reshape(C, 1).astype(jnp.float32),
    )


# --------------------------------- wrapper --------------------------------- #

def cross_attention(kparams, query_feature, key_value_feature,
                    num_heads=NUM_HEADS, head_batched=True):
    """query_feature, key_value_feature: NCHW (B, C, H, W) -> NCHW (B, C, Hkv, Wkv)."""
    B, C, Hq, Wq = query_feature.shape
    _, Ckv, Hk, Wk = key_value_feature.shape
    assert C == Ckv and C % num_heads == 0
    assert (C // num_heads) % 8 == 0, "head_dim must be sublane-aligned (multiple of 8)"

    if (Hq, Wq) != (Hk, Wk):
        # F.interpolate(mode='bilinear', align_corners=False) equivalent (XLA glue;
        # not exercised by the demo, which uses matched spatial sizes).
        query_feature = jax.image.resize(
            query_feature, (B, C, Hk, Wk), method="bilinear", antialias=False)

    N = Hk * Wk
    # channels-first token layout (free reshape from NCHW, lane dim = N); bf16
    # halves the HBM DMA for the activations (review item 5).
    xq = query_feature.reshape(B, C, N).astype(jnp.bfloat16)
    xkv = key_value_feature.reshape(B, C, N).astype(jnp.bfloat16)

    # Second parallel grid axis over 128-wide query tiles (review item 6).
    q_tile = 128 if (N % 128 == 0 and N > 128) else N
    n_qt = N // q_tile

    kernel = functools.partial(_cross_attention_kernel,
                               num_heads=num_heads, head_batched=head_batched)

    out = pl.pallas_call(
        kernel,
        out_shape=jax.ShapeDtypeStruct((B, C, N), jnp.float32),
        grid=(B, n_qt),
        in_specs=[
            pl.BlockSpec((1, C, q_tile), lambda b, j: (b, 0, j)),   # xq tile
            pl.BlockSpec((1, C, N), lambda b, j: (b, 0, 0)),        # xkv (full)
            pl.BlockSpec((C, C), lambda b, j: (0, 0)),              # wq^T * scale
            pl.BlockSpec((C, 1), lambda b, j: (0, 0)),              # bq * scale
            pl.BlockSpec((2 * C, C), lambda b, j: (0, 0)),          # wkv^T
            pl.BlockSpec((2 * C, 1), lambda b, j: (0, 0)),          # bkv
            pl.BlockSpec((C, C), lambda b, j: (0, 0)),              # wp^T
            pl.BlockSpec((C, 1), lambda b, j: (0, 0)),              # bp
        ],
        out_specs=pl.BlockSpec((1, C, q_tile), lambda b, j: (b, 0, j)),
        compiler_params=pltpu.CompilerParams(
            dimension_semantics=("parallel", "parallel")),
    )(xq, xkv, kparams["wq_t"], kparams["bq"], kparams["wkv_t"],
      kparams["bkv"], kparams["wp_t"], kparams["bp"])

    return out.reshape(B, C, Hk, Wk)


# ------------------------- pure-JAX reference check ------------------------- #

def cross_attention_reference(params, query_feature, key_value_feature,
                              num_heads=NUM_HEADS):
    B, C, Hk, Wk = key_value_feature.shape
    if query_feature.shape[2:] != (Hk, Wk):
        query_feature = jax.image.resize(
            query_feature, (B, C, Hk, Wk), method="bilinear", antialias=False)
    N = Hk * Wk
    d = C // num_heads
    hp = jax.lax.Precision.HIGHEST

    q_tok = query_feature.reshape(B, C, N).transpose(0, 2, 1)
    kv_tok = key_value_feature.reshape(B, C, N).transpose(0, 2, 1)

    q = jnp.einsum("bnc,cd->bnd", q_tok, params["wq"], precision=hp) + params["bq"]
    kv = jnp.einsum("bnc,cd->bnd", kv_tok, params["wkv"], precision=hp) + params["bkv"]
    k, v = kv[..., :C], kv[..., C:]

    def split_heads(t):
        return t.reshape(B, N, num_heads, d).transpose(0, 2, 1, 3)

    qh, kh, vh = split_heads(q), split_heads(k), split_heads(v)
    s = jnp.einsum("bhnd,bhmd->bhnm", qh, kh, precision=hp) * (d ** -0.5)
    p = jax.nn.softmax(s, axis=-1)
    o = jnp.einsum("bhnm,bhmd->bhnd", p, vh, precision=hp)
    o = o.transpose(0, 2, 1, 3).reshape(B, N, C)
    o = jnp.einsum("bnc,cd->bnd", o, params["wp"], precision=hp) + params["bp"]
    return o.transpose(0, 2, 1).reshape(B, C, Hk, Wk)


# ----------------------------- parameter init ------------------------------ #

def init_cross_attention(key, dim, qkv_bias=False):
    k1, k2, k3, k4, k5, k6 = jax.random.split(key, 6)

    def lin_w(k, fan_in, fan_out):
        return jax.random.normal(k, (fan_in, fan_out), jnp.float32) / math.sqrt(fan_in)

    wq = lin_w(k1, dim, dim)
    wkv = lin_w(k2, dim, 2 * dim)
    wp = lin_w(k3, dim, dim)
    bp = 0.01 * jax.random.normal(k4, (dim,), jnp.float32)
    if qkv_bias:
        bq = 0.01 * jax.random.normal(k5, (dim,), jnp.float32)
        bkv = 0.01 * jax.random.normal(k6, (2 * dim,), jnp.float32)
    else:
        bq = jnp.zeros((dim,), jnp.float32)
        bkv = jnp.zeros((2 * dim,), jnp.float32)
    return dict(wq=wq, bq=bq, wkv=wkv, bkv=bkv, wp=wp, bp=bp)


# ----------------------------------- main ----------------------------------- #

if __name__ == "__main__":
    B, C, H, W = 2, 64, 16, 16          # N = H*W = 256, head_dim = 8
    key = jax.random.PRNGKey(0)
    kp, kq, kkv = jax.random.split(key, 3)

    params = init_cross_attention(kp, C, qkv_bias=False)
    kparams = prepare_cross_attention_params(params, NUM_HEADS)
    q_feat = jax.random.normal(kq, (B, C, H, W), jnp.float32)
    kv_feat = jax.random.normal(kkv, (B, C, H, W), jnp.float32)

    fwd = jax.jit(cross_attention, static_argnames=("num_heads", "head_batched"))
    try:
        out = jax.block_until_ready(
            fwd(kparams, q_feat, kv_feat, num_heads=NUM_HEADS, head_batched=True))
    except Exception:
        # TODO(synk): fallback in case the installed jax cannot lower the
        # head-batched dot_general (depth-d contraction over the sublane axis)
        # inside Pallas; per-head 2-D matmuls are the previously-validated path.
        out = jax.block_until_ready(
            fwd(kparams, q_feat, kv_feat, num_heads=NUM_HEADS, head_batched=False))
    assert out.shape == (B, C, H, W)

    ref = jax.block_until_ready(
        cross_attention_reference(params, q_feat, kv_feat, num_heads=NUM_HEADS))
    max_err = float(jnp.max(jnp.abs(out - ref)))
    assert jnp.allclose(out, ref, rtol=2e-2, atol=2e-2), f"max abs err {max_err}"

    print("KERNEL_OK")
</pallas_src>

<mosaic_0001>
module attributes {stable_mosaic.version = 11 : i64} {
  func.func @_cross_attention_kernel(%arg0: i32, %arg1: i32, %arg2: memref<1x64x128xbf16, #tpu.memory_space<vmem>>, %arg3: memref<1x64x256xbf16, #tpu.memory_space<vmem>>, %arg4: memref<64x64xbf16, #tpu.memory_space<vmem>>, %arg5: memref<64x1xf32, #tpu.memory_space<vmem>>, %arg6: memref<128x64xbf16, #tpu.memory_space<vmem>>, %arg7: memref<128x1xf32, #tpu.memory_space<vmem>>, %arg8: memref<64x64xbf16, #tpu.memory_space<vmem>>, %arg9: memref<64x1xf32, #tpu.memory_space<vmem>>, %arg10: memref<1x64x128xf32, #tpu.memory_space<vmem>>) attributes {dimension_semantics = [#tpu.dimension_semantics<parallel>, #tpu.dimension_semantics<parallel>], iteration_bounds = array<i64: 2, 2>, scalar_prefetch = 0 : i64, scratch_operands = 0 : i64, tpu.core_type = #tpu.core_type<tc>, window_params = [{transform_indices = @transform_0, window_bounds = array<i64: 1, 64, 128>}, {transform_indices = @transform_1, window_bounds = array<i64: 1, 64, 256>}, {pipeline_mode = #tpu.pipeline_mode<synchronous>, transform_indices = @transform_2, window_bounds = array<i64: 64, 64>}, {pipeline_mode = #tpu.pipeline_mode<synchronous>, transform_indices = @transform_3, window_bounds = array<i64: 64, 1>}, {pipeline_mode = #tpu.pipeline_mode<synchronous>, transform_indices = @transform_4, window_bounds = array<i64: 128, 64>}, {pipeline_mode = #tpu.pipeline_mode<synchronous>, transform_indices = @transform_5, window_bounds = array<i64: 128, 1>}, {pipeline_mode = #tpu.pipeline_mode<synchronous>, transform_indices = @transform_6, window_bounds = array<i64: 64, 64>}, {pipeline_mode = #tpu.pipeline_mode<synchronous>, transform_indices = @transform_7, window_bounds = array<i64: 64, 1>}, {transform_indices = @transform_8, window_bounds = array<i64: 1, 64, 128>}]} {
    %c0 = arith.constant 0 : index
    %c0_0 = arith.constant 0 : index
    %c0_1 = arith.constant 0 : index
    %0 = vector.load %arg2[%c0, %c0_0, %c0_1] : memref<1x64x128xbf16, #tpu.memory_space<vmem>>, vector<1x64x128xbf16>
    %1 = vector.shape_cast %0 : vector<1x64x128xbf16> to vector<64x128xbf16>
    %c0_2 = arith.constant 0 : index
    %c0_3 = arith.constant 0 : index
    %c0_4 = arith.constant 0 : index
    %2 = vector.load %arg3[%c0_2, %c0_3, %c0_4] : memref<1x64x256xbf16, #tpu.memory_space<vmem>>, vector<1x64x256xbf16>
    %3 = vector.shape_cast %2 : vector<1x64x256xbf16> to vector<64x256xbf16>
    %c0_5 = arith.constant 0 : index
    %c0_6 = arith.constant 0 : index
    %4 = vector.load %arg4[%c0_5, %c0_6] : memref<64x64xbf16, #tpu.memory_space<vmem>>, vector<64x64xbf16>
    %cst = arith.constant dense<0.000000e+00> : vector<64x128xf32>
    %5 = tpu.matmul %4, %1, %cst {dimension_numbers = #tpu.dot_dimension_numbers<[1], [0], [0], [1], [0, 0, 1, 1], [], []>} : vector<64x64xbf16>, vector<64x128xbf16>, vector<64x128xf32> -> vector<64x128xf32>
    %c0_7 = arith.constant 0 : index
    %c0_8 = arith.constant 0 : index
    %6 = vector.load %arg5[%c0_7, %c0_8] : memref<64x1xf32, #tpu.memory_space<vmem>>, vector<64x1xf32>
    %7 = vector.broadcast %6 : vector<64x1xf32> to vector<64x128xf32>
    %8 = arith.addf %5, %7 : vector<64x128xf32>
    %c0_9 = arith.constant 0 : index
    %c0_10 = arith.constant 0 : index
    %9 = vector.load %arg6[%c0_9, %c0_10] : memref<128x64xbf16, #tpu.memory_space<vmem>>, vector<128x64xbf16>
    %cst_11 = arith.constant dense<0.000000e+00> : vector<128x256xf32>
    %10 = tpu.matmul %9, %3, %cst_11 {dimension_numbers = #tpu.dot_dimension_numbers<[1], [0], [0], [1], [0, 0, 1, 1], [], []>} : vector<128x64xbf16>, vector<64x256xbf16>, vector<128x256xf32> -> vector<128x256xf32>
    %c0_12 = arith.constant 0 : index
    %c0_13 = arith.constant 0 : index
    %11 = vector.load %arg7[%c0_12, %c0_13] : memref<128x1xf32, #tpu.memory_space<vmem>>, vector<128x1xf32>
    %12 = vector.broadcast %11 : vector<128x1xf32> to vector<128x256xf32>
    %13 = arith.addf %10, %12 : vector<128x256xf32>
    %14 = vector.extract_strided_slice %13 {offsets = [0, 0], sizes = [64, 256], strides = [1, 1]} : vector<128x256xf32> to vector<64x256xf32>
    %15 = vector.extract_strided_slice %13 {offsets = [64, 0], sizes = [64, 256], strides = [1, 1]} : vector<128x256xf32> to vector<64x256xf32>
    %16 = vector.shape_cast %8 : vector<64x128xf32> to vector<8x8x128xf32>
    %17 = arith.truncf %16 : vector<8x8x128xf32> to vector<8x8x128xbf16>
    %18 = vector.shape_cast %14 : vector<64x256xf32> to vector<8x8x256xf32>
    %19 = arith.truncf %18 : vector<8x8x256xf32> to vector<8x8x256xbf16>
    %20 = vector.shape_cast %15 : vector<64x256xf32> to vector<8x8x256xf32>
    %21 = arith.truncf %20 : vector<8x8x256xf32> to vector<8x8x256xbf16>
    "tpu.trace_start"() <{level = 10 : i32, message = "hdk,hdq->hkq"}> : () -> ()
    %cst_14 = arith.constant dense<0.000000e+00> : vector<8x256x128xf32>
    %22 = tpu.matmul %19, %17, %cst_14 {dimension_numbers = #tpu.dot_dimension_numbers<[1], [1], [2], [2], [0, 0, 0, 2, 1, 2], [0], [0]>} : vector<8x8x256xbf16>, vector<8x8x128xbf16>, vector<8x256x128xf32> -> vector<8x256x128xf32>
    "tpu.trace_stop"() : () -> ()
    %cst_15 = arith.constant dense<0xFF800000> : vector<8x128xf32>
    %23 = vector.multi_reduction <maximumf>, %22, %cst_15 [1] : vector<8x256x128xf32> to vector<8x128xf32>
    %24 = vector.shape_cast %23 : vector<8x128xf32> to vector<8x1x128xf32>
    %25 = vector.broadcast %24 : vector<8x1x128xf32> to vector<8x256x128xf32>
    %26 = arith.subf %22, %25 : vector<8x256x128xf32>
    %27 = math.exp %26 : vector<8x256x128xf32>
    %cst_16 = arith.constant dense<0.000000e+00> : vector<8x128xf32>
    %28 = vector.multi_reduction <add>, %27, %cst_16 [1] : vector<8x256x128xf32> to vector<8x128xf32>
    %29 = vector.shape_cast %28 : vector<8x128xf32> to vector<8x1x128xf32>
    %30 = arith.truncf %27 : vector<8x256x128xf32> to vector<8x256x128xbf16>
    "tpu.trace_start"() <{level = 10 : i32, message = "hdk,hkq->hdq"}> : () -> ()
    %cst_17 = arith.constant dense<0.000000e+00> : vector<8x8x128xf32>
    %31 = tpu.matmul %21, %30, %cst_17 {dimension_numbers = #tpu.dot_dimension_numbers<[2], [1], [1], [2], [0, 0, 0, 1, 1, 2], [0], [0]>} : vector<8x8x256xbf16>, vector<8x256x128xbf16>, vector<8x8x128xf32> -> vector<8x8x128xf32>
    "tpu.trace_stop"() : () -> ()
    %32 = tpu.reciprocal %29 {approx = true} : vector<8x1x128xf32> -> vector<8x1x128xf32>
    %33 = vector.broadcast %32 : vector<8x1x128xf32> to vector<8x8x128xf32>
    %34 = arith.mulf %31, %33 : vector<8x8x128xf32>
    %35 = vector.shape_cast %34 : vector<8x8x128xf32> to vector<64x128xf32>
    %36 = arith.truncf %35 : vector<64x128xf32> to vector<64x128xbf16>
    %c0_18 = arith.constant 0 : index
    %c0_19 = arith.constant 0 : index
    %37 = vector.load %arg8[%c0_18, %c0_19] : memref<64x64xbf16, #tpu.memory_space<vmem>>, vector<64x64xbf16>
    %cst_20 = arith.constant dense<0.000000e+00> : vector<64x128xf32>
    %38 = tpu.matmul %37, %36, %cst_20 {dimension_numbers = #tpu.dot_dimension_numbers<[1], [0], [0], [1], [0, 0, 1, 1], [], []>} : vector<64x64xbf16>, vector<64x128xbf16>, vector<64x128xf32> -> vector<64x128xf32>
    %c0_21 = arith.constant 0 : index
    %c0_22 = arith.constant 0 : index
    %39 = vector.load %arg9[%c0_21, %c0_22] : memref<64x1xf32, #tpu.memory_space<vmem>>, vector<64x1xf32>
    %40 = vector.broadcast %39 : vector<64x1xf32> to vector<64x128xf32>
    %41 = arith.addf %38, %40 : vector<64x128xf32>
    %c0_23 = arith.constant 0 : index
    %c0_24 = arith.constant 0 : index
    %c0_25 = arith.constant 0 : index
    %42 = vector.load %arg10[%c0_23, %c0_24, %c0_25] : memref<1x64x128xf32, #tpu.memory_space<vmem>>, vector<1x64x128xf32>
    %43 = vector.shape_cast %42 : vector<1x64x128xf32> to vector<64x128xf32>
    %44 = vector.shape_cast %41 : vector<64x128xf32> to vector<1x64x128xf32>
    tpu.vector_store %arg10[%c0_23, %c0_24, %c0_25], %44 {strides = array<i32>} : memref<1x64x128xf32, #tpu.memory_space<vmem>>, vector<1x64x128xf32>,
    return
  }
  func.func @transform_0(%arg0: i32, %arg1: i32) -> (i32, i32, i32) {
    %c0_i32 = arith.constant 0 : i32
    %c0_i32_0 = arith.constant 0 : i32
    return %arg0, %c0_i32, %arg1 : i32, i32, i32
  }
  func.func @transform_1(%arg0: i32, %arg1: i32) -> (i32, i32, i32) {
    %c0_i32 = arith.constant 0 : i32
    %c0_i32_0 = arith.constant 0 : i32
    %c0_i32_1 = arith.constant 0 : i32
    return %arg0, %c0_i32, %c0_i32_0 : i32, i32, i32
  }
  func.func @transform_2(%arg0: i32, %arg1: i32) -> (i32, i32) {
    %c0_i32 = arith.constant 0 : i32
    %c0_i32_0 = arith.constant 0 : i32
    %c0_i32_1 = arith.constant 0 : i32
    return %c0_i32, %c0_i32_0 : i32, i32
  }
  func.func @transform_3(%arg0: i32, %arg1: i32) -> (i32, i32) {
    %c0_i32 = arith.constant 0 : i32
    %c0_i32_0 = arith.constant 0 : i32
    %c0_i32_1 = arith.constant 0 : i32
    return %c0_i32, %c0_i32_0 : i32, i32
  }
  func.func @transform_4(%arg0: i32, %arg1: i32) -> (i32, i32) {
    %c0_i32 = arith.constant 0 : i32
    %c0_i32_0 = arith.constant 0 : i32
    %c0_i32_1 = arith.constant 0 : i32
    return %c0_i32, %c0_i32_0 : i32, i32
  }
  func.func @transform_5(%arg0: i32, %arg1: i32) -> (i32, i32) {
    %c0_i32 = arith.constant 0 : i32
    %c0_i32_0 = arith.constant 0 : i32
    %c0_i32_1 = arith.constant 0 : i32
    return %c0_i32, %c0_i32_0 : i32, i32
  }
  func.func @transform_6(%arg0: i32, %arg1: i32) -> (i32, i32) {
    %c0_i32 = arith.constant 0 : i32
    %c0_i32_0 = arith.constant 0 : i32
    %c0_i32_1 = arith.constant 0 : i32
    return %c0_i32, %c0_i32_0 : i32, i32
  }
  func.func @transform_7(%arg0: i32, %arg1: i32) -> (i32, i32) {
    %c0_i32 = arith.constant 0 : i32
    %c0_i32_0 = arith.constant 0 : i32
    %c0_i32_1 = arith.constant 0 : i32
    return %c0_i32, %c0_i32_0 : i32, i32
  }
  func.func @transform_8(%arg0: i32, %arg1: i32) -> (i32, i32, i32) {
    %c0_i32 = arith.constant 0 : i32
    %c0_i32_0 = arith.constant 0 : i32
    return %arg0, %c0_i32, %arg1 : i32, i32, i32
  }
}

module attributes {stable_mosaic.version = 11 : i64} {
  func.func @_cross_attention_kernel(%arg0: i32, %arg1: i32, %arg2: memref<1x64x128xbf16, #tpu.memory_space<vmem>>, %arg3: memref<1x64x256xbf16, #tpu.memory_space<vmem>>, %arg4: memref<64x64xbf16, #tpu.memory_space<vmem>>, %arg5: memref<64x1xf32, #tpu.memory_space<vmem>>, %arg6: memref<128x64xbf16, #tpu.memory_space<vmem>>, %arg7: memref<128x1xf32, #tpu.memory_space<vmem>>, %arg8: memref<64x64xbf16, #tpu.memory_space<vmem>>, %arg9: memref<64x1xf32, #tpu.memory_space<vmem>>, %arg10: memref<1x64x128xf32, #tpu.memory_space<vmem>>) attributes {dimension_semantics = [#tpu.dimension_semantics<parallel>, #tpu.dimension_semantics<parallel>], iteration_bounds = array<i64: 2, 2>, scalar_prefetch = 0 : i64, scratch_operands = 0 : i64, tpu.core_type = #tpu.core_type<tc>, window_params = [{transform_indices = @transform_0, window_bounds = array<i64: 1, 64, 128>}, {transform_indices = @transform_1, window_bounds = array<i64: 1, 64, 256>}, {pipeline_mode = #tpu.pipeline_mode<synchronous>, transform_indices = @transform_2, window_bounds = array<i64: 64, 64>}, {pipeline_mode = #tpu.pipeline_mode<synchronous>, transform_indices = @transform_3, window_bounds = array<i64: 64, 1>}, {pipeline_mode = #tpu.pipeline_mode<synchronous>, transform_indices = @transform_4, window_bounds = array<i64: 128, 64>}, {pipeline_mode = #tpu.pipeline_mode<synchronous>, transform_indices = @transform_5, window_bounds = array<i64: 128, 1>}, {pipeline_mode = #tpu.pipeline_mode<synchronous>, transform_indices = @transform_6, window_bounds = array<i64: 64, 64>}, {pipeline_mode = #tpu.pipeline_mode<synchronous>, transform_indices = @transform_7, window_bounds = array<i64: 64, 1>}, {transform_indices = @transform_8, window_bounds = array<i64: 1, 64, 128>}]} {
    %c0 = arith.constant 0 : index
    %c0_0 = arith.constant 0 : index
    %c0_1 = arith.constant 0 : index
    %0 = vector.load %arg2[%c0, %c0_0, %c0_1] : memref<1x64x128xbf16, #tpu.memory_space<vmem>>, vector<1x64x128xbf16>
    %1 = vector.shape_cast %0 : vector<1x64x128xbf16> to vector<64x128xbf16>
    %c0_2 = arith.constant 0 : index
    %c0_3 = arith.constant 0 : index
    %c0_4 = arith.constant 0 : index
    %2 = vector.load %arg3[%c0_2, %c0_3, %c0_4] : memref<1x64x256xbf16, #tpu.memory_space<vmem>>, vector<1x64x256xbf16>
    %3 = vector.shape_cast %2 : vector<1x64x256xbf16> to vector<64x256xbf16>
    %c0_5 = arith.constant 0 : index
    %c0_6 = arith.constant 0 : index
    %4 = vector.load %arg4[%c0_5, %c0_6] : memref<64x64xbf16, #tpu.memory_space<vmem>>, vector<64x64xbf16>
    %cst = arith.constant dense<0.000000e+00> : vector<64x128xf32>
    %5 = tpu.matmul %4, %1, %cst {dimension_numbers = #tpu.dot_dimension_numbers<[1], [0], [0], [1], [0, 0, 1, 1], [], []>} : vector<64x64xbf16>, vector<64x128xbf16>, vector<64x128xf32> -> vector<64x128xf32>
    %c0_7 = arith.constant 0 : index
    %c0_8 = arith.constant 0 : index
    %6 = vector.load %arg5[%c0_7, %c0_8] : memref<64x1xf32, #tpu.memory_space<vmem>>, vector<64x1xf32>
    %7 = vector.broadcast %6 : vector<64x1xf32> to vector<64x128xf32>
    %8 = arith.addf %5, %7 : vector<64x128xf32>
    %c0_9 = arith.constant 0 : index
    %c0_10 = arith.constant 0 : index
    %9 = vector.load %arg6[%c0_9, %c0_10] : memref<128x64xbf16, #tpu.memory_space<vmem>>, vector<128x64xbf16>
    %cst_11 = arith.constant dense<0.000000e+00> : vector<128x256xf32>
    %10 = tpu.matmul %9, %3, %cst_11 {dimension_numbers = #tpu.dot_dimension_numbers<[1], [0], [0], [1], [0, 0, 1, 1], [], []>} : vector<128x64xbf16>, vector<64x256xbf16>, vector<128x256xf32> -> vector<128x256xf32>
    %c0_12 = arith.constant 0 : index
    %c0_13 = arith.constant 0 : index
    %11 = vector.load %arg7[%c0_12, %c0_13] : memref<128x1xf32, #tpu.memory_space<vmem>>, vector<128x1xf32>
    %12 = vector.broadcast %11 : vector<128x1xf32> to vector<128x256xf32>
    %13 = arith.addf %10, %12 : vector<128x256xf32>
    %14 = vector.extract_strided_slice %13 {offsets = [0, 0], sizes = [64, 256], strides = [1, 1]} : vector<128x256xf32> to vector<64x256xf32>
    %15 = vector.extract_strided_slice %13 {offsets = [64, 0], sizes = [64, 256], strides = [1, 1]} : vector<128x256xf32> to vector<64x256xf32>
    %16 = vector.extract_strided_slice %8 {offsets = [0, 0], sizes = [8, 128], strides = [1, 1]} : vector<64x128xf32> to vector<8x128xf32>
    %17 = arith.truncf %16 : vector<8x128xf32> to vector<8x128xbf16>
    %18 = vector.extract_strided_slice %14 {offsets = [0, 0], sizes = [8, 256], strides = [1, 1]} : vector<64x256xf32> to vector<8x256xf32>
    %19 = arith.truncf %18 : vector<8x256xf32> to vector<8x256xbf16>
    %20 = vector.extract_strided_slice %15 {offsets = [0, 0], sizes = [8, 256], strides = [1, 1]} : vector<64x256xf32> to vector<8x256xf32>
    %21 = arith.truncf %20 : vector<8x256xf32> to vector<8x256xbf16>
    %cst_14 = arith.constant dense<0.000000e+00> : vector<256x128xf32>
    %22 = tpu.matmul %19, %17, %cst_14 {dimension_numbers = #tpu.dot_dimension_numbers<[0], [0], [1], [1], [0, 1, 1, 1], [], []>} : vector<8x256xbf16>, vector<8x128xbf16>, vector<256x128xf32> -> vector<256x128xf32>
    %cst_15 = arith.constant dense<0xFF800000> : vector<128xf32>
    %23 = vector.multi_reduction <maximumf>, %22, %cst_15 [0] : vector<256x128xf32> to vector<128xf32>
    %24 = vector.shape_cast %23 : vector<128xf32> to vector<1x128xf32>
    %25 = vector.broadcast %24 : vector<1x128xf32> to vector<256x128xf32>
    %26 = arith.subf %22, %25 : vector<256x128xf32>
    %27 = math.exp %26 : vector<256x128xf32>
    %cst_16 = arith.constant dense<0.000000e+00> : vector<128xf32>
    %28 = vector.multi_reduction <add>, %27, %cst_16 [0] : vector<256x128xf32> to vector<128xf32>
    %29 = vector.shape_cast %28 : vector<128xf32> to vector<1x128xf32>
    %30 = arith.truncf %27 : vector<256x128xf32> to vector<256x128xbf16>
    %cst_17 = arith.constant dense<0.000000e+00> : vector<8x128xf32>
    %31 = tpu.matmul %21, %30, %cst_17 {dimension_numbers = #tpu.dot_dimension_numbers<[1], [0], [0], [1], [0, 0, 1, 1], [], []>} : vector<8x256xbf16>, vector<256x128xbf16>, vector<8x128xf32> -> vector<8x128xf32>
    %32 = tpu.reciprocal %29 {approx = true} : vector<1x128xf32> -> vector<1x128xf32>
    %33 = vector.broadcast %32 : vector<1x128xf32> to vector<8x128xf32>
    %34 = arith.mulf %31, %33 : vector<8x128xf32>
    %35 = vector.extract_strided_slice %8 {offsets = [8, 0], sizes = [8, 128], strides = [1, 1]} : vector<64x128xf32> to vector<8x128xf32>
    %36 = arith.truncf %35 : vector<8x128xf32> to vector<8x128xbf16>
    %37 = vector.extract_strided_slice %14 {offsets = [8, 0], sizes = [8, 256], strides = [1, 1]} : vector<64x256xf32> to vector<8x256xf32>
    %38 = arith.truncf %37 : vector<8x256xf32> to vector<8x256xbf16>
    %39 = vector.extract_strided_slice %15 {offsets = [8, 0], sizes = [8, 256], strides = [1, 1]} : vector<64x256xf32> to vector<8x256xf32>
    %40 = arith.truncf %39 : vector<8x256xf32> to vector<8x256xbf16>
    %cst_18 = arith.constant dense<0.000000e+00> : vector<256x128xf32>
    %41 = tpu.matmul %38, %36, %cst_18 {dimension_numbers = #tpu.dot_dimension_numbers<[0], [0], [1], [1], [0, 1, 1, 1], [], []>} : vector<8x256xbf16>, vector<8x128xbf16>, vector<256x128xf32> -> vector<256x128xf32>
    %cst_19 = arith.constant dense<0xFF800000> : vector<128xf32>
    %42 = vector.multi_reduction <maximumf>, %41, %cst_19 [0] : vector<256x128xf32> to vector<128xf32>
    %43 = vector.shape_cast %42 : vector<128xf32> to vector<1x128xf32>
    %44 = vector.broadcast %43 : vector<1x128xf32> to vector<256x128xf32>
    %45 = arith.subf %41, %44 : vector<256x128xf32>
    %46 = math.exp %45 : vector<256x128xf32>
    %cst_20 = arith.constant dense<0.000000e+00> : vector<128xf32>
    %47 = vector.multi_reduction <add>, %46, %cst_20 [0] : vector<256x128xf32> to vector<128xf32>
    %48 = vector.shape_cast %47 : vector<128xf32> to vector<1x128xf32>
    %49 = arith.truncf %46 : vector<256x128xf32> to vector<256x128xbf16>
    %cst_21 = arith.constant dense<0.000000e+00> : vector<8x128xf32>
    %50 = tpu.matmul %40, %49, %cst_21 {dimension_numbers = #tpu.dot_dimension_numbers<[1], [0], [0], [1], [0, 0, 1, 1], [], []>} : vector<8x256xbf16>, vector<256x128xbf16>, vector<8x128xf32> -> vector<8x128xf32>
    %51 = tpu.reciprocal %48 {approx = true} : vector<1x128xf32> -> vector<1x128xf32>
    %52 = vector.broadcast %51 : vector<1x128xf32> to vector<8x128xf32>
    %53 = arith.mulf %50, %52 : vector<8x128xf32>
    %54 = vector.extract_strided_slice %8 {offsets = [16, 0], sizes = [8, 128], strides = [1, 1]} : vector<64x128xf32> to vector<8x128xf32>
    %55 = arith.truncf %54 : vector<8x128xf32> to vector<8x128xbf16>
    %56 = vector.extract_strided_slice %14 {offsets = [16, 0], sizes = [8, 256], strides = [1, 1]} : vector<64x256xf32> to vector<8x256xf32>
    %57 = arith.truncf %56 : vector<8x256xf32> to vector<8x256xbf16>
    %58 = vector.extract_strided_slice %15 {offsets = [16, 0], sizes = [8, 256], strides = [1, 1]} : vector<64x256xf32> to vector<8x256xf32>
    %59 = arith.truncf %58 : vector<8x256xf32> to vector<8x256xbf16>
    %cst_22 = arith.constant dense<0.000000e+00> : vector<256x128xf32>
    %60 = tpu.matmul %57, %55, %cst_22 {dimension_numbers = #tpu.dot_dimension_numbers<[0], [0], [1], [1], [0, 1, 1, 1], [], []>} : vector<8x256xbf16>, vector<8x128xbf16>, vector<256x128xf32> -> vector<256x128xf32>
    %cst_23 = arith.constant dense<0xFF800000> : vector<128xf32>
    %61 = vector.multi_reduction <maximumf>, %60, %cst_23 [0] : vector<256x128xf32> to vector<128xf32>
    %62 = vector.shape_cast %61 : vector<128xf32> to vector<1x128xf32>
    %63 = vector.broadcast %62 : vector<1x128xf32> to vector<256x128xf32>
    %64 = arith.subf %60, %63 : vector<256x128xf32>
    %65 = math.exp %64 : vector<256x128xf32>
    %cst_24 = arith.constant dense<0.000000e+00> : vector<128xf32>
    %66 = vector.multi_reduction <add>, %65, %cst_24 [0] : vector<256x128xf32> to vector<128xf32>
    %67 = vector.shape_cast %66 : vector<128xf32> to vector<1x128xf32>
    %68 = arith.truncf %65 : vector<256x128xf32> to vector<256x128xbf16>
    %cst_25 = arith.constant dense<0.000000e+00> : vector<8x128xf32>
    %69 = tpu.matmul %59, %68, %cst_25 {dimension_numbers = #tpu.dot_dimension_numbers<[1], [0], [0], [1], [0, 0, 1, 1], [], []>} : vector<8x256xbf16>, vector<256x128xbf16>, vector<8x128xf32> -> vector<8x128xf32>
    %70 = tpu.reciprocal %67 {approx = true} : vector<1x128xf32> -> vector<1x128xf32>
    %71 = vector.broadcast %70 : vector<1x128xf32> to vector<8x128xf32>
    %72 = arith.mulf %69, %71 : vector<8x128xf32>
    %73 = vector.extract_strided_slice %8 {offsets = [24, 0], sizes = [8, 128], strides = [1, 1]} : vector<64x128xf32> to vector<8x128xf32>
    %74 = arith.truncf %73 : vector<8x128xf32> to vector<8x128xbf16>
    %75 = vector.extract_strided_slice %14 {offsets = [24, 0], sizes = [8, 256], strides = [1, 1]} : vector<64x256xf32> to vector<8x256xf32>
    %76 = arith.truncf %75 : vector<8x256xf32> to vector<8x256xbf16>
    %77 = vector.extract_strided_slice %15 {offsets = [24, 0], sizes = [8, 256], strides = [1, 1]} : vector<64x256xf32> to vector<8x256xf32>
    %78 = arith.truncf %77 : vector<8x256xf32> to vector<8x256xbf16>
    %cst_26 = arith.constant dense<0.000000e+00> : vector<256x128xf32>
    %79 = tpu.matmul %76, %74, %cst_26 {dimension_numbers = #tpu.dot_dimension_numbers<[0], [0], [1], [1], [0, 1, 1, 1], [], []>} : vector<8x256xbf16>, vector<8x128xbf16>, vector<256x128xf32> -> vector<256x128xf32>
    %cst_27 = arith.constant dense<0xFF800000> : vector<128xf32>
    %80 = vector.multi_reduction <maximumf>, %79, %cst_27 [0] : vector<256x128xf32> to vector<128xf32>
    %81 = vector.shape_cast %80 : vector<128xf32> to vector<1x128xf32>
    %82 = vector.broadcast %81 : vector<1x128xf32> to vector<256x128xf32>
    %83 = arith.subf %79, %82 : vector<256x128xf32>
    %84 = math.exp %83 : vector<256x128xf32>
    %cst_28 = arith.constant dense<0.000000e+00> : vector<128xf32>
    %85 = vector.multi_reduction <add>, %84, %cst_28 [0] : vector<256x128xf32> to vector<128xf32>
    %86 = vector.shape_cast %85 : vector<128xf32> to vector<1x128xf32>
    %87 = arith.truncf %84 : vector<256x128xf32> to vector<256x128xbf16>
    %cst_29 = arith.constant dense<0.000000e+00> : vector<8x128xf32>
    %88 = tpu.matmul %78, %87, %cst_29 {dimension_numbers = #tpu.dot_dimension_numbers<[1], [0], [0], [1], [0, 0, 1, 1], [], []>} : vector<8x256xbf16>, vector<256x128xbf16>, vector<8x128xf32> -> vector<8x128xf32>
    %89 = tpu.reciprocal %86 {approx = true} : vector<1x128xf32> -> vector<1x128xf32>
    %90 = vector.broadcast %89 : vector<1x128xf32> to vector<8x128xf32>
    %91 = arith.mulf %88, %90 : vector<8x128xf32>
    %92 = vector.extract_strided_slice %8 {offsets = [32, 0], sizes = [8, 128], strides = [1, 1]} : vector<64x128xf32> to vector<8x128xf32>
    %93 = arith.truncf %92 : vector<8x128xf32> to vector<8x128xbf16>
    %94 = vector.extract_strided_slice %14 {offsets = [32, 0], sizes = [8, 256], strides = [1, 1]} : vector<64x256xf32> to vector<8x256xf32>
    %95 = arith.truncf %94 : vector<8x256xf32> to vector<8x256xbf16>
    %96 = vector.extract_strided_slice %15 {offsets = [32, 0], sizes = [8, 256], strides = [1, 1]} : vector<64x256xf32> to vector<8x256xf32>
    %97 = arith.truncf %96 : vector<8x256xf32> to vector<8x256xbf16>
    %cst_30 = arith.constant dense<0.000000e+00> : vector<256x128xf32>
    %98 = tpu.matmul %95, %93, %cst_30 {dimension_numbers = #tpu.dot_dimension_numbers<[0], [0], [1], [1], [0, 1, 1, 1], [], []>} : vector<8x256xbf16>, vector<8x128xbf16>, vector<256x128xf32> -> vector<256x128xf32>
    %cst_31 = arith.constant dense<0xFF800000> : vector<128xf32>
    %99 = vector.multi_reduction <maximumf>, %98, %cst_31 [0] : vector<256x128xf32> to vector<128xf32>
    %100 = vector.shape_cast %99 : vector<128xf32> to vector<1x128xf32>
    %101 = vector.broadcast %100 : vector<1x128xf32> to vector<256x128xf32>
    %102 = arith.subf %98, %101 : vector<256x128xf32>
    %103 = math.exp %102 : vector<256x128xf32>
    %cst_32 = arith.constant dense<0.000000e+00> : vector<128xf32>
    %104 = vector.multi_reduction <add>, %103, %cst_32 [0] : vector<256x128xf32> to vector<128xf32>
    %105 = vector.shape_cast %104 : vector<128xf32> to vector<1x128xf32>
    %106 = arith.truncf %103 : vector<256x128xf32> to vector<256x128xbf16>
    %cst_33 = arith.constant dense<0.000000e+00> : vector<8x128xf32>
    %107 = tpu.matmul %97, %106, %cst_33 {dimension_numbers = #tpu.dot_dimension_numbers<[1], [0], [0], [1], [0, 0, 1, 1], [], []>} : vector<8x256xbf16>, vector<256x128xbf16>, vector<8x128xf32> -> vector<8x128xf32>
    %108 = tpu.reciprocal %105 {approx = true} : vector<1x128xf32> -> vector<1x128xf32>
    %109 = vector.broadcast %108 : vector<1x128xf32> to vector<8x128xf32>
    %110 = arith.mulf %107, %109 : vector<8x128xf32>
    %111 = vector.extract_strided_slice %8 {offsets = [40, 0], sizes = [8, 128], strides = [1, 1]} : vector<64x128xf32> to vector<8x128xf32>
    %112 = arith.truncf %111 : vector<8x128xf32> to vector<8x128xbf16>
    %113 = vector.extract_strided_slice %14 {offsets = [40, 0], sizes = [8, 256], strides = [1, 1]} : vector<64x256xf32> to vector<8x256xf32>
    %114 = arith.truncf %113 : vector<8x256xf32> to vector<8x256xbf16>
    %115 = vector.extract_strided_slice %15 {offsets = [40, 0], sizes = [8, 256], strides = [1, 1]} : vector<64x256xf32> to vector<8x256xf32>
    %116 = arith.truncf %115 : vector<8x256xf32> to vector<8x256xbf16>
    %cst_34 = arith.constant dense<0.000000e+00> : vector<256x128xf32>
    %117 = tpu.matmul %114, %112, %cst_34 {dimension_numbers = #tpu.dot_dimension_numbers<[0], [0], [1], [1], [0, 1, 1, 1], [], []>} : vector<8x256xbf16>, vector<8x128xbf16>, vector<256x128xf32> -> vector<256x128xf32>
    %cst_35 = arith.constant dense<0xFF800000> : vector<128xf32>
    %118 = vector.multi_reduction <maximumf>, %117, %cst_35 [0] : vector<256x128xf32> to vector<128xf32>
    %119 = vector.shape_cast %118 : vector<128xf32> to vector<1x128xf32>
    %120 = vector.broadcast %119 : vector<1x128xf32> to vector<256x128xf32>
    %121 = arith.subf %117, %120 : vector<256x128xf32>
    %122 = math.exp %121 : vector<256x128xf32>
    %cst_36 = arith.constant dense<0.000000e+00> : vector<128xf32>
    %123 = vector.multi_reduction <add>, %122, %cst_36 [0] : vector<256x128xf32> to vector<128xf32>
    %124 = vector.shape_cast %123 : vector<128xf32> to vector<1x128xf32>
    %125 = arith.truncf %122 : vector<256x128xf32> to vector<256x128xbf16>
    %cst_37 = arith.constant dense<0.000000e+00> : vector<8x128xf32>
    %126 = tpu.matmul %116, %125, %cst_37 {dimension_numbers = #tpu.dot_dimension_numbers<[1], [0], [0], [1], [0, 0, 1, 1], [], []>} : vector<8x256xbf16>, vector<256x128xbf16>, vector<8x128xf32> -> vector<8x128xf32>
    %127 = tpu.reciprocal %124 {approx = true} : vector<1x128xf32> -> vector<1x128xf32>
    %128 = vector.broadcast %127 : vector<1x128xf32> to vector<8x128xf32>
    %129 = arith.mulf %126, %128 : vector<8x128xf32>
    %130 = vector.extract_strided_slice %8 {offsets = [48, 0], sizes = [8, 128], strides = [1, 1]} : vector<64x128xf32> to vector<8x128xf32>
    %131 = arith.truncf %130 : vector<8x128xf32> to vector<8x128xbf16>
    %132 = vector.extract_strided_slice %14 {offsets = [48, 0], sizes = [8, 256], strides = [1, 1]} : vector<64x256xf32> to vector<8x256xf32>
    %133 = arith.truncf %132 : vector<8x256xf32> to vector<8x256xbf16>
    %134 = vector.extract_strided_slice %15 {offsets = [48, 0], sizes = [8, 256], strides = [1, 1]} : vector<64x256xf32> to vector<8x256xf32>
    %135 = arith.truncf %134 : vector<8x256xf32> to vector<8x256xbf16>
    %cst_38 = arith.constant dense<0.000000e+00> : vector<256x128xf32>
    %136 = tpu.matmul %133, %131, %cst_38 {dimension_numbers = #tpu.dot_dimension_numbers<[0], [0], [1], [1], [0, 1, 1, 1], [], []>} : vector<8x256xbf16>, vector<8x128xbf16>, vector<256x128xf32> -> vector<256x128xf32>
    %cst_39 = arith.constant dense<0xFF800000> : vector<128xf32>
    %137 = vector.multi_reduction <maximumf>, %136, %cst_39 [0] : vector<256x128xf32> to vector<128xf32>
    %138 = vector.shape_cast %137 : vector<128xf32> to vector<1x128xf32>
    %139 = vector.broadcast %138 : vector<1x128xf32> to vector<256x128xf32>
    %140 = arith.subf %136, %139 : vector<256x128xf32>
    %141 = math.exp %140 : vector<256x128xf32>
    %cst_40 = arith.constant dense<0.000000e+00> : vector<128xf32>
    %142 = vector.multi_reduction <add>, %141, %cst_40 [0] : vector<256x128xf32> to vector<128xf32>
    %143 = vector.shape_cast %142 : vector<128xf32> to vector<1x128xf32>
    %144 = arith.truncf %141 : vector<256x128xf32> to vector<256x128xbf16>
    %cst_41 = arith.constant dense<0.000000e+00> : vector<8x128xf32>
    %145 = tpu.matmul %135, %144, %cst_41 {dimension_numbers = #tpu.dot_dimension_numbers<[1], [0], [0], [1], [0, 0, 1, 1], [], []>} : vector<8x256xbf16>, vector<256x128xbf16>, vector<8x128xf32> -> vector<8x128xf32>
    %146 = tpu.reciprocal %143 {approx = true} : vector<1x128xf32> -> vector<1x128xf32>
    %147 = vector.broadcast %146 : vector<1x128xf32> to vector<8x128xf32>
    %148 = arith.mulf %145, %147 : vector<8x128xf32>
    %149 = vector.extract_strided_slice %8 {offsets = [56, 0], sizes = [8, 128], strides = [1, 1]} : vector<64x128xf32> to vector<8x128xf32>
    %150 = arith.truncf %149 : vector<8x128xf32> to vector<8x128xbf16>
    %151 = vector.extract_strided_slice %14 {offsets = [56, 0], sizes = [8, 256], strides = [1, 1]} : vector<64x256xf32> to vector<8x256xf32>
    %152 = arith.truncf %151 : vector<8x256xf32> to vector<8x256xbf16>
    %153 = vector.extract_strided_slice %15 {offsets = [56, 0], sizes = [8, 256], strides = [1, 1]} : vector<64x256xf32> to vector<8x256xf32>
    %154 = arith.truncf %153 : vector<8x256xf32> to vector<8x256xbf16>
    %cst_42 = arith.constant dense<0.000000e+00> : vector<256x128xf32>
    %155 = tpu.matmul %152, %150, %cst_42 {dimension_numbers = #tpu.dot_dimension_numbers<[0], [0], [1], [1], [0, 1, 1, 1], [], []>} : vector<8x256xbf16>, vector<8x128xbf16>, vector<256x128xf32> -> vector<256x128xf32>
    %cst_43 = arith.constant dense<0xFF800000> : vector<128xf32>
    %156 = vector.multi_reduction <maximumf>, %155, %cst_43 [0] : vector<256x128xf32> to vector<128xf32>
    %157 = vector.shape_cast %156 : vector<128xf32> to vector<1x128xf32>
    %158 = vector.broadcast %157 : vector<1x128xf32> to vector<256x128xf32>
    %159 = arith.subf %155, %158 : vector<256x128xf32>
    %160 = math.exp %159 : vector<256x128xf32>
    %cst_44 = arith.constant dense<0.000000e+00> : vector<128xf32>
    %161 = vector.multi_reduction <add>, %160, %cst_44 [0] : vector<256x128xf32> to vector<128xf32>
    %162 = vector.shape_cast %161 : vector<128xf32> to vector<1x128xf32>
    %163 = arith.truncf %160 : vector<256x128xf32> to vector<256x128xbf16>
    %cst_45 = arith.constant dense<0.000000e+00> : vector<8x128xf32>
    %164 = tpu.matmul %154, %163, %cst_45 {dimension_numbers = #tpu.dot_dimension_numbers<[1], [0], [0], [1], [0, 0, 1, 1], [], []>} : vector<8x256xbf16>, vector<256x128xbf16>, vector<8x128xf32> -> vector<8x128xf32>
    %165 = tpu.reciprocal %162 {approx = true} : vector<1x128xf32> -> vector<1x128xf32>
    %166 = vector.broadcast %165 : vector<1x128xf32> to vector<8x128xf32>
    %167 = arith.mulf %164, %166 : vector<8x128xf32>
    %168 = tpu.concatenate %34, %53, %72, %91, %110, %129, %148, %167 in 0 : vector<8x128xf32>, vector<8x128xf32>, vector<8x128xf32>, vector<8x128xf32>, vector<8x128xf32>, vector<8x128xf32>, vector<8x128xf32>, vector<8x128xf32> -> vector<64x128xf32>
    %169 = arith.truncf %168 : vector<64x128xf32> to vector<64x128xbf16>
    %c0_46 = arith.constant 0 : index
    %c0_47 = arith.constant 0 : index
    %170 = vector.load %arg8[%c0_46, %c0_47] : memref<64x64xbf16, #tpu.memory_space<vmem>>, vector<64x64xbf16>
    %cst_48 = arith.constant dense<0.000000e+00> : vector<64x128xf32>
    %171 = tpu.matmul %170, %169, %cst_48 {dimension_numbers = #tpu.dot_dimension_numbers<[1], [0], [0], [1], [0, 0, 1, 1], [], []>} : vector<64x64xbf16>, vector<64x128xbf16>, vector<64x128xf32> -> vector<64x128xf32>
    %c0_49 = arith.constant 0 : index
    %c0_50 = arith.constant 0 : index
    %172 = vector.load %arg9[%c0_49, %c0_50] : memref<64x1xf32, #tpu.memory_space<vmem>>, vector<64x1xf32>
    %173 = vector.broadcast %172 : vector<64x1xf32> to vector<64x128xf32>
    %174 = arith.addf %171, %173 : vector<64x128xf32>
    %c0_51 = arith.constant 0 : index
    %c0_52 = arith.constant 0 : index
    %c0_53 = arith.constant 0 : index
    %175 = vector.load %arg10[%c0_51, %c0_52, %c0_53] : memref<1x64x128xf32, #tpu.memory_space<vmem>>, vector<1x64x128xf32>
    %176 = vector.shape_cast %175 : vector<1x64x128xf32> to vector<64x128xf32>
    %177 = vector.shape_cast %174 : vector<64x128xf32> to vector<1x64x128xf32>
    tpu.vector_store %arg10[%c0_51, %c0_52, %c0_53], %177 {strides = array<i32>} : memref<1x64x128xf32, #tpu.memory_space<vmem>>, vector<1x64x128xf32>,
    return
  }
  func.func @transform_0(%arg0: i32, %arg1: i32) -> (i32, i32, i32) {
    %c0_i32 = arith.constant 0 : i32
    %c0_i32_0 = arith.constant 0 : i32
    return %arg0, %c0_i32, %arg1 : i32, i32, i32
  }
  func.func @transform_1(%arg0: i32, %arg1: i32) -> (i32, i32, i32) {
    %c0_i32 = arith.constant 0 : i32
    %c0_i32_0 = arith.constant 0 : i32
    %c0_i32_1 = arith.constant 0 : i32
    return %arg0, %c0_i32, %c0_i32_0 : i32, i32, i32
  }
  func.func @transform_2(%arg0: i32, %arg1: i32) -> (i32, i32) {
    %c0_i32 = arith.constant 0 : i32
    %c0_i32_0 = arith.constant 0 : i32
    %c0_i32_1 = arith.constant 0 : i32
    return %c0_i32, %c0_i32_0 : i32, i32
  }
  func.func @transform_3(%arg0: i32, %arg1: i32) -> (i32, i32) {
    %c0_i32 = arith.constant 0 : i32
    %c0_i32_0 = arith.constant 0 : i32
    %c0_i32_1 = arith.constant 0 : i32
    return %c0_i32, %c0_i32_0 : i32, i32
  }
  func.func @transform_4(%arg0: i32, %arg1: i32) -> (i32, i32) {
    %c0_i32 = arith.constant 0 : i32
    %c0_i32_0 = arith.constant 0 : i32
    %c0_i32_1 = arith.constant 0 : i32
    return %c0_i32, %c0_i32_0 : i32, i32
  }
  func.func @transform_5(%arg0: i32, %arg1: i32) -> (i32, i32) {
    %c0_i32 = arith.constant 0 : i32
    %c0_i32_0 = arith.constant 0 : i32
    %c0_i32_1 = arith.constant 0 : i32
    return %c0_i32, %c0_i32_0 : i32, i32
  }
  func.func @transform_6(%arg0: i32, %arg1: i32) -> (i32, i32) {
    %c0_i32 = arith.constant 0 : i32
    %c0_i32_0 = arith.constant 0 : i32
    %c0_i32_1 = arith.constant 0 : i32
    return %c0_i32, %c0_i32_0 : i32, i32
  }
  func.func @transform_7(%arg0: i32, %arg1: i32) -> (i32, i32) {
    %c0_i32 = arith.constant 0 : i32
    %c0_i32_0 = arith.constant 0 : i32
    %c0_i32_1 = arith.constant 0 : i32
    return %c0_i32, %c0_i32_0 : i32, i32
  }
  func.func @transform_8(%arg0: i32, %arg1: i32) -> (i32, i32, i32) {
    %c0_i32 = arith.constant 0 : i32
    %c0_i32_0 = arith.constant 0 : i32
    return %arg0, %c0_i32, %arg1 : i32, i32, i32
  }
}

</mosaic_0001>

<bundles_post_ra>
// kernel: cross_attention.1
= control target key start
LH: loop header
LB: loop body
LE: loop exit
PB: predicated region body
PF: predicated region fallthrough
CT: control target
= control target key end

     0   :  { %s6620_s27 = smov 0   ;;  %s6622_s28 = smov 0   ;;  %s10607_s0 = inlined_call_operand.vmem [shape: bf16[2,64,256], index: 0, kind: input, shape index: {}]   ;;  %s10608_s1 = inlined_call_operand.vmem [shape: bf16[2,64,256], index: 1, kind: input, shape index: {}]   ;;  %s10609_s2 = inlined_call_operand.vmem [shape: bf16[64,64], index: 2, kind: input, shape index: {}]   ;;  %s10610_s3 = inlined_call_operand.vmem [shape: f32[64,1], index: 3, kind: input, shape index: {}]   ;;  %s10611_s4 = inlined_call_operand.vmem [shape: bf16[128,64], index: 4, kind: input, shape index: {}]   ;;  %s10612_s5 = inlined_call_operand.vmem [shape: f32[128,1], index: 5, kind: input, shape index: {}]   ;;  %s10613_s6 = inlined_call_operand.vmem [shape: bf16[64,64], index: 6, kind: input, shape index: {}]   ;;  %s10614_s7 = inlined_call_operand.vmem [shape: f32[64,1], index: 7, kind: input, shape index: {}]   ;;  %s10615_s8 = inlined_call_operand.vmem [shape: f32[2,64,256], index: 8, kind: output, shape index: {}]  }
   0x1   :  { %s6624_s29 = smov 0   ;;  %s6626_s30 = smov 0  }
   0x2   :  { %s6628_s9 = smov 0   ;;  %s6630_s10 = smov 0  }
   0x3   :  { %s6632_s11 = smov 0  }
   0x4 LB: > { %s27_s12 = sadd.s32 1, %s6564_s9  ;;  %s30_s13 = sadd.s32 1, %s6568_s10  ;;  %s6572_s11 = sphi %s6632_s11, %s18_s11   ;;  %s6568_s10 = sphi %s6630_s10, %s11835_s10   ;;  %s6564_s9 = sphi %s6628_s9, %s11834_s9   ;;  %s6560_s30 = sphi %s6626_s30, %s11833_s30   ;;  %s6556_s29 = sphi %s6624_s29, %s11832_s29   ;;  %s6552_s28 = sphi %s6622_s28, %s11831_s28   ;;  %s6548_s27 = sphi %s6620_s27, %s11830_s27  }
   0x5   : > { %p28_p0 = scmp.ge.s32.totalorder %s27_s12, 2  ;;  %s5069_s14 = sadd.s32 4294967295, %s6572_s11  }
   0x6   : > { %p46_p1 = scmp.ne.s32.totalorder %s6552_s28, %s6548_s27  ;;  %p47_p2 = scmp.eq.s32.totalorder %s6572_s11, 0 }
   0x7   : > { %s11837_s12 = smov (%p28_p0, %s27_s12), 0  ;;  %s11839_s13 = smov (!%p28_p0, %s30_s13), %s6568_s10 }
   0x8   : > { %p32_p3 = scmp.ge.s32.totalorder %s11839_s13, 2  ;;  %p230_p4 = scmp.eq.s32.totalorder %s5069_s14, 3 }
   0x9   : > { %s35_s15 = ssub.s32 %s6564_s9, %s11837_s12  ;;  %p48_p5 = por %p47_p2, %p46_p1 }
   0xa   : > { %s11841_s13 = smov (%p32_p3, %s11839_s13), 0  ;;  %p6668_p6 = por %p230_p4, %p46_p1 }
   0xb   : > { %s34_s17 = ssub.s32 %s6568_s10, %s11841_s13  ;;  %s39_s19 = sadd.s32 1, %s6552_s28 }
   0xc   : > { %s36_s18 = sor.u32 %s35_s15, %s34_s17  ;;  %p5072_p8 = scmp.ge.s32.totalorder %s6572_s11, 4 }
   0xd   : > { %p37_p7 = scmp.eq.s32.totalorder %s36_s18, 0 }
   0xe   : > { %270 = sbr.rel (%p5072_p8) target bundleno = 32 (0x20), region = 40 }
   0xf   : > { %s6676_s20 = scalar_select %p37_p7, %s6552_s28, %s39_s19  }
  0x15   : > { %273 = sbr.rel (!%p48_p5) target bundleno = 32 (0x20), region = 44  ;;  %s275_s21 = sand.u32 (%p48_p5), 1, %s6552_s28  }
  0x16   : > { %s5074_s22 = sshll.u32 (%p48_p5), %s6568_s10, 4  ;;  %s5073_s23 = sshll.u32 (%p48_p5), %s275_s21, 5 }
  0x17   : > { %s279_s24 = sadd.s32 (%p48_p5), %s6564_s9, %s5074_s22  ;;  %s277_s17 = scalar_lea.vmem (%p48_p5), [#allocation2], %s5073_s23 }
  0x18   : > { %s5075_s25 = sshll.u32 (%p48_p5), %s279_s24, 2 }
  0x19   : > { %s281_s15 = scalar_lea.vmem (%p48_p5), %s10607_s0, %s5075_s25 }
  0x1a   : > { %v297_v0 = vld [vmem:[%s281_s15] sm:$0xf] (%p48_p5)  ;;  %v299_v1 = vld [vmem:[%s281_s15 + $0x8] sm:$0xf] (%p48_p5)  ;;  %v301_v2 = vld [vmem:[%s281_s15 + $0x10] sm:$0xf] (%p48_p5) }
  0x1b   : > { %298 = vst [vmem:[%s277_s17] sm:$0xf] (%p48_p5), %v297_v0  ;;  %300 = vst [vmem:[%s277_s17 + $0x4] sm:$0xf] (%p48_p5), %v299_v1  ;;  %v303_v3 = vld [vmem:[%s281_s15 + $0x18] sm:$0xf] (%p48_p5) }
  0x1c   : > { %302 = vst [vmem:[%s277_s17 + $0x8] sm:$0xf] %v301_v2  ;;  %v305_v4 = vld [vmem:[%s281_s15 + $0x20] sm:$0xf]  ;;  %v307_v5 = vld [vmem:[%s281_s15 + $0x28] sm:$0xf] }
  0x1d   : > { %304 = vst [vmem:[%s277_s17 + $0xc] sm:$0xf] %v303_v3  ;;  %306 = vst [vmem:[%s277_s17 + $0x10] sm:$0xf] %v305_v4  ;;  %v309_v6 = vld [vmem:[%s281_s15 + $0x30] sm:$0xf] }
  0x1e   : > { %308 = vst [vmem:[%s277_s17 + $0x14] sm:$0xf] %v307_v5  ;;  %v311_v7 = vld [vmem:[%s281_s15 + $0x38] sm:$0xf]  ;;  %310 = vst [vmem:[%s277_s17 + $0x18] sm:$0xf] %v309_v6 }
  0x1f   : > { %312 = vst [vmem:[%s277_s17 + $0x1c] sm:$0xf] %v311_v7 }
  0x20 PF: > { %p5076_p9 = scmp.ge.s32.totalorder %s6572_s11, 1  ;;  %p358_p10 = scmp.lt.s32.totalorder %s6572_s11, 5 }
  0x22   : > { %p359_p11 = pnand %p5076_p9, %p358_p10 }
  0x24   : > { %362 = sbr.rel (%p359_p11) target bundleno = 1590 (0x636), region = 89 }
  0x2b   : > { %s365_s18 = sand.u32 1, %s6548_s27   ;;  %p402_p12 = scmp.lt.s32.totalorder %s6560_s30, 1  ;;  %v5971_v8 = vld [vmem:[%s10609_s2] sm:$0xff]   ;;  %vm524_vm0 = vcmask 523264   ;;  %v6574_v10 = vmov 0   ;;  %v5974_v21 = vld [vmem:[%s10609_s2 + $0x8] sm:$0xff]  }
  0x2c   : > { %s5077_s19 = sshll.u32 %s365_s18, 5  ;;  %5595 = vmatprep.mubr.msk.bf16.mxu0 %vm524_vm0, %v5971_v8  ;;  %850 = vmatprep.mubr.bf16.mxu1 %v6574_v10  ;;  %v5977_v23 = vld [vmem:[%s10609_s2 + $0x10] sm:$0xff]   ;;  %v618_v24 = vld [vmem:[%s10612_s5] sm:$0xff]  ;;  %v619_v25 = vld [vmem:[%s10612_s5 + $0x8] sm:$0xff]  ;;  %vm1052_vm1 = vcmask 1043456   ;;  %vm1003_vm2 = vcmask 64512  }
  0x2d   : > { %s367_s23 = scalar_lea.vmem [#allocation2], %s5077_s19  ;;  %5956 = vset.pattern.permute.xlu0 %v6574_v10  ;;  %5957 = vset.pattern.permute.xlu1 %v6574_v10  ;;  %v432_v26 = vld [vmem:[%s10610_s3] sm:$0xff]  ;;  %v620_v28 = vld [vmem:[%s10612_s5 + $0x10] sm:$0xff]  ;;  %v433_v29 = vld [vmem:[%s10610_s3 + $0x8] sm:$0xff]  ;;  %s5254_s27 = sshll.u32 (%p6668_p6), %s6560_s30, 4 }
  0x2e   : > { %v5958_v9 = vld [vmem:[%s367_s23] sm:$0xff]   ;;  %s403_s24 = scalar_select %p402_p12, %s6560_s30, 1  ;;  %v5961_v11 = vld [vmem:[%s367_s23 + $0x8] sm:$0xff]   ;;  %v5965_v12 = vld [vmem:[%s367_s23 + $0x10] sm:$0xff]   ;;  %636 = vperm.xlu0 %5956, %v618_v24   ;;  %442 = vperm.xlu1 %5957, %v432_v26  }
  0x2f   : > { %5587 = vmatprep.subr.bf16.mxu0 %v5958_v9  ;;  %v5969_v17 = vld [vmem:[%s367_s23 + $0x18] sm:$0xff]   ;;  %v5976_v27 = vld [vmem:[%s10611_s4] sm:$0xff]   ;;  %v434_v32 = vld [vmem:[%s10610_s3 + $0x10] sm:$0xff]  ;;  %s5078_s23 = sshll.u32 %s365_s18, 6  ;;  %s4922_s18 = sadd.s32 (%p6668_p6), %s6556_s29, %s5254_s27 }
  0x30   : > { %s5258_s25 = sshll.u32 %s403_s24, 6  ;;  %5588 = vmatpush3.bf16.msra.mxu0 %v5958_v9  ;;  %v5978_v30 = vld [vmem:[%s10609_s2 + $0x18] sm:$0xff]   ;;  %v5979_v33 = vld [vmem:[%s10611_s4 + $0x8] sm:$0xff]   ;;  %v622_v35 = vld [vmem:[%s10612_s5 + $0x20] sm:$0xff]  ;;  %s10561_s24 = scalar_lea.vmem [#allocation3], %s5078_s23 }
  0x31   : > { %s406_s15 = scalar_lea.vmem %s10608_s1, %s5258_s25  ;;  %5589 = vmatprep.subr.bf16.mxu0 %v5961_v11  ;;  %v621_v31 = vld [vmem:[%s10612_s5 + $0x18] sm:$0xff]  ;;  %v623_v36 = vld [vmem:[%s10612_s5 + $0x28] sm:$0xff]  ;;  %v436_v37 = vld [vmem:[%s10610_s3 + $0x20] sm:$0xff]  ;;  %s5255_s16 = sshll.u32 (%p6668_p6), %s4922_s18, 3 }
  0x32   : > { %v5959_v13 = vld [vmem:[%s406_s15 + $0x4] ss:$8 sps:$4 sm:$0xff]   ;;  %v5962_v14 = vld [vmem:[%s406_s15] ss:$8 sps:$4 sm:$0xff]   ;;  %v5963_v15 = vld [vmem:[%s406_s15 + $0x14] ss:$8 sps:$4 sm:$0xff]   ;;  %641 = vperm.xlu0 %5956, %v619_v25   ;;  %447 = vperm.xlu1 %5957, %v433_v29   ;;  %s4924_s14 = scalar_lea.vmem (%p6668_p6), %s10615_s8, %s5255_s16 }
  0x33   : > { %818 = vmatprep.subr.bf16.mxu1 %v5959_v13  ;;  %v5966_v16 = vld [vmem:[%s406_s15 + $0x10] ss:$8 sps:$4 sm:$0xff]   ;;  %v5967_v18 = vld [vmem:[%s406_s15 + $0x24] ss:$8 sps:$4 sm:$0xff]   ;;  %v5970_v19 = vld [vmem:[%s406_s15 + $0x20] ss:$8 sps:$4 sm:$0xff]  }
  0x34   : > { %819 = vmatpush1.bf16.msra.mxu1 %v5962_v14  ;;  %5590 = vmatpush3.bf16.msra.mxu0 %v5961_v11  ;;  %v5972_v20 = vld [vmem:[%s406_s15 + $0x34] ss:$8 sps:$4 sm:$0xff]   ;;  %v5975_v22 = vld [vmem:[%s406_s15 + $0x30] ss:$8 sps:$4 sm:$0xff]   ;;  %v437_v39 = vld [vmem:[%s10610_s3 + $0x28] sm:$0xff] }
  0x35   : > { %820 = vmatprep.subr.bf16.mxu1 %v5963_v15  ;;  %5591 = vmatprep.subr.bf16.mxu0 %v5965_v12  ;;  %v435_v34 = vld [vmem:[%s10610_s3 + $0x18] sm:$0xff]  ;;  %v5980_v38 = vld [vmem:[%s10611_s4 + $0x10] sm:$0xff]   ;;  %v5982_v42 = vld [vmem:[%s10611_s4 + $0x20] sm:$0xff]  }
  0x36   : > { %646 = vperm.xlu0 %5956, %v620_v28   ;;  %651 = vperm.xlu1 %5957, %v621_v31   ;;  %v624_v40 = vld [vmem:[%s10612_s5 + $0x30] sm:$0xff]  ;;  %v5981_v41 = vld [vmem:[%s10611_s4 + $0x18] sm:$0xff]   ;;  %v5983_v43 = vld [vmem:[%s10611_s4 + $0x28] sm:$0xff]  }
  0x37   : > { %v5984_v44 = vld [vmem:[%s10611_s4 + $0x30] sm:$0xff]   ;;  %v5985_v45 = vld [vmem:[%s10611_s4 + $0x38] sm:$0xff]  }
  0x38   : > { %821 = vmatpush1.bf16.msra.mxu1 %v5966_v16  ;;  %5592 = vmatpush3.bf16.msra.mxu0 %v5965_v12 }
  0x39   : > { %822 = vmatprep.subr.bf16.mxu1 %v5967_v18  ;;  %5593 = vmatprep.subr.bf16.mxu0 %v5969_v17 }
  0x3a   : > { %452 = vperm.xlu0 %5956, %v434_v32   ;;  %457 = vperm.xlu1 %5957, %v435_v34  }
  0x3c   : > { %823 = vmatpush1.bf16.msra.mxu1 %v5970_v19  ;;  %5594 = vmatpush3.bf16.msra.mxu0 %v5969_v17 }
  0x3d   : > { %824 = vmatprep.subr.bf16.mxu1 %v5972_v20 }
  0x3e   : > { %656 = vperm.xlu0 %5956, %v622_v35   ;;  %661 = vperm.xlu1 %5957, %v623_v36  }
  0x3f   : > { %5596 = vmatmul.mubr.msk.bf16.vlgmr.msra.gmra.mrb[0].mxu0 %vm524_vm0, %v5974_v21 }
  0x40   : > { %825 = vmatpush1.bf16.msra.mxu1 %v5975_v22  ;;  %5599 = vmatprep.mubr.msk.bf16.mxu0 %vm524_vm0, %v5977_v23 }
  0x42   : > { %462 = vperm.xlu0 %5956, %v436_v37   ;;  %467 = vperm.xlu1 %5957, %v437_v39  }
  0x43   : > { %5109 = vmatmul.mubr.msk.bf16.vlgmr.msra.gmra.mrb[0].mxu1 %vm524_vm0, %v5976_v27 }
  0x44   : > { %860 = vmatprep.mubr.bf16.mxu1 %v6574_v10 }
  0x46   : > { %666 = vperm.xlu0 %5956, %v624_v40  }
  0x47   : > { %5600 = vmatmul.mubr.msk.bf16.gmra.mrb[4].mxu0 %vm524_vm0, %v5978_v30 }
  0x4b   : > { %5110 = vmatmul.mubr.msk.bf16.gmra.mrb[4].mxu1 %vm524_vm0, %v5979_v33 }
  0x4c   : > { %870 = vmatprep.mubr.bf16.mxu1 %v6574_v10 }
  0x53   : > { %5111 = vmatmul.mubr.msk.bf16.gmra.mrb[8].mxu1 %vm524_vm0, %v5980_v38 }
  0x54   : > { %880 = vmatprep.mubr.bf16.mxu1 %v6574_v10 }
  0x5b   : > { %5112 = vmatmul.mubr.msk.bf16.gmra.mrb[12].mxu1 %vm524_vm0, %v5981_v41 }
  0x5c   : > { %890 = vmatprep.mubr.bf16.mxu1 %v6574_v10 }
  0x63   : > { %5113 = vmatmul.mubr.msk.bf16.gmra.mrb[16].mxu1 %vm524_vm0, %v5982_v42 }
  0x64   : > { %900 = vmatprep.mubr.bf16.mxu1 %v6574_v10 }
  0x6b   : > { %5114 = vmatmul.mubr.msk.bf16.gmra.mrb[20].mxu1 %vm524_vm0, %v5983_v43 }
  0x6c   : > { %910 = vmatprep.mubr.bf16.mxu1 %v6574_v10 }
  0x73   : > { %5115 = vmatmul.mubr.msk.bf16.gmra.mrb[24].mxu1 %vm524_vm0, %v5984_v44 }
  0x74   : > { %920 = vmatprep.mubr.bf16.mxu1 %v6574_v10 }
  0x7b   : > { %5116 = vmatmul.mubr.msk.bf16.gmra.mrb[28].mxu1 %vm524_vm0, %v5985_v45 }
  0xad   : > { %v637_v46 = vpop.permute.xlu0 %636  ;;  %v443_v47 = vpop.permute.xlu1 %442 }
  0xb1   : > { %v642_v48 = vpop.permute.xlu0 %641  ;;  %v448_v49 = vpop.permute.xlu1 %447 }
  0xb5   : > { %v647_v50 = vpop.permute.xlu0 %646  ;;  %v652_v51 = vpop.permute.xlu1 %651 }
  0xb9   : > { %v453_v53 = vpop.permute.xlu0 %452  ;;  %v458_v58 = vpop.permute.xlu1 %457 }
  0xbd   : > { %v6816_v37 = vpop.permute.xlu0 %656  ;;  %v6818_v40 = vpop.permute.xlu1 %661 }
  0xc1   : > { %v463_v39 = vpop.permute.xlu0 %462  ;;  %v468_v42 = vpop.permute.xlu1 %467 }
  0xc5   : > { %v6820_v41 = vpop.permute.xlu0 %666 }
 0x112   : > { %v5597_v52 = vpop.f32.mrb[0].mxu0 }
 0x113   : > { %v571_v54 = vpop.f32.mrb[1].mxu0  ;;  %v580_v55 = vadd.f32 %v5597_v52, %v453_v53 }
 0x114   : > { %v572_v56 = vadd.f32 %v571_v54, %v443_v47  ;;  %v5598_v57 = vpop.f32.mrb[2].mxu0 }
 0x115   : > { %v574_v59 = vpop.f32.mrb[3].mxu0  ;;  %v583_v60 = vadd.f32 %v5598_v57, %v458_v58  ;;  %v6792_v2 = vpack.c.bf16 %v580_v55, %v580_v55 }
 0x116   : > { %v931_v61 = vpack.c.bf16 %v572_v56, %v572_v56  ;;  %v852_v62 = vpop.f32.mrb[0].mxu1  ;;  %v575_v63 = vadd.f32 %v574_v59, %v448_v49 }
 0x117   : > { %v853_v0 = vadd.f32 %v852_v62, %v637_v46  ;;  %v854_v1 = vpop.f32.mrb[1].mxu1  ;;  %v6796_v6 = vpack.c.bf16 %v583_v60, %v583_v60 }
 0x118   : > { %v1054_v3 = vsel %vm1052_vm1, %v931_v61, 0  ;;  %v856_v4 = vpop.f32.mrb[2].mxu1  ;;  %5891 = vmatprep.subr.msk.bf16.mxu0 %vm1052_vm1, %v931_v61  ;;  %v932_v5 = vpack.c.bf16 %v575_v63, %v575_v63  ;;  %v855_v26 = vadd.f32 %v854_v1, %v637_v46 }
 0x119   : > { %v939_v7 = vpack.c.bf16 %v853_v0, %v853_v0  ;;  %v857_v8 = vadd.f32 %v856_v4, %v642_v48  ;;  %v858_v9 = vpop.f32.mrb[3].mxu1  ;;  %5604 = vmatpush3.bf16.msra.mxu0 %v1054_v3 }
 0x11a   : > { %v6798_v10 = vpop.f32.mrb[4].mxu0  ;;  %5893 = vmatprep.subr.msk.bf16.mxu0 %vm1052_vm1, %v6792_v2  ;;  %v1298_v11 = vsel %vm1052_vm1, %v932_v5, 0  ;;  %5892 = vmatprep.subr.msk.bf16.mxu1 %vm1052_vm1, %v932_v5  ;;  %v859_v27 = vadd.f32 %v858_v9, %v642_v48  ;;  %v940_v28 = vpack.c.bf16 %v855_v26, %v855_v26  ;;  %v1542_v48 = vsel %vm1052_vm1, %v6792_v2, 0 }
 0x11b   : > { %v941_v12 = vpack.c.bf16 %v857_v8, %v857_v8  ;;  %971 = vxpose.xlu0.c.b16.start.end [1/1] (short) %v939_v7, 128  ;;  %v587_v13 = vpop.f32.mrb[5].mxu0  ;;  %5638 = vmatpush3.bf16.msra.mxu1 %v1298_v11 }
 0x11c   : > { %v6804_v14 = vpop.f32.mrb[6].mxu0  ;;  %5894 = vmatprep.subr.msk.bf16.mxu1 %vm1052_vm1, %v6796_v6  ;;  %v942_v29 = vpack.c.bf16 %v859_v27, %v859_v27  ;;  %v588_v44 = vadd.f32 %v587_v13, %v463_v39 }
 0x11d   : > { %1217 = vxpose.xlu1.c.b16.start.end [1/1] (short) %v941_v12, 128  ;;  %v590_v15 = vpop.f32.mrb[7].mxu0 }
 0x11e   : > { %v862_v16 = vpop.f32.mrb[4].mxu1  ;;  %v591_v46 = vadd.f32 %v590_v15, %v468_v42  ;;  %v6826_v49 = vpack.c.bf16 %v588_v44, %v588_v44 }
 0x11f   : > { %v864_v17 = vpop.f32.mrb[5].mxu1  ;;  %v863_v30 = vadd.f32 %v862_v16, %v647_v50  ;;  %v625_v16 = vld [vmem:[%s10612_s5 + $0x38] sm:$0xff] }
 0x120   : > { %v866_v18 = vpop.f32.mrb[6].mxu1  ;;  %v865_v34 = vadd.f32 %v864_v17, %v647_v50  ;;  %v6831_v52 = vpack.c.bf16 %v591_v46, %v591_v46 }
 0x121   : > { %v868_v19 = vpop.f32.mrb[7].mxu1  ;;  %v867_v31 = vadd.f32 %v866_v18, %v652_v51  ;;  %v943_v32 = vpack.c.bf16 %v863_v30, %v863_v30 }
 0x122   : > { %v869_v35 = vadd.f32 %v868_v19, %v652_v51  ;;  %v944_v36 = vpack.c.bf16 %v865_v34, %v865_v34  ;;  %v1786_v51 = vsel %vm1052_vm1, %v6796_v6, 0  ;;  %v438_v19 = vld [vmem:[%s10610_s3 + $0x30] sm:$0xff] }
 0x123   : > { %v945_v33 = vpack.c.bf16 %v867_v31, %v867_v31 }
 0x124   : > { %v946_v38 = vpack.c.bf16 %v869_v35, %v869_v35  ;;  %v2030_v35 = vsel %vm1052_vm1, %v6826_v49, 0 }
 0x126   : > { %v872_v20 = vpop.f32.mrb[8].mxu1 }
 0x127   : > { %v6808_v21 = vpop.f32.mrb[9].mxu1  ;;  %v873_v53 = vadd.f32 %v872_v20, %v6816_v37  ;;  %v439_v20 = vld [vmem:[%s10610_s3 + $0x38] sm:$0xff] }
 0x128   : > { %v876_v22 = vpop.f32.mrb[10].mxu1 }
 0x129   : > { %v6810_v23 = vpop.f32.mrb[11].mxu1  ;;  %v877_v55 = vadd.f32 %v876_v22, %v6818_v40  ;;  %v947_v57 = vpack.c.bf16 %v873_v53, %v873_v53 }
 0x12b   : > { %v949_v59 = vpack.c.bf16 %v877_v55, %v877_v55 }
 0x12e   : > { %v6812_v24 = vpop.f32.mrb[12].mxu1 }
 0x12f   : > { %v6814_v25 = vpop.f32.mrb[13].mxu1 }
 0x130   : > { %v6852_v5 = vpop.f32.mrb[14].mxu1 }
 0x131   : > { %v6854_v7 = vpop.f32.mrb[15].mxu1 }
 0x136   : > { %v6890_v42 = vpop.f32.mrb[16].mxu1 }
 0x137   : > { %10934 = vst [vmem:[#allocation4_spill] sm:$0xff] %v6890_v42  ;;  %v6892_v44 = vpop.f32.mrb[17].mxu1 }
 0x138   : > { %987 = vxpose.xlu0.c.b16.start.end [1/1] (short) %v940_v28, 128  ;;  %10935 = vst [vmem:[#allocation5_spill] sm:$0xff] %v6892_v44  ;;  %v6897_v46 = vpop.f32.mrb[18].mxu1 }
 0x139   : > { %10936 = vst [vmem:[#allocation6_spill] sm:$0xff] %v6897_v46 }
 0x13a   : > { %1233 = vxpose.xlu1.c.b16.start.end [1/1] (short) %v942_v29, 128 }
 0x155   : > { %1461 = vxpose.xlu0.c.b16.start.end [1/1] (short) %v943_v32, 128 }
 0x157   : > { %1705 = vxpose.xlu1.c.b16.start.end [1/1] (short) %v945_v33, 128 }
 0x172   : > { %1477 = vxpose.xlu0.c.b16.start.end [1/1] (short) %v944_v36, 128 }
 0x174   : > { %1721 = vxpose.xlu1.c.b16.start.end [1/1] (short) %v946_v38, 128  ;;  %v2274_v38 = vsel %vm1052_vm1, %v6831_v52, 0 }
 0x181   : > { %v979_v43 = vpop.trf.xlu0 }
 0x182   : > { %5605 = vmatprep.mubr.msk.bf16.mxu0 %vm1003_vm2, %v979_v43 }
 0x183   : > { %v1225_v45 = vpop.trf.xlu1 }
 0x184   : > { %5639 = vmatprep.mubr.msk.bf16.mxu1 %vm1003_vm2, %v1225_v45  ;;  %v875_v45 = vadd.f32 %v6808_v21, %v6816_v37 }
 0x185   : > { %v980_v47 = vpop.trf.xlu0 }
 0x186   : > { %5606 = vmatmul.mubr.msk.bf16.vlgmr.msra.gmra.mrb[8].mxu0 %vm1003_vm2, %v980_v47 }
 0x187   : > { %5672 = vmatpush3.bf16.msra.mxu0 %v1542_v48  ;;  %v1226_v50 = vpop.trf.xlu1  ;;  %v6899_v48 = vpop.f32.mrb[19].mxu1 }
 0x188   : > { %5895 = vmatprep.subr.msk.bf16.mxu0 %vm1052_vm1, %v6826_v49  ;;  %5640 = vmatmul.mubr.msk.bf16.vlgmr.msra.gmra.mrb[32].mxu1 %vm1003_vm2, %v1226_v50  ;;  %10937 = vst [vmem:[#allocation7_spill] sm:$0xff] %v6899_v48  ;;  %v6902_v49 = vpop.f32.mrb[20].mxu1 }
 0x189   : > { %5706 = vmatpush3.bf16.msra.mxu1 %v1786_v51  ;;  %v981_v54 = vpop.trf.xlu0  ;;  %10938 = vst [vmem:[#allocation8_spill] sm:$0xff] %v6902_v49  ;;  %v6904_v51 = vpop.f32.mrb[21].mxu1 }
 0x18a   : > { %5896 = vmatprep.subr.msk.bf16.mxu1 %vm1052_vm1, %v6831_v52  ;;  %5609 = vmatprep.mubr.msk.bf16.mxu0 %vm1003_vm2, %v981_v54  ;;  %10939 = vst [vmem:[#allocation9_spill] sm:$0xff] %v6904_v51  ;;  %v948_v52 = vpack.c.bf16 %v875_v45, %v875_v45  ;;  %v6907_v53 = vpop.f32.mrb[22].mxu1  ;;  %v879_v54 = vadd.f32 %v6810_v23, %v6818_v40 }
 0x18b   : > { %v1227_v56 = vpop.trf.xlu1  ;;  %10940 = vst [vmem:[#allocation10_spill] sm:$0xff] %v6907_v53  ;;  %v6909_v37 = vpop.f32.mrb[23].mxu1  ;;  %v4766_v53 = vld [vmem:[%s10614_s7 + $0x28] sm:$0xff] }
 0x18c   : > { %5643 = vmatprep.mubr.msk.bf16.mxu1 %vm1003_vm2, %v1227_v56  ;;  %10941 = vst [vmem:[#allocation11_spill] sm:$0xff] %v6909_v37  ;;  %v6914_v55 = vpop.f32.mrb[24].mxu1 }
 0x18d   : > { %v982_v58 = vpop.trf.xlu0  ;;  %10942 = vst [vmem:[#allocation12_spill] sm:$0xff] %v6914_v55 }
 0x18e   : > { %5610 = vmatmul.mubr.msk.bf16.gmra.mrb[12].mxu0 %vm1003_vm2, %v982_v58 }
 0x18f   : > { %v1228_v60 = vpop.trf.xlu1  ;;  %1949 = vxpose.xlu0.c.b16.start.end [1/1] (short) %v947_v57, 128  ;;  %v6916_v57 = vpop.f32.mrb[25].mxu1 }
 0x190   : > { %5644 = vmatmul.mubr.msk.bf16.gmra.mrb[36].mxu1 %vm1003_vm2, %v1228_v60  ;;  %10943 = vst [vmem:[#allocation13_spill] sm:$0xff] %v6916_v57  ;;  %v6919_v58 = vpop.f32.mrb[26].mxu1 }
 0x191   : > { %2193 = vxpose.xlu1.c.b16.start.end [1/1] (short) %v949_v59, 128  ;;  %v983_v61 = vpop.trf.xlu0  ;;  %10944 = vst [vmem:[#allocation14_spill] sm:$0xff] %v6919_v58  ;;  %v6921_v60 = vpop.f32.mrb[27].mxu1 }
 0x192   : > { %5613 = vmatprep.mubr.msk.bf16.mxu0 %vm1003_vm2, %v983_v61  ;;  %10945 = vst [vmem:[#allocation15_spill] sm:$0xff] %v6921_v60  ;;  %v950_v61 = vpack.c.bf16 %v879_v54, %v879_v54 }
 0x193   : > { %v1229_v62 = vpop.trf.xlu1 }
 0x194   : > { %5647 = vmatprep.mubr.msk.bf16.mxu1 %vm1003_vm2, %v1229_v62  ;;  %v6924_v62 = vpop.f32.mrb[28].mxu1 }
 0x195   : > { %v984_v63 = vpop.trf.xlu0  ;;  %10946 = vst [vmem:[#allocation16_spill] sm:$0xff] %v6924_v62  ;;  %v6926_v40 = vpop.f32.mrb[29].mxu1 }
 0x196   : > { %5614 = vmatmul.mubr.msk.bf16.gmra.mrb[16].mxu0 %vm1003_vm2, %v984_v63  ;;  %10947 = vst [vmem:[#allocation17_spill] sm:$0xff] %v6926_v40  ;;  %v6929_v63 = vpop.f32.mrb[30].mxu1 }
 0x197   : > { %v1230_v0 = vpop.trf.xlu1  ;;  %10948 = vst [vmem:[#allocation18_spill] sm:$0xff] %v6929_v63 }
 0x198   : > { %5648 = vmatmul.mubr.msk.bf16.gmra.mrb[40].mxu1 %vm1003_vm2, %v1230_v0 }
 0x199   : > { %v985_v1 = vpop.trf.xlu0 }
 0x19a   : > { %5617 = vmatprep.mubr.msk.bf16.mxu0 %vm1003_vm2, %v985_v1  ;;  %v6931_v1 = vpop.f32.mrb[31].mxu1 }
 0x19b   : > { %v1231_v2 = vpop.trf.xlu1  ;;  %10949 = vst [vmem:[#allocation19_spill] sm:$0xff] %v6931_v1  ;;  %v4762_v1 = vld [vmem:[%s10614_s7 + $0x8] sm:$0xff] }
 0x19c   : > { %5651 = vmatprep.mubr.msk.bf16.mxu1 %vm1003_vm2, %v1231_v2 }
 0x19d   : > { %v986_v3 = vpop.trf.xlu0 }
 0x19e   : > { %5618 = vmatmul.mubr.msk.bf16.gmra.mrb[20].mxu0 %vm1003_vm2, %v986_v3 }
 0x19f   : > { %v1232_v4 = vpop.trf.xlu1 }
 0x1a0   : > { %5652 = vmatmul.mubr.msk.bf16.gmra.mrb[44].mxu1 %vm1003_vm2, %v1232_v4 }
 0x1a1   : > { %v995_v6 = vpop.trf.xlu0 }
 0x1a2   : > { %5621 = vmatprep.mubr.msk.bf16.mxu0 %vm1003_vm2, %v995_v6 }
 0x1a3   : > { %v1241_v8 = vpop.trf.xlu1 }
 0x1a4   : > { %5655 = vmatprep.mubr.msk.bf16.mxu1 %vm1003_vm2, %v1241_v8 }
 0x1a5   : > { %v996_v9 = vpop.trf.xlu0 }
 0x1a6   : > { %5622 = vmatmul.mubr.msk.bf16.gmra.mrb[24].mxu0 %vm1003_vm2, %v996_v9 }
 0x1a7   : > { %v1242_v11 = vpop.trf.xlu1 }
 0x1a8   : > { %5656 = vmatmul.mubr.msk.bf16.gmra.mrb[48].mxu1 %vm1003_vm2, %v1242_v11 }
 0x1a9   : > { %v997_v12 = vpop.trf.xlu0 }
 0x1aa   : > { %5625 = vmatprep.mubr.msk.bf16.mxu0 %vm1003_vm2, %v997_v12  ;;  %v883_v12 = vadd.f32 %v6812_v24, %v6820_v41 }
 0x1ab   : > { %v1243_v13 = vpop.trf.xlu1 }
 0x1ac   : > { %5659 = vmatprep.mubr.msk.bf16.mxu1 %vm1003_vm2, %v1243_v13 }
 0x1ad   : > { %v998_v15 = vpop.trf.xlu0 }
 0x1ae   : > { %5626 = vmatmul.mubr.msk.bf16.gmra.mrb[28].mxu0 %vm1003_vm2, %v998_v15 }
 0x1af   : > { %v1244_v17 = vpop.trf.xlu1 }
 0x1b0   : > { %5660 = vmatmul.mubr.msk.bf16.gmra.mrb[52].mxu1 %vm1003_vm2, %v1244_v17 }
 0x1b1   : > { %671 = vperm.xlu1 %5957, %v625_v16   ;;  %v999_v18 = vpop.trf.xlu0  ;;  %v951_v16 = vpack.c.bf16 %v883_v12, %v883_v12 }
 0x1b2   : > { %5629 = vmatprep.mubr.msk.bf16.mxu0 %vm1003_vm2, %v999_v18 }
 0x1b3   : > { %v1245_v22 = vpop.trf.xlu1 }
 0x1b4   : > { %472 = vperm.xlu0 %5956, %v438_v19   ;;  %5663 = vmatprep.mubr.msk.bf16.mxu1 %vm1003_vm2, %v1245_v22 }
 0x1b5   : > { %477 = vperm.xlu1 %5957, %v439_v20   ;;  %v1000_v26 = vpop.trf.xlu0 }
 0x1b6   : > { %5630 = vmatmul.mubr.msk.bf16.gmra.mrb[32].mxu0 %vm1003_vm2, %v1000_v26 }
 0x1b7   : > { %v1246_v27 = vpop.trf.xlu1 }
 0x1b8   : > { %5664 = vmatmul.mubr.msk.bf16.gmra.mrb[56].mxu1 %vm1003_vm2, %v1246_v27 }
 0x1b9   : > { %v1001_v28 = vpop.trf.xlu0 }
 0x1ba   : > { %5633 = vmatprep.mubr.msk.bf16.mxu0 %vm1003_vm2, %v1001_v28 }
 0x1bb   : > { %v1247_v29 = vpop.trf.xlu1 }
 0x1bc   : > { %5667 = vmatprep.mubr.msk.bf16.mxu1 %vm1003_vm2, %v1247_v29 }
 0x1bd   : > { %v1002_v30 = vpop.trf.xlu0 }
 0x1be   : > { %5634 = vmatmul.mubr.msk.bf16.gmra.mrb[36].mxu0 %vm1003_vm2, %v1002_v30 }
 0x1bf   : > { %v1248_v31 = vpop.trf.xlu1 }
 0x1c0   : > { %5668 = vmatmul.mubr.msk.bf16.gmra.mrb[60].mxu1 %vm1003_vm2, %v1248_v31 }
 0x1c1   : > { %v1469_v32 = vpop.trf.xlu0 }
 0x1c2   : > { %5673 = vmatprep.mubr.msk.bf16.mxu0 %vm1003_vm2, %v1469_v32 }
 0x1c3   : > { %v1713_v33 = vpop.trf.xlu1 }
 0x1c4   : > { %5707 = vmatprep.mubr.msk.bf16.mxu1 %vm1003_vm2, %v1713_v33  ;;  %v885_v33 = vadd.f32 %v6814_v25, %v6820_v41 }
 0x1c5   : > { %v1470_v34 = vpop.trf.xlu0 }
 0x1c6   : > { %5674 = vmatmul.mubr.msk.bf16.vlgmr.msra.gmra.mrb[40].mxu0 %vm1003_vm2, %v1470_v34 }
 0x1c7   : > { %5740 = vmatpush3.bf16.msra.mxu0 %v2030_v35  ;;  %v1714_v36 = vpop.trf.xlu1 }
 0x1c8   : > { %5708 = vmatmul.mubr.msk.bf16.vlgmr.msra.gmra.mrb[64].mxu1 %vm1003_vm2, %v1714_v36  ;;  %v952_v36 = vpack.c.bf16 %v885_v33, %v885_v33 }
 0x1c9   : > { %5774 = vmatpush3.bf16.msra.mxu1 %v2274_v38  ;;  %v1471_v39 = vpop.trf.xlu0 }
 0x1ca   : > { %5677 = vmatprep.mubr.msk.bf16.mxu0 %vm1003_vm2, %v1471_v39 }
 0x1cb   : > { %v1715_v43 = vpop.trf.xlu1 }
 0x1cc   : > { %5711 = vmatprep.mubr.msk.bf16.mxu1 %vm1003_vm2, %v1715_v43 }
 0x1cd   : > { %v1472_v47 = vpop.trf.xlu0 }
 0x1ce   : > { %5678 = vmatmul.mubr.msk.bf16.gmra.mrb[44].mxu0 %vm1003_vm2, %v1472_v47 }
 0x1cf   : > { %v1716_v50 = vpop.trf.xlu1 }
 0x1d0   : > { %5712 = vmatmul.mubr.msk.bf16.gmra.mrb[68].mxu1 %vm1003_vm2, %v1716_v50 }
 0x1d1   : > { %v1473_v21 = vpop.trf.xlu0 }
 0x1d2   : > { %1965 = vxpose.xlu0.c.b16.start.end [1/1] (short) %v948_v52, 128  ;;  %5681 = vmatprep.mubr.msk.bf16.mxu0 %vm1003_vm2, %v1473_v21 }
 0x1d3   : > { %v1717_v56 = vpop.trf.xlu1 }
 0x1d4   : > { %5715 = vmatprep.mubr.msk.bf16.mxu1 %vm1003_vm2, %v1717_v56  ;;  %v626_v56 = vld [vmem:[%s10612_s5 + $0x40] sm:$0xff] }
 0x1d5   : > { %v1474_v59 = vpop.trf.xlu0 }
 0x1d6   : > { %5682 = vmatmul.mubr.msk.bf16.gmra.mrb[48].mxu0 %vm1003_vm2, %v1474_v59 }
 0x1d7   : > { %v1718_v23 = vpop.trf.xlu1 }
 0x1d8   : > { %2209 = vxpose.xlu1.c.b16.start.end [1/1] (short) %v950_v61, 128  ;;  %5716 = vmatmul.mubr.msk.bf16.gmra.mrb[72].mxu1 %vm1003_vm2, %v1718_v23  ;;  %v628_v23 = vld [vmem:[%s10612_s5 + $0x50] sm:$0xff] }
 0x1d9   : > { %v1475_v0 = vpop.trf.xlu0 }
 0x1da   : > { %5685 = vmatprep.mubr.msk.bf16.mxu0 %vm1003_vm2, %v1475_v0 }
 0x1db   : > { %v1719_v2 = vpop.trf.xlu1 }
 0x1dc   : > { %5719 = vmatprep.mubr.msk.bf16.mxu1 %vm1003_vm2, %v1719_v2 }
 0x1dd   : > { %v1476_v3 = vpop.trf.xlu0 }
 0x1de   : > { %5686 = vmatmul.mubr.msk.bf16.gmra.mrb[52].mxu0 %vm1003_vm2, %v1476_v3 }
 0x1df   : > { %v1720_v4 = vpop.trf.xlu1 }
 0x1e0   : > { %5720 = vmatmul.mubr.msk.bf16.gmra.mrb[76].mxu1 %vm1003_vm2, %v1720_v4 }
 0x1e1   : > { %v1485_v6 = vpop.trf.xlu0 }
 0x1e2   : > { %5689 = vmatprep.mubr.msk.bf16.mxu0 %vm1003_vm2, %v1485_v6 }
 0x1e3   : > { %v1729_v8 = vpop.trf.xlu1 }
 0x1e4   : > { %5723 = vmatprep.mubr.msk.bf16.mxu1 %vm1003_vm2, %v1729_v8 }
 0x1e5   : > { %v1486_v9 = vpop.trf.xlu0 }
 0x1e6   : > { %5690 = vmatmul.mubr.msk.bf16.gmra.mrb[56].mxu0 %vm1003_vm2, %v1486_v9  ;;  %v630_v9 = vld [vmem:[%s10612_s5 + $0x60] sm:$0xff] }
 0x1e7   : > { %v1730_v11 = vpop.trf.xlu1 }
 0x1e8   : > { %5724 = vmatmul.mubr.msk.bf16.gmra.mrb[80].mxu1 %vm1003_vm2, %v1730_v11 }
 0x1e9   : > { %v1487_v13 = vpop.trf.xlu0 }
 0x1ea   : > { %5693 = vmatprep.mubr.msk.bf16.mxu0 %vm1003_vm2, %v1487_v13 }
 0x1eb   : > { %v1731_v15 = vpop.trf.xlu1 }
 0x1ec   : > { %5727 = vmatprep.mubr.msk.bf16.mxu1 %vm1003_vm2, %v1731_v15 }
 0x1ed   : > { %v1488_v17 = vpop.trf.xlu0 }
 0x1ee   : > { %5694 = vmatmul.mubr.msk.bf16.gmra.mrb[60].mxu0 %vm1003_vm2, %v1488_v17 }
 0x1ef   : > { %v1732_v18 = vpop.trf.xlu1  ;;  %2437 = vxpose.xlu0.c.b16.start.end [1/1] (short) %v951_v16, 128  ;;  %v4761_v16 = vld [vmem:[%s10614_s7] sm:$0xff] }
 0x1f0   : > { %5728 = vmatmul.mubr.msk.bf16.gmra.mrb[84].mxu1 %vm1003_vm2, %v1732_v18 }
 0x1f1   : > { %v1489_v19 = vpop.trf.xlu0 }
 0x1f2   : > { %5697 = vmatprep.mubr.msk.bf16.mxu0 %vm1003_vm2, %v1489_v19  ;;  %v4763_v19 = vld [vmem:[%s10614_s7 + $0x10] sm:$0xff] }
 0x1f3   : > { %v1733_v20 = vpop.trf.xlu1 }
 0x1f4   : > { %5731 = vmatprep.mubr.msk.bf16.mxu1 %vm1003_vm2, %v1733_v20 }
 0x1f5   : > { %v1490_v24 = vpop.trf.xlu0 }
 0x1f6   : > { %5698 = vmatmul.mubr.msk.bf16.gmra.mrb[64].mxu0 %vm1003_vm2, %v1490_v24 }
 0x1f7   : > { %v1734_v22 = vpop.trf.xlu1 }
 0x1f8   : > { %5732 = vmatmul.mubr.msk.bf16.gmra.mrb[88].mxu1 %vm1003_vm2, %v1734_v22  ;;  %v4765_v22 = vld [vmem:[%s10614_s7 + $0x20] sm:$0xff] }
 0x1f9   : > { %v1491_v26 = vpop.trf.xlu0 }
 0x1fa   : > { %5701 = vmatprep.mubr.msk.bf16.mxu0 %vm1003_vm2, %v1491_v26 }
 0x1fb   : > { %v1735_v27 = vpop.trf.xlu1 }
 0x1fc   : > { %5735 = vmatprep.mubr.msk.bf16.mxu1 %vm1003_vm2, %v1735_v27 }
 0x1fd   : > { %v1492_v28 = vpop.trf.xlu0 }
 0x1fe   : > { %5702 = vmatmul.mubr.msk.bf16.gmra.mrb[68].mxu0 %vm1003_vm2, %v1492_v28  ;;  %v4767_v28 = vld [vmem:[%s10614_s7 + $0x30] sm:$0xff] }
 0x1ff   : > { %v1736_v29 = vpop.trf.xlu1 }
 0x200   : > { %5736 = vmatmul.mubr.msk.bf16.gmra.mrb[92].mxu1 %vm1003_vm2, %v1736_v29 }
 0x201   : > { %v1957_v30 = vpop.trf.xlu0 }
 0x202   : > { %5741 = vmatprep.mubr.msk.bf16.mxu0 %vm1003_vm2, %v1957_v30 }
 0x203   : > { %v2201_v31 = vpop.trf.xlu1 }
 0x204   : > { %5775 = vmatprep.mubr.msk.bf16.mxu1 %vm1003_vm2, %v2201_v31 }
 0x205   : > { %v1958_v32 = vpop.trf.xlu0 }
 0x206   : > { %5742 = vmatmul.mubr.msk.bf16.vlgmr.msra.gmra.mrb[72].mxu0 %vm1003_vm2, %v1958_v32 }
 0x207   : > { %v2202_v34 = vpop.trf.xlu1 }
 0x208   : > { %5776 = vmatmul.mubr.msk.bf16.vlgmr.msra.gmra.mrb[96].mxu1 %vm1003_vm2, %v2202_v34 }
 0x209   : > { %v1959_v35 = vpop.trf.xlu0 }
 0x20a   : > { %5745 = vmatprep.mubr.msk.bf16.mxu0 %vm1003_vm2, %v1959_v35 }
 0x20b   : > { %v2203_v38 = vpop.trf.xlu1 }
 0x20c   : > { %2453 = vxpose.xlu0.c.b16.start.end [1/1] (short) %v952_v36, 128  ;;  %5779 = vmatprep.mubr.msk.bf16.mxu1 %vm1003_vm2, %v2203_v38 }
 0x20d   : > { %v1960_v39 = vpop.trf.xlu0 }
 0x20e   : > { %5746 = vmatmul.mubr.msk.bf16.gmra.mrb[76].mxu0 %vm1003_vm2, %v1960_v39 }
 0x20f   : > { %v2204_v43 = vpop.trf.xlu1 }
 0x210   : > { %5780 = vmatmul.mubr.msk.bf16.gmra.mrb[100].mxu1 %vm1003_vm2, %v2204_v43 }
 0x211   : > { %v1961_v25 = vpop.trf.xlu0 }
 0x212   : > { %5749 = vmatprep.mubr.msk.bf16.mxu0 %vm1003_vm2, %v1961_v25 }
 0x213   : > { %v2205_v41 = vpop.trf.xlu1 }
 0x214   : > { %5783 = vmatprep.mubr.msk.bf16.mxu1 %vm1003_vm2, %v2205_v41 }
 0x215   : > { %v1962_v45 = vpop.trf.xlu0 }
 0x216   : > { %5750 = vmatmul.mubr.msk.bf16.gmra.mrb[80].mxu0 %vm1003_vm2, %v1962_v45 }
 0x217   : > { %v2206_v47 = vpop.trf.xlu1 }
 0x218   : > { %5784 = vmatmul.mubr.msk.bf16.gmra.mrb[104].mxu1 %vm1003_vm2, %v2206_v47 }
 0x219   : > { %v1963_v50 = vpop.trf.xlu0 }
 0x21a   : > { %5753 = vmatprep.mubr.msk.bf16.mxu0 %vm1003_vm2, %v1963_v50 }
 0x21b   : > { %v2207_v52 = vpop.trf.xlu1 }
 0x21c   : > { %5787 = vmatprep.mubr.msk.bf16.mxu1 %vm1003_vm2, %v2207_v52 }
 0x21d   : > { %v1964_v21 = vpop.trf.xlu0 }
 0x21e   : > { %5754 = vmatmul.mubr.msk.bf16.gmra.mrb[84].mxu0 %vm1003_vm2, %v1964_v21 }
 0x21f   : > { %v2208_v54 = vpop.trf.xlu1 }
 0x220   : > { %5788 = vmatmul.mubr.msk.bf16.gmra.mrb[108].mxu1 %vm1003_vm2, %v2208_v54 }
 0x230   : > { %v672_v59 = vpop.permute.xlu1 %671 }
 0x231   : > { %v887_v61 = vadd.f32 %v6852_v5, %v672_v59  ;;  %676 = vperm.xlu0 %5956, %v626_v56   ;;  %v889_v29 = vadd.f32 %v6854_v7, %v672_v59 }
 0x233   : > { %v953_v0 = vpack.c.bf16 %v887_v61, %v887_v61  ;;  %v473_v2 = vpop.permute.xlu0 %472  ;;  %v954_v32 = vpack.c.bf16 %v889_v29, %v889_v29 }
 0x234   : > { %v596_v3 = vadd.f32 %v6798_v10, %v473_v2  ;;  %v478_v4 = vpop.permute.xlu1 %477  ;;  %v632_v10 = vld [vmem:[%s10612_s5 + $0x70] sm:$0xff] }
 0x235   : > { %v599_v6 = vadd.f32 %v6804_v14, %v478_v4  ;;  %2681 = vxpose.xlu1.c.b16.start.end [1/1] (short) %v953_v0, 128  ;;  %686 = vperm.xlu0 %5956, %v628_v23  }
 0x236   : > { %v937_v8 = vpack.c.bf16 %v596_v3, %v596_v3 }
 0x237   : > { %v938_v5 = vpack.c.bf16 %v599_v6, %v599_v6 }
 0x238   : > { %v2518_v11 = vsel %vm1052_vm1, %v937_v8, 0  ;;  %v1973_v12 = vpop.trf.xlu0  ;;  %5897 = vmatprep.subr.msk.bf16.mxu0 %vm1052_vm1, %v937_v8 }
 0x239   : > { %v2762_v13 = vsel %vm1052_vm1, %v938_v5, 0  ;;  %696 = vperm.xlu0 %5956, %v630_v9   ;;  %5808 = vmatpush3.bf16.msra.mxu0 %v2518_v11 }
 0x23a   : > { %5898 = vmatprep.subr.msk.bf16.mxu1 %vm1052_vm1, %v938_v5  ;;  %5757 = vmatprep.mubr.msk.bf16.mxu0 %vm1003_vm2, %v1973_v12 }
 0x23b   : > { %5842 = vmatpush3.bf16.msra.mxu1 %v2762_v13 }
 0x23c   : > { %v1974_v14 = vpop.trf.xlu0 }
 0x23d   : > { %706 = vperm.xlu0 %5956, %v632_v10   ;;  %5758 = vmatmul.mubr.msk.bf16.gmra.mrb[88].mxu0 %vm1003_vm2, %v1974_v14 }
 0x23e   : > { %v2217_v15 = vpop.trf.xlu1 }
 0x23f   : > { %5791 = vmatprep.mubr.msk.bf16.mxu1 %vm1003_vm2, %v2217_v15 }
 0x240   : > { %v1975_v17 = vpop.trf.xlu0 }
 0x241   : > { %4771 = vperm.xlu0 %5956, %v4761_v16   ;;  %5761 = vmatprep.mubr.msk.bf16.mxu0 %vm1003_vm2, %v1975_v17 }
 0x242   : > { %v2218_v18 = vpop.trf.xlu1 }
 0x243   : > { %5792 = vmatmul.mubr.msk.bf16.gmra.mrb[112].mxu1 %vm1003_vm2, %v2218_v18 }
 0x244   : > { %v1976_v20 = vpop.trf.xlu0 }
 0x245   : > { %4781 = vperm.xlu0 %5956, %v4763_v19   ;;  %5762 = vmatmul.mubr.msk.bf16.gmra.mrb[92].mxu0 %vm1003_vm2, %v1976_v20 }
 0x246   : > { %v2219_v24 = vpop.trf.xlu1 }
 0x247   : > { %5795 = vmatprep.mubr.msk.bf16.mxu1 %vm1003_vm2, %v2219_v24 }
 0x248   : > { %v1977_v26 = vpop.trf.xlu0 }
 0x249   : > { %4791 = vperm.xlu0 %5956, %v4765_v22   ;;  %5765 = vmatprep.mubr.msk.bf16.mxu0 %vm1003_vm2, %v1977_v26 }
 0x24a   : > { %v2220_v27 = vpop.trf.xlu1 }
 0x24b   : > { %5796 = vmatmul.mubr.msk.bf16.gmra.mrb[116].mxu1 %vm1003_vm2, %v2220_v27 }
 0x24c   : > { %v1978_v30 = vpop.trf.xlu0 }
 0x24d   : > { %4801 = vperm.xlu0 %5956, %v4767_v28   ;;  %5766 = vmatmul.mubr.msk.bf16.gmra.mrb[96].mxu0 %vm1003_vm2, %v1978_v30 }
 0x24e   : > { %v2221_v31 = vpop.trf.xlu1 }
 0x24f   : > { %5799 = vmatprep.mubr.msk.bf16.mxu1 %vm1003_vm2, %v2221_v31 }
 0x250   : > { %v1979_v33 = vpop.trf.xlu0 }
 0x251   : > { %5769 = vmatprep.mubr.msk.bf16.mxu0 %vm1003_vm2, %v1979_v33 }
 0x252   : > { %2697 = vxpose.xlu1.c.b16.start.end [1/1] (short) %v954_v32, 128  ;;  %v2222_v34 = vpop.trf.xlu1 }
 0x253   : > { %5800 = vmatmul.mubr.msk.bf16.gmra.mrb[120].mxu1 %vm1003_vm2, %v2222_v34 }
 0x254   : > { %v1980_v35 = vpop.trf.xlu0 }
 0x255   : > { %5770 = vmatmul.mubr.msk.bf16.gmra.mrb[100].mxu0 %vm1003_vm2, %v1980_v35 }
 0x256   : > { %v2223_v36 = vpop.trf.xlu1 }
 0x257   : > { %5803 = vmatprep.mubr.msk.bf16.mxu1 %vm1003_vm2, %v2223_v36 }
 0x258   : > { %v2445_v7 = vpop.trf.xlu0 }
 0x259   : > { %v7020_v38 = vpop.f32.mrb[8].mxu0  ;;  %5809 = vmatprep.mubr.msk.bf16.mxu0 %vm1003_vm2, %v2445_v7 }
 0x25a   : > { %v2224_v39 = vpop.trf.xlu1  ;;  %v7023_v43 = vpop.f32.mrb[9].mxu0 }
 0x25b   : > { %v7025_v25 = vpop.f32.mrb[10].mxu0  ;;  %v7027_v41 = vpop.f32.mrb[32].mxu1  ;;  %5804 = vmatmul.mubr.msk.bf16.gmra.mrb[124].mxu1 %vm1003_vm2, %v2224_v39  ;;  %v627_v39 = vld [vmem:[%s10612_s5 + $0x48] sm:$0xff] }
 0x25c   : > { %v2446_v45 = vpop.trf.xlu0  ;;  %v7030_v47 = vpop.f32.mrb[11].mxu0 }
 0x25d   : > { %v2925_v50 = vmax.f32 %v7023_v43, %v7030_v47  ;;  %v7034_v52 = vpop.f32.mrb[33].mxu1  ;;  %5810 = vmatmul.mubr.msk.bf16.vlgmr.msra.gmra.mrb[104].mxu0 %vm1003_vm2, %v2446_v45 }
 0x25e   : > { %v7037_v21 = vpop.f32.mrb[34].mxu1 }
 0x25f   : > { %v2926_v54 = vmax.f32 %v2925_v50, %v7020_v38  ;;  %v7040_v56 = vpop.f32.mrb[35].mxu1 }
 0x260   : > { %v2962_v59 = vmax.f32 %v7034_v52, %v7040_v56  ;;  %v2447_v61 = vpop.trf.xlu0 }
 0x261   : > { %v7044_v23 = vpop.f32.mrb[12].mxu0  ;;  %v2927_v0 = vmax.f32 %v2926_v54, %v7025_v25  ;;  %5813 = vmatprep.mubr.msk.bf16.mxu0 %vm1003_vm2, %v2447_v61 }
 0x262   : > { %v2963_v2 = vmax.f32 %v2962_v59, %v7027_v41  ;;  %v7049_v3 = vpop.f32.mrb[13].mxu0 }
 0x263   : > { %v2928_v4 = vmax.f32 %v2927_v0, %v7049_v3  ;;  %v7052_v6 = vpop.f32.mrb[14].mxu0  ;;  %v7054_v8 = vpop.f32.mrb[36].mxu1 }
 0x264   : > { %v2448_v9 = vpop.trf.xlu0  ;;  %v7056_v5 = vpop.f32.mrb[15].mxu0  ;;  %v2964_v11 = vmax.f32 %v2963_v2, %v7037_v21 }
 0x265   : > { %v2929_v12 = vmax.f32 %v2928_v4, %v7056_v5  ;;  %v7060_v13 = vpop.f32.mrb[37].mxu1  ;;  %5814 = vmatmul.mubr.msk.bf16.gmra.mrb[108].mxu0 %vm1003_vm2, %v2448_v9 }
 0x266   : > { %v2965_v10 = vmax.f32 %v2964_v11, %v7060_v13  ;;  %v7064_v14 = vpop.f32.mrb[38].mxu1  ;;  %v629_v11 = vld [vmem:[%s10612_s5 + $0x58] sm:$0xff] }
 0x267   : > { %v2930_v15 = vmax.f32 %v2929_v12, %v7044_v23  ;;  %v7067_v16 = vpop.f32.mrb[39].mxu1 }
 0x268   : > { %v2966_v17 = vmax.f32 %v2965_v10, %v7067_v16  ;;  %v2449_v18 = vpop.trf.xlu0 }
 0x269   : > { %v7070_v19 = vpop.f32.mrb[16].mxu0  ;;  %v2931_v20 = vmax.f32 %v2930_v15, %v7052_v6  ;;  %5817 = vmatprep.mubr.msk.bf16.mxu0 %vm1003_vm2, %v2449_v18 }
 0x26a   : > { %v2967_v24 = vmax.f32 %v2966_v17, %v7054_v8  ;;  %v7075_v22 = vpop.f32.mrb[17].mxu0 }
 0x26b   : > { %v2932_v26 = vmax.f32 %v2931_v20, %v7075_v22  ;;  %v7078_v27 = vpop.f32.mrb[18].mxu0  ;;  %v7080_v28 = vpop.f32.mrb[40].mxu1 }
 0x26c   : > { %v2450_v29 = vpop.trf.xlu0  ;;  %v7082_v30 = vpop.f32.mrb[19].mxu0  ;;  %v2968_v31 = vmax.f32 %v2967_v24, %v7064_v14 }
 0x26d   : > { %v2933_v32 = vmax.f32 %v2932_v26, %v7082_v30  ;;  %v7086_v33 = vpop.f32.mrb[41].mxu1  ;;  %5818 = vmatmul.mubr.msk.bf16.gmra.mrb[112].mxu0 %vm1003_vm2, %v2450_v29 }
 0x26e   : > { %v2969_v34 = vmax.f32 %v2968_v31, %v7086_v33  ;;  %v7090_v35 = vpop.f32.mrb[42].mxu1  ;;  %v631_v31 = vld [vmem:[%s10612_s5 + $0x68] sm:$0xff] }
 0x26f   : > { %10950 = vst [vmem:[#allocation20_spill] sm:$0xff] %v7090_v35  ;;  %v2934_v36 = vmax.f32 %v2933_v32, %v7070_v19  ;;  %v7093_v7 = vpop.f32.mrb[43].mxu1 }
 0x270   : > { %v2970_v45 = vmax.f32 %v2969_v34, %v7093_v7  ;;  %v2451_v50 = vpop.trf.xlu0 }
 0x271   : > { %v7099_v54 = vpop.f32.mrb[20].mxu0  ;;  %v2935_v59 = vmax.f32 %v2934_v36, %v7078_v27  ;;  %5821 = vmatprep.mubr.msk.bf16.mxu0 %vm1003_vm2, %v2451_v50 }
 0x272   : > { %v2971_v61 = vmax.f32 %v2970_v45, %v7080_v28  ;;  %681 = vperm.xlu1 %5957, %v627_v39   ;;  %v7104_v0 = vpop.f32.mrb[21].mxu0 }
 0x273   : > { %v2936_v2 = vmax.f32 %v2935_v59, %v7104_v0  ;;  %v7107_v4 = vpop.f32.mrb[22].mxu0  ;;  %v7109_v9 = vpop.f32.mrb[44].mxu1 }
 0x274   : > { %10951 = vst [vmem:[#allocation21_spill] sm:$0xff] %v7109_v9  ;;  %v2452_v12 = vpop.trf.xlu0  ;;  %v7114_v10 = vpop.f32.mrb[23].mxu0  ;;  %v2972_v15 = vmax.f32 %v2971_v61, %v7090_v35 }
 0x275   : > { %v2937_v17 = vmax.f32 %v2936_v2, %v7114_v10  ;;  %v7118_v18 = vpop.f32.mrb[45].mxu1  ;;  %5822 = vmatmul.mubr.msk.bf16.gmra.mrb[116].mxu0 %vm1003_vm2, %v2452_v12 }
 0x276   : > { %10952 = vst [vmem:[#allocation22_spill] sm:$0xff] %v7118_v18  ;;  %v2973_v20 = vmax.f32 %v2972_v15, %v7118_v18  ;;  %v7122_v24 = vpop.f32.mrb[46].mxu1  ;;  %691 = vperm.xlu1 %5957, %v629_v11   ;;  %v633_v11 = vld [vmem:[%s10612_s5 + $0x78] sm:$0xff] }
 0x277   : > { %10953 = vst [vmem:[#allocation23_spill] sm:$0xff] %v7122_v24  ;;  %v2938_v26 = vmax.f32 %v2937_v17, %v7099_v54  ;;  %v7125_v29 = vpop.f32.mrb[47].mxu1 }
 0x278   : > { %10954 = vst [vmem:[#allocation24_spill] sm:$0xff] %v7125_v29  ;;  %v2974_v32 = vmax.f32 %v2973_v20, %v7125_v29  ;;  %v2461_v34 = vpop.trf.xlu0 }
 0x279   : > { %v7131_v36 = vpop.f32.mrb[24].mxu0  ;;  %v2939_v39 = vmax.f32 %v2938_v26, %v7107_v4  ;;  %5825 = vmatprep.mubr.msk.bf16.mxu0 %vm1003_vm2, %v2461_v34 }
 0x27a   : > { %v2975_v45 = vmax.f32 %v2974_v32, %v7109_v9  ;;  %701 = vperm.xlu1 %5957, %v631_v31   ;;  %v7136_v50 = vpop.f32.mrb[25].mxu0 }
 0x27b   : > { %v2940_v59 = vmax.f32 %v2939_v39, %v7136_v50  ;;  %v7139_v61 = vpop.f32.mrb[26].mxu0  ;;  %v7141_v2 = vpop.f32.mrb[48].mxu1 }
 0x27c   : > { %10955 = vst [vmem:[#allocation25_spill] sm:$0xff] %v7141_v2  ;;  %v2462_v12 = vpop.trf.xlu0  ;;  %v7146_v15 = vpop.f32.mrb[27].mxu0  ;;  %v2976_v17 = vmax.f32 %v2975_v45, %v7122_v24 }
 0x27d   : > { %v2941_v20 = vmax.f32 %v2940_v59, %v7146_v15  ;;  %v7150_v26 = vpop.f32.mrb[49].mxu1  ;;  %5826 = vmatmul.mubr.msk.bf16.gmra.mrb[120].mxu0 %vm1003_vm2, %v2462_v12 }
 0x27e   : > { %10956 = vst [vmem:[#allocation26_spill] sm:$0xff] %v7150_v26  ;;  %v2977_v31 = vmax.f32 %v2976_v17, %v7150_v26  ;;  %v7154_v32 = vpop.f32.mrb[50].mxu1  ;;  %711 = vperm.xlu1 %5957, %v633_v11  }
 0x27f   : > { %10957 = vst [vmem:[#allocation27_spill] sm:$0xff] %v7154_v32  ;;  %v2942_v34 = vmax.f32 %v2941_v20, %v7131_v36  ;;  %v7157_v39 = vpop.f32.mrb[51].mxu1 }
 0x280   : > { %10958 = vst [vmem:[#allocation28_spill] sm:$0xff] %v7157_v39  ;;  %v2978_v45 = vmax.f32 %v2977_v31, %v7157_v39  ;;  %v2463_v59 = vpop.trf.xlu0  ;;  %v4764_v31 = vld [vmem:[%s10614_s7 + $0x18] sm:$0xff] }
 0x281   : > { %v7163_v40 = vpop.f32.mrb[28].mxu0  ;;  %v2943_v12 = vmax.f32 %v2942_v34, %v7139_v61  ;;  %5829 = vmatprep.mubr.msk.bf16.mxu0 %vm1003_vm2, %v2463_v59 }
 0x282   : > { %v2979_v17 = vmax.f32 %v2978_v45, %v7141_v2  ;;  %4776 = vperm.xlu1 %5957, %v4762_v1   ;;  %v7168_v11 = vpop.f32.mrb[29].mxu0 }
 0x283   : > { %v2944_v20 = vmax.f32 %v2943_v12, %v7168_v11  ;;  %v7171_v60 = vpop.f32.mrb[30].mxu0  ;;  %v7173_v37 = vpop.f32.mrb[52].mxu1 }
 0x284   : > { %10959 = vst [vmem:[#allocation29_spill] sm:$0xff] %v7173_v37  ;;  %v2464_v57 = vpop.trf.xlu0  ;;  %v7178_v46 = vpop.f32.mrb[31].mxu0  ;;  %v2980_v34 = vmax.f32 %v2979_v17, %v7154_v32 }
 0x285   : > { %v2945_v45 = vmax.f32 %v2944_v20, %v7178_v46  ;;  %v7182_v1 = vpop.f32.mrb[53].mxu1  ;;  %5830 = vmatmul.mubr.msk.bf16.gmra.mrb[124].mxu0 %vm1003_vm2, %v2464_v57 }
 0x286   : > { %10960 = vst [vmem:[#allocation30_spill] sm:$0xff] %v7182_v1  ;;  %v2981_v59 = vmax.f32 %v2980_v34, %v7182_v1  ;;  %v7186_v12 = vpop.f32.mrb[54].mxu1  ;;  %4786 = vperm.xlu1 %5957, %v4764_v31  }
 0x287   : > { %10961 = vst [vmem:[#allocation31_spill] sm:$0xff] %v7186_v12  ;;  %v2946_v63 = vmax.f32 %v2945_v45, %v7163_v40  ;;  %v7189_v58 = vpop.f32.mrb[55].mxu1 }
 0x288   : > { %10962 = vst [vmem:[#allocation32_spill] sm:$0xff] %v7189_v58  ;;  %v2982_v17 = vmax.f32 %v2981_v59, %v7189_v58  ;;  %v2465_v20 = vpop.trf.xlu0  ;;  %v4768_v59 = vld [vmem:[%s10614_s7 + $0x38] sm:$0xff] }
 0x289   : > { %v7195_v48 = vpop.f32.mrb[32].mxu0  ;;  %v2947_v57 = vmax.f32 %v2946_v63, %v7171_v60  ;;  %5833 = vmatprep.mubr.msk.bf16.mxu0 %vm1003_vm2, %v2465_v20 }
 0x28a   : > { %v2983_v34 = vmax.f32 %v2982_v17, %v7173_v37  ;;  %4796 = vperm.xlu1 %5957, %v4766_v53   ;;  %v7200_v31 = vpop.f32.mrb[33].mxu0 }
 0x28b   : > { %v2948_v45 = vmax.f32 %v2947_v57, %v7200_v31  ;;  %v7203_v42 = vpop.f32.mrb[34].mxu0  ;;  %v7205_v62 = vpop.f32.mrb[56].mxu1 }
 0x28c   : > { %10963 = vst [vmem:[#allocation33_spill] sm:$0xff] %v7205_v62  ;;  %v2466_v55 = vpop.trf.xlu0  ;;  %v7210_v51 = vpop.f32.mrb[35].mxu0  ;;  %v2984_v63 = vmax.f32 %v2983_v34, %v7186_v12 }
 0x28d   : > { %v2949_v17 = vmax.f32 %v2948_v45, %v7210_v51  ;;  %v7214_v53 = vpop.f32.mrb[57].mxu1  ;;  %5834 = vmatmul.mubr.msk.bf16.gmra.mrb[128].mxu0 %vm1003_vm2, %v2466_v55 }
 0x28e   : > { %10964 = vst [vmem:[#allocation34_spill] sm:$0xff] %v7214_v53  ;;  %v2985_v20 = vmax.f32 %v2984_v63, %v7214_v53  ;;  %v7218_v57 = vpop.f32.mrb[58].mxu1  ;;  %4806 = vperm.xlu1 %5957, %v4768_v59  }
 0x28f   : > { %10965 = vst [vmem:[#allocation35_spill] sm:$0xff] %v7218_v57  ;;  %v2950_v49 = vmax.f32 %v2949_v17, %v7195_v48  ;;  %v7221_v44 = vpop.f32.mrb[59].mxu1 }
 0x290   : > { %10966 = vst [vmem:[#allocation36_spill] sm:$0xff] %v7221_v44  ;;  %v2986_v37 = vmax.f32 %v2985_v20, %v7221_v44  ;;  %v2467_v58 = vpop.trf.xlu0 }
 0x291   : > { %v7224_v1 = vpop.f32.mrb[36].mxu0  ;;  %v2951_v34 = vmax.f32 %v2950_v49, %v7203_v42  ;;  %5837 = vmatprep.mubr.msk.bf16.mxu0 %vm1003_vm2, %v2467_v58 }
 0x292   : > { %v2987_v55 = vmax.f32 %v2986_v37, %v7205_v62  ;;  %v7229_v45 = vpop.f32.mrb[37].mxu0 }
 0x293   : > { %v2952_v63 = vmax.f32 %v2951_v34, %v7229_v45  ;;  %v7232_v59 = vpop.f32.mrb[38].mxu0  ;;  %v7234_v17 = vpop.f32.mrb[60].mxu1 }
 0x294   : > { %10967 = vst [vmem:[#allocation37_spill] sm:$0xff] %v7234_v17  ;;  %v2468_v53 = vpop.trf.xlu0  ;;  %v7236_v12 = vpop.f32.mrb[39].mxu0  ;;  %v2988_v20 = vmax.f32 %v2987_v55, %v7218_v57 }
 0x295   : > { %v2953_v44 = vmax.f32 %v2952_v63, %v7236_v12  ;;  %v7240_v49 = vpop.f32.mrb[61].mxu1  ;;  %5838 = vmatmul.mubr.msk.bf16.gmra.mrb[132].mxu0 %vm1003_vm2, %v2468_v53 }
 0x296   : > { %10968 = vst [vmem:[#allocation38_spill] sm:$0xff] %v7240_v49  ;;  %v2989_v37 = vmax.f32 %v2988_v20, %v7240_v49  ;;  %v7244_v58 = vpop.f32.mrb[62].mxu1 }
 0x297   : > { %10969 = vst [vmem:[#allocation39_spill] sm:$0xff] %v7244_v58  ;;  %v2954_v34 = vmax.f32 %v2953_v44, %v7224_v1  ;;  %v7247_v62 = vpop.f32.mrb[63].mxu1 }
 0x298   : > { %10970 = vst [vmem:[#allocation40_spill] sm:$0xff] %v7247_v62  ;;  %v2990_v32 = vmax.f32 %v2989_v37, %v7247_v62 }
 0x299   : > { %v2955_v2 = vmax.f32 %v2954_v34, %v7232_v59  ;;  %v7251_v39 = vpop.f32.mrb[40].mxu0 }
 0x29a   : > { %10971 = vst [vmem:[#allocation41_spill] sm:$0xff] %v7251_v39  ;;  %v2991_v55 = vmax.f32 %v2990_v32, %v7234_v17  ;;  %v7254_v63 = vpop.f32.mrb[41].mxu0 }
 0x29b   : > { %10972 = vst [vmem:[#allocation42_spill] sm:$0xff] %v7254_v63  ;;  %v2956_v57 = vrot.slane %v2955_v2, 4  ;;  %v2689_v53 = vpop.trf.xlu1  ;;  %v7256_v26 = vpop.f32.mrb[42].mxu0 }
 0x29c   : > { %10973 = vst [vmem:[#allocation43_spill] sm:$0xff] %v7256_v26  ;;  %v2992_v20 = vmax.f32 %v2991_v55, %v7244_v58  ;;  %v7259_v49 = vpop.f32.mrb[64].mxu1  ;;  %v7261_v44 = vpop.f32.mrb[43].mxu0  ;;  %5843 = vmatprep.mubr.msk.bf16.mxu1 %vm1003_vm2, %v2689_v53 }
 0x29d   : > { %10974 = vst [vmem:[#allocation44_spill] sm:$0xff] %v7259_v49  ;;  %10975 = vst [vmem:[#allocation45_spill] sm:$0xff] %v7261_v44  ;;  %v2957_v37 = vmax.f32 %v2955_v2, %v2956_v57  ;;  %v2999_v34 = vmax.f32 %v7254_v63, %v7261_v44  ;;  %v7266_v62 = vpop.f32.mrb[65].mxu1 }
 0x29e   : > { %10976 = vst [vmem:[#allocation46_spill] sm:$0xff] %v7266_v62  ;;  %v2993_v32 = vrot.slane %v2992_v20, 4  ;;  %v7268_v17 = vpop.f32.mrb[66].mxu1 }
 0x29f   : > { %10977 = vst [vmem:[#allocation47_spill] sm:$0xff] %v7268_v17  ;;  %v2958_v24 = vrot.slane %v2957_v37, 2  ;;  %v3000_v9 = vmax.f32 %v2999_v34, %v7251_v39  ;;  %v7271_v29 = vpop.f32.mrb[67].mxu1  ;;  %v2690_v55 = vpop.trf.xlu1 }
 0x2a0   : > { %10978 = vst [vmem:[#allocation48_spill] sm:$0xff] %v7271_v29  ;;  %v2994_v58 = vmax.f32 %v2992_v20, %v2993_v32  ;;  %v3036_v18 = vmax.f32 %v7266_v62, %v7271_v29  ;;  %5844 = vmatmul.mubr.msk.bf16.vlgmr.msra.gmra.mrb[128].mxu1 %vm1003_vm2, %v2690_v55 }
 0x2a1   : > { %v2959_v2 = vmax.f32 %v2957_v37, %v2958_v24  ;;  %v7276_v57 = vpop.f32.mrb[44].mxu0  ;;  %v3001_v53 = vmax.f32 %v3000_v9, %v7256_v26 }
 0x2a2   : > { %10979 = vst [vmem:[#allocation49_spill] sm:$0xff] %v7276_v57  ;;  %v2995_v44 = vrot.slane %v2994_v58, 2  ;;  %v3037_v63 = vmax.f32 %v3036_v18, %v7259_v49  ;;  %v7280_v35 = vpop.f32.mrb[45].mxu0 }
 0x2a3   : > { %10980 = vst [vmem:[#allocation50_spill] sm:$0xff] %v7280_v35  ;;  %v2960_v34 = vrot.slane %v2959_v2, 1  ;;  %v7283_v39 = vmax.f32 %v3001_v53, %v7280_v35  ;;  %v2691_v20 = vpop.trf.xlu1  ;;  %v7285_v32 = vpop.f32.mrb[46].mxu0 }
 0x2a4   : > { %10981 = vst [vmem:[#allocation51_spill] sm:$0xff] %v7285_v32  ;;  %v7287_v29 = vmax.f32 %v2994_v58, %v2995_v44  ;;  %v7289_v55 = vpop.f32.mrb[68].mxu1  ;;  %v7291_v24 = vpop.f32.mrb[47].mxu0  ;;  %v3038_v9 = vmax.f32 %v3037_v63, %v7268_v17  ;;  %5847 = vmatprep.mubr.msk.bf16.mxu1 %vm1003_vm2, %v2691_v20 }
 0x2a5   : > { %10982 = vst [vmem:[#allocation52_spill] sm:$0xff] %v7289_v55  ;;  %10983 = vst [vmem:[#allocation53_spill] sm:$0xff] %v7291_v24  ;;  %v7295_v18 = vmax.f32 %v2959_v2, %v2960_v34  ;;  %v3003_v37 = vmax.f32 %v7283_v39, %v7291_v24  ;;  %v7299_v53 = vpop.f32.mrb[69].mxu1 }
 0x2a6   : > { %10984 = vst [vmem:[#allocation54_spill] sm:$0xff] %v7299_v53  ;;  %v2997_v49 = vrot.slane %v7287_v29, 1  ;;  %v7303_v58 = vmax.f32 %v3038_v9, %v7299_v53  ;;  %v7305_v44 = vpop.f32.mrb[70].mxu1 }
 0x2a7   : > { %10985 = vst [vmem:[#allocation55_spill] sm:$0xff] %v7305_v44  ;;  %v3221_v62 = vsub.f32 %v7023_v43, %v7295_v18  ;;  %v3222_v63 = vsub.f32 %v7030_v47, %v7295_v18  ;;  %v3223_v2 = vsub.f32 %v7020_v38, %v7295_v18  ;;  %v3224_v39 = vsub.f32 %v7025_v25, %v7295_v18  ;;  %v7315_v34 = vpop.f32.mrb[71].mxu1  ;;  %v2692_v20 = vpop.trf.xlu1 }
 0x2a8   : > { %10986 = vst [vmem:[#allocation56_spill] sm:$0xff] %v7315_v34  ;;  %v3225_v9 = vsub.f32 %v7049_v3, %v7295_v18  ;;  %v3226_v53 = vsub.f32 %v7056_v5, %v7295_v18  ;;  %v3227_v43 = vsub.f32 %v7044_v23, %v7295_v18  ;;  %v3228_v47 = vsub.f32 %v7052_v6, %v7295_v18 }
 0x2a9   : > { %5848 = vmatmul.mubr.msk.bf16.gmra.mrb[132].mxu1 %vm1003_vm2, %v2692_v20  ;;  %v3229_v38 = vsub.f32 %v7075_v22, %v7295_v18  ;;  %v3230_v25 = vsub.f32 %v7082_v30, %v7295_v18  ;;  %v3231_v3 = vsub.f32 %v7070_v19, %v7295_v18  ;;  %v3232_v5 = vsub.f32 %v7078_v27, %v7295_v18  ;;  %v7334_v17 = vpop.f32.mrb[48].mxu0 }
 0x2aa   : > { %10987 = vst [vmem:[#allocation57_spill] sm:$0xff] %v7334_v17  ;;  %v3233_v23 = vsub.f32 %v7104_v0, %v7295_v18  ;;  %v3234_v6 = vsub.f32 %v7114_v10, %v7295_v18  ;;  %v3235_v22 = vsub.f32 %v7099_v54, %v7295_v18  ;;  %v3236_v30 = vsub.f32 %v7107_v4, %v7295_v18  ;;  %v7344_v20 = vpop.f32.mrb[49].mxu0 }
 0x2ab   : > { %10988 = vst [vmem:[#allocation58_spill] sm:$0xff] %v7344_v20  ;;  %v3237_v19 = vsub.f32 %v7136_v50, %v7295_v18  ;;  %v3238_v27 = vsub.f32 %v7146_v15, %v7295_v18  ;;  %v3239_v0 = vsub.f32 %v7131_v36, %v7295_v18  ;;  %v3240_v10 = vsub.f32 %v7139_v61, %v7295_v18  ;;  %v2693_v24 = vpop.trf.xlu1  ;;  %v7354_v35 = vpop.f32.mrb[50].mxu0 }
 0x2ac   : > { %10989 = vst [vmem:[#allocation59_spill] sm:$0xff] %v7354_v35  ;;  %v3241_v54 = vsub.f32 %v7168_v11, %v7295_v18  ;;  %v3242_v4 = vsub.f32 %v7178_v46, %v7295_v18  ;;  %v3243_v50 = vsub.f32 %v7163_v40, %v7295_v18  ;;  %v3244_v15 = vsub.f32 %v7171_v60, %v7295_v18  ;;  %v7364_v26 = vpop.f32.mrb[72].mxu1  ;;  %v7366_v36 = vpop.f32.mrb[51].mxu0 }
 0x2ad   : > { %10990 = vst [vmem:[#allocation60_spill] sm:$0xff] %v7364_v26  ;;  %10991 = vst [vmem:[#allocation61_spill] sm:$0xff] %v7366_v36  ;;  %5851 = vmatprep.mubr.msk.bf16.mxu1 %vm1003_vm2, %v2693_v24  ;;  %v3245_v61 = vsub.f32 %v7200_v31, %v7295_v18  ;;  %v7377_v35 = vpop.f32.mrb[73].mxu1  ;;  %v3477_v46 = vmul.f32 1.442695, %v3221_v62  ;;  %v7394_v11 = vmax.f32 %v7287_v29, %v2997_v49 }
 0x2ae   : > { %10992 = vst [vmem:[#allocation62_spill] sm:$0xff] %v7377_v35  ;;  %v7387_v26 = vpop.f32.mrb[74].mxu1  ;;  %v3479_v17 = vmul.f32 1.442695, %v3222_v63  ;;  %v3481_v36 = vmul.f32 1.442695, %v3223_v2  ;;  %v7390_v35 = vmax.f32 %v3003_v37, %v7276_v57 }
 0x2af   : > { %10993 = vst [vmem:[#allocation63_spill] sm:$0xff] %v7387_v26  ;;  %v2694_v40 = vpop.trf.xlu1  ;;  %v3483_v44 = vmul.f32 1.442695, %v3224_v39  ;;  %5990 = vpow2.f32 %v3477_v46  ;;  %v3485_v24 = vmul.f32 1.442695, %v3225_v9 }
 0x2b0   : > { %5992 = vpow2.f32 %v3479_v17  ;;  %v3487_v60 = vmul.f32 1.442695, %v3226_v53  ;;  %v3489_v31 = vmul.f32 1.442695, %v3227_v43  ;;  %v3491_v20 = vmul.f32 1.442695, %v3228_v47 }
 0x2b1   : > { %5852 = vmatmul.mubr.msk.bf16.gmra.mrb[136].mxu1 %vm1003_vm2, %v2694_v40  ;;  %5994 = vpow2.f32 %v3481_v36  ;;  %v3493_v63 = vmul.f32 1.442695, %v3229_v38  ;;  %v3495_v2 = vmul.f32 1.442695, %v3230_v25  ;;  %v3497_v39 = vmul.f32 1.442695, %v3231_v3 }
 0x2b2   : > { %5996 = vpow2.f32 %v3483_v44  ;;  %v3499_v37 = vmul.f32 1.442695, %v3232_v5  ;;  %v3501_v40 = vmul.f32 1.442695, %v3233_v23  ;;  %v3503_v46 = vmul.f32 1.442695, %v3234_v6 }
 0x2b3   : > { %v2695_v62 = vpop.trf.xlu1  ;;  %5998 = vpow2.f32 %v3485_v24  ;;  %v3505_v17 = vmul.f32 1.442695, %v3235_v22  ;;  %v3507_v53 = vmul.f32 1.442695, %v3236_v30  ;;  %v7397_v9 = vmul.f32 1.442695, %v3237_v19 }
 0x2b4   : > { %5855 = vmatprep.mubr.msk.bf16.mxu1 %vm1003_vm2, %v2695_v62  ;;  %6000 = vpow2.f32 %v3487_v60  ;;  %v7399_v43 = vmul.f32 1.442695, %v3238_v27  ;;  %v7401_v29 = vmul.f32 1.442695, %v3239_v0  ;;  %v7403_v49 = vmul.f32 1.442695, %v3240_v10 }
 0x2b5   : > { %6002 = vpow2.f32 %v3489_v31  ;;  %v7405_v47 = vmul.f32 1.442695, %v3241_v54  ;;  %v7407_v38 = vmul.f32 1.442695, %v3242_v4  ;;  %v7409_v25 = vmul.f32 1.442695, %v3243_v50 }
 0x2b6   : > { %6004 = vpow2.f32 %v3491_v20  ;;  %v7412_v3 = vmul.f32 1.442695, %v3244_v15  ;;  %v7414_v5 = vmul.f32 1.442695, %v3245_v61  ;;  %v7418_v6 = vpop.f32.mrb[75].mxu1  ;;  %v7420_v22 = vpop.f32.mrb[52].mxu0 }
 0x2b7   : > { %v2696_v44 = vpop.trf.xlu1  ;;  %6006 = vpow2.f32 %v3493_v63  ;;  %10994 = vst [vmem:[#allocation64_spill] sm:$0xff] %v7418_v6  ;;  %10995 = vst [vmem:[#allocation65_spill] sm:$0xff] %v7420_v22  ;;  %v7428_v27 = vpop.f32.mrb[53].mxu0  ;;  %v11009_v4 = vld [vmem:[#allocation22_spill] sm:$0xff]  ;;  %v11011_v20 = vld [vmem:[#allocation21_spill] sm:$0xff] }
 0x2b8   : > { %6008 = vpow2.f32 %v3495_v2  ;;  %10996 = vst [vmem:[#allocation66_spill] sm:$0xff] %v7428_v27  ;;  %v7430_v0 = vpop.f32.mrb[76].mxu1  ;;  %v7440_v15 = vpop.f32.mrb[54].mxu0 }
 0x2b9   : > { %5856 = vmatmul.mubr.msk.bf16.gmra.mrb[140].mxu1 %vm1003_vm2, %v2696_v44  ;;  %10997 = vst [vmem:[#allocation67_spill] sm:$0xff] %v7430_v0  ;;  %v7432_v10 = vpop.eup %5990  ;;  %6010 = vpow2.f32 %v3497_v39  ;;  %10999 = vst [vmem:[#allocation69_spill] sm:$0xff] %v7440_v15  ;;  %v7442_v36 = vpop.f32.mrb[77].mxu1  ;;  %v11005_v44 = vld [vmem:[#allocation20_spill] sm:$0xff] }
 0x2ba   : > { %10998 = vst [vmem:[#allocation68_spill] sm:$0xff] %v7432_v10  ;;  %11000 = vst [vmem:[#allocation70_spill] sm:$0xff] %v7442_v36  ;;  %v7444_v61 = vpop.eup %5992  ;;  %6012 = vpow2.f32 %v3499_v37  ;;  %v7452_v62 = vpop.f32.mrb[55].mxu0 }
 0x2bb   : > { %11001 = vst [vmem:[#allocation71_spill] sm:$0xff] %v7444_v61  ;;  %11002 = vst [vmem:[#allocation72_spill] sm:$0xff] %v7452_v62  ;;  %v7454_v63 = vpop.f32.mrb[78].mxu1  ;;  %v7456_v2 = vpop.eup %5994  ;;  %6014 = vpow2.f32 %v3501_v40  ;;  %v3989_v39 = vadd.f32 %v7444_v61, %v7432_v10  ;;  %v11010_v40 = vld [vmem:[#allocation24_spill] sm:$0xff] }
 0x2bc   : > { %11003 = vst [vmem:[#allocation73_spill] sm:$0xff] %v7454_v63  ;;  %11004 = vst [vmem:[#allocation74_spill] sm:$0xff] %v7456_v2  ;;  %v7464_v24 = vpop.f32.mrb[79].mxu1  ;;  %v7466_v50 = vpop.f32.mrb[56].mxu0  ;;  %6016 = vpow2.f32 %v3503_v46  ;;  %v11015_v63 = vld [vmem:[#allocation26_spill] sm:$0xff]  ;;  %v11021_v46 = vld [vmem:[#allocation27_spill] sm:$0xff] }
 0x2bd   : > { %11006 = vst [vmem:[#allocation20_spill] sm:$0xff] %v7464_v24  ;;  %11007 = vst [vmem:[#allocation75_spill] sm:$0xff] %v7466_v50  ;;  %v7468_v31 = vpop.eup %5996  ;;  %v7476_v37 = vpop.f32.mrb[57].mxu0  ;;  %6018 = vpow2.f32 %v3505_v17  ;;  %v3990_v57 = vadd.f32 %v7456_v2, %v3989_v39  ;;  %v11014_v50 = vld [vmem:[#allocation23_spill] sm:$0xff]  ;;  %v11020_v39 = vld [vmem:[#allocation25_spill] sm:$0xff] }
 0x2be   : > { %11008 = vst [vmem:[#allocation76_spill] sm:$0xff] %v7468_v31  ;;  %11012 = vst [vmem:[#allocation22_spill] sm:$0xff] %v7476_v37  ;;  %v2705_v23 = vpop.trf.xlu1  ;;  %v7478_v60 = vpop.eup %5998  ;;  %6020 = vpow2.f32 %v3507_v53  ;;  %v11019_v37 = vld [vmem:[#allocation28_spill] sm:$0xff]  ;;  %v11027_v2 = vld [vmem:[#allocation29_spill] sm:$0xff] }
 0x2bf   : > { %11013 = vst [vmem:[#allocation24_spill] sm:$0xff] %v7478_v60  ;;  %v7485_v0 = vpop.f32.mrb[58].mxu0  ;;  %v7487_v19 = vpop.f32.mrb[80].mxu1  ;;  %5859 = vmatprep.mubr.msk.bf16.mxu1 %vm1003_vm2, %v2705_v23  ;;  %6022 = vpow2.f32 %v7397_v9  ;;  %v3991_v23 = vadd.f32 %v7468_v31, %v3990_v57  ;;  %v11028_v9 = vld [vmem:[#allocation31_spill] sm:$0xff]  ;;  %v11029_v31 = vld [vmem:[#allocation34_spill] sm:$0xff] }
 0x2c0   : > { %11016 = vst [vmem:[#allocation21_spill] sm:$0xff] %v7485_v0  ;;  %11017 = vst [vmem:[#allocation23_spill] sm:$0xff] %v7487_v19  ;;  %v7490_v30 = vpop.eup %6000  ;;  %v7498_v24 = vpop.f32.mrb[59].mxu0  ;;  %v11023_v19 = vld [vmem:[#allocation30_spill] sm:$0xff]  ;;  %v11024_v0 = vld [vmem:[#allocation32_spill] sm:$0xff]  ;;  %6024 = vpow2.f32 %v7399_v43 }
 0x2c1   : > { %11018 = vst [vmem:[#allocation26_spill] sm:$0xff] %v7490_v30  ;;  %11022 = vst [vmem:[#allocation28_spill] sm:$0xff] %v7498_v24  ;;  %v7500_v54 = vpop.eup %6002  ;;  %v7508_v22 = vpop.f32.mrb[81].mxu1  ;;  %6026 = vpow2.f32 %v7401_v29  ;;  %v11031_v43 = vld [vmem:[#allocation36_spill] sm:$0xff]  ;;  %v11032_v24 = vld [vmem:[#allocation33_spill] sm:$0xff]  ;;  %v11045_v29 = vsub.f32 %v7195_v48, %v7295_v18  ;;  %v11050_v48 = vsub.f32 %v7236_v12, %v7295_v18 }
 0x2c2   : > { %11025 = vst [vmem:[#allocation25_spill] sm:$0xff] %v7508_v22  ;;  %v7510_v15 = vpop.f32.mrb[60].mxu0  ;;  %v7512_v36 = vpop.eup %6004  ;;  %6028 = vpow2.f32 %v7403_v49  ;;  %v11040_v49 = vld [vmem:[#allocation37_spill] sm:$0xff] }
 0x2c3   : > { %11026 = vst [vmem:[#allocation27_spill] sm:$0xff] %v7510_v15  ;;  %v7521_v62 = vpop.f32.mrb[82].mxu1  ;;  %v2706_v17 = vpop.trf.xlu1  ;;  %v3992_v15 = vadd.f32 %v7478_v60, %v3991_v23  ;;  %6030 = vpow2.f32 %v7405_v47  ;;  %v3529_v6 = vmul.f32 1.442695, %v11045_v29  ;;  %v3535_v29 = vmul.f32 1.442695, %v11050_v48 }
 0x2c4   : > { %11030 = vst [vmem:[#allocation30_spill] sm:$0xff] %v7521_v62  ;;  %v7523_v26 = vpop.eup %6006  ;;  %v7531_v61 = vpop.f32.mrb[83].mxu1  ;;  %5860 = vmatmul.mubr.msk.bf16.gmra.mrb[144].mxu1 %vm1003_vm2, %v2706_v17  ;;  %v11041_v62 = vld [vmem:[#allocation39_spill] sm:$0xff]  ;;  %6032 = vpow2.f32 %v7407_v38 }
 0x2c5   : > { %11033 = vst [vmem:[#allocation32_spill] sm:$0xff] %v7531_v61  ;;  %v7534_v53 = vpop.f32.mrb[61].mxu0  ;;  %v7536_v57 = vpop.eup %6008  ;;  %6034 = vpow2.f32 %v7409_v25  ;;  %v11049_v25 = vsub.f32 %v7229_v45, %v7295_v18  ;;  %v11053_v45 = vsub.f32 %v7034_v52, %v7394_v11 }
 0x2c6   : > { %11034 = vst [vmem:[#allocation29_spill] sm:$0xff] %v7534_v53  ;;  %v7545_v27 = vpop.permute.xlu0 %676  ;;  %v7547_v61 = vpop.f32.mrb[62].mxu0  ;;  %v3993_v53 = vadd.f32 %v7490_v30, %v3992_v15  ;;  %6036 = vpow2.f32 %v7412_v3 }
 0x2c7   : > { %11038 = vst [vmem:[#allocation31_spill] sm:$0xff] %v7545_v27  ;;  %11039 = vst [vmem:[#allocation34_spill] sm:$0xff] %v7547_v61  ;;  %v7549_v17 = vpop.eup %6010  ;;  %v7557_v60 = vpop.f32.mrb[84].mxu1  ;;  %v11044_v61 = vsub.f32 %v7210_v51, %v7295_v18  ;;  %6038 = vpow2.f32 %v7414_v5  ;;  %v11056_v5 = vsub.f32 %v7040_v56, %v7394_v11  ;;  %v11059_v56 = vsub.f32 %v7060_v13, %v7394_v11 }
 0x2c8   : > { %11042 = vst [vmem:[#allocation36_spill] sm:$0xff] %v7557_v60  ;;  %v7559_v23 = vpop.f32.mrb[63].mxu0  ;;  %v7561_v10 = vpop.eup %6012  ;;  %v11046_v60 = vsub.f32 %v7203_v42, %v7295_v18  ;;  %v3994_v30 = vadd.f32 %v7500_v54, %v3993_v53  ;;  %v11051_v42 = vsub.f32 %v7224_v1, %v7295_v18 }
 0x2c9   : > { %11043 = vst [vmem:[#allocation33_spill] sm:$0xff] %v7559_v23  ;;  %v3527_v47 = vmul.f32 1.442695, %v11044_v61  ;;  %v2707_v22 = vpop.trf.xlu1  ;;  %v7567_v15 = vpop.eup %6014  ;;  %v3533_v61 = vmul.f32 1.442695, %v11049_v25 }
 0x2ca   : > { %v3531_v23 = vmul.f32 1.442695, %v11046_v60  ;;  %v7577_v38 = vpop.f32.mrb[85].mxu1  ;;  %5863 = vmatprep.mubr.msk.bf16.mxu1 %vm1003_vm2, %v2707_v22  ;;  %v7580_v51 = vpop.eup %6016  ;;  %v3537_v60 = vmul.f32 1.442695, %v11051_v42  ;;  %v11052_v22 = vsub.f32 %v7232_v59, %v7295_v18  ;;  %v11057_v59 = vsub.f32 %v7027_v41, %v7394_v11 }
 0x2cb   : > { %11047 = vst [vmem:[#allocation37_spill] sm:$0xff] %v7577_v38  ;;  %11048 = vst [vmem:[#allocation39_spill] sm:$0xff] %v7580_v51  ;;  %v7592_v53 = vpop.eup %6018  ;;  %v3995_v38 = vadd.f32 %v7512_v36, %v3994_v30  ;;  %v3541_v25 = vmul.f32 1.442695, %v11053_v45  ;;  %v7602_v12 = vpop.f32.mrb[86].mxu1  ;;  %6040 = vpow2.f32 %v3527_v47  ;;  %v11058_v30 = vsub.f32 %v7037_v21, %v7394_v11 }
 0x2cc   : > { %v3539_v3 = vmul.f32 1.442695, %v11052_v22  ;;  %11054 = vst [vmem:[#allocation77_spill] sm:$0xff] %v7602_v12  ;;  %v7604_v48 = vpop.f32.mrb[64].mxu0  ;;  %v7606_v1 = vpop.eup %6020  ;;  %v3543_v42 = vmul.f32 1.442695, %v11056_v5  ;;  %6042 = vpow2.f32 %v3529_v6  ;;  %v11060_v41 = vsub.f32 %v7067_v16, %v7394_v11 }
 0x2cd   : > { %11055 = vst [vmem:[#allocation78_spill] sm:$0xff] %v7604_v48  ;;  %v3545_v18 = vmul.f32 1.442695, %v11057_v59  ;;  %v7617_v52 = vmul.f32 1.442695, %v11058_v30  ;;  %v7619_v22 = vpop.permute.xlu0 %686  ;;  %v2708_v45 = vpop.trf.xlu1  ;;  %v3996_v47 = vadd.f32 %v7523_v26, %v3995_v38  ;;  %6044 = vpow2.f32 %v3531_v23 }
 0x2ce   : > { %v7621_v48 = vpop.eup %6022  ;;  %v7627_v5 = vmul.f32 1.442695, %v11059_v56  ;;  %v7632_v59 = vmul.f32 1.442695, %v11060_v41  ;;  %v7634_v21 = vpop.f32.mrb[87].mxu1  ;;  %5864 = vmatmul.mubr.msk.bf16.gmra.mrb[148].mxu1 %vm1003_vm2, %v2708_v45  ;;  %v11063_v6 = vsub.f32 %v7054_v8, %v7394_v11  ;;  %v11064_v38 = vsub.f32 %v7064_v14, %v7394_v11 }
 0x2cf   : > { %11061 = vst [vmem:[#allocation79_spill] sm:$0xff] %v7634_v21  ;;  %v7637_v30 = vpop.f32.mrb[65].mxu0  ;;  %v7639_v12 = vpop.eup %6024  ;;  %v11065_v56 = vsub.f32 %v7086_v33, %v7394_v11  ;;  %6046 = vpow2.f32 %v3533_v61  ;;  %v3997_v23 = vadd.f32 %v7536_v57, %v3996_v47  ;;  %v11066_v8 = vsub.f32 %v7093_v7, %v7394_v11 }
 0x2d0   : > { %11062 = vst [vmem:[#allocation80_spill] sm:$0xff] %v7637_v30  ;;  %v7644_v13 = vmul.f32 1.442695, %v11063_v6  ;;  %v7649_v16 = vmul.f32 1.442695, %v11064_v38  ;;  %v7656_v45 = vpop.eup %6026  ;;  %v11067_v14 = vsub.f32 %v7080_v28, %v7394_v11  ;;  %v7669_v30 = vpop.f32.mrb[66].mxu0  ;;  %6048 = vpow2.f32 %v3535_v29 }
 0x2d1   : > { %v7654_v41 = vmul.f32 1.442695, %v11065_v56  ;;  %v7662_v6 = vmul.f32 1.442695, %v11066_v8  ;;  %11068 = vst [vmem:[#allocation81_spill] sm:$0xff] %v7669_v30  ;;  %v7671_v33 = vpop.f32.mrb[88].mxu1  ;;  %v7673_v56 = vpop.eup %6028  ;;  %v11070_v61 = vsub.f32 %v11005_v44, %v7394_v11  ;;  %v11071_v7 = vsub.f32 %v11009_v4, %v7394_v11 }
 0x2d2   : > { %v7667_v38 = vmul.f32 1.442695, %v11067_v14  ;;  %11069 = vst [vmem:[#allocation82_spill] sm:$0xff] %v7671_v33  ;;  %v11072_v28 = vsub.f32 %v11010_v40, %v7394_v11  ;;  %v2709_v30 = vpop.trf.xlu1  ;;  %v7690_v33 = vpop.eup %6030  ;;  %6050 = vpow2.f32 %v3537_v60  ;;  %v3998_v29 = vadd.f32 %v7549_v17, %v3997_v23 }
 0x2d3   : > { %v7678_v47 = vmul.f32 1.442695, %v11070_v61  ;;  %v7683_v8 = vmul.f32 1.442695, %v11071_v7  ;;  %v11073_v44 = vsub.f32 %v11011_v20, %v7394_v11  ;;  %v11074_v4 = vsub.f32 %v11014_v50, %v7394_v11  ;;  %v7703_v21 = vpop.f32.mrb[67].mxu0  ;;  %v7705_v40 = vpop.f32.mrb[89].mxu1  ;;  %5867 = vmatprep.mubr.msk.bf16.mxu1 %vm1003_vm2, %v2709_v30 }
 0x2d4   : > { %v7688_v14 = vmul.f32 1.442695, %v11072_v28  ;;  %11075 = vst [vmem:[#allocation83_spill] sm:$0xff] %v7703_v21  ;;  %11076 = vst [vmem:[#allocation84_spill] sm:$0xff] %v7705_v40  ;;  %v7708_v28 = vpop.eup %6032  ;;  %6052 = vpow2.f32 %v3539_v3  ;;  %v11077_v60 = vsub.f32 %v11015_v63, %v7394_v11  ;;  %v11078_v23 = vsub.f32 %v11019_v37, %v7394_v11  ;;  %v7725_v40 = vpop.permute.xlu0 %696 }
 0x2d5   : > { %v7696_v61 = vmul.f32 1.442695, %v11073_v44  ;;  %v7701_v7 = vmul.f32 1.442695, %v11074_v4  ;;  %v11079_v44 = vsub.f32 %v11020_v39, %v7394_v11  ;;  %11080 = vst [vmem:[#allocation85_spill] sm:$0xff] %v7725_v40  ;;  %v7727_v30 = vpop.eup %6034  ;;  %v3999_v3 = vadd.f32 %v7561_v10, %v3998_v29  ;;  %v7740_v39 = vpop.f32.mrb[90].mxu1 }
 0x2d6   : > { %v7713_v20 = vmul.f32 1.442695, %v11077_v60  ;;  %v7718_v50 = vmul.f32 1.442695, %v11078_v23  ;;  %6054 = vpow2.f32 %v3541_v25  ;;  %v11081_v63 = vsub.f32 %v11021_v46, %v7394_v11  ;;  %11083 = vst [vmem:[#allocation86_spill] sm:$0xff] %v7740_v39  ;;  %v7744_v21 = vpop.eup %6036  ;;  %v2710_v39 = vpop.trf.xlu1 }
 0x2d7   : > { %v7723_v4 = vmul.f32 1.442695, %v11079_v44  ;;  %v11082_v37 = vsub.f32 %v11023_v19, %v7394_v11  ;;  %v7742_v44 = vpop.f32.mrb[68].mxu0  ;;  %6056 = vpow2.f32 %v3543_v42  ;;  %v11085_v25 = vsub.f32 %v11024_v0, %v7394_v11  ;;  %5868 = vmatmul.mubr.msk.bf16.gmra.mrb[152].mxu1 %vm1003_vm2, %v2710_v39 }
 0x2d8   : > { %v7733_v60 = vmul.f32 1.442695, %v11081_v63  ;;  %11084 = vst [vmem:[#allocation87_spill] sm:$0xff] %v7742_v44  ;;  %v11086_v46 = vsub.f32 %v11027_v2, %v7394_v11  ;;  %v3040_v19 = vmax.f32 %v7303_v58, %v7315_v34  ;;  %v7760_v44 = vpop.eup %6038  ;;  %v4000_v42 = vadd.f32 %v7567_v15, %v3999_v3  ;;  %v11091_v3 = vld [vmem:[#allocation5_spill] sm:$0xff] }
 0x2d9   : > { %v7738_v23 = vmul.f32 1.442695, %v11082_v37  ;;  %v7749_v29 = vmul.f32 1.442695, %v11085_v25  ;;  %v7758_v37 = vpop.f32.mrb[91].mxu1  ;;  %6058 = vpow2.f32 %v3545_v18  ;;  %v11088_v0 = vsub.f32 %v11028_v9, %v7394_v11  ;;  %v7775_v34 = vpop.eup %6040 }
 0x2da   : > { %v7754_v63 = vmul.f32 1.442695, %v11086_v46  ;;  %11087 = vst [vmem:[#allocation88_spill] sm:$0xff] %v7758_v37  ;;  %v3005_v2 = vmax.f32 %v7390_v35, %v7285_v32  ;;  %v7771_v46 = vpop.f32.mrb[69].mxu0  ;;  %v7773_v58 = vpop.f32.mrb[92].mxu1  ;;  %6060 = vpow2.f32 %v7617_v52  ;;  %v3041_v18 = vmax.f32 %v3040_v19, %v7289_v55 }
 0x2db   : > { %v7766_v25 = vmul.f32 1.442695, %v11088_v0  ;;  %11089 = vst [vmem:[#allocation89_spill] sm:$0xff] %v7771_v46  ;;  %11090 = vst [vmem:[#allocation90_spill] sm:$0xff] %v7773_v58  ;;  %v895_v9 = vadd.f32 %v11091_v3, %v7545_v27  ;;  %v11092_v0 = vld [vmem:[#allocation8_spill] sm:$0xff]  ;;  %v7785_v35 = vpop.f32.mrb[70].mxu0  ;;  %v7789_v32 = vpop.eup %6042  ;;  %v4001_v58 = vadd.f32 %v7580_v51, %v4000_v42  ;;  %6062 = vpow2.f32 %v7627_v5 }
 0x2dc   : > { %v7783_v37 = vadd.f32 %v11092_v0, %v7619_v22  ;;  %11094 = vst [vmem:[#allocation8_spill] sm:$0xff] %v7785_v35  ;;  %v7787_v39 = vpop.f32.mrb[93].mxu1  ;;  %v11096_v52 = vsub.f32 %v11029_v31, %v7394_v11  ;;  %v11097_v3 = vld [vmem:[#allocation58_spill] sm:$0xff]  ;;  %v7799_v46 = vpop.f32.mrb[71].mxu0  ;;  %6064 = vpow2.f32 %v7632_v59  ;;  %v11100_v35 = vld [vmem:[#allocation55_spill] sm:$0xff]  ;;  %v11101_v5 = vld [vmem:[#allocation9_spill] sm:$0xff] }
 0x2dd   : > { %11095 = vst [vmem:[#allocation91_spill] sm:$0xff] %v7787_v39  ;;  %v3006_v55 = vmax.f32 %v3005_v2, %v11097_v3  ;;  %11098 = vst [vmem:[#allocation92_spill] sm:$0xff] %v7799_v46  ;;  %v7801_v0 = vpop.f32.mrb[94].mxu1  ;;  %v3042_v39 = vmax.f32 %v3041_v18, %v11100_v35  ;;  %v956_v42 = vpack.c.bf16 %v895_v9, %v895_v9  ;;  %v2711_v51 = vpop.trf.xlu1  ;;  %6066 = vpow2.f32 %v7644_v13  ;;  %v11104_v59 = vld [vmem:[#allocation61_spill] sm:$0xff] }
 0x2de   : > { %11093 = vst [vmem:[#allocation5_spill] sm:$0xff] %v7783_v37  ;;  %v7796_v19 = vmul.f32 1.442695, %v11096_v52  ;;  %11099 = vst [vmem:[#allocation93_spill] sm:$0xff] %v7801_v0  ;;  %v7803_v37 = vpop.eup %6044  ;;  %v905_v27 = vadd.f32 %v11101_v5, %v7619_v22  ;;  %v7809_v31 = vpop.f32.mrb[95].mxu1  ;;  %v4002_v2 = vadd.f32 %v7592_v53, %v4001_v58  ;;  %v11103_v3 = vsub.f32 %v11031_v43, %v7394_v11  ;;  %v11106_v58 = vld [vmem:[#allocation62_spill] sm:$0xff] }
 0x2df   : > { %11102 = vst [vmem:[#allocation9_spill] sm:$0xff] %v7809_v31  ;;  %v7811_v52 = vpop.eup %6046  ;;  %v3007_v18 = vmax.f32 %v3006_v55, %v11104_v59  ;;  %5871 = vmatprep.mubr.msk.bf16.mxu1 %vm1003_vm2, %v2711_v51  ;;  %6068 = vpow2.f32 %v7649_v16  ;;  %v11105_v22 = vsub.f32 %v11032_v24, %v7394_v11  ;;  %v3043_v13 = vmax.f32 %v3042_v39, %v11106_v58  ;;  %v11107_v43 = vld [vmem:[#allocation12_spill] sm:$0xff]  ;;  %v11109_v51 = vld [vmem:[#allocation35_spill] sm:$0xff]  ;;  %v11111_v24 = vld [vmem:[#allocation57_spill] sm:$0xff]  ;;  %v7845_v31 = vpop.permute.xlu0 %706 }
 0x2e0   : > { %v7818_v0 = vmul.f32 1.442695, %v11103_v3  ;;  %v7822_v9 = vpop.eup %6048  ;;  %4445 = vmatprep.mubr.bf16.mxu0 %v956_v42  ;;  %v7833_v3 = vadd.f32 %v11107_v43, %v7725_v40  ;;  %v4003_v55 = vadd.f32 %v7606_v1, %v4002_v2  ;;  %6070 = vpow2.f32 %v7654_v41  ;;  %11112 = vst [vmem:[#allocation35_spill] sm:$0xff] %v7845_v31  ;;  %v11113_v42 = vld [vmem:[#allocation64_spill] sm:$0xff]  ;;  %v11116_v40 = vld [vmem:[#allocation59_spill] sm:$0xff] }
 0x2e1   : > { %v7828_v5 = vmul.f32 1.442695, %v11105_v22  ;;  %v7835_v35 = vpop.eup %6050  ;;  %v11110_v16 = vsub.f32 %v11109_v51, %v7394_v11  ;;  %v3008_v22 = vmax.f32 %v3007_v18, %v11111_v24  ;;  %6072 = vpow2.f32 %v7662_v6  ;;  %v2712_v41 = vpop.trf.xlu1  ;;  %v11114_v18 = vld [vmem:[#allocation38_spill] sm:$0xff] }
 0x2e2   : > { %11108 = vst [vmem:[#allocation12_spill] sm:$0xff] %v7833_v3  ;;  %v7847_v39 = vpop.eup %6052  ;;  %v3044_v43 = vmax.f32 %v3043_v13, %v11113_v42  ;;  %v960_v3 = vpack.c.bf16 %v905_v27, %v905_v27  ;;  %v4293_v2 = vpack.c.bf16 %v7639_v12, %v7621_v48  ;;  %v4004_v51 = vadd.f32 %v7621_v48, %v4003_v55  ;;  %v7864_v27 = vpop.f32.mrb[96].mxu1  ;;  %v11118_v42 = vld [vmem:[#allocation60_spill] sm:$0xff] }
 0x2e3   : > { %v7842_v59 = vmul.f32 1.442695, %v11110_v16  ;;  %v7853_v58 = vpop.eup %6054  ;;  %6074 = vpow2.f32 %v7667_v38  ;;  %v11115_v16 = vsub.f32 %v11114_v18, %v7394_v11  ;;  %v3009_v6 = vmax.f32 %v3008_v22, %v11116_v40  ;;  %5872 = vmatmul.mubr.msk.bf16.gmra.mrb[156].mxu1 %vm1003_vm2, %v2712_v41  ;;  %11117 = vst [vmem:[#allocation38_spill] sm:$0xff] %v7864_v27  ;;  %v11119_v48 = vld [vmem:[#allocation68_spill] sm:$0xff]  ;;  %v11120_v38 = vld [vmem:[#allocation71_spill] sm:$0xff]  ;;  %v7876_v22 = vpop.f32.mrb[97].mxu1 }
 0x2e4   : > { %v7866_v13 = vpop.eup %6056  ;;  %6076 = vpow2.f32 %v7678_v47  ;;  %v3045_v46 = vmax.f32 %v3044_v43, %v11118_v42  ;;  %5403 = vmatprep.subr.bf16.mxu0 %v4293_v2  ;;  %v4285_v55 = vpack.c.bf16 %v11120_v38, %v11119_v48  ;;  %v11121_v18 = vld [vmem:[#allocation16_spill] sm:$0xff]  ;;  %4525 = vmatprep.mubr.bf16.mxu1 %v960_v3  ;;  %11123 = vst [vmem:[#allocation71_spill] sm:$0xff] %v7876_v22  ;;  %v11124_v43 = vld [vmem:[#allocation66_spill] sm:$0xff]  ;;  %v7885_v42 = vpop.f32.mrb[98].mxu1 }
 0x2e5   : > { %v7860_v24 = vmul.f32 1.442695, %v11115_v16  ;;  %v7874_v16 = vadd.f32 %v11121_v18, %v7845_v31  ;;  %v7878_v41 = vpop.eup %6058  ;;  %v4005_v40 = vadd.f32 %v7639_v12, %v4004_v51  ;;  %6078 = vpow2.f32 %v7683_v8  ;;  %11125 = vst [vmem:[#allocation16_spill] sm:$0xff] %v7885_v42  ;;  %v11126_v3 = vld [vmem:[#allocation40_spill] sm:$0xff]  ;;  %v11129_v51 = vld [vmem:[#allocation63_spill] sm:$0xff]  ;;  %v7903_v31 = vpop.f32.mrb[72].mxu0 }
 0x2e6   : > { %v4026_v47 = vadd.f32 %v7866_v13, %v7853_v58  ;;  %v3010_v2 = vmax.f32 %v3009_v6, %v11124_v43  ;;  %v7887_v48 = vpop.eup %6060  ;;  %6080 = vpow2.f32 %v7688_v14  ;;  %v11127_v38 = vsub.f32 %v11126_v3, %v7394_v11  ;;  %5404 = vmatpush3.bf16.msra.mxu0 %v4285_v55  ;;  %v7901_v6 = vpop.f32.mrb[99].mxu1  ;;  %11131 = vst [vmem:[#allocation94_spill] sm:$0xff] %v7903_v31 }
 0x2e7   : > { %11122 = vst [vmem:[#allocation68_spill] sm:$0xff] %v7874_v16  ;;  %v11128_v12 = vsub.f32 %v11040_v49, %v7394_v11  ;;  %v3046_v16 = vmax.f32 %v3045_v46, %v11129_v51  ;;  %11130 = vst [vmem:[#allocation40_spill] sm:$0xff] %v7901_v6  ;;  %v7905_v43 = vpop.eup %6062  ;;  %v4006_v14 = vadd.f32 %v7656_v45, %v4005_v40  ;;  %6082 = vpow2.f32 %v7696_v61  ;;  %v7911_v49 = vpop.f32.mrb[73].mxu0  ;;  %v11135_v51 = vld [vmem:[#allocation70_spill] sm:$0xff] }
 0x2e8   : > { %v7893_v18 = vmul.f32 1.442695, %v11127_v38  ;;  %v4027_v3 = vadd.f32 %v7878_v41, %v4026_v47  ;;  %v11132_v38 = vld [vmem:[#allocation72_spill] sm:$0xff]  ;;  %11133 = vst [vmem:[#allocation95_spill] sm:$0xff] %v7911_v49  ;;  %6084 = vpow2.f32 %v7701_v7  ;;  %v11134_v46 = vsub.f32 %v11041_v62, %v7394_v11  ;;  %v7924_v40 = vpop.f32.mrb[74].mxu0 }
 0x2e9   : > { %v7898_v8 = vmul.f32 1.442695, %v11128_v12  ;;  %v3011_v42 = vmax.f32 %v3010_v2, %v11132_v38  ;;  %v7913_v12 = vpop.eup %6064  ;;  %v3047_v31 = vmax.f32 %v3046_v16, %v11135_v51  ;;  %v4294_v61 = vpack.c.bf16 %v7673_v56, %v7656_v45  ;;  %11136 = vst [vmem:[#allocation96_spill] sm:$0xff] %v7924_v40  ;;  %v11137_v38 = vld [vmem:[#allocation65_spill] sm:$0xff]  ;;  %v7932_v11 = vpop.f32.mrb[75].mxu0  ;;  %v11139_v16 = vld [vmem:[#allocation20_spill] sm:$0xff] }
 0x2ea   : > { %v7919_v55 = vmul.f32 1.442695, %v11134_v46  ;;  %v7926_v47 = vpop.eup %6066  ;;  %v4007_v2 = vadd.f32 %v7673_v56, %v4006_v14  ;;  %6086 = vpow2.f32 %v7713_v20  ;;  %v4028_v7 = vadd.f32 %v7887_v48, %v4027_v3  ;;  %11138 = vst [vmem:[#allocation97_spill] sm:$0xff] %v7932_v11  ;;  %v11140_v46 = vld [vmem:[#allocation74_spill] sm:$0xff]  ;;  %v11141_v51 = vld [vmem:[#allocation76_spill] sm:$0xff]  ;;  %v11143_v3 = vld [vmem:[#allocation69_spill] sm:$0xff] }
 0x2eb   : > { %v3012_v49 = vmax.f32 %v3011_v42, %v11137_v38  ;;  %v7934_v62 = vpop.eup %6068  ;;  %6088 = vpow2.f32 %v7718_v50  ;;  %v3048_v45 = vmax.f32 %v3047_v31, %v11139_v16  ;;  %5405 = vmatprep.subr.bf16.mxu0 %v4294_v61  ;;  %v4286_v40 = vpack.c.bf16 %v11141_v51, %v11140_v46  ;;  %v7948_v50 = vpop.f32.mrb[100].mxu1  ;;  %v11146_v51 = vld [vmem:[#allocation67_spill] sm:$0xff]  ;;  %v11147_v46 = vld [vmem:[#allocation24_spill] sm:$0xff]  ;;  %v11148_v16 = vld [vmem:[#allocation26_spill] sm:$0xff] }
 0x2ec   : > { %v4295_v56 = vpack.c.bf16 %v7708_v28, %v7690_v33  ;;  %v7942_v20 = vpop.eup %6070  ;;  %v4008_v14 = vadd.f32 %v7690_v33, %v4007_v2  ;;  %6090 = vpow2.f32 %v7723_v4  ;;  %v4029_v42 = vadd.f32 %v7905_v43, %v4028_v7  ;;  %11144 = vst [vmem:[#allocation76_spill] sm:$0xff] %v7948_v50  ;;  %v7958_v4 = vpop.f32.mrb[101].mxu1 }
 0x2ed   : > { %11142 = vst [vmem:[#allocation74_spill] sm:$0xff] %v7942_v20  ;;  %v3013_v38 = vmax.f32 %v3012_v49, %v11143_v3  ;;  %v7950_v31 = vpop.eup %6072  ;;  %6092 = vpow2.f32 %v7733_v60  ;;  %v3049_v61 = vmax.f32 %v3048_v45, %v11146_v51  ;;  %5406 = vmatpush3.bf16.msra.mxu0 %v4286_v40  ;;  %v4287_v11 = vpack.c.bf16 %v11148_v16, %v11147_v46  ;;  %v11151_v60 = vld [vmem:[#allocation22_spill] sm:$0xff]  ;;  %v7966_v40 = vpop.f32.mrb[102].mxu1  ;;  %v11154_v16 = vld [vmem:[#allocation73_spill] sm:$0xff] }
 0x2ee   : > { %11145 = vst [vmem:[#allocation98_spill] sm:$0xff] %v7950_v31  ;;  %v4296_v33 = vpack.c.bf16 %v7744_v21, %v7727_v30  ;;  %11149 = vst [vmem:[#allocation24_spill] sm:$0xff] %v7958_v4  ;;  %v7960_v2 = vpop.eup %6074  ;;  %v4009_v49 = vadd.f32 %v7708_v28, %v4008_v14  ;;  %6094 = vpow2.f32 %v7738_v23  ;;  %v4030_v7 = vadd.f32 %v7913_v12, %v4029_v42  ;;  %v7976_v23 = vpop.f32.mrb[103].mxu1  ;;  %v11158_v42 = vld [vmem:[#allocation28_spill] sm:$0xff] }
 0x2ef   : > { %11150 = vst [vmem:[#allocation26_spill] sm:$0xff] %v7960_v2  ;;  %v3014_v3 = vmax.f32 %v3013_v38, %v11151_v60  ;;  %5407 = vmatprep.subr.bf16.mxu0 %v4295_v56  ;;  %11152 = vst [vmem:[#allocation99_spill] sm:$0xff] %v7966_v40  ;;  %v7968_v45 = vpop.eup %6076  ;;  %6096 = vpow2.f32 %v7749_v29  ;;  %v3050_v46 = vmax.f32 %v3049_v61, %v11154_v16  ;;  %v7978_v14 = vpop.f32.mrb[76].mxu0 }
 0x2f0   : > { %11153 = vst [vmem:[#allocation100_spill] sm:$0xff] %v7968_v45  ;;  %v4288_v51 = vpack.c.bf16 %v7512_v36, %v7500_v54  ;;  %v4297_v28 = vpack.c.bf16 %v7775_v34, %v7760_v44  ;;  %11155 = vst [vmem:[#allocation101_spill] sm:$0xff] %v7976_v23  ;;  %v7980_v38 = vpop.eup %6078  ;;  %v4010_v56 = vadd.f32 %v7727_v30, %v4009_v49  ;;  %6098 = vpow2.f32 %v7754_v63  ;;  %v7986_v16 = vpop.f32.mrb[77].mxu0  ;;  %v11160_v36 = vld [vmem:[#allocation25_spill] sm:$0xff] }
 0x2f1   : > { %11156 = vst [vmem:[#allocation102_spill] sm:$0xff] %v7978_v14  ;;  %11157 = vst [vmem:[#allocation103_spill] sm:$0xff] %v7980_v38  ;;  %v4031_v29 = vadd.f32 %v7926_v47, %v4030_v7  ;;  %v3015_v61 = vmax.f32 %v3014_v3, %v11158_v42  ;;  %v7988_v54 = vpop.eup %6080  ;;  %6100 = vpow2.f32 %v7766_v25  ;;  %v3051_v60 = vmax.f32 %v3050_v46, %v11160_v36  ;;  %v7996_v63 = vpop.f32.mrb[78].mxu0  ;;  %v11162_v25 = vld [vmem:[#allocation75_spill] sm:$0xff] }
 0x2f2   : > { %11159 = vst [vmem:[#allocation104_spill] sm:$0xff] %v7986_v16  ;;  %5408 = vmatpush3.bf16.msra.mxu0 %v4287_v11  ;;  %v4289_v14 = vpack.c.bf16 %v7536_v57, %v7523_v26  ;;  %v4298_v30 = vpack.c.bf16 %v7803_v37, %v7789_v32  ;;  %11161 = vst [vmem:[#allocation105_spill] sm:$0xff] %v7996_v63  ;;  %v7998_v49 = vpop.eup %6082  ;;  %v4011_v3 = vadd.f32 %v7744_v21, %v4010_v56  ;;  %v8004_v11 = vpop.f32.mrb[79].mxu0  ;;  %v11164_v26 = vld [vmem:[#allocation32_spill] sm:$0xff]  ;;  %v11168_v21 = vld [vmem:[#allocation39_spill] sm:$0xff] }
 0x2f3   : > { %6102 = vpow2.f32 %v7796_v19  ;;  %v4032_v7 = vadd.f32 %v7934_v62, %v4031_v29  ;;  %v3016_v42 = vmax.f32 %v3015_v61, %v11162_v25  ;;  %5409 = vmatprep.subr.bf16.mxu0 %v4296_v33  ;;  %11163 = vst [vmem:[#allocation106_spill] sm:$0xff] %v8004_v11  ;;  %v8006_v46 = vpop.eup %6084  ;;  %v3052_v57 = vmax.f32 %v3051_v60, %v11164_v26  ;;  %v11165_v29 = vld [vmem:[#allocation21_spill] sm:$0xff]  ;;  %v8020_v25 = vpop.f32.mrb[104].mxu1  ;;  %v11167_v60 = vld [vmem:[#allocation23_spill] sm:$0xff] }
 0x2f4   : > { %6104 = vpow2.f32 %v7818_v0  ;;  %v8014_v19 = vpop.eup %6086  ;;  %v4012_v56 = vadd.f32 %v7760_v44, %v4011_v3  ;;  %11166 = vst [vmem:[#allocation107_spill] sm:$0xff] %v8020_v25  ;;  %v11172_v44 = vld [vmem:[#allocation30_spill] sm:$0xff] }
 0x2f5   : > { %6106 = vpow2.f32 %v7828_v5  ;;  %v4033_v33 = vadd.f32 %v7942_v20, %v4032_v7  ;;  %v3017_v61 = vmax.f32 %v3016_v42, %v11165_v29  ;;  %v8022_v0 = vpop.eup %6088  ;;  %v3053_v36 = vmax.f32 %v3052_v57, %v11167_v60  ;;  %v8030_v5 = vpop.f32.mrb[105].mxu1 }
 0x2f6   : > { %6108 = vpow2.f32 %v7842_v59  ;;  %5410 = vmatpush3.bf16.msra.mxu0 %v4288_v51  ;;  %11169 = vst [vmem:[#allocation39_spill] sm:$0xff] %v8030_v5  ;;  %v8032_v3 = vpop.eup %6090  ;;  %v4013_v42 = vadd.f32 %v7775_v34, %v4012_v56  ;;  %v11170_v59 = vld [vmem:[#allocation29_spill] sm:$0xff]  ;;  %v8038_v51 = vpop.f32.mrb[106].mxu1 }
 0x2f7   : > { %6110 = vpow2.f32 %v7860_v24  ;;  %v4034_v7 = vadd.f32 %v7950_v31, %v4033_v33  ;;  %v3018_v29 = vmax.f32 %v3017_v61, %v11170_v59  ;;  %5411 = vmatprep.subr.bf16.mxu0 %v4297_v28  ;;  %11171 = vst [vmem:[#allocation108_spill] sm:$0xff] %v8038_v51  ;;  %v8040_v57 = vpop.eup %6092  ;;  %v3054_v26 = vmax.f32 %v3053_v36, %v11172_v44  ;;  %v8048_v24 = vpop.f32.mrb[107].mxu1  ;;  %v11175_v61 = vld [vmem:[#allocation33_spill] sm:$0xff] }
 0x2f8   : > { %6112 = vpow2.f32 %v7893_v18  ;;  %11173 = vst [vmem:[#allocation109_spill] sm:$0xff] %v8048_v24  ;;  %v8050_v56 = vpop.f32.mrb[80].mxu0  ;;  %v8052_v33 = vpop.eup %6094  ;;  %v4014_v28 = vadd.f32 %v7789_v32, %v4013_v42  ;;  %v11177_v34 = vld [vmem:[#allocation37_spill] sm:$0xff]  ;;  %v11181_v32 = vld [vmem:[#allocation79_spill] sm:$0xff] }
 0x2f9   : > { %11174 = vst [vmem:[#allocation110_spill] sm:$0xff] %v8050_v56  ;;  %6114 = vpow2.f32 %v7898_v8  ;;  %v4035_v18 = vadd.f32 %v7960_v2, %v4034_v7  ;;  %v3019_v36 = vmax.f32 %v3018_v29, %v11175_v61  ;;  %v8058_v44 = vpop.f32.mrb[81].mxu0  ;;  %v8060_v60 = vpop.eup %6096  ;;  %v3055_v59 = vmax.f32 %v3054_v26, %v11177_v34  ;;  %v11179_v61 = vld [vmem:[#allocation27_spill] sm:$0xff] }
 0x2fa   : > { %11176 = vst [vmem:[#allocation111_spill] sm:$0xff] %v8058_v44  ;;  %6116 = vpow2.f32 %v7919_v55  ;;  %5412 = vmatpush3.bf16.msra.mxu0 %v4289_v14  ;;  %v8068_v8 = vpop.f32.mrb[82].mxu0  ;;  %v8070_v42 = vpop.eup %6098  ;;  %v4015_v29 = vadd.f32 %v7803_v37, %v4014_v28  ;;  %v11182_v55 = vld [vmem:[#allocation34_spill] sm:$0xff] }
 0x2fb   : > { %11178 = vst [vmem:[#allocation112_spill] sm:$0xff] %v8068_v8  ;;  %v4036_v7 = vadd.f32 %v7968_v45, %v4035_v18  ;;  %v3020_v44 = vmax.f32 %v3019_v36, %v11179_v61  ;;  %5413 = vmatprep.subr.bf16.mxu0 %v4298_v30  ;;  %v8077_v14 = vpop.permute.xlu1 %681  ;;  %v8079_v26 = vpop.f32.mrb[83].mxu0  ;;  %v3056_v8 = vmax.f32 %v3055_v59, %v11181_v32  ;;  %v11198_v45 = vld [vmem:[#allocation84_spill] sm:$0xff] }
 0x2fc   : > { %11180 = vst [vmem:[#allocation113_spill] sm:$0xff] %v8079_v26  ;;  %v8081_v56 = vpop.eup %6100  ;;  %v3110_v30 = vmax.f32 %v7876_v22, %v7901_v6  ;;  %v4016_v18 = vadd.f32 %v7811_v52, %v4015_v29  ;;  %v8097_v32 = vpop.f32.mrb[108].mxu1  ;;  %v11184_v26 = vld [vmem:[#allocation36_spill] sm:$0xff]  ;;  %v11185_v6 = vpack.c.bf16 %v7561_v10, %v7549_v17  ;;  %v11188_v10 = vpack.c.bf16 %v7822_v9, %v7811_v52  ;;  %v11190_v29 = vld [vmem:[#allocation77_spill] sm:$0xff] }
 0x2fd   : > { %v8090_v28 = vpop.eup %6102  ;;  %v4037_v36 = vadd.f32 %v7980_v38, %v4036_v7  ;;  %v3021_v61 = vmax.f32 %v3020_v44, %v11182_v55  ;;  %11183 = vst [vmem:[#allocation114_spill] sm:$0xff] %v8097_v32  ;;  %v3057_v37 = vmax.f32 %v3056_v8, %v11184_v26  ;;  %v8110_v7 = vpop.f32.mrb[109].mxu1  ;;  %v11187_v26 = vld [vmem:[#allocation80_spill] sm:$0xff]  ;;  %v11215_v38 = vld [vmem:[#allocation89_spill] sm:$0xff] }
 0x2fe   : > { %v8099_v34 = vpop.eup %6104  ;;  %5414 = vmatpush3.bf16.msra.mxu0 %v11185_v6  ;;  %v3111_v22 = vmax.f32 %v3110_v30, %v7864_v27  ;;  %11186 = vst [vmem:[#allocation115_spill] sm:$0xff] %v8110_v7  ;;  %v4017_v55 = vadd.f32 %v7822_v9, %v4016_v18  ;;  %v8124_v30 = vpop.f32.mrb[110].mxu1  ;;  %v11191_v18 = vld [vmem:[#allocation16_spill] sm:$0xff] }
 0x2ff   : > { %v8112_v59 = vpop.eup %6106  ;;  %v4038_v8 = vadd.f32 %v7988_v54, %v4037_v36  ;;  %v3022_v32 = vmax.f32 %v3021_v61, %v11187_v26  ;;  %5415 = vmatprep.subr.bf16.mxu0 %v11188_v10  ;;  %v8122_v6 = vpop.permute.xlu1 %691  ;;  %11189 = vst [vmem:[#allocation116_spill] sm:$0xff] %v8124_v30  ;;  %v3058_v27 = vmax.f32 %v3057_v37, %v11190_v29  ;;  %v11194_v26 = vld [vmem:[#allocation83_spill] sm:$0xff] }
 0x300   : > { %v8126_v44 = vpop.eup %6108  ;;  %v3112_v20 = vmax.f32 %v3111_v22, %v11191_v18  ;;  %v8132_v36 = vpop.f32.mrb[111].mxu1  ;;  %v4018_v10 = vadd.f32 %v7835_v35, %v4017_v55  ;;  %v11196_v61 = vld [vmem:[#allocation31_spill] sm:$0xff]  ;;  %v11197_v18 = vld [vmem:[#allocation4_spill] sm:$0xff]  ;;  %v11199_v30 = vpack.c.bf16 %v11168_v21, %v7567_v15  ;;  %v11204_v15 = vpack.c.bf16 %v7847_v39, %v7835_v35  ;;  %v11208_v35 = vld [vmem:[#allocation81_spill] sm:$0xff] }
 0x301   : > { %11192 = vst [vmem:[#allocation117_spill] sm:$0xff] %v8132_v36  ;;  %v8134_v52 = vpop.f32.mrb[84].mxu0  ;;  %v8136_v9 = vpop.eup %6110  ;;  %v4039_v17 = vadd.f32 %v7998_v49, %v4038_v8  ;;  %v3023_v31 = vmax.f32 %v3022_v32, %v11194_v26  ;;  %v893_v2 = vadd.f32 %v11197_v18, %v11196_v61  ;;  %v11200_v32 = vld [vmem:[#allocation7_spill] sm:$0xff]  ;;  %v11203_v61 = vld [vmem:[#allocation78_spill] sm:$0xff] }
 0x302   : > { %11193 = vst [vmem:[#allocation118_spill] sm:$0xff] %v8134_v52  ;;  %v8143_v29 = vpop.f32.mrb[85].mxu0  ;;  %v8145_v22 = vpop.eup %6112  ;;  %v3059_v52 = vmax.f32 %v3058_v27, %v11198_v45  ;;  %5416 = vmatpush3.bf16.msra.mxu0 %v11199_v30  ;;  %v3113_v55 = vmax.f32 %v3112_v20, %v7958_v4  ;;  %v899_v8 = vadd.f32 %v11200_v32, %v8077_v14  ;;  %v11207_v4 = vld [vmem:[#allocation88_spill] sm:$0xff]  ;;  %v11209_v45 = vld [vmem:[#allocation82_spill] sm:$0xff] }
 0x303   : > { %11195 = vst [vmem:[#allocation119_spill] sm:$0xff] %v8143_v29  ;;  %v8156_v26 = vpop.f32.mrb[86].mxu0  ;;  %v8158_v37 = vpop.eup %6114  ;;  %v8161_v29 = vadd.f32 %v7847_v39, %v4018_v10  ;;  %v4040_v18 = vadd.f32 %v8006_v46, %v4039_v17  ;;  %v3024_v27 = vmax.f32 %v3023_v31, %v11203_v61  ;;  %5417 = vmatprep.subr.bf16.mxu0 %v11204_v15  ;;  %v11213_v31 = vld [vmem:[#allocation10_spill] sm:$0xff] }
 0x304   : > { %11201 = vst [vmem:[#allocation31_spill] sm:$0xff] %v8156_v26  ;;  %v8170_v21 = vpop.permute.xlu1 %701  ;;  %v8172_v30 = vpop.f32.mrb[87].mxu0  ;;  %v3060_v10 = vmax.f32 %v3059_v52, %v11207_v4  ;;  %v3114_v26 = vmax.f32 %v3113_v55, %v7976_v23  ;;  %v958_v15 = vpack.c.bf16 %v899_v8, %v899_v8  ;;  %v11211_v55 = vld [vmem:[#allocation97_spill] sm:$0xff]  ;;  %v11212_v23 = vld [vmem:[#allocation95_spill] sm:$0xff] }
 0x305   : > { %11202 = vst [vmem:[#allocation4_spill] sm:$0xff] %v8161_v29  ;;  %11205 = vst [vmem:[#allocation7_spill] sm:$0xff] %v8170_v21  ;;  %v8174_v32 = vpop.eup %6116  ;;  %v4041_v17 = vadd.f32 %v8014_v19, %v4040_v18  ;;  %v3025_v39 = vmax.f32 %v3024_v27, %v11208_v35  ;;  %v3073_v4 = vmax.f32 %v11212_v23, %v11211_v55  ;;  %v11218_v55 = vld [vmem:[#allocation94_spill] sm:$0xff] }
 0x306   : > { %11206 = vst [vmem:[#allocation78_spill] sm:$0xff] %v8172_v30  ;;  %v3061_v29 = vmax.f32 %v3060_v10, %v11209_v45  ;;  %v11210_v30 = vpack.c.bf16 %v7606_v1, %v7592_v53  ;;  %v3115_v52 = vmax.f32 %v3114_v26, %v7948_v50  ;;  %v8193_v18 = vadd.f32 %v11213_v31, %v8122_v6  ;;  %v11217_v1 = vld [vmem:[#allocation86_spill] sm:$0xff]  ;;  %v11219_v50 = vld [vmem:[#allocation92_spill] sm:$0xff] }
 0x307   : > { %v4042_v8 = vadd.f32 %v8022_v0, %v4041_v17  ;;  %v955_v27 = vpack.c.bf16 %v893_v2, %v893_v2  ;;  %v3026_v20 = vmax.f32 %v3025_v39, %v11215_v38  ;;  %v11216_v10 = vpack.c.bf16 %v8022_v0, %v8014_v19  ;;  %v11220_v2 = vld [vmem:[#allocation14_spill] sm:$0xff]  ;;  %v11223_v0 = vld [vmem:[#allocation91_spill] sm:$0xff] }
 0x308   : > { %5418 = vmatpush3.bf16.msra.mxu0 %v11210_v30  ;;  %11214 = vst [vmem:[#allocation81_spill] sm:$0xff] %v8193_v18  ;;  %v3062_v26 = vmax.f32 %v3061_v29, %v11217_v1  ;;  %v3116_v30 = vmax.f32 %v3115_v52, %v7966_v40  ;;  %v3074_v23 = vmax.f32 %v3073_v4, %v11218_v55  ;;  %v8211_v19 = vpop.permute.xlu1 %711 }
 0x309   : > { %5425 = vmatprep.subr.bf16.mxu0 %v11216_v10  ;;  %v4043_v31 = vadd.f32 %v8032_v3, %v4042_v8  ;;  %v3027_v17 = vmax.f32 %v3026_v20, %v11219_v50  ;;  %v8209_v39 = vadd.f32 %v11220_v2, %v8170_v21  ;;  %11222 = vst [vmem:[#allocation10_spill] sm:$0xff] %v8211_v19  ;;  %v11225_v8 = vld [vmem:[#allocation87_spill] sm:$0xff]  ;;  %v11227_v2 = vld [vmem:[#allocation96_spill] sm:$0xff] }
 0x30a   : > { %v3063_v10 = vmax.f32 %v3062_v26, %v11223_v0  ;;  %v11224_v29 = vpack.c.bf16 %v7866_v13, %v7853_v58  ;;  %v3117_v52 = vmax.f32 %v3116_v30, %v8030_v5  ;;  %v3075_v53 = vmax.f32 %v3074_v23, %v11227_v2  ;;  %v11229_v58 = vld [vmem:[#allocation18_spill] sm:$0xff]  ;;  %v11231_v30 = vld [vmem:[#allocation8_spill] sm:$0xff]  ;;  %v11278_v2 = vld [vmem:[#allocation65_spill] sm:$0xff] }
 0x30b   : > { %4446 = vmatmul.mubr.bf16.vlgmr.msra.gmra.mrb[136].mxu0 %v955_v27  ;;  %11221 = vst [vmem:[#allocation82_spill] sm:$0xff] %v8209_v39  ;;  %v4044_v4 = vadd.f32 %v8040_v57, %v4043_v31  ;;  %v3028_v20 = vmax.f32 %v3027_v17, %v11225_v8  ;;  %v11226_v27 = vpack.c.bf16 %v8040_v57, %v8032_v3  ;;  %v11228_v39 = vld [vmem:[#allocation9_spill] sm:$0xff] }
 0x30c   : > { %5426 = vmatpush3.bf16.msra.mxu0 %v11224_v29  ;;  %4485 = vmatprep.mubr.bf16.mxu0 %v958_v15  ;;  %v3064_v55 = vmax.f32 %v3063_v10, %v11228_v39  ;;  %v3118_v26 = vmax.f32 %v3117_v52, %v8048_v24  ;;  %v8228_v13 = vadd.f32 %v11229_v58, %v8211_v19  ;;  %v11232_v29 = vld [vmem:[#allocation90_spill] sm:$0xff]  ;;  %v11287_v24 = vld [vmem:[#allocation33_spill] sm:$0xff] }
 0x30d   : > { %5427 = vmatprep.subr.bf16.mxu0 %v11226_v27  ;;  %v4045_v15 = vadd.f32 %v8052_v33, %v4044_v4  ;;  %v3029_v31 = vmax.f32 %v3028_v20, %v11231_v30  ;;  %v3076_v17 = vmax.f32 %v3075_v53, %v7986_v16  ;;  %v11233_v3 = vpack.c.bf16 %v7887_v48, %v7878_v41  ;;  %v11235_v20 = vld [vmem:[#allocation93_spill] sm:$0xff]  ;;  %v11236_v41 = vld [vmem:[#allocation102_spill] sm:$0xff] }
 0x30e   : > { %11230 = vst [vmem:[#allocation89_spill] sm:$0xff] %v8228_v13  ;;  %v3065_v5 = vmax.f32 %v3064_v55, %v11232_v29  ;;  %v3119_v23 = vmax.f32 %v3118_v26, %v8020_v25  ;;  %v11234_v52 = vpack.c.bf16 %v8060_v60, %v8052_v33  ;;  %v11237_v26 = vpack.c.bf16 %v7913_v12, %v7905_v43  ;;  %v11276_v16 = vld [vmem:[#allocation26_spill] sm:$0xff] }
 0x30f   : > { %v4046_v57 = vadd.f32 %v8060_v60, %v4045_v15  ;;  %v3030_v10 = vrot.slane %v3029_v31, 4  ;;  %v3077_v4 = vmax.f32 %v3076_v17, %v8004_v11  ;;  %v11275_v11 = vld [vmem:[#allocation100_spill] sm:$0xff] }
 0x310   : > { %5428 = vmatpush3.bf16.msra.mxu0 %v11233_v3  ;;  %v3066_v27 = vmax.f32 %v3065_v5, %v11235_v20  ;;  %v3120_v53 = vmax.f32 %v3119_v23, %v8038_v51  ;;  %v11238_v5 = vpack.c.bf16 %v8081_v56, %v8070_v42 }
 0x311   : > { %5429 = vmatprep.subr.bf16.mxu0 %v11234_v52  ;;  %v4047_v55 = vadd.f32 %v8070_v42, %v4046_v57  ;;  %v3031_v58 = vmax.f32 %v3029_v31, %v3030_v10  ;;  %v3078_v48 = vmax.f32 %v3077_v4, %v11236_v41  ;;  %v11239_v52 = vld [vmem:[#allocation111_spill] sm:$0xff]  ;;  %v11240_v4 = vpack.c.bf16 %v7934_v62, %v7926_v47  ;;  %v11274_v41 = vld [vmem:[#allocation72_spill] sm:$0xff] }
 0x312   : > { %v3067_v3 = vrot.slane %v3066_v27, 4  ;;  %v3121_v15 = vmax.f32 %v3120_v53, %v8110_v7  ;;  %v11241_v53 = vld [vmem:[#allocation6_spill] sm:$0xff] }
 0x313   : > { %v4048_v60 = vadd.f32 %v8081_v56, %v4047_v55  ;;  %v3032_v33 = vrot.slane %v3031_v58, 2  ;;  %v3079_v17 = vmax.f32 %v3078_v48, %v7996_v63  ;;  %v8264_v55 = vadd.f32 %v11241_v53, %v8077_v14  ;;  %v11242_v56 = vld [vmem:[#allocation114_spill] sm:$0xff]  ;;  %v8298_v53 = vpop.f32.mrb[88].mxu0 }
 0x314   : > { %5430 = vmatpush3.bf16.msra.mxu0 %v11237_v26  ;;  %v3068_v23 = vmax.f32 %v3066_v27, %v3067_v3  ;;  %v3122_v31 = vmax.f32 %v3121_v15, %v8132_v36  ;;  %v11245_v3 = vld [vmem:[#allocation113_spill] sm:$0xff]  ;;  %11256 = vst [vmem:[#allocation91_spill] sm:$0xff] %v8298_v53  ;;  %v11273_v63 = vld [vmem:[#allocation66_spill] sm:$0xff] }
 0x315   : > { %5431 = vmatprep.subr.bf16.mxu0 %v11238_v5  ;;  %v4049_v57 = vadd.f32 %v8090_v28, %v4048_v60  ;;  %v3033_v10 = vmax.f32 %v3031_v58, %v3032_v33  ;;  %v3080_v43 = vmax.f32 %v3079_v17, %v11239_v52  ;;  %v11244_v58 = vpack.c.bf16 %v8099_v34, %v8090_v28  ;;  %v11247_v33 = vld [vmem:[#allocation110_spill] sm:$0xff]  ;;  %v11249_v17 = vld [vmem:[#allocation85_spill] sm:$0xff] }
 0x316   : > { %v3069_v12 = vrot.slane %v3068_v23, 2  ;;  %v8267_v42 = vmax.f32 %v3122_v31, %v11242_v56  ;;  %v11250_v31 = vld [vmem:[#allocation13_spill] sm:$0xff]  ;;  %v11252_v28 = vld [vmem:[#allocation98_spill] sm:$0xff] }
 0x317   : > { %v4050_v27 = vadd.f32 %v8099_v34, %v4049_v57  ;;  %v3034_v48 = vrot.slane %v3033_v10, 1  ;;  %v3081_v26 = vmax.f32 %v3080_v43, %v11245_v3  ;;  %v8286_v57 = vadd.f32 %v11250_v31, %v11249_v17  ;;  %v11253_v43 = vld [vmem:[#allocation74_spill] sm:$0xff]  ;;  %v11259_v31 = vld [vmem:[#allocation41_spill] sm:$0xff] }
 0x318   : > { %5432 = vmatpush3.bf16.msra.mxu0 %v11240_v4  ;;  %11243 = vst [vmem:[#allocation86_spill] sm:$0xff] %v8267_v42  ;;  %v8274_v15 = vmax.f32 %v3068_v23, %v3069_v12  ;;  %v11254_v23 = vpack.c.bf16 %v11252_v28, %v11253_v43  ;;  %v11255_v4 = vld [vmem:[#allocation11_spill] sm:$0xff]  ;;  %v11260_v43 = vpack.c.bf16 %v8126_v44, %v8112_v59  ;;  %v11347_v42 = vld [vmem:[#allocation77_spill] sm:$0xff] }
 0x319   : > { %5433 = vmatprep.subr.bf16.mxu0 %v11244_v58  ;;  %v4051_v14 = vadd.f32 %v8112_v59, %v4050_v27  ;;  %v8279_v60 = vmax.f32 %v3033_v10, %v3034_v48  ;;  %v8282_v5 = vmax.f32 %v3081_v26, %v11247_v33  ;;  %11251 = vst [vmem:[#allocation14_spill] sm:$0xff] %v8286_v57  ;;  %v11257_v48 = vld [vmem:[#allocation42_spill] sm:$0xff]  ;;  %v11258_v26 = vld [vmem:[#allocation45_spill] sm:$0xff]  ;;  %v11267_v59 = vld [vmem:[#allocation51_spill] sm:$0xff] }
 0x31a   : > { %v8296_v10 = vadd.f32 %v11255_v4, %v8122_v6  ;;  %v11262_v6 = vld [vmem:[#allocation43_spill] sm:$0xff] }
 0x31b   : > { %11248 = vst [vmem:[#allocation92_spill] sm:$0xff] %v8282_v5  ;;  %v4052_v27 = vadd.f32 %v8126_v44, %v4051_v14  ;;  %v3285_v58 = vsub.f32 %v11257_v48, %v8279_v60  ;;  %v3286_v17 = vsub.f32 %v11258_v26, %v8279_v60  ;;  %v3287_v28 = vsub.f32 %v11259_v31, %v8279_v60  ;;  %v11263_v14 = vld [vmem:[#allocation50_spill] sm:$0xff]  ;;  %v11264_v48 = vld [vmem:[#allocation53_spill] sm:$0xff]  ;;  %v11293_v57 = vld [vmem:[#allocation103_spill] sm:$0xff] }
 0x31c   : > { %5434 = vmatpush3.bf16.msra.mxu0 %v11254_v23  ;;  %v8310_v23 = vpop.f32.mrb[89].mxu0  ;;  %v3288_v4 = vsub.f32 %v11262_v6, %v8279_v60  ;;  %v3289_v62 = vsub.f32 %v11263_v14, %v8279_v60  ;;  %v3290_v12 = vsub.f32 %v11264_v48, %v8279_v60  ;;  %v11265_v26 = vld [vmem:[#allocation49_spill] sm:$0xff]  ;;  %v3292_v44 = vsub.f32 %v11267_v59, %v8279_v60  ;;  %v11350_v5 = vld [vmem:[#allocation88_spill] sm:$0xff] }
 0x31d   : > { %5435 = vmatprep.subr.bf16.mxu0 %v11260_v43  ;;  %11261 = vst [vmem:[#allocation87_spill] sm:$0xff] %v8310_v23  ;;  %v3291_v34 = vsub.f32 %v11265_v26, %v8279_v60  ;;  %v8320_v13 = vpop.f32.mrb[90].mxu0  ;;  %v4053_v31 = vadd.f32 %v8136_v9, %v4052_v27  ;;  %v11268_v43 = vld [vmem:[#allocation58_spill] sm:$0xff]  ;;  %v11269_v6 = vld [vmem:[#allocation61_spill] sm:$0xff]  ;;  %v11272_v26 = vld [vmem:[#allocation59_spill] sm:$0xff]  ;;  %v3297_v27 = vsub.f32 %v11273_v63, %v8279_v60 }
 0x31e   : > { %11266 = vst [vmem:[#allocation9_spill] sm:$0xff] %v8320_v13  ;;  %v3293_v19 = vsub.f32 %v11268_v43, %v8279_v60  ;;  %v3294_v33 = vsub.f32 %v11269_v6, %v8279_v60  ;;  %v8329_v14 = vpop.f32.mrb[91].mxu0  ;;  %v11271_v48 = vld [vmem:[#allocation57_spill] sm:$0xff]  ;;  %v3296_v52 = vsub.f32 %v11272_v26, %v8279_v60  ;;  %v3298_v59 = vsub.f32 %v11274_v41, %v8279_v60  ;;  %v11280_v26 = vld [vmem:[#allocation22_spill] sm:$0xff]  ;;  %v11282_v41 = vld [vmem:[#allocation28_spill] sm:$0xff] }
 0x31f   : > { %11270 = vst [vmem:[#allocation18_spill] sm:$0xff] %v8329_v14  ;;  %v3295_v3 = vsub.f32 %v11271_v48, %v8279_v60  ;;  %v11277_v43 = vpack.c.bf16 %v11275_v11, %v11276_v16  ;;  %v4054_v6 = vadd.f32 %v8145_v22, %v4053_v31  ;;  %v3299_v56 = vsub.f32 %v11278_v2, %v8279_v60  ;;  %v11279_v48 = vld [vmem:[#allocation69_spill] sm:$0xff]  ;;  %v11283_v16 = vld [vmem:[#allocation75_spill] sm:$0xff]  ;;  %v8382_v13 = vpop.f32.mrb[92].mxu0 }
 0x320   : > { %v3300_v36 = vsub.f32 %v11279_v48, %v8279_v60  ;;  %v3301_v7 = vsub.f32 %v11280_v26, %v8279_v60  ;;  %v11281_v63 = vpack.c.bf16 %v8145_v22, %v8136_v9  ;;  %v3302_v51 = vsub.f32 %v11282_v41, %v8279_v60  ;;  %v11284_v31 = vld [vmem:[#allocation21_spill] sm:$0xff]  ;;  %v8360_v48 = vpop.f32.mrb[112].mxu1  ;;  %v11288_v22 = vld [vmem:[#allocation27_spill] sm:$0xff]  ;;  %v11289_v41 = vld [vmem:[#allocation34_spill] sm:$0xff]  ;;  %11295 = vst [vmem:[#allocation6_spill] sm:$0xff] %v8382_v13 }
 0x321   : > { %5436 = vmatpush3.bf16.msra.mxu0 %v11277_v43  ;;  %v3303_v11 = vsub.f32 %v11283_v16, %v8279_v60  ;;  %v3304_v43 = vsub.f32 %v11284_v31, %v8279_v60  ;;  %v11285_v2 = vld [vmem:[#allocation29_spill] sm:$0xff]  ;;  %11286 = vst [vmem:[#allocation8_spill] sm:$0xff] %v8360_v48  ;;  %v4055_v26 = vadd.f32 %v8158_v37, %v4054_v6  ;;  %v8369_v16 = vpop.f32.mrb[113].mxu1  ;;  %v11291_v31 = vld [vmem:[#allocation80_spill] sm:$0xff]  ;;  %v3629_v14 = vmul.f32 1.442695, %v3297_v27 }
 0x322   : > { %5437 = vmatprep.subr.bf16.mxu0 %v11281_v63  ;;  %v3305_v25 = vsub.f32 %v11285_v2, %v8279_v60  ;;  %v3306_v9 = vsub.f32 %v11287_v24, %v8279_v60  ;;  %v3307_v63 = vsub.f32 %v11288_v22, %v8279_v60  ;;  %v3308_v40 = vsub.f32 %v11289_v41, %v8279_v60  ;;  %v11292_v2 = vld [vmem:[#allocation83_spill] sm:$0xff]  ;;  %v8384_v41 = vpop.f32.mrb[114].mxu1 }
 0x323   : > { %11290 = vst [vmem:[#allocation90_spill] sm:$0xff] %v8369_v16  ;;  %v3309_v18 = vsub.f32 %v11291_v31, %v8279_v60  ;;  %v3310_v21 = vsub.f32 %v11292_v2, %v8279_v60  ;;  %v3311_v6 = vsub.f32 %v11203_v61, %v8279_v60  ;;  %v3312_v24 = vsub.f32 %v11208_v35, %v8279_v60  ;;  %v8400_v2 = vpop.f32.mrb[115].mxu1 }
 0x324   : > { %v11294_v22 = vpack.c.bf16 %v7988_v54, %v11293_v57  ;;  %11296 = vst [vmem:[#allocation85_spill] sm:$0xff] %v8384_v41  ;;  %v8387_v53 = vadd.f32 %v8174_v32, %v4055_v26  ;;  %v3313_v31 = vsub.f32 %v11215_v38, %v8279_v60  ;;  %v3314_v61 = vsub.f32 %v11219_v50, %v8279_v60  ;;  %v8398_v57 = vpop.f32.mrb[93].mxu0  ;;  %v11333_v26 = vld [vmem:[#allocation73_spill] sm:$0xff] }
 0x325   : > { %v3315_v35 = vsub.f32 %v11225_v8, %v8279_v60  ;;  %v11298_v54 = vpack.c.bf16 %v8174_v32, %v8158_v37  ;;  %11299 = vst [vmem:[#allocation98_spill] sm:$0xff] %v8398_v57  ;;  %11300 = vst [vmem:[#allocation74_spill] sm:$0xff] %v8400_v2  ;;  %v3609_v38 = vmul.f32 1.442695, %v3287_v28  ;;  %v3611_v50 = vmul.f32 1.442695, %v3288_v4 }
 0x326   : > { %5438 = vmatpush3.bf16.msra.mxu0 %v11294_v22  ;;  %11297 = vst [vmem:[#allocation13_spill] sm:$0xff] %v8387_v53  ;;  %v3605_v22 = vmul.f32 1.442695, %v3285_v58  ;;  %v3607_v53 = vmul.f32 1.442695, %v3286_v17  ;;  %v962_v8 = vpack.c.bf16 %v8296_v10, %v8296_v10  ;;  %v8407_v23 = vpop.f32.mrb[94].mxu0  ;;  %v11304_v58 = vpack.c.bf16 %v8006_v46, %v7998_v49 }
 0x327   : > { %5439 = vmatprep.subr.bf16.mxu0 %v11298_v54  ;;  %v3613_v41 = vmul.f32 1.442695, %v3289_v62  ;;  %11302 = vst [vmem:[#allocation11_spill] sm:$0xff] %v8407_v23  ;;  %v3615_v37 = vmul.f32 1.442695, %v3290_v12  ;;  %v11303_v54 = vrot.slane %v8274_v15, 1 }
 0x328   : > { %6118 = vpow2.f32 %v3605_v22  ;;  %v3617_v32 = vmul.f32 1.442695, %v3291_v34  ;;  %v3619_v17 = vmul.f32 1.442695, %v3292_v44  ;;  %v3621_v62 = vmul.f32 1.442695, %v3293_v19 }
 0x329   : > { %v8412_v57 = vmax.f32 %v8274_v15, %v11303_v54  ;;  %6120 = vpow2.f32 %v3607_v53  ;;  %v3623_v28 = vmul.f32 1.442695, %v3294_v33  ;;  %v3625_v10 = vmul.f32 1.442695, %v3295_v3  ;;  %v11322_v54 = vld [vmem:[#allocation60_spill] sm:$0xff] }
 0x32a   : > { %5440 = vmatpush3.bf16.msra.mxu0 %v11304_v58  ;;  %6122 = vpow2.f32 %v3609_v38  ;;  %v3627_v4 = vmul.f32 1.442695, %v3296_v52  ;;  %v3631_v12 = vmul.f32 1.442695, %v3298_v59  ;;  %v3633_v34 = vmul.f32 1.442695, %v3299_v56 }
 0x32b   : > { %6124 = vpow2.f32 %v3611_v50  ;;  %v8417_v22 = vmul.f32 1.442695, %v3300_v36  ;;  %v11305_v15 = vpack.c.bf16 %v8264_v55, %v8264_v55  ;;  %v8422_v49 = vmul.f32 1.442695, %v3301_v7  ;;  %v11317_v58 = vld [vmem:[#allocation55_spill] sm:$0xff] }
 0x32c   : > { %6126 = vpow2.f32 %v3613_v41  ;;  %v8424_v46 = vmul.f32 1.442695, %v3302_v51  ;;  %v8426_v19 = vmul.f32 1.442695, %v3303_v11  ;;  %v8428_v52 = vmul.f32 1.442695, %v3304_v43 }
 0x32d   : > { %4486 = vmatmul.mubr.bf16.vlgmr.msra.gmra.mrb[140].mxu0 %v11305_v15  ;;  %6128 = vpow2.f32 %v3615_v37  ;;  %v8430_v3 = vmul.f32 1.442695, %v3305_v25  ;;  %v8432_v56 = vmul.f32 1.442695, %v3306_v9  ;;  %v8434_v36 = vmul.f32 1.442695, %v3307_v63 }
 0x32e   : > { %4565 = vmatprep.mubr.bf16.mxu0 %v962_v8  ;;  %6130 = vpow2.f32 %v3617_v32  ;;  %v8436_v55 = vmul.f32 1.442695, %v3308_v40  ;;  %v8438_v33 = vmul.f32 1.442695, %v3309_v18  ;;  %v8440_v51 = vmul.f32 1.442695, %v3310_v21 }
 0x32f   : > { %6132 = vpow2.f32 %v3619_v17  ;;  %v8442_v7 = vmul.f32 1.442695, %v3311_v6  ;;  %v8444_v53 = vmul.f32 1.442695, %v3312_v24  ;;  %v8446_v44 = vmul.f32 1.442695, %v3313_v31 }
 0x330   : > { %6134 = vpow2.f32 %v3621_v62  ;;  %v8448_v25 = vmul.f32 1.442695, %v3314_v61  ;;  %v8450_v27 = vmul.f32 1.442695, %v3315_v35  ;;  %v11306_v40 = vld [vmem:[#allocation46_spill] sm:$0xff]  ;;  %v11307_v18 = vld [vmem:[#allocation48_spill] sm:$0xff] }
 0x331   : > { %6136 = vpow2.f32 %v3623_v28  ;;  %v11308_v21 = vld [vmem:[#allocation44_spill] sm:$0xff]  ;;  %v8458_v9 = vpop.f32.mrb[95].mxu0  ;;  %v8460_v63 = vpop.f32.mrb[116].mxu1  ;;  %v11311_v24 = vld [vmem:[#allocation47_spill] sm:$0xff]  ;;  %v11312_v31 = vld [vmem:[#allocation54_spill] sm:$0xff] }
 0x332   : > { %11309 = vst [vmem:[#allocation42_spill] sm:$0xff] %v8458_v9  ;;  %11310 = vst [vmem:[#allocation45_spill] sm:$0xff] %v8460_v63  ;;  %v8462_v6 = vpop.eup %6118  ;;  %6138 = vpow2.f32 %v3625_v10  ;;  %v11313_v35 = vld [vmem:[#allocation56_spill] sm:$0xff]  ;;  %v8470_v50 = vpop.f32.mrb[117].mxu1  ;;  %v11318_v62 = vld [vmem:[#allocation62_spill] sm:$0xff] }
 0x333   : > { %11314 = vst [vmem:[#allocation41_spill] sm:$0xff] %v8470_v50  ;;  %v8472_v8 = vpop.f32.mrb[96].mxu0  ;;  %v8474_v37 = vpop.eup %6120  ;;  %6140 = vpow2.f32 %v3627_v4  ;;  %v11316_v32 = vld [vmem:[#allocation52_spill] sm:$0xff]  ;;  %v11326_v59 = vld [vmem:[#allocation63_spill] sm:$0xff] }
 0x334   : > { %11315 = vst [vmem:[#allocation43_spill] sm:$0xff] %v8472_v8  ;;  %v8482_v10 = vpop.f32.mrb[118].mxu1  ;;  %v8484_v15 = vpop.f32.mrb[97].mxu0  ;;  %6142 = vpow2.f32 %v3629_v14  ;;  %v4063_v61 = vadd.f32 %v8474_v37, %v8462_v6  ;;  %v11321_v4 = vld [vmem:[#allocation64_spill] sm:$0xff]  ;;  %v11327_v14 = vld [vmem:[#allocation70_spill] sm:$0xff] }
 0x335   : > { %11319 = vst [vmem:[#allocation50_spill] sm:$0xff] %v8482_v10  ;;  %11320 = vst [vmem:[#allocation53_spill] sm:$0xff] %v8484_v15  ;;  %v8486_v38 = vpop.eup %6122  ;;  %v8494_v17 = vpop.f32.mrb[119].mxu1  ;;  %6144 = vpow2.f32 %v3631_v12  ;;  %v11328_v8 = vld [vmem:[#allocation20_spill] sm:$0xff]  ;;  %v11332_v12 = vld [vmem:[#allocation67_spill] sm:$0xff] }
 0x336   : > { %11323 = vst [vmem:[#allocation49_spill] sm:$0xff] %v8494_v17  ;;  %v8496_v11 = vpop.f32.mrb[98].mxu0  ;;  %v8498_v28 = vpop.eup %6124  ;;  %6146 = vpow2.f32 %v3633_v34  ;;  %v11337_v34 = vld [vmem:[#allocation32_spill] sm:$0xff]  ;;  %v11338_v17 = vld [vmem:[#allocation23_spill] sm:$0xff] }
 0x337   : > { %11324 = vst [vmem:[#allocation51_spill] sm:$0xff] %v8496_v11  ;;  %11325 = vst [vmem:[#allocation58_spill] sm:$0xff] %v8498_v28  ;;  %v8506_v41 = vpop.f32.mrb[99].mxu0  ;;  %v8508_v23 = vpop.f32.mrb[120].mxu1  ;;  %v4064_v11 = vadd.f32 %v8486_v38, %v4063_v61  ;;  %6148 = vpow2.f32 %v8417_v22  ;;  %v11341_v22 = vld [vmem:[#allocation30_spill] sm:$0xff] }
 0x338   : > { %11329 = vst [vmem:[#allocation61_spill] sm:$0xff] %v8506_v41  ;;  %11330 = vst [vmem:[#allocation57_spill] sm:$0xff] %v8508_v23  ;;  %v8510_v43 = vpop.eup %6126  ;;  %v8517_v63 = vpop.f32.mrb[121].mxu1  ;;  %v11336_v41 = vld [vmem:[#allocation25_spill] sm:$0xff]  ;;  %6150 = vpow2.f32 %v8422_v49  ;;  %v11346_v49 = vld [vmem:[#allocation36_spill] sm:$0xff] }
 0x339   : > { %11331 = vst [vmem:[#allocation59_spill] sm:$0xff] %v8510_v43  ;;  %11334 = vst [vmem:[#allocation66_spill] sm:$0xff] %v8517_v63  ;;  %v8519_v13 = vpop.f32.mrb[100].mxu0  ;;  %v8521_v15 = vpop.eup %6128  ;;  %v11342_v23 = vld [vmem:[#allocation37_spill] sm:$0xff]  ;;  %6152 = vpow2.f32 %v8424_v46 }
 0x33a   : > { %11335 = vst [vmem:[#allocation72_spill] sm:$0xff] %v8519_v13  ;;  %v8530_v50 = vpop.f32.mrb[122].mxu1  ;;  %v8532_v10 = vpop.f32.mrb[101].mxu0  ;;  %v4065_v13 = vadd.f32 %v8498_v28, %v4064_v11  ;;  %6154 = vpow2.f32 %v8426_v19 }
 0x33b   : > { %11339 = vst [vmem:[#allocation100_spill] sm:$0xff] %v8530_v50  ;;  %11340 = vst [vmem:[#allocation26_spill] sm:$0xff] %v8532_v10  ;;  %v8534_v63 = vpop.eup %6130  ;;  %v8542_v61 = vpop.f32.mrb[123].mxu1  ;;  %v11345_v10 = vld [vmem:[#allocation79_spill] sm:$0xff]  ;;  %6156 = vpow2.f32 %v8428_v52  ;;  %v11356_v52 = vsub.f32 %v11306_v40, %v8412_v57 }
 0x33c   : > { %11343 = vst [vmem:[#allocation65_spill] sm:$0xff] %v8542_v61  ;;  %v8544_v47 = vpop.f32.mrb[102].mxu0  ;;  %v8546_v9 = vpop.eup %6132  ;;  %v11349_v61 = vld [vmem:[#allocation84_spill] sm:$0xff]  ;;  %6158 = vpow2.f32 %v8430_v3 }
 0x33d   : > { %11344 = vst [vmem:[#allocation69_spill] sm:$0xff] %v8544_v47  ;;  %v8555_v16 = vpop.f32.mrb[103].mxu0  ;;  %v8557_v2 = vpop.eup %6134  ;;  %v4066_v47 = vadd.f32 %v8510_v43, %v4065_v13  ;;  %6160 = vpow2.f32 %v8432_v56  ;;  %v11355_v13 = vsub.f32 %v11231_v30, %v8279_v60  ;;  %v11360_v30 = vsub.f32 %v11307_v18, %v8412_v57 }
 0x33e   : > { %11348 = vst [vmem:[#allocation22_spill] sm:$0xff] %v8555_v16  ;;  %v8565_v28 = vpop.f32.mrb[124].mxu1  ;;  %v8567_v11 = vpop.eup %6136  ;;  %6162 = vpow2.f32 %v8434_v36  ;;  %v11364_v36 = vsub.f32 %v11311_v24, %v8412_v57  ;;  %v11365_v18 = vsub.f32 %v11312_v31, %v8412_v57  ;;  %v11367_v24 = vsub.f32 %v11316_v32, %v8412_v57 }
 0x33f   : > { %11351 = vst [vmem:[#allocation28_spill] sm:$0xff] %v8565_v28  ;;  %v8576_v16 = vpop.f32.mrb[125].mxu1  ;;  %v8578_v46 = vpop.eup %6138  ;;  %v4067_v50 = vadd.f32 %v8521_v15, %v4066_v47  ;;  %v3667_v3 = vmul.f32 1.442695, %v11355_v13  ;;  %v3671_v60 = vmul.f32 1.442695, %v11360_v30  ;;  %v11361_v13 = vsub.f32 %v11308_v21, %v8412_v57 }
 0x340   : > { %11352 = vst [vmem:[#allocation75_spill] sm:$0xff] %v8576_v16  ;;  %v8586_v28 = vpop.f32.mrb[126].mxu1  ;;  %v8588_v19 = vpop.f32.mrb[104].mxu0  ;;  %v3669_v16 = vmul.f32 1.442695, %v11356_v52  ;;  %6164 = vpow2.f32 %v8436_v55  ;;  %v11366_v21 = vsub.f32 %v11313_v35, %v8412_v57  ;;  %v11368_v31 = vsub.f32 %v11317_v58, %v8412_v57 }
 0x341   : > { %11353 = vst [vmem:[#allocation21_spill] sm:$0xff] %v8586_v28  ;;  %11354 = vst [vmem:[#allocation29_spill] sm:$0xff] %v8588_v19  ;;  %v8590_v43 = vpop.eup %6140  ;;  %v8601_v48 = vpop.f32.mrb[127].mxu1  ;;  %v4068_v56 = vadd.f32 %v8534_v63, %v4067_v50  ;;  %v8615_v47 = vmul.f32 1.442695, %v11361_v13  ;;  %6166 = vpow2.f32 %v8438_v33  ;;  %v11370_v33 = vsub.f32 %v11318_v62, %v8412_v57 }
 0x342   : > { %11357 = vst [vmem:[#allocation33_spill] sm:$0xff] %v8601_v48  ;;  %v8603_v28 = vpop.f32.mrb[105].mxu0  ;;  %v8605_v19 = vpop.eup %6142  ;;  %v8625_v48 = vmul.f32 1.442695, %v11364_v36  ;;  %v8630_v50 = vmul.f32 1.442695, %v11365_v18  ;;  %6168 = vpow2.f32 %v8440_v51  ;;  %v11371_v32 = vsub.f32 %v11321_v4, %v8412_v57 }
 0x343   : > { %11358 = vst [vmem:[#allocation27_spill] sm:$0xff] %v8603_v28  ;;  %11359 = vst [vmem:[#allocation34_spill] sm:$0xff] %v8605_v19  ;;  %v8617_v40 = vpop.f32.mrb[106].mxu0  ;;  %v8619_v52 = vpop.eup %6144  ;;  %v8635_v30 = vmul.f32 1.442695, %v11366_v21  ;;  %v4069_v55 = vadd.f32 %v8546_v9, %v4068_v56  ;;  %v11372_v58 = vsub.f32 %v11322_v54, %v8412_v57  ;;  %6170 = vpow2.f32 %v8442_v7 }
 0x344   : > { %11362 = vst [vmem:[#allocation80_spill] sm:$0xff] %v8617_v40  ;;  %11363 = vst [vmem:[#allocation83_spill] sm:$0xff] %v8619_v52  ;;  %v8637_v13 = vpop.eup %6146  ;;  %v8644_v36 = vmul.f32 1.442695, %v11367_v24  ;;  %v8649_v18 = vmul.f32 1.442695, %v11368_v31  ;;  %v11373_v62 = vsub.f32 %v11326_v59, %v8412_v57  ;;  %v11374_v4 = vsub.f32 %v11327_v14, %v8412_v57 }
 0x345   : > { %v8651_v40 = vpop.f32.mrb[107].mxu0  ;;  %v8653_v35 = vpop.eup %6148  ;;  %v8659_v56 = vmul.f32 1.442695, %v11370_v33  ;;  %v8664_v21 = vmul.f32 1.442695, %v11371_v32  ;;  %v4070_v51 = vadd.f32 %v8557_v2, %v4069_v55  ;;  %6172 = vpow2.f32 %v8444_v53 }
 0x346   : > { %11369 = vst [vmem:[#allocation103_spill] sm:$0xff] %v8651_v40  ;;  %v8669_v24 = vmul.f32 1.442695, %v11372_v58  ;;  %v8671_v31 = vpop.eup %6150  ;;  %v8678_v33 = vmul.f32 1.442695, %v11373_v62  ;;  %v11375_v54 = vsub.f32 %v11328_v8, %v8412_v57  ;;  %v11376_v55 = vsub.f32 %v11332_v12, %v8412_v57 }
 0x347   : > { %v8683_v32 = vmul.f32 1.442695, %v11374_v4  ;;  %v8685_v20 = vpop.eup %6152  ;;  %v11377_v58 = vsub.f32 %v11333_v26, %v8412_v57  ;;  %6174 = vpow2.f32 %v8446_v44  ;;  %v4071_v53 = vadd.f32 %v8567_v11, %v4070_v51 }
 0x348   : > { %v8691_v7 = vmul.f32 1.442695, %v11375_v54  ;;  %v8696_v59 = vmul.f32 1.442695, %v11376_v55  ;;  %v8703_v62 = vpop.eup %6154  ;;  %v11378_v8 = vsub.f32 %v11336_v41, %v8412_v57  ;;  %v11379_v12 = vsub.f32 %v11337_v34, %v8412_v57  ;;  %v8717_v55 = vpop.f32.mrb[108].mxu0 }
 0x349   : > { %v8701_v14 = vmul.f32 1.442695, %v11377_v58  ;;  %11380 = vst [vmem:[#allocation46_spill] sm:$0xff] %v8717_v55  ;;  %v8719_v26 = vpop.eup %6156  ;;  %6176 = vpow2.f32 %v8448_v25  ;;  %v11381_v44 = vsub.f32 %v11338_v17, %v8412_v57  ;;  %v11382_v41 = vsub.f32 %v11341_v22, %v8412_v57  ;;  %v8751_v55 = vpop.f32.mrb[109].mxu0 }
 0x34a   : > { %v8710_v4 = vmul.f32 1.442695, %v11378_v8  ;;  %v8715_v54 = vmul.f32 1.442695, %v11379_v12  ;;  %v11383_v34 = vsub.f32 %v11342_v23, %v8412_v57  ;;  %v8737_v12 = vpop.eup %6158  ;;  %6178 = vpow2.f32 %v8450_v27  ;;  %11387 = vst [vmem:[#allocation44_spill] sm:$0xff] %v8751_v55 }
 0x34b   : > { %v8725_v51 = vmul.f32 1.442695, %v11381_v44  ;;  %v8730_v58 = vmul.f32 1.442695, %v11382_v41  ;;  %v4072_v25 = vadd.f32 %v8578_v46, %v4071_v53  ;;  %v11384_v17 = vsub.f32 %v11345_v10, %v8412_v57  ;;  %v8753_v23 = vpop.eup %6160 }
 0x34c   : > { %v8735_v8 = vmul.f32 1.442695, %v11383_v34  ;;  %v11385_v22 = vsub.f32 %v11346_v49, %v8412_v57  ;;  %6180 = vpow2.f32 %v3667_v3  ;;  %v11388_v27 = vsub.f32 %v11347_v42, %v8412_v57 }
 0x34d   : > { %v8744_v44 = vmul.f32 1.442695, %v11384_v17  ;;  %v11389_v10 = vsub.f32 %v11349_v61, %v8412_v57  ;;  %v11390_v49 = vsub.f32 %v11350_v5, %v8412_v57  ;;  %6182 = vpow2.f32 %v3669_v16 }
 0x34e   : > { %v8749_v41 = vmul.f32 1.442695, %v11385_v22  ;;  %v8758_v34 = vmul.f32 1.442695, %v11388_v27  ;;  %v8770_v22 = vpop.eup %6162  ;;  %v11391_v42 = vsub.f32 %v11209_v45, %v8412_v57  ;;  %v11393_v61 = vsub.f32 %v11217_v1, %v8412_v57 }
 0x34f   : > { %v8763_v53 = vmul.f32 1.442695, %v11389_v10  ;;  %v8768_v17 = vmul.f32 1.442695, %v11390_v49  ;;  %v8783_v10 = vpop.f32.mrb[110].mxu0  ;;  %v8785_v5 = vpop.eup %6164  ;;  %6184 = vpow2.f32 %v3671_v60  ;;  %v11396_v49 = vsub.f32 %v11223_v0, %v8412_v57 }
 0x350   : > { %11386 = vst [vmem:[#allocation48_spill] sm:$0xff] %v8749_v41  ;;  %v4073_v41 = vadd.f32 %v8590_v43, %v4072_v25  ;;  %v8776_v3 = vmul.f32 1.442695, %v11391_v42  ;;  %v8781_v27 = vmul.f32 1.442695, %v11393_v61  ;;  %11395 = vst [vmem:[#allocation56_spill] sm:$0xff] %v8783_v10  ;;  %v11398_v45 = vsub.f32 %v11228_v39, %v8412_v57  ;;  %v8802_v61 = vpop.eup %6166 }
 0x351   : > { %v8790_v25 = vmul.f32 1.442695, %v11396_v49  ;;  %v11400_v1 = vsub.f32 %v11232_v29, %v8412_v57  ;;  %6186 = vpow2.f32 %v8615_v47  ;;  %v4325_v0 = vpack.c.bf16 %v8685_v20, %v8671_v31  ;;  %v8810_v39 = vpop.f32.mrb[111].mxu0  ;;  %v8812_v49 = vpop.eup %6168 }
 0x352   : > { %11392 = vst [vmem:[#allocation47_spill] sm:$0xff] %v8776_v3  ;;  %11394 = vst [vmem:[#allocation54_spill] sm:$0xff] %v8781_v27  ;;  %v8795_v16 = vmul.f32 1.442695, %v11398_v45  ;;  %v4074_v27 = vadd.f32 %v8605_v19, %v4073_v41  ;;  %v4317_v60 = vpack.c.bf16 %v8474_v37, %v8462_v6  ;;  %6188 = vpow2.f32 %v8625_v48  ;;  %v11403_v45 = vld [vmem:[#allocation58_spill] sm:$0xff]  ;;  %v11404_v6 = vld [vmem:[#allocation59_spill] sm:$0xff] }
 0x353   : > { %11397 = vst [vmem:[#allocation52_spill] sm:$0xff] %v8790_v25  ;;  %v8800_v42 = vmul.f32 1.442695, %v11400_v1  ;;  %11402 = vst [vmem:[#allocation64_spill] sm:$0xff] %v8810_v39  ;;  %v4326_v29 = vpack.c.bf16 %v8719_v26, %v8703_v62  ;;  %v4318_v41 = vpack.c.bf16 %v11403_v45, %v8486_v38  ;;  %v4327_v47 = vpack.c.bf16 %v8753_v23, %v8737_v12  ;;  %v8821_v1 = vpop.eup %6170  ;;  %v11414_v19 = vld [vmem:[#allocation86_spill] sm:$0xff] }
 0x354   : > { %11399 = vst [vmem:[#allocation55_spill] sm:$0xff] %v8795_v16  ;;  %6190 = vpow2.f32 %v8630_v50  ;;  %5447 = vmatprep.subr.bf16.mxu1 %v4325_v0  ;;  %v4319_v37 = vpack.c.bf16 %v8521_v15, %v11404_v6  ;;  %v4328_v48 = vpack.c.bf16 %v8785_v5, %v8770_v22  ;;  %v8829_v16 = vpop.f32.mrb[112].mxu0  ;;  %v8831_v25 = vpop.eup %6172  ;;  %v11407_v0 = vld [vmem:[#allocation92_spill] sm:$0xff] }
 0x355   : > { %11401 = vst [vmem:[#allocation62_spill] sm:$0xff] %v8800_v42  ;;  %v4075_v42 = vadd.f32 %v8619_v52, %v4074_v27  ;;  %11405 = vst [vmem:[#allocation60_spill] sm:$0xff] %v8829_v16  ;;  %6192 = vpow2.f32 %v8635_v30  ;;  %5448 = vmatpush3.bf16.msra.mxu1 %v4317_v60  ;;  %v11406_v27 = vld [vmem:[#allocation112_spill] sm:$0xff]  ;;  %v8840_v15 = vpop.f32.mrb[113].mxu0  ;;  %v8842_v6 = vpop.eup %6174 }
 0x356   : > { %v3083_v45 = vmax.f32 %v11407_v0, %v11406_v27  ;;  %11408 = vst [vmem:[#allocation63_spill] sm:$0xff] %v8840_v15  ;;  %6194 = vpow2.f32 %v8644_v36  ;;  %5449 = vmatprep.subr.bf16.mxu1 %v4326_v29  ;;  %v8850_v38 = vpop.f32.mrb[114].mxu0  ;;  %v8852_v50 = vpop.eup %6176  ;;  %v11410_v0 = vld [vmem:[#allocation119_spill] sm:$0xff]  ;;  %v11412_v36 = vld [vmem:[#allocation78_spill] sm:$0xff]  ;;  %v11415_v52 = vld [vmem:[#allocation116_spill] sm:$0xff] }
 0x357   : > { %v4076_v16 = vadd.f32 %v8637_v13, %v4075_v42  ;;  %11409 = vst [vmem:[#allocation70_spill] sm:$0xff] %v8850_v38  ;;  %6196 = vpow2.f32 %v8649_v18  ;;  %v8860_v29 = vpop.f32.mrb[115].mxu0  ;;  %v8862_v30 = vpop.eup %6178  ;;  %v11416_v3 = vmax.f32 %v11414_v19, %v11415_v52  ;;  %v11417_v18 = vld [vmem:[#allocation93_spill] sm:$0xff]  ;;  %v11555_v52 = vld [vmem:[#allocation8_spill] sm:$0xff] }
 0x358   : > { %v3084_v27 = vmax.f32 %v3083_v45, %v11410_v0  ;;  %11411 = vst [vmem:[#allocation20_spill] sm:$0xff] %v8860_v29  ;;  %6198 = vpow2.f32 %v8659_v56  ;;  %v8870_v45 = vpop.eup %6180  ;;  %v11413_v0 = vld [vmem:[#allocation90_spill] sm:$0xff]  ;;  %v3147_v56 = vmax.f32 %v8603_v28, %v8651_v40 }
 0x359   : > { %v4077_v60 = vadd.f32 %v8653_v35, %v4076_v16  ;;  %6200 = vpow2.f32 %v8664_v21  ;;  %5450 = vmatpush3.bf16.msra.mxu1 %v4318_v41  ;;  %v3125_v16 = vmax.f32 %v11416_v3, %v11413_v0  ;;  %v8880_v29 = vpop.eup %6182  ;;  %v11418_v21 = vsub.f32 %v11417_v18, %v8412_v57  ;;  %v11419_v3 = vld [vmem:[#allocation118_spill] sm:$0xff] }
 0x35a   : > { %v3085_v42 = vmax.f32 %v3084_v27, %v11412_v36  ;;  %6202 = vpow2.f32 %v8669_v24  ;;  %5451 = vmatprep.subr.bf16.mxu1 %v4327_v47  ;;  %v8891_v19 = vpop.eup %6184  ;;  %v11420_v28 = vld [vmem:[#allocation74_spill] sm:$0xff] }
 0x35b   : > { %v4078_v38 = vadd.f32 %v8671_v31, %v4077_v60  ;;  %v8887_v41 = vmul.f32 1.442695, %v11418_v21  ;;  %6204 = vpow2.f32 %v8678_v33  ;;  %v3126_v36 = vmax.f32 %v3125_v16, %v11420_v28  ;;  %v11421_v31 = vld [vmem:[#allocation29_spill] sm:$0xff]  ;;  %v8897_v24 = vpop.eup %6186  ;;  %v8905_v21 = vpop.f32.mrb[116].mxu0 }
 0x35c   : > { %v3086_v40 = vmax.f32 %v3085_v42, %v11419_v3  ;;  %v3148_v60 = vmax.f32 %v3147_v56, %v11421_v31  ;;  %6206 = vpow2.f32 %v8683_v32  ;;  %v4100_v47 = vadd.f32 %v8891_v19, %v8880_v29  ;;  %11422 = vst [vmem:[#allocation67_spill] sm:$0xff] %v8905_v21  ;;  %v8907_v33 = vpop.eup %6188  ;;  %v11423_v42 = vld [vmem:[#allocation31_spill] sm:$0xff]  ;;  %v11424_v56 = vld [vmem:[#allocation8_spill] sm:$0xff]  ;;  %v8913_v32 = vpop.f32.mrb[117].mxu0 }
 0x35d   : > { %v4079_v57 = vadd.f32 %v8685_v20, %v4078_v38  ;;  %6208 = vpow2.f32 %v8691_v7  ;;  %5452 = vmatpush3.bf16.msra.mxu1 %v4319_v37  ;;  %v3127_v27 = vmax.f32 %v3126_v36, %v11424_v56  ;;  %v11425_v20 = vld [vmem:[#allocation80_spill] sm:$0xff]  ;;  %11426 = vst [vmem:[#allocation73_spill] sm:$0xff] %v8913_v32  ;;  %v8922_v37 = vpop.f32.mrb[118].mxu0  ;;  %v11428_v36 = vld [vmem:[#allocation87_spill] sm:$0xff] }
 0x35e   : > { %v3087_v16 = vmax.f32 %v3086_v40, %v11423_v42  ;;  %v3149_v38 = vmax.f32 %v3148_v60, %v11425_v20  ;;  %v8915_v31 = vpop.eup %6190  ;;  %6210 = vpow2.f32 %v8696_v59  ;;  %v4101_v18 = vadd.f32 %v8897_v24, %v4100_v47  ;;  %5453 = vmatprep.subr.bf16.mxu1 %v4328_v48  ;;  %11427 = vst [vmem:[#allocation25_spill] sm:$0xff] %v8922_v37  ;;  %v11429_v20 = vld [vmem:[#allocation85_spill] sm:$0xff] }
 0x35f   : > { %v4080_v3 = vadd.f32 %v8703_v62, %v4079_v57  ;;  %v8924_v40 = vpop.eup %6192  ;;  %6212 = vpow2.f32 %v8701_v14  ;;  %v3128_v56 = vmax.f32 %v3127_v27, %v11429_v20  ;;  %v8930_v57 = vpop.f32.mrb[119].mxu0  ;;  %v11431_v27 = vpack.c.bf16 %v8546_v9, %v8534_v63 }
 0x360   : > { %v3088_v60 = vmax.f32 %v3087_v16, %v11428_v36  ;;  %v3150_v62 = vmax.f32 %v3149_v38, %v8751_v55  ;;  %11430 = vst [vmem:[#allocation32_spill] sm:$0xff] %v8930_v57  ;;  %v8932_v59 = vpop.eup %6194  ;;  %6214 = vpow2.f32 %v8710_v4  ;;  %v4102_v48 = vadd.f32 %v8907_v33, %v4101_v18  ;;  %v11432_v16 = vld [vmem:[#allocation18_spill] sm:$0xff]  ;;  %v11433_v55 = vld [vmem:[#allocation41_spill] sm:$0xff]  ;;  %v8971_v7 = vpop.f32.mrb[120].mxu0 }
 0x361   : > { %v4081_v47 = vadd.f32 %v8719_v26, %v4080_v3  ;;  %v8939_v14 = vpop.eup %6196  ;;  %6216 = vpow2.f32 %v8715_v54  ;;  %5454 = vmatpush3.bf16.msra.mxu1 %v11431_v27  ;;  %v3129_v20 = vmax.f32 %v3128_v56, %v11433_v55  ;;  %v11434_v9 = vpack.c.bf16 %v8812_v49, %v8802_v61  ;;  %v11435_v56 = vld [vmem:[#allocation91_spill] sm:$0xff]  ;;  %11438 = vst [vmem:[#allocation23_spill] sm:$0xff] %v8971_v7 }
 0x362   : > { %v3089_v38 = vmax.f32 %v3088_v60, %v11432_v16  ;;  %v3151_v26 = vmax.f32 %v3150_v62, %v8810_v39  ;;  %v8948_v4 = vpop.eup %6198  ;;  %6218 = vpow2.f32 %v8725_v51  ;;  %v4103_v18 = vadd.f32 %v8915_v31, %v4102_v48  ;;  %v11436_v62 = vld [vmem:[#allocation49_spill] sm:$0xff]  ;;  %v11443_v39 = vld [vmem:[#allocation48_spill] sm:$0xff] }
 0x363   : > { %v4082_v3 = vadd.f32 %v8737_v12, %v4081_v47  ;;  %5455 = vmatprep.subr.bf16.mxu1 %v11434_v9  ;;  %v8958_v63 = vpop.eup %6200  ;;  %6220 = vpow2.f32 %v8730_v58  ;;  %v3130_v27 = vmax.f32 %v3129_v20, %v11436_v62  ;;  %v11437_v12 = vld [vmem:[#allocation46_spill] sm:$0xff]  ;;  %v11439_v20 = vpack.c.bf16 %v8567_v11, %v8557_v2  ;;  %v11453_v62 = vld [vmem:[#allocation47_spill] sm:$0xff] }
 0x364   : > { %v3090_v60 = vmax.f32 %v3089_v38, %v11435_v56  ;;  %v3152_v47 = vmax.f32 %v3151_v26, %v11437_v12  ;;  %v8964_v51 = vpop.eup %6202  ;;  %6222 = vpow2.f32 %v8735_v8  ;;  %v4104_v54 = vadd.f32 %v8924_v40, %v4103_v18  ;;  %v11440_v38 = vld [vmem:[#allocation9_spill] sm:$0xff]  ;;  %v8982_v18 = vpop.f32.mrb[121].mxu0  ;;  %v11469_v56 = vld [vmem:[#allocation62_spill] sm:$0xff] }
 0x365   : > { %v4083_v48 = vadd.f32 %v8753_v23, %v4082_v3  ;;  %v8973_v58 = vpop.eup %6204  ;;  %6224 = vpow2.f32 %v8744_v44  ;;  %5456 = vmatpush3.bf16.msra.mxu1 %v11439_v20  ;;  %v11441_v23 = vld [vmem:[#allocation45_spill] sm:$0xff]  ;;  %11442 = vst [vmem:[#allocation30_spill] sm:$0xff] %v8982_v18  ;;  %v11444_v2 = vpack.c.bf16 %v8831_v25, %v8821_v1 }
 0x366   : > { %v3091_v26 = vmax.f32 %v3090_v60, %v11440_v38  ;;  %v3131_v3 = vmax.f32 %v3130_v27, %v11441_v23  ;;  %v3153_v8 = vmax.f32 %v3152_v47, %v8783_v10  ;;  %v8984_v12 = vpop.eup %6206  ;;  %6226 = vpow2.f32 %v11443_v39  ;;  %v8994_v60 = vpop.f32.mrb[122].mxu0  ;;  %v11446_v47 = vld [vmem:[#allocation98_spill] sm:$0xff] }
 0x367   : > { %v4084_v9 = vadd.f32 %v8770_v22, %v4083_v48  ;;  %v4105_v44 = vadd.f32 %v8932_v59, %v4104_v54  ;;  %5457 = vmatprep.subr.bf16.mxu1 %v11444_v2  ;;  %11445 = vst [vmem:[#allocation37_spill] sm:$0xff] %v8994_v60  ;;  %v8996_v27 = vpop.eup %6208  ;;  %6228 = vpow2.f32 %v8758_v34  ;;  %v11447_v22 = vld [vmem:[#allocation50_spill] sm:$0xff]  ;;  %v9002_v54 = vpop.f32.mrb[123].mxu0 }
 0x368   : > { %v3092_v20 = vmax.f32 %v3091_v26, %v11446_v47  ;;  %v3132_v48 = vmax.f32 %v3131_v3, %v11447_v22  ;;  %v3154_v39 = vmax.f32 %v3153_v8, %v8840_v15  ;;  %11448 = vst [vmem:[#allocation79_spill] sm:$0xff] %v9002_v54  ;;  %v9004_v10 = vpop.eup %6210  ;;  %6230 = vpow2.f32 %v8763_v53  ;;  %v11450_v3 = vld [vmem:[#allocation42_spill] sm:$0xff]  ;;  %v9043_v55 = vpop.f32.mrb[124].mxu0 }
 0x369   : > { %v4085_v2 = vadd.f32 %v8785_v5, %v4084_v9  ;;  %v4106_v11 = vadd.f32 %v8939_v14, %v4105_v44  ;;  %v9011_v34 = vpop.eup %6212  ;;  %6232 = vpow2.f32 %v8768_v17  ;;  %v11449_v26 = vpack.c.bf16 %v8590_v43, %v8578_v46  ;;  %v11451_v15 = vld [vmem:[#allocation66_spill] sm:$0xff]  ;;  %v11452_v5 = vld [vmem:[#allocation20_spill] sm:$0xff]  ;;  %11460 = vst [vmem:[#allocation36_spill] sm:$0xff] %v9043_v55 }
 0x36a   : > { %v3093_v8 = vmax.f32 %v3092_v20, %v11450_v3  ;;  %v3133_v22 = vmax.f32 %v3132_v48, %v11451_v15  ;;  %v3155_v9 = vmax.f32 %v3154_v39, %v11452_v5  ;;  %v9020_v53 = vpop.eup %6214  ;;  %6234 = vpow2.f32 %v11453_v62  ;;  %v11455_v20 = vld [vmem:[#allocation54_spill] sm:$0xff]  ;;  %v11459_v15 = vld [vmem:[#allocation52_spill] sm:$0xff] }
 0x36b   : > { %5458 = vmatpush3.bf16.msra.mxu1 %v11449_v26  ;;  %v4086_v44 = vadd.f32 %v8802_v61, %v4085_v2  ;;  %v4107_v23 = vadd.f32 %v8948_v4, %v4106_v11  ;;  %v11454_v17 = vpack.c.bf16 %v8852_v50, %v8842_v6  ;;  %v9030_v46 = vpop.eup %6216  ;;  %6236 = vpow2.f32 %v11455_v20  ;;  %v11456_v48 = vld [vmem:[#allocation6_spill] sm:$0xff]  ;;  %v11457_v26 = vld [vmem:[#allocation65_spill] sm:$0xff]  ;;  %v11458_v61 = vld [vmem:[#allocation60_spill] sm:$0xff] }
 0x36c   : > { %v3094_v39 = vmax.f32 %v3093_v8, %v11456_v48  ;;  %v3134_v5 = vmax.f32 %v3133_v22, %v11457_v26  ;;  %v3156_v2 = vmax.f32 %v3155_v9, %v11458_v61  ;;  %v9036_v62 = vpop.eup %6218  ;;  %6238 = vpow2.f32 %v11459_v15  ;;  %v11461_v8 = vld [vmem:[#allocation55_spill] sm:$0xff]  ;;  %v11463_v26 = vld [vmem:[#allocation34_spill] sm:$0xff] }
 0x36d   : > { %5459 = vmatprep.subr.bf16.mxu1 %v11454_v17  ;;  %v4087_v11 = vadd.f32 %v8812_v49, %v4086_v44  ;;  %v4108_v17 = vadd.f32 %v8958_v63, %v4107_v23  ;;  %v4341_v43 = vpack.c.bf16 %v9030_v46, %v9020_v53  ;;  %v9045_v20 = vpop.eup %6220  ;;  %6240 = vpow2.f32 %v11461_v8  ;;  %v11462_v22 = vld [vmem:[#allocation83_spill] sm:$0xff]  ;;  %v11466_v49 = vld [vmem:[#allocation57_spill] sm:$0xff]  ;;  %v11467_v15 = vld [vmem:[#allocation70_spill] sm:$0xff]  ;;  %v9054_v23 = vpop.f32.mrb[125].mxu0 }
 0x36e   : > { %v11464_v9 = vpack.c.bf16 %v11462_v22, %v11463_v26  ;;  %v11465_v61 = vld [vmem:[#allocation11_spill] sm:$0xff]  ;;  %v3135_v44 = vmax.f32 %v3134_v5, %v11466_v49  ;;  %v3157_v3 = vmax.f32 %v3156_v2, %v11467_v15  ;;  %11468 = vst [vmem:[#allocation77_spill] sm:$0xff] %v9054_v23  ;;  %v9056_v47 = vpop.eup %6222  ;;  %6242 = vpow2.f32 %v11469_v56  ;;  %v9066_v5 = vpop.f32.mrb[126].mxu0  ;;  %v11473_v56 = vld [vmem:[#allocation53_spill] sm:$0xff] }
 0x36f   : > { %v3095_v48 = vmax.f32 %v3094_v39, %v11465_v61  ;;  %v4088_v38 = vadd.f32 %v8821_v1, %v4087_v11  ;;  %v4109_v8 = vadd.f32 %v8964_v51, %v4108_v17  ;;  %5469 = vmatprep.subr.bf16.mxu0 %v4341_v43  ;;  %v4342_v26 = vpack.c.bf16 %v9045_v20, %v9036_v62  ;;  %v9068_v2 = vpop.eup %6224  ;;  %v11474_v43 = vld [vmem:[#allocation100_spill] sm:$0xff] }
 0x370   : > { %5460 = vmatpush3.bf16.msra.mxu1 %v11464_v9  ;;  %v11470_v39 = vpack.c.bf16 %v8870_v45, %v8862_v30  ;;  %11471 = vst [vmem:[#allocation84_spill] sm:$0xff] %v9066_v5  ;;  %6244 = vpow2.f32 %v8887_v41  ;;  %v11472_v1 = vpack.c.bf16 %v8891_v19, %v8880_v29  ;;  %v3136_v17 = vmax.f32 %v3135_v44, %v11474_v43  ;;  %v9077_v9 = vpop.f32.mrb[127].mxu0  ;;  %v9079_v15 = vpop.eup %6226  ;;  %v11476_v19 = vld [vmem:[#allocation5_spill] sm:$0xff] }
 0x371   : > { %v3096_v11 = vmax.f32 %v3095_v48, %v11473_v56  ;;  %v3158_v22 = vmax.f32 %v3157_v3, %v8913_v32  ;;  %11475 = vst [vmem:[#allocation88_spill] sm:$0xff] %v9077_v9  ;;  %v4110_v5 = vadd.f32 %v8973_v58, %v4109_v8  ;;  %v4343_v41 = vpack.c.bf16 %v9068_v2, %v9056_v47  ;;  %v9085_v29 = vpop.eup %6228  ;;  %v11478_v44 = vld [vmem:[#allocation61_spill] sm:$0xff]  ;;  %v11479_v32 = vld [vmem:[#allocation75_spill] sm:$0xff]  ;;  %v11480_v8 = vld [vmem:[#allocation14_spill] sm:$0xff] }
 0x372   : > { %5461 = vmatprep.subr.bf16.mxu1 %v11470_v39  ;;  %5470 = vmatpush3.bf16.msra.mxu0 %v11472_v1  ;;  %v4089_v39 = vadd.f32 %v8831_v25, %v4088_v38  ;;  %v959_v48 = vpack.c.bf16 %v11476_v19, %v11476_v19  ;;  %v11477_v3 = vpack.c.bf16 %v8653_v35, %v8637_v13  ;;  %v9095_v38 = vpop.eup %6230 }
 0x373   : > { %5471 = vmatprep.subr.bf16.mxu0 %v4342_v26  ;;  %v3097_v1 = vmax.f32 %v3096_v11, %v11478_v44  ;;  %v3137_v43 = vmax.f32 %v3136_v17, %v11479_v32  ;;  %v3159_v25 = vmax.f32 %v3158_v22, %v8930_v57  ;;  %v964_v26 = vpack.c.bf16 %v11480_v8, %v11480_v8  ;;  %v9103_v13 = vpop.eup %6232  ;;  %v11482_v11 = vld [vmem:[#allocation43_spill] sm:$0xff]  ;;  %v11483_v22 = vld [vmem:[#allocation33_spill] sm:$0xff]  ;;  %v11484_v8 = vld [vmem:[#allocation4_spill] sm:$0xff] }
 0x374   : > { %5462 = vmatpush3.bf16.msra.mxu1 %v11477_v3  ;;  %v4090_v49 = vadd.f32 %v8842_v6, %v4089_v39  ;;  %v4111_v56 = vadd.f32 %v8984_v12, %v4110_v5  ;;  %v4344_v19 = vpack.c.bf16 %v9085_v29, %v9079_v15  ;;  %v11481_v35 = vpack.c.bf16 %v8907_v33, %v8897_v24  ;;  %v9114_v5 = vpop.eup %6234  ;;  %v9120_v33 = vpop.f32.mrb[128].mxu0 }
 0x375   : > { %v3098_v17 = vmax.f32 %v3097_v1, %v11482_v11  ;;  %v3138_v3 = vmax.f32 %v3137_v43, %v11483_v22  ;;  %v3160_v57 = vmax.f32 %v3159_v25, %v8905_v21  ;;  %v11485_v6 = vrot.slane %v11484_v8, 4  ;;  %11486 = vst [vmem:[#allocation58_spill] sm:$0xff] %v9120_v33  ;;  %v9122_v43 = vpop.eup %6236  ;;  %v11487_v1 = vld [vmem:[#allocation51_spill] sm:$0xff]  ;;  %v9127_v21 = vpop.f32.mrb[129].mxu0 }
 0x376   : > { %5472 = vmatpush3.bf16.msra.mxu0 %v11481_v35  ;;  %v4091_v32 = vadd.f32 %v8852_v50, %v4090_v49  ;;  %v4112_v44 = vadd.f32 %v8996_v27, %v4111_v56  ;;  %v4345_v24 = vpack.c.bf16 %v9103_v13, %v9095_v38  ;;  %v11488_v35 = vld [vmem:[#allocation28_spill] sm:$0xff]  ;;  %11489 = vst [vmem:[#allocation59_spill] sm:$0xff] %v9127_v21  ;;  %v9129_v50 = vpop.eup %6238 }
 0x377   : > { %v4021_v39 = vadd.f32 %v11485_v6, %v11484_v8  ;;  %5473 = vmatprep.subr.bf16.mxu0 %v4343_v41  ;;  %4526 = vmatmul.mubr.bf16.vlgmr.msra.gmra.mrb[160].mxu1 %v959_v48  ;;  %v3099_v25 = vmax.f32 %v3098_v17, %v11487_v1  ;;  %v3139_v8 = vmax.f32 %v3138_v3, %v11488_v35  ;;  %v9135_v48 = vpop.f32.mrb[130].mxu0 }
 0x378   : > { %4605 = vmatprep.mubr.bf16.mxu1 %v964_v26  ;;  %v3161_v6 = vmax.f32 %v3160_v57, %v8922_v37  ;;  %v4092_v49 = vadd.f32 %v8862_v30, %v4091_v32  ;;  %v4113_v56 = vadd.f32 %v9004_v10, %v4112_v44  ;;  %v4346_v41 = vpack.c.bf16 %v9122_v43, %v9114_v5  ;;  %v9137_v26 = vpop.eup %6240  ;;  %v11492_v57 = vld [vmem:[#allocation26_spill] sm:$0xff]  ;;  %v11493_v37 = vld [vmem:[#allocation21_spill] sm:$0xff]  ;;  %v9145_v30 = vpop.f32.mrb[131].mxu0 }
 0x379   : > { %11490 = vst [vmem:[#allocation92_spill] sm:$0xff] %v9135_v48  ;;  %v11491_v17 = vpack.c.bf16 %v8924_v40, %v8915_v31  ;;  %v3100_v3 = vmax.f32 %v3099_v25, %v11492_v57  ;;  %v3140_v33 = vmax.f32 %v3139_v8, %v11493_v37  ;;  %11494 = vst [vmem:[#allocation86_spill] sm:$0xff] %v9145_v30  ;;  %v9147_v32 = vpop.eup %6242  ;;  %v4022_v40 = vrot.slane %v4021_v39, 2  ;;  %v11497_v25 = vld [vmem:[#allocation22_spill] sm:$0xff] }
 0x37a   : > { %v3162_v21 = vmax.f32 %v3161_v6, %v8982_v18  ;;  %v9150_v44 = vadd.f32 %v8870_v45, %v4092_v49  ;;  %v4114_v48 = vadd.f32 %v9011_v34, %v4113_v56  ;;  %v4347_v31 = vpack.c.bf16 %v9137_v26, %v9129_v50 }
 0x37b   : > { %5474 = vmatpush3.bf16.msra.mxu0 %v11491_v17  ;;  %v9155_v17 = vpop.eup %6244  ;;  %v3101_v8 = vmax.f32 %v3100_v3, %v11497_v25  ;;  %v3141_v37 = vrot.slane %v3140_v33, 4  ;;  %v11498_v49 = vpack.c.bf16 %v8939_v14, %v8932_v59  ;;  %v9168_v3 = vpop.f32.mrb[132].mxu0 }
 0x37c   : > { %11495 = vst [vmem:[#allocation93_spill] sm:$0xff] %v9150_v44  ;;  %5475 = vmatprep.subr.bf16.mxu0 %v4344_v19  ;;  %11496 = vst [vmem:[#allocation31_spill] sm:$0xff] %v9155_v17  ;;  %v3163_v6 = vmax.f32 %v3162_v21, %v9002_v54  ;;  %v4115_v18 = vadd.f32 %v9020_v53, %v4114_v48  ;;  %v4348_v45 = vpack.c.bf16 %v9155_v17, %v9147_v32  ;;  %v11499_v19 = vld [vmem:[#allocation72_spill] sm:$0xff]  ;;  %v11501_v54 = vld [vmem:[#allocation69_spill] sm:$0xff]  ;;  %v9172_v17 = vpop.f32.mrb[133].mxu0 }
 0x37d   : > { %v3102_v56 = vmax.f32 %v3101_v8, %v11499_v19  ;;  %v3142_v44 = vmax.f32 %v3140_v33, %v3141_v37  ;;  %11500 = vst [vmem:[#allocation87_spill] sm:$0xff] %v9168_v3  ;;  %v4023_v21 = vadd.f32 %v4022_v40, %v4021_v39  ;;  %11502 = vst [vmem:[#allocation18_spill] sm:$0xff] %v9172_v17  ;;  %v9175_v14 = vpop.f32.mrb[134].mxu0  ;;  %v11506_v33 = vld [vmem:[#allocation13_spill] sm:$0xff]  ;;  %v11507_v8 = vld [vmem:[#allocation7_spill] sm:$0xff] }
 0x37e   : > { %v3164_v30 = vmax.f32 %v3163_v6, %v8971_v7  ;;  %v4116_v35 = vadd.f32 %v9030_v46, %v4115_v18  ;;  %11503 = vst [vmem:[#allocation48_spill] sm:$0xff] %v9175_v14  ;;  %v11504_v37 = vpack.c.bf16 %v8958_v63, %v8948_v4  ;;  %v9181_v39 = vpop.f32.mrb[135].mxu0  ;;  %v4057_v40 = vrot.slane %v11506_v33, 4  ;;  %v11508_v6 = vld [vmem:[#allocation15_spill] sm:$0xff] }
 0x37f   : > { %5476 = vmatpush3.bf16.msra.mxu0 %v11498_v49  ;;  %v3103_v53 = vmax.f32 %v3102_v56, %v11501_v54  ;;  %v3143_v48 = vrot.slane %v3142_v44, 2  ;;  %11505 = vst [vmem:[#allocation47_spill] sm:$0xff] %v9181_v39  ;;  %v9187_v49 = vadd.f32 %v11508_v6, %v11507_v8  ;;  %v11514_v8 = vld [vmem:[#allocation38_spill] sm:$0xff]  ;;  %v11543_v3 = vld [vmem:[#allocation119_spill] sm:$0xff] }
 0x380   : > { %5477 = vmatprep.subr.bf16.mxu0 %v4345_v24  ;;  %v3165_v22 = vmax.f32 %v3164_v30, %v8994_v60  ;;  %v4117_v59 = vadd.f32 %v9036_v62, %v4116_v35  ;;  %v4024_v62 = vrot.slane %v4023_v21, 1  ;;  %v11544_v39 = vld [vmem:[#allocation78_spill] sm:$0xff] }
 0x381   : > { %v3104_v18 = vrot.slane %v3103_v53, 4  ;;  %v3144_v46 = vmax.f32 %v3142_v44, %v3143_v48  ;;  %v11509_v44 = vld [vmem:[#allocation81_spill] sm:$0xff]  ;;  %v11510_v48 = vpack.c.bf16 %v8973_v58, %v8964_v51  ;;  %v11512_v51 = vld [vmem:[#allocation71_spill] sm:$0xff] }
 0x382   : > { %v3166_v24 = vmax.f32 %v3165_v22, %v9054_v23  ;;  %v4118_v30 = vadd.f32 %v9045_v20, %v4117_v59  ;;  %v961_v22 = vpack.c.bf16 %v11509_v44, %v11509_v44  ;;  %v11520_v44 = vld [vmem:[#allocation99_spill] sm:$0xff] }
 0x383   : > { %5478 = vmatpush3.bf16.msra.mxu0 %v11504_v37  ;;  %v3105_v35 = vmax.f32 %v3103_v53, %v3104_v18  ;;  %v3145_v56 = vrot.slane %v3144_v46, 1  ;;  %v966_v53 = vpack.c.bf16 %v9187_v49, %v9187_v49  ;;  %v9207_v18 = vadd.f32 %v4057_v40, %v11506_v33  ;;  %v11515_v49 = vld [vmem:[#allocation16_spill] sm:$0xff]  ;;  %v11517_v33 = vld [vmem:[#allocation101_spill] sm:$0xff] }
 0x384   : > { %5479 = vmatprep.subr.bf16.mxu0 %v4346_v41  ;;  %v3167_v4 = vmax.f32 %v3166_v24, %v9077_v9  ;;  %v4119_v63 = vadd.f32 %v9056_v47, %v4118_v30  ;;  %v9204_v47 = vadd.f32 %v4024_v62, %v4023_v21  ;;  %v11516_v21 = vld [vmem:[#allocation24_spill] sm:$0xff]  ;;  %v11522_v62 = vld [vmem:[#allocation109_spill] sm:$0xff]  ;;  %v9271_v9 = vpop.f32.mrb[128].mxu1 }
 0x385   : > { %v3106_v20 = vrot.slane %v3105_v35, 2  ;;  %v9196_v59 = vmax.f32 %v3144_v46, %v3145_v56  ;;  %v11513_v46 = vld [vmem:[#allocation40_spill] sm:$0xff]  ;;  %11536 = vst [vmem:[#allocation52_spill] sm:$0xff] %v9271_v9  ;;  %v9281_v7 = vpop.f32.mrb[129].mxu1  ;;  %v4059_v9 = vrot.slane %v9207_v18, 2 }
 0x386   : > { %v9199_v37 = vmax.f32 %v3167_v4, %v9043_v55  ;;  %v4120_v41 = vadd.f32 %v9068_v2, %v4119_v63  ;;  %v11519_v4 = vld [vmem:[#allocation76_spill] sm:$0xff]  ;;  %v11525_v63 = vld [vmem:[#allocation115_spill] sm:$0xff]  ;;  %11541 = vst [vmem:[#allocation55_spill] sm:$0xff] %v9281_v7  ;;  %v9290_v17 = vpop.f32.mrb[130].mxu1  ;;  %6246 = vrcp.f32 %v9204_v47 }
 0x387   : > { %5480 = vmatpush3.bf16.msra.mxu0 %v11510_v48  ;;  %v3107_v24 = vmax.f32 %v3105_v35, %v3106_v20  ;;  %v11518_v35 = vpack.c.bf16 %v8996_v27, %v8984_v12  ;;  %v11521_v48 = vld [vmem:[#allocation39_spill] sm:$0xff]  ;;  %v11524_v27 = vld [vmem:[#allocation108_spill] sm:$0xff]  ;;  %11545 = vst [vmem:[#allocation83_spill] sm:$0xff] %v9290_v17  ;;  %v9346_v47 = vadd.f32 %v4059_v9, %v9207_v18 }
 0x388   : > { %11511 = vst [vmem:[#allocation54_spill] sm:$0xff] %v9199_v37  ;;  %5481 = vmatprep.subr.bf16.mxu0 %v4347_v31  ;;  %v4121_v2 = vadd.f32 %v9079_v15, %v4120_v41  ;;  %v11523_v31 = vld [vmem:[#allocation107_spill] sm:$0xff]  ;;  %v11532_v40 = vld [vmem:[#allocation96_spill] sm:$0xff] }
 0x389   : > { %v3108_v56 = vrot.slane %v3107_v24, 1  ;;  %v11529_v20 = vld [vmem:[#allocation95_spill] sm:$0xff] }
 0x38a   : > { %v4122_v41 = vadd.f32 %v9085_v29, %v4121_v2  ;;  %v11554_v29 = vld [vmem:[#allocation61_spill] sm:$0xff] }
 0x38b   : > { %5482 = vmatpush3.bf16.msra.mxu0 %v11518_v35  ;;  %v9238_v6 = vmax.f32 %v3107_v24, %v3108_v56  ;;  %v11528_v56 = vpack.c.bf16 %v9011_v34, %v9004_v10  ;;  %v11533_v24 = vld [vmem:[#allocation104_spill] sm:$0xff]  ;;  %v11534_v10 = vld [vmem:[#allocation106_spill] sm:$0xff] }
 0x38c   : > { %5483 = vmatprep.subr.bf16.mxu0 %v4348_v45  ;;  %v4123_v2 = vadd.f32 %v9095_v38, %v4122_v41  ;;  %v11530_v45 = vld [vmem:[#allocation97_spill] sm:$0xff]  ;;  %v11531_v38 = vld [vmem:[#allocation94_spill] sm:$0xff] }
 0x38d   : > { %v3349_v15 = vsub.f32 %v11529_v20, %v9238_v6  ;;  %v3350_v35 = vsub.f32 %v11530_v45, %v9238_v6  ;;  %v3351_v41 = vsub.f32 %v11531_v38, %v9238_v6  ;;  %v3352_v58 = vsub.f32 %v11532_v40, %v9238_v6  ;;  %v11537_v45 = vld [vmem:[#allocation105_spill] sm:$0xff]  ;;  %v11538_v38 = vld [vmem:[#allocation111_spill] sm:$0xff] }
 0x38e   : > { %v4124_v12 = vadd.f32 %v9103_v13, %v4123_v2  ;;  %v3353_v55 = vsub.f32 %v11533_v24, %v9238_v6  ;;  %v3354_v34 = vsub.f32 %v11534_v10, %v9238_v6  ;;  %v3356_v23 = vsub.f32 %v11537_v45, %v9238_v6  ;;  %v11539_v40 = vld [vmem:[#allocation113_spill] sm:$0xff]  ;;  %v11540_v2 = vld [vmem:[#allocation110_spill] sm:$0xff] }
 0x38f   : > { %5484 = vmatpush3.bf16.msra.mxu0 %v11528_v56  ;;  %v11535_v56 = vld [vmem:[#allocation102_spill] sm:$0xff]  ;;  %v3357_v60 = vsub.f32 %v11538_v38, %v9238_v6  ;;  %v3358_v13 = vsub.f32 %v11539_v40, %v9238_v6  ;;  %v3359_v24 = vsub.f32 %v11540_v2, %v9238_v6  ;;  %v3361_v45 = vsub.f32 %v11543_v3, %v9238_v6 }
 0x390   : > { %v3355_v20 = vsub.f32 %v11535_v56, %v9238_v6  ;;  %v4125_v10 = vadd.f32 %v9114_v5, %v4124_v12  ;;  %v11542_v56 = vld [vmem:[#allocation112_spill] sm:$0xff]  ;;  %v3362_v38 = vsub.f32 %v11544_v39, %v9238_v6  ;;  %v11546_v40 = vld [vmem:[#allocation118_spill] sm:$0xff]  ;;  %v3364_v28 = vsub.f32 %v11423_v42, %v9238_v6  ;;  %v9300_v12 = vpop.f32.mrb[131].mxu1  ;;  %v11548_v39 = vld [vmem:[#allocation91_spill] sm:$0xff] }
 0x391   : > { %v3360_v14 = vsub.f32 %v11542_v56, %v9238_v6  ;;  %v3363_v2 = vsub.f32 %v11546_v40, %v9238_v6  ;;  %v3365_v5 = vsub.f32 %v11428_v36, %v9238_v6  ;;  %11547 = vst [vmem:[#allocation34_spill] sm:$0xff] %v9300_v12  ;;  %v11550_v40 = vld [vmem:[#allocation98_spill] sm:$0xff]  ;;  %v3733_v17 = vmul.f32 1.442695, %v3349_v15  ;;  %v9338_v37 = vpop.f32.mrb[132].mxu1 }
 0x392   : > { %4566 = vmatmul.mubr.bf16.vlgmr.msra.gmra.mrb[144].mxu0 %v961_v22  ;;  %v3366_v22 = vsub.f32 %v11432_v16, %v9238_v6  ;;  %v4126_v3 = vadd.f32 %v9122_v43, %v4125_v10  ;;  %v11551_v42 = vld [vmem:[#allocation42_spill] sm:$0xff]  ;;  %v11553_v43 = vld [vmem:[#allocation53_spill] sm:$0xff]  ;;  %v3735_v30 = vmul.f32 1.442695, %v3350_v35  ;;  %v3737_v0 = vmul.f32 1.442695, %v3351_v41 }
 0x393   : > { %4645 = vmatprep.mubr.bf16.mxu0 %v966_v53  ;;  %v11549_v53 = vld [vmem:[#allocation9_spill] sm:$0xff]  ;;  %v11552_v36 = vld [vmem:[#allocation6_spill] sm:$0xff]  ;;  %v3739_v7 = vmul.f32 1.442695, %v3352_v58  ;;  %6248 = vpow2.f32 %v3733_v17  ;;  %v3741_v10 = vmul.f32 1.442695, %v3353_v55 }
 0x394   : > { %v4127_v56 = vadd.f32 %v9129_v50, %v4126_v3  ;;  %11556 = vst [vmem:[#allocation11_spill] sm:$0xff] %v9338_v37  ;;  %6250 = vpow2.f32 %v3735_v30  ;;  %v3743_v50 = vmul.f32 1.442695, %v3354_v34  ;;  %v3745_v58 = vmul.f32 1.442695, %v3355_v20  ;;  %v9343_v35 = vpop.f32.mrb[133].mxu1 }
 0x395   : > { %6252 = vpow2.f32 %v3737_v0  ;;  %11559 = vst [vmem:[#allocation5_spill] sm:$0xff] %v9343_v35  ;;  %v3747_v41 = vmul.f32 1.442695, %v3356_v23  ;;  %v9348_v17 = vpop.f32.mrb[134].mxu1  ;;  %v3751_v55 = vmul.f32 1.442695, %v3358_v13 }
 0x396   : > { %v4128_v3 = vadd.f32 %v9137_v26, %v4127_v56  ;;  %v11557_v26 = vld [vmem:[#allocation31_spill] sm:$0xff]  ;;  %6254 = vpow2.f32 %v3739_v7  ;;  %11560 = vst [vmem:[#allocation14_spill] sm:$0xff] %v9348_v17  ;;  %v11562_v34 = vld [vmem:[#allocation17_spill] sm:$0xff]  ;;  %v3753_v0 = vmul.f32 1.442695, %v3359_v24  ;;  %v4061_v7 = vrot.slane %v9346_v47, 1 }
 0x397   : > { %6256 = vpow2.f32 %v3741_v10  ;;  %v11561_v30 = vld [vmem:[#allocation35_spill] sm:$0xff]  ;;  %v3755_v20 = vmul.f32 1.442695, %v3360_v14  ;;  %v3759_v23 = vmul.f32 1.442695, %v3362_v38  ;;  %v11567_v14 = vld [vmem:[#allocation41_spill] sm:$0xff]  ;;  %v11585_v17 = vsub.f32 %v11549_v53, %v9238_v6 }
 0x398   : > { %v4129_v16 = vadd.f32 %v9147_v32, %v4128_v3  ;;  %v3749_v32 = vmul.f32 1.442695, %v3357_v60  ;;  %6258 = vpow2.f32 %v3743_v50  ;;  %v9352_v56 = vadd.f32 %v11562_v34, %v11561_v30  ;;  %v9355_v60 = vpop.eup %6246  ;;  %v11565_v50 = vld [vmem:[#allocation85_spill] sm:$0xff] }
 0x399   : > { %6260 = vpow2.f32 %v3745_v58  ;;  %v3761_v9 = vmul.f32 1.442695, %v3363_v2  ;;  %v3763_v18 = vmul.f32 1.442695, %v3364_v28  ;;  %11564 = vst [vmem:[#allocation4_spill] sm:$0xff] %v9355_v60  ;;  %v11568_v38 = vld [vmem:[#allocation49_spill] sm:$0xff] }
 0x39a   : > { %v9341_v15 = vadd.f32 %v11557_v26, %v4129_v16  ;;  %11563 = vst [vmem:[#allocation43_spill] sm:$0xff] %v9352_v56  ;;  %6262 = vpow2.f32 %v3747_v41  ;;  %v3757_v16 = vmul.f32 1.442695, %v3361_v45  ;;  %v3765_v10 = vmul.f32 1.442695, %v3365_v5  ;;  %v9359_v26 = vpop.f32.mrb[135].mxu1 }
 0x39b   : > { %6264 = vpow2.f32 %v3749_v32  ;;  %v3767_v13 = vmul.f32 1.442695, %v3366_v22  ;;  %11566 = vst [vmem:[#allocation51_spill] sm:$0xff] %v9359_v26  ;;  %v11569_v28 = vld [vmem:[#allocation45_spill] sm:$0xff]  ;;  %v9369_v41 = vpop.f32.mrb[136].mxu1  ;;  %v11571_v22 = vld [vmem:[#allocation50_spill] sm:$0xff]  ;;  %v11582_v32 = vsub.f32 %v11548_v39, %v9238_v6 }
 0x39c   : > { %11558 = vst [vmem:[#allocation62_spill] sm:$0xff] %v9341_v15  ;;  %6266 = vpow2.f32 %v3751_v55  ;;  %11570 = vst [vmem:[#allocation26_spill] sm:$0xff] %v9369_v41  ;;  %v11572_v55 = vld [vmem:[#allocation66_spill] sm:$0xff]  ;;  %v9379_v45 = vpop.f32.mrb[137].mxu1  ;;  %v11575_v3 = vld [vmem:[#allocation57_spill] sm:$0xff] }
 0x39d   : > { %v9361_v24 = vpop.eup %6248  ;;  %6268 = vpow2.f32 %v3753_v0  ;;  %11574 = vst [vmem:[#allocation22_spill] sm:$0xff] %v9379_v45  ;;  %v9389_v15 = vpop.f32.mrb[138].mxu1  ;;  %v3771_v45 = vmul.f32 1.442695, %v11585_v17  ;;  %v11589_v17 = vsub.f32 %v11551_v42, %v9238_v6 }
 0x39e   : > { %v9371_v5 = vpop.eup %6250  ;;  %6270 = vpow2.f32 %v3755_v20  ;;  %11577 = vst [vmem:[#allocation72_spill] sm:$0xff] %v9389_v15  ;;  %v9399_v34 = vpop.f32.mrb[139].mxu1  ;;  %v3769_v15 = vmul.f32 1.442695, %v11582_v32 }
 0x39f   : > { %v9381_v2 = vpop.eup %6252  ;;  %6272 = vpow2.f32 %v3757_v16  ;;  %v4137_v58 = vadd.f32 %v9371_v5, %v9361_v24  ;;  %11581 = vst [vmem:[#allocation69_spill] sm:$0xff] %v9399_v34  ;;  %v9409_v0 = vpop.f32.mrb[140].mxu1 }
 0x3a0   : > { %v9391_v30 = vpop.eup %6254  ;;  %6274 = vpow2.f32 %v3759_v23  ;;  %11584 = vst [vmem:[#allocation13_spill] sm:$0xff] %v9409_v0  ;;  %v9424_v0 = vpop.f32.mrb[141].mxu1 }
 0x3a1   : > { %v9401_v20 = vpop.eup %6256  ;;  %6276 = vpow2.f32 %v3761_v9  ;;  %v4138_v23 = vadd.f32 %v9381_v2, %v4137_v58  ;;  %v11587_v58 = vsub.f32 %v11550_v40, %v9238_v6  ;;  %11588 = vst [vmem:[#allocation7_spill] sm:$0xff] %v9424_v0  ;;  %v11591_v40 = vsub.f32 %v11552_v36, %v9238_v6  ;;  %v9445_v53 = vpop.f32.mrb[142].mxu1 }
 0x3a2   : > { %v9411_v16 = vpop.eup %6258  ;;  %6278 = vpow2.f32 %v3763_v18  ;;  %v3775_v18 = vmul.f32 1.442695, %v11589_v17  ;;  %11593 = vst [vmem:[#allocation81_spill] sm:$0xff] %v9445_v53  ;;  %v11596_v17 = vsub.f32 %v11482_v11, %v9238_v6  ;;  %v9467_v53 = vpop.f32.mrb[143].mxu1  ;;  %v11600_v11 = vsub.f32 %v11497_v25, %v9238_v6 }
 0x3a3   : > { %v9416_v41 = vpop.eup %6260  ;;  %6280 = vpow2.f32 %v3765_v10  ;;  %v3773_v32 = vmul.f32 1.442695, %v11587_v58  ;;  %v4139_v60 = vadd.f32 %v9391_v30, %v4138_v23  ;;  %v9434_v10 = vadd.f32 %v4061_v7, %v9346_v47  ;;  %11599 = vst [vmem:[#allocation71_spill] sm:$0xff] %v9467_v53 }
 0x3a4   : > { %v9426_v12 = vpop.eup %6262  ;;  %6282 = vpow2.f32 %v3767_v13  ;;  %v3777_v23 = vmul.f32 1.442695, %v11591_v40  ;;  %v11592_v58 = vsub.f32 %v11465_v61, %v9238_v6  ;;  %v11594_v47 = vsub.f32 %v11553_v43, %v9238_v6 }
 0x3a5   : > { %11590 = vst [vmem:[#allocation15_spill] sm:$0xff] %v9434_v10  ;;  %v9436_v39 = vpop.eup %6264  ;;  %6284 = vpow2.f32 %v3769_v15  ;;  %v4140_v13 = vadd.f32 %v9401_v20, %v4139_v60  ;;  %v11595_v15 = vsub.f32 %v11554_v29, %v9238_v6  ;;  %v3785_v61 = vmul.f32 1.442695, %v11596_v17  ;;  %v9489_v10 = vpop.f32.mrb[144].mxu1 }
 0x3a6   : > { %v3779_v9 = vmul.f32 1.442695, %v11592_v58  ;;  %v9447_v42 = vpop.eup %6266  ;;  %6286 = vpow2.f32 %v3771_v45  ;;  %v3781_v7 = vmul.f32 1.442695, %v11594_v47  ;;  %v11597_v60 = vsub.f32 %v11487_v1, %v9238_v6  ;;  %11605 = vst [vmem:[#allocation40_spill] sm:$0xff] %v9489_v10 }
 0x3a7   : > { %v3783_v36 = vmul.f32 1.442695, %v11595_v15  ;;  %v9458_v40 = vpop.eup %6268  ;;  %6288 = vpow2.f32 %v3773_v32  ;;  %v11598_v45 = vsub.f32 %v11492_v57, %v9238_v6  ;;  %v4141_v47 = vadd.f32 %v9411_v16, %v4140_v13 }
 0x3a8   : > { %v3787_v58 = vmul.f32 1.442695, %v11597_v60  ;;  %v9469_v29 = vpop.eup %6270  ;;  %6290 = vpow2.f32 %v3775_v18  ;;  %v3791_v15 = vmul.f32 1.442695, %v11600_v11  ;;  %v11601_v32 = vsub.f32 %v11499_v19, %v9238_v6 }
 0x3a9   : > { %v3789_v43 = vmul.f32 1.442695, %v11598_v45  ;;  %v11602_v17 = vsub.f32 %v11501_v54, %v9238_v6  ;;  %v9480_v60 = vpop.eup %6272  ;;  %6292 = vpow2.f32 %v3777_v23  ;;  %v4142_v13 = vadd.f32 %v9416_v41, %v4141_v47 }
 0x3aa   : > { %v3793_v1 = vmul.f32 1.442695, %v11601_v32  ;;  %v11603_v18 = vsub.f32 %v11512_v51, %v9196_v59  ;;  %v11604_v25 = vsub.f32 %v11513_v46, %v9196_v59  ;;  %v9491_v19 = vpop.eup %6274  ;;  %6294 = vpow2.f32 %v3779_v9 }
 0x3ab   : > { %v3795_v57 = vmul.f32 1.442695, %v11602_v17  ;;  %v11606_v54 = vsub.f32 %v11514_v8, %v9196_v59  ;;  %v11607_v23 = vsub.f32 %v11515_v49, %v9196_v59  ;;  %v11608_v51 = vsub.f32 %v11516_v21, %v9196_v59  ;;  %v9508_v32 = vpop.eup %6276 }
 0x3ac   : > { %v3797_v45 = vmul.f32 1.442695, %v11603_v18  ;;  %v3799_v11 = vmul.f32 1.442695, %v11604_v25  ;;  %6296 = vpow2.f32 %v3781_v7  ;;  %v4143_v9 = vadd.f32 %v9426_v12, %v4142_v13  ;;  %v9521_v25 = vpop.f32.mrb[145].mxu1  ;;  %v9523_v21 = vpop.eup %6278 }
 0x3ad   : > { %v9496_v6 = vmul.f32 1.442695, %v11606_v54  ;;  %v9501_v47 = vmul.f32 1.442695, %v11607_v23  ;;  %v9506_v46 = vmul.f32 1.442695, %v11608_v51  ;;  %v11609_v8 = vsub.f32 %v11517_v33, %v9196_v59  ;;  %v9540_v51 = vpop.eup %6280 }
 0x3ae   : > { %v11610_v49 = vsub.f32 %v11519_v4, %v9196_v59  ;;  %11611 = vst [vmem:[#allocation38_spill] sm:$0xff] %v9521_v25  ;;  %6298 = vpow2.f32 %v3783_v36  ;;  %v11612_v7 = vsub.f32 %v11520_v44, %v9196_v59  ;;  %v11613_v33 = vsub.f32 %v11521_v48, %v9196_v59 }
 0x3af   : > { %v9514_v17 = vmul.f32 1.442695, %v11609_v8  ;;  %v11614_v4 = vsub.f32 %v11522_v62, %v9196_v59  ;;  %6300 = vpow2.f32 %v3785_v61  ;;  %v4144_v36 = vadd.f32 %v9436_v39, %v4143_v9  ;;  %v9555_v62 = vpop.eup %6282 }
 0x3b0   : > { %v9519_v18 = vmul.f32 1.442695, %v11610_v49  ;;  %v9528_v54 = vmul.f32 1.442695, %v11612_v7  ;;  %v9533_v13 = vmul.f32 1.442695, %v11613_v33  ;;  %v11615_v44 = vsub.f32 %v11523_v31, %v9196_v59 }
 0x3b1   : > { %v9538_v23 = vmul.f32 1.442695, %v11614_v4  ;;  %v11616_v48 = vsub.f32 %v11524_v27, %v9196_v59  ;;  %v9553_v7 = vpop.f32.mrb[146].mxu1  ;;  %6302 = vpow2.f32 %v3787_v58  ;;  %v11618_v61 = vsub.f32 %v11525_v63, %v9196_v59  ;;  %v9568_v27 = vpop.eup %6284 }
 0x3b2   : > { %v9546_v8 = vmul.f32 1.442695, %v11615_v44  ;;  %11617 = vst [vmem:[#allocation16_spill] sm:$0xff] %v9553_v7  ;;  %v4349_v31 = vpack.c.bf16 %v9371_v5, %v9361_v24  ;;  %v4350_v9 = vpack.c.bf16 %v9391_v30, %v9381_v2  ;;  %v9566_v4 = vpop.f32.mrb[147].mxu1  ;;  %6304 = vpow2.f32 %v3789_v43  ;;  %v11621_v5 = vld [vmem:[#allocation84_spill] sm:$0xff]  ;;  %v11622_v30 = vld [vmem:[#allocation54_spill] sm:$0xff] }
 0x3b3   : > { %v9551_v49 = vmul.f32 1.442695, %v11616_v48  ;;  %v9560_v33 = vmul.f32 1.442695, %v11618_v61  ;;  %11619 = vst [vmem:[#allocation24_spill] sm:$0xff] %v9566_v4  ;;  %v4145_v44 = vadd.f32 %v9447_v42, %v4144_v36  ;;  %v4357_v58 = vpack.c.bf16 %v9555_v62, %v9540_v51  ;;  %v9575_v48 = vpop.f32.mrb[148].mxu1  ;;  %v9577_v61 = vpop.eup %6286 }
 0x3b4   : > { %11620 = vst [vmem:[#allocation101_spill] sm:$0xff] %v9575_v48  ;;  %6306 = vpow2.f32 %v3791_v15  ;;  %v3169_v43 = vmax.f32 %v11622_v30, %v11621_v5  ;;  %v9585_v36 = vpop.f32.mrb[149].mxu1  ;;  %v9587_v7 = vpop.eup %6288  ;;  %v4358_v15 = vpack.c.bf16 %v9577_v61, %v9568_v27  ;;  %v11625_v30 = vld [vmem:[#allocation59_spill] sm:$0xff] }
 0x3b5   : > { %11623 = vst [vmem:[#allocation76_spill] sm:$0xff] %v9585_v36  ;;  %6308 = vpow2.f32 %v3793_v1  ;;  %v4146_v63 = vadd.f32 %v9458_v40, %v4145_v44  ;;  %5491 = vmatprep.subr.bf16.mxu1 %v4357_v58  ;;  %v9594_v48 = vpop.f32.mrb[150].mxu1  ;;  %v9596_v2 = vpop.eup %6290  ;;  %v11630_v1 = vld [vmem:[#allocation117_spill] sm:$0xff] }
 0x3b6   : > { %11624 = vst [vmem:[#allocation99_spill] sm:$0xff] %v9594_v48  ;;  %6310 = vpow2.f32 %v3795_v57  ;;  %5492 = vmatpush3.bf16.msra.mxu1 %v4349_v31  ;;  %v3170_v36 = vmax.f32 %v3169_v43, %v11625_v30  ;;  %v9603_v58 = vpop.f32.mrb[151].mxu1  ;;  %v9605_v10 = vpop.eup %6292  ;;  %v4359_v57 = vpack.c.bf16 %v9596_v2, %v9587_v7  ;;  %v11627_v31 = vld [vmem:[#allocation34_spill] sm:$0xff]  ;;  %v11628_v48 = vld [vmem:[#allocation55_spill] sm:$0xff]  ;;  %v11631_v44 = vsub.f32 %v11630_v1, %v9196_v59 }
 0x3b7   : > { %11626 = vst [vmem:[#allocation39_spill] sm:$0xff] %v9603_v58  ;;  %v4147_v24 = vadd.f32 %v9469_v29, %v4146_v63  ;;  %6312 = vpow2.f32 %v3797_v45  ;;  %5493 = vmatprep.subr.bf16.mxu1 %v4358_v15  ;;  %v3184_v43 = vmax.f32 %v11628_v48, %v11627_v31  ;;  %v9612_v4 = vpop.eup %6294  ;;  %v11632_v58 = vld [vmem:[#allocation114_spill] sm:$0xff]  ;;  %v11635_v31 = vld [vmem:[#allocation52_spill] sm:$0xff] }
 0x3b8   : > { %11629 = vst [vmem:[#allocation109_spill] sm:$0xff] %v9612_v4  ;;  %6314 = vpow2.f32 %v3799_v11  ;;  %v9617_v25 = vmul.f32 1.442695, %v11631_v44  ;;  %v11633_v30 = vsub.f32 %v11632_v58, %v9196_v59  ;;  %v11634_v45 = vld [vmem:[#allocation86_spill] sm:$0xff]  ;;  %v9625_v5 = vpop.eup %6296  ;;  %v4360_v11 = vpack.c.bf16 %v9612_v4, %v9605_v10  ;;  %v11637_v58 = vld [vmem:[#allocation116_spill] sm:$0xff] }
 0x3b9   : > { %v3171_v15 = vmax.f32 %v3170_v36, %v11634_v45  ;;  %v4148_v56 = vadd.f32 %v9480_v60, %v4147_v24  ;;  %6316 = vpow2.f32 %v9496_v6  ;;  %v3185_v1 = vmax.f32 %v3184_v43, %v11635_v31  ;;  %v9632_v44 = vpop.eup %6298  ;;  %v11639_v36 = vld [vmem:[#allocation90_spill] sm:$0xff]  ;;  %v9653_v31 = vpop.f32.mrb[152].mxu1 }
 0x3ba   : > { %v9622_v63 = vmul.f32 1.442695, %v11633_v30  ;;  %11636 = vst [vmem:[#allocation107_spill] sm:$0xff] %v9632_v44  ;;  %6318 = vpow2.f32 %v9501_v47  ;;  %v11638_v30 = vsub.f32 %v11637_v58, %v9196_v59  ;;  %v11640_v45 = vsub.f32 %v11639_v36, %v9196_v59  ;;  %5494 = vmatpush3.bf16.msra.mxu1 %v4350_v9  ;;  %v11641_v6 = vld [vmem:[#allocation58_spill] sm:$0xff]  ;;  %v9646_v4 = vpop.eup %6300  ;;  %v11642_v58 = vld [vmem:[#allocation83_spill] sm:$0xff]  ;;  %11643 = vst [vmem:[#allocation108_spill] sm:$0xff] %v9653_v31 }
 0x3bb   : > { %v3172_v53 = vmax.f32 %v3171_v15, %v11641_v6  ;;  %v4149_v43 = vadd.f32 %v9491_v19, %v4148_v56  ;;  %6320 = vpow2.f32 %v9506_v46  ;;  %5495 = vmatprep.subr.bf16.mxu1 %v4359_v57  ;;  %v4361_v47 = vpack.c.bf16 %v9632_v44, %v9625_v5  ;;  %v9655_v36 = vpop.eup %6302  ;;  %v11644_v9 = vld [vmem:[#allocation74_spill] sm:$0xff]  ;;  %v11647_v57 = vld [vmem:[#allocation92_spill] sm:$0xff]  ;;  %v9669_v44 = vpop.f32.mrb[153].mxu1 }
 0x3bc   : > { %v9638_v48 = vmul.f32 1.442695, %v11638_v30  ;;  %v9643_v24 = vmul.f32 1.442695, %v11640_v45  ;;  %v3186_v30 = vmax.f32 %v3185_v1, %v11642_v58  ;;  %6322 = vpow2.f32 %v9514_v17  ;;  %11648 = vst [vmem:[#allocation115_spill] sm:$0xff] %v9669_v44  ;;  %v9671_v1 = vpop.eup %6304  ;;  %v11726_v44 = vld [vmem:[#allocation88_spill] sm:$0xff] }
 0x3bd   : > { %v11645_v45 = vsub.f32 %v11644_v9, %v9196_v59  ;;  %v11646_v56 = vsub.f32 %v11555_v52, %v9196_v59  ;;  %v3173_v6 = vmax.f32 %v3172_v53, %v11647_v57  ;;  %v4150_v58 = vadd.f32 %v9508_v32, %v4149_v43 }
 0x3be   : > { %6324 = vpow2.f32 %v9519_v18  ;;  %v3187_v9 = vmax.f32 %v3186_v30, %v9343_v35  ;;  %v9680_v52 = vpop.eup %6306  ;;  %v11650_v53 = vsub.f32 %v11565_v50, %v9196_v59  ;;  %v11651_v43 = vsub.f32 %v11567_v14, %v9196_v59  ;;  %v11653_v30 = vld [vmem:[#allocation18_spill] sm:$0xff] }
 0x3bf   : > { %v9661_v15 = vmul.f32 1.442695, %v11645_v45  ;;  %v9666_v46 = vmul.f32 1.442695, %v11646_v56  ;;  %v9678_v45 = vpop.f32.mrb[154].mxu1  ;;  %6326 = vpow2.f32 %v9528_v54  ;;  %v11652_v17 = vpack.c.bf16 %v9411_v16, %v9401_v20  ;;  %v9699_v31 = vpop.eup %6308 }
 0x3c0   : > { %11649 = vst [vmem:[#allocation95_spill] sm:$0xff] %v9678_v45  ;;  %v9686_v56 = vmul.f32 1.442695, %v11650_v53  ;;  %v9691_v18 = vmul.f32 1.442695, %v11651_v43  ;;  %v3174_v35 = vmax.f32 %v3173_v6, %v11653_v30  ;;  %v9697_v45 = vpop.f32.mrb[155].mxu1  ;;  %v4151_v54 = vadd.f32 %v9523_v21, %v4150_v58  ;;  %v9706_v53 = vpop.eup %6310 }
 0x3c1   : > { %5496 = vmatpush3.bf16.msra.mxu1 %v11652_v17  ;;  %11654 = vst [vmem:[#allocation97_spill] sm:$0xff] %v9697_v45  ;;  %6328 = vpow2.f32 %v9533_v13  ;;  %v3188_v14 = vmax.f32 %v3187_v9, %v9359_v26  ;;  %v11655_v20 = vsub.f32 %v11568_v38, %v9196_v59  ;;  %v11656_v6 = vsub.f32 %v11569_v28, %v9196_v59  ;;  %v11657_v13 = vld [vmem:[#allocation47_spill] sm:$0xff]  ;;  %v9720_v17 = vpop.eup %6312 }
 0x3c2   : > { %5497 = vmatprep.subr.bf16.mxu1 %v4360_v11  ;;  %6330 = vpow2.f32 %v9538_v23  ;;  %v3175_v11 = vmax.f32 %v3174_v35, %v11657_v13  ;;  %v4152_v9 = vadd.f32 %v9540_v51, %v4151_v54  ;;  %v9727_v43 = vpop.eup %6314  ;;  %v11658_v28 = vsub.f32 %v11571_v22, %v9196_v59  ;;  %v11661_v54 = vld [vmem:[#allocation87_spill] sm:$0xff] }
 0x3c3   : > { %v9712_v16 = vmul.f32 1.442695, %v11655_v20  ;;  %v9717_v58 = vmul.f32 1.442695, %v11656_v6  ;;  %6332 = vpow2.f32 %v9546_v8  ;;  %v3189_v38 = vmax.f32 %v3188_v14, %v9338_v37  ;;  %v9744_v6 = vpop.eup %6316 }
 0x3c4   : > { %6334 = vpow2.f32 %v9551_v49  ;;  %v9733_v20 = vmul.f32 1.442695, %v11658_v28  ;;  %v11659_v35 = vsub.f32 %v11572_v55, %v9196_v59  ;;  %v11660_v8 = vpack.c.bf16 %v9426_v12, %v9416_v41  ;;  %v9752_v28 = vpop.f32.mrb[156].mxu1  ;;  %v11663_v12 = vld [vmem:[#allocation65_spill] sm:$0xff] }
 0x3c5   : > { %v3176_v14 = vmax.f32 %v3175_v11, %v11661_v54  ;;  %v4153_v49 = vadd.f32 %v9555_v62, %v4152_v9  ;;  %6336 = vpow2.f32 %v9560_v33  ;;  %v4174_v22 = vadd.f32 %v9727_v43, %v9720_v17  ;;  %11662 = vst [vmem:[#allocation94_spill] sm:$0xff] %v9752_v28  ;;  %v11665_v62 = vld [vmem:[#allocation48_spill] sm:$0xff]  ;;  %v11666_v9 = vld [vmem:[#allocation14_spill] sm:$0xff]  ;;  %v9764_v23 = vpop.f32.mrb[157].mxu1  ;;  %v11738_v54 = vld [vmem:[#allocation15_spill] sm:$0xff] }
 0x3c6   : > { %v9738_v51 = vmul.f32 1.442695, %v11659_v35  ;;  %5498 = vmatpush3.bf16.msra.mxu1 %v11660_v8  ;;  %v9754_v35 = vpop.eup %6318  ;;  %6338 = vpow2.f32 %v9617_v25  ;;  %v11664_v41 = vsub.f32 %v11663_v12, %v9196_v59  ;;  %v3190_v8 = vmax.f32 %v3189_v38, %v11666_v9  ;;  %11667 = vst [vmem:[#allocation96_spill] sm:$0xff] %v9764_v23  ;;  %v9773_v12 = vpop.f32.mrb[158].mxu1  ;;  %v11720_v23 = vld [vmem:[#allocation30_spill] sm:$0xff] }
 0x3c7   : > { %5499 = vmatprep.subr.bf16.mxu1 %v4361_v47  ;;  %v3177_v33 = vmax.f32 %v3176_v14, %v11665_v62  ;;  %v9766_v50 = vpop.eup %6320  ;;  %v4154_v47 = vadd.f32 %v9568_v27, %v4153_v49  ;;  %6340 = vpow2.f32 %v9622_v63  ;;  %v4175_v55 = vadd.f32 %v9744_v6, %v4174_v22  ;;  %11668 = vst [vmem:[#allocation104_spill] sm:$0xff] %v9773_v12  ;;  %v11671_v49 = vld [vmem:[#allocation22_spill] sm:$0xff]  ;;  %v9785_v9 = vpop.f32.mrb[159].mxu1 }
 0x3c8   : > { %v9760_v11 = vmul.f32 1.442695, %v11664_v41  ;;  %v9775_v41 = vpop.eup %6322  ;;  %6342 = vpow2.f32 %v9638_v48  ;;  %v11669_v38 = vsub.f32 %v11575_v3, %v9196_v59  ;;  %v11670_v27 = vpack.c.bf16 %v9447_v42, %v9436_v39  ;;  %11672 = vst [vmem:[#allocation106_spill] sm:$0xff] %v9785_v9 }
 0x3c9   : > { %v3178_v63 = vrot.slane %v3177_v33, 4  ;;  %v3191_v22 = vmax.f32 %v3190_v8, %v11671_v49  ;;  %v9787_v25 = vpop.eup %6324  ;;  %v4155_v37 = vadd.f32 %v9577_v61, %v4154_v47  ;;  %6344 = vpow2.f32 %v9643_v24  ;;  %v11674_v8 = vld [vmem:[#allocation100_spill] sm:$0xff] }
 0x3ca   : > { %v3849_v14 = vmul.f32 1.442695, %v11669_v38  ;;  %5500 = vmatpush3.bf16.msra.mxu1 %v11670_v27  ;;  %v4176_v48 = vadd.f32 %v9754_v35, %v4175_v55  ;;  %v11673_v39 = vpack.c.bf16 %v9655_v36, %v9646_v4  ;;  %v9797_v42 = vpop.eup %6326  ;;  %6346 = vpow2.f32 %v9661_v15  ;;  %v11676_v15 = vld [vmem:[#allocation75_spill] sm:$0xff] }
 0x3cb   : > { %v11675_v38 = vsub.f32 %v11674_v8, %v9196_v59  ;;  %v3179_v61 = vmax.f32 %v3177_v33, %v3178_v63  ;;  %v3192_v24 = vmax.f32 %v3191_v22, %v9399_v34  ;;  %v9804_v47 = vpop.eup %6328  ;;  %v4156_v55 = vadd.f32 %v9587_v7, %v4155_v37  ;;  %v11679_v7 = vld [vmem:[#allocation26_spill] sm:$0xff]  ;;  %v11713_v34 = vld [vmem:[#allocation73_spill] sm:$0xff] }
 0x3cc   : > { %5501 = vmatprep.subr.bf16.mxu1 %v11673_v39  ;;  %6348 = vpow2.f32 %v9666_v46  ;;  %v4177_v3 = vadd.f32 %v9766_v50, %v4176_v48  ;;  %v9811_v49 = vpop.eup %6330  ;;  %v11677_v33 = vsub.f32 %v11676_v15, %v9196_v59  ;;  %v11678_v22 = vpack.c.bf16 %v9469_v29, %v9458_v40  ;;  %v11681_v29 = vld [vmem:[#allocation33_spill] sm:$0xff] }
 0x3cd   : > { %v3851_v27 = vmul.f32 1.442695, %v11675_v38  ;;  %6350 = vpow2.f32 %v9686_v56  ;;  %v3180_v37 = vrot.slane %v3179_v61, 2  ;;  %v3193_v46 = vmax.f32 %v3192_v24, %v11679_v7  ;;  %v9821_v8 = vpop.eup %6332  ;;  %v11716_v7 = vld [vmem:[#allocation67_spill] sm:$0xff] }
 0x3ce   : > { %v3853_v63 = vmul.f32 1.442695, %v11677_v33  ;;  %5502 = vmatpush3.bf16.msra.mxu1 %v11678_v22  ;;  %v4157_v48 = vadd.f32 %v9596_v2, %v4156_v55  ;;  %6352 = vpow2.f32 %v9691_v18  ;;  %v4178_v38 = vadd.f32 %v9775_v41, %v4177_v3  ;;  %v9831_v40 = vpop.eup %6334  ;;  %v11683_v55 = vld [vmem:[#allocation72_spill] sm:$0xff] }
 0x3cf   : > { %v11680_v56 = vpack.c.bf16 %v9680_v52, %v9671_v1  ;;  %6354 = vpow2.f32 %v9712_v16  ;;  %v11682_v24 = vsub.f32 %v11681_v29, %v9196_v59  ;;  %v3181_v2 = vmax.f32 %v3179_v61, %v3180_v37  ;;  %v9838_v22 = vpop.eup %6336  ;;  %v11685_v16 = vld [vmem:[#allocation28_spill] sm:$0xff] }
 0x3d0   : > { %v3194_v18 = vmax.f32 %v3193_v46, %v11683_v55  ;;  %11684 = vst [vmem:[#allocation102_spill] sm:$0xff] %v9838_v22  ;;  %v4158_v3 = vadd.f32 %v9605_v10, %v4157_v48  ;;  %6356 = vpow2.f32 %v9717_v58  ;;  %v9845_v39 = vpop.eup %6338  ;;  %v11686_v61 = vsub.f32 %v11685_v16, %v9196_v59  ;;  %v11707_v55 = vld [vmem:[#allocation43_spill] sm:$0xff] }
 0x3d1   : > { %5503 = vmatprep.subr.bf16.mxu1 %v11680_v56  ;;  %v3855_v33 = vmul.f32 1.442695, %v11682_v24  ;;  %v4179_v56 = vadd.f32 %v9787_v25, %v4178_v38  ;;  %6358 = vpow2.f32 %v9733_v20  ;;  %v11687_v46 = vpack.c.bf16 %v9491_v19, %v9480_v60  ;;  %v9857_v48 = vpop.eup %6340  ;;  %v11688_v38 = vld [vmem:[#allocation109_spill] sm:$0xff] }
 0x3d2   : > { %v3857_v37 = vmul.f32 1.442695, %v11686_v61  ;;  %v3182_v10 = vrot.slane %v3181_v2, 1  ;;  %v9855_v58 = vmax.f32 %v3194_v18, %v9424_v0  ;;  %v4159_v29 = vadd.f32 %v11688_v38, %v4158_v3  ;;  %v9867_v19 = vpop.eup %6342  ;;  %v11690_v18 = vld [vmem:[#allocation21_spill] sm:$0xff] }
 0x3d3   : > { %5504 = vmatpush3.bf16.msra.mxu1 %v11687_v46  ;;  %6360 = vpow2.f32 %v9738_v51  ;;  %v4180_v20 = vadd.f32 %v9797_v42, %v4179_v56  ;;  %v11689_v24 = vpack.c.bf16 %v9706_v53, %v9699_v31  ;;  %v11691_v16 = vsub.f32 %v11690_v18, %v9196_v59  ;;  %v9877_v46 = vpop.eup %6344  ;;  %v11693_v59 = vld [vmem:[#allocation27_spill] sm:$0xff]  ;;  %v11698_v18 = vld [vmem:[#allocation80_spill] sm:$0xff] }
 0x3d4   : > { %6362 = vpow2.f32 %v9760_v11  ;;  %v9873_v3 = vmax.f32 %v3181_v2, %v3182_v10  ;;  %v4160_v38 = vadd.f32 %v9625_v5, %v4159_v29  ;;  %v9883_v11 = vpop.eup %6346  ;;  %v11694_v10 = vld [vmem:[#allocation103_spill] sm:$0xff]  ;;  %v11696_v5 = vpack.c.bf16 %v9523_v21, %v9508_v32  ;;  %v11699_v2 = vld [vmem:[#allocation44_spill] sm:$0xff] }
 0x3d5   : > { %5505 = vmatprep.subr.bf16.mxu1 %v11689_v24  ;;  %v3859_v61 = vmul.f32 1.442695, %v11691_v16  ;;  %6364 = vpow2.f32 %v3849_v14  ;;  %v4181_v24 = vadd.f32 %v9804_v47, %v4180_v20  ;;  %v11695_v16 = vld [vmem:[#allocation29_spill] sm:$0xff]  ;;  %v11697_v29 = vld [vmem:[#allocation107_spill] sm:$0xff]  ;;  %v4373_v60 = vpack.c.bf16 %v9883_v11, %v9877_v46  ;;  %v11700_v21 = vld [vmem:[#allocation64_spill] sm:$0xff] }
 0x3d6   : > { %6366 = vpow2.f32 %v3851_v27  ;;  %v9894_v14 = vpop.eup %6348  ;;  %v4161_v20 = vadd.f32 %v11697_v29, %v4160_v38  ;;  %v11711_v32 = vld [vmem:[#allocation60_spill] sm:$0xff] }
 0x3d7   : > { %5506 = vmatpush3.bf16.msra.mxu1 %v11696_v5  ;;  %6368 = vpow2.f32 %v3853_v63  ;;  %v4182_v27 = vadd.f32 %v9811_v49, %v4181_v24  ;;  %v9900_v15 = vpop.eup %6350  ;;  %5513 = vmatprep.subr.bf16.mxu0 %v4373_v60  ;;  %v11701_v24 = vld [vmem:[#allocation12_spill] sm:$0xff]  ;;  %v11703_v5 = vpack.c.bf16 %v9727_v43, %v9720_v17 }
 0x3d8   : > { %6370 = vpow2.f32 %v3855_v33  ;;  %v9908_v0 = vpop.eup %6352  ;;  %v4162_v63 = vadd.f32 %v9646_v4, %v4161_v20  ;;  %v4374_v33 = vpack.c.bf16 %v9900_v15, %v9894_v14  ;;  %v11702_v29 = vpack.c.bf16 %v11701_v24, %v11701_v24  ;;  %v11704_v4 = vld [vmem:[#allocation46_spill] sm:$0xff]  ;;  %v11705_v20 = vld [vmem:[#allocation56_spill] sm:$0xff] }
 0x3d9   : > { %6372 = vpow2.f32 %v3857_v37  ;;  %v4183_v38 = vadd.f32 %v9821_v8, %v4182_v27  ;;  %v9917_v56 = vpop.eup %6354  ;;  %5514 = vmatpush3.bf16.msra.mxu0 %v11703_v5  ;;  %v11706_v27 = vld [vmem:[#allocation63_spill] sm:$0xff]  ;;  %v11708_v24 = vpack.c.bf16 %v11707_v55, %v11707_v55  ;;  %v11709_v5 = vld [vmem:[#allocation20_spill] sm:$0xff]  ;;  %v11712_v55 = vld [vmem:[#allocation70_spill] sm:$0xff] }
 0x3da   : > { %4606 = vmatmul.mubr.bf16.vlgmr.msra.gmra.mrb[164].mxu1 %v11702_v29  ;;  %6374 = vpow2.f32 %v3859_v61  ;;  %v9931_v29 = vpop.eup %6356  ;;  %v4163_v61 = vadd.f32 %v9655_v36, %v4162_v63  ;;  %5515 = vmatprep.subr.bf16.mxu0 %v4374_v33  ;;  %v4375_v43 = vpack.c.bf16 %v9917_v56, %v9908_v0  ;;  %v11714_v63 = vld [vmem:[#allocation32_spill] sm:$0xff]  ;;  %v11718_v36 = vpack.c.bf16 %v9754_v35, %v9744_v6 }
 0x3db   : > { %4685 = vmatprep.mubr.bf16.mxu1 %v11708_v24  ;;  %v4184_v17 = vadd.f32 %v9831_v40, %v4183_v38  ;;  %v9939_v37 = vpop.eup %6358  ;;  %v11719_v38 = vld [vmem:[#allocation25_spill] sm:$0xff]  ;;  %v11727_v51 = vld [vmem:[#allocation36_spill] sm:$0xff]  ;;  %v11729_v24 = vld [vmem:[#allocation59_spill] sm:$0xff]  ;;  %6376 = vrcp.f32 %v11738_v54  ;;  %v11742_v54 = vsub.f32 %v11704_v4, %v9873_v3  ;;  %v11747_v4 = vsub.f32 %v11706_v27, %v9873_v3 }
 0x3dc   : > { %11710 = vst [vmem:[#allocation105_spill] sm:$0xff] %v9939_v37  ;;  %v4164_v26 = vadd.f32 %v9671_v1, %v4163_v61  ;;  %v4376_v12 = vpack.c.bf16 %v9939_v37, %v9931_v29  ;;  %v11721_v61 = vld [vmem:[#allocation79_spill] sm:$0xff] }
 0x3dd   : > { %v9949_v33 = vpop.eup %6360  ;;  %v4185_v60 = vadd.f32 %v9838_v22, %v4184_v17  ;;  %5516 = vmatpush3.bf16.msra.mxu0 %v11718_v36 }
 0x3de   : > { %11715 = vst [vmem:[#allocation111_spill] sm:$0xff] %v9949_v33  ;;  %v9957_v9 = vpop.eup %6362  ;;  %v4165_v28 = vadd.f32 %v9680_v52, %v4164_v26  ;;  %5517 = vmatprep.subr.bf16.mxu0 %v4375_v43  ;;  %v11730_v26 = vpack.c.bf16 %v9775_v41, %v9766_v50  ;;  %v11732_v52 = vld [vmem:[#allocation58_spill] sm:$0xff] }
 0x3df   : > { %11717 = vst [vmem:[#allocation113_spill] sm:$0xff] %v9957_v9  ;;  %v9970_v22 = vpop.eup %6364  ;;  %v4186_v37 = vadd.f32 %v9845_v39, %v4185_v60  ;;  %v4377_v6 = vpack.c.bf16 %v9957_v9, %v9949_v33  ;;  %v11731_v60 = vld [vmem:[#allocation86_spill] sm:$0xff] }
 0x3e0   : > { %v9978_v1 = vpop.eup %6366  ;;  %v4166_v9 = vadd.f32 %v9699_v31, %v4165_v28  ;;  %v3444_v28 = vsub.f32 %v11665_v62, %v9873_v3 }
 0x3e1   : > { %11724 = vst [vmem:[#allocation110_spill] sm:$0xff] %v9978_v1  ;;  %v9988_v43 = vpop.eup %6368  ;;  %v4187_v36 = vadd.f32 %v9857_v48, %v4186_v37  ;;  %v4378_v35 = vpack.c.bf16 %v9978_v1, %v9970_v22  ;;  %5518 = vmatpush3.bf16.msra.mxu0 %v11730_v26  ;;  %v11734_v37 = vsub.f32 %v11693_v59, %v9873_v3 }
 0x3e2   : > { %v9996_v33 = vpop.eup %6370  ;;  %v10012_v17 = vadd.f32 %v9706_v53, %v4166_v9  ;;  %5519 = vmatprep.subr.bf16.mxu0 %v4376_v12  ;;  %v11735_v53 = vsub.f32 %v11694_v10, %v9873_v3  ;;  %v11736_v12 = vsub.f32 %v11695_v16, %v9873_v3  ;;  %v11737_v26 = vsub.f32 %v11698_v18, %v9873_v3 }
 0x3e3   : > { %v10009_v1 = vpop.eup %6372  ;;  %v4188_v50 = vadd.f32 %v9867_v19, %v4187_v36  ;;  %v3861_v45 = vmul.f32 1.442695, %v11734_v37  ;;  %v11739_v59 = vpack.c.bf16 %v9797_v42, %v9787_v25  ;;  %v11740_v10 = vsub.f32 %v11699_v2, %v9873_v3  ;;  %v11744_v2 = vld [vmem:[#allocation10_spill] sm:$0xff] }
 0x3e4   : > { %11733 = vst [vmem:[#allocation112_spill] sm:$0xff] %v10012_v17  ;;  %v10019_v31 = vpop.eup %6374  ;;  %v3863_v9 = vmul.f32 1.442695, %v11735_v53  ;;  %v3865_v36 = vmul.f32 1.442695, %v11736_v12  ;;  %v11749_v53 = vsub.f32 %v11711_v32, %v9873_v3  ;;  %v11753_v32 = vsub.f32 %v11713_v34, %v9873_v3 }
 0x3e5   : > { %v4189_v41 = vadd.f32 %v9877_v46, %v4188_v50  ;;  %v3867_v17 = vmul.f32 1.442695, %v11737_v26  ;;  %5520 = vmatpush3.bf16.msra.mxu0 %v11739_v59  ;;  %6378 = vpow2.f32 %v3861_v45  ;;  %v3869_v37 = vmul.f32 1.442695, %v11740_v10  ;;  %v5419_v26 = vpop.f32.mrb[136].mxu0 }
 0x3e6   : > { %5521 = vmatprep.subr.bf16.mxu0 %v4377_v6  ;;  %6380 = vpow2.f32 %v3863_v9  ;;  %v11741_v46 = vsub.f32 %v11700_v21, %v9873_v3  ;;  %v3873_v50 = vmul.f32 1.442695, %v11742_v54  ;;  %v11743_v45 = vsub.f32 %v11705_v20, %v9873_v3  ;;  %v5420_v12 = vpop.f32.mrb[137].mxu0 }
 0x3e7   : > { %v4190_v16 = vadd.f32 %v9883_v11, %v4189_v41  ;;  %6382 = vpow2.f32 %v3865_v36  ;;  %v11745_v11 = vld [vmem:[#allocation19_spill] sm:$0xff]  ;;  %v11746_v21 = vpack.c.bf16 %v9811_v49, %v9804_v47  ;;  %v3877_v41 = vmul.f32 1.442695, %v11747_v4  ;;  %v11750_v47 = vld [vmem:[#allocation82_spill] sm:$0xff] }
 0x3e8   : > { %v3871_v18 = vmul.f32 1.442695, %v11741_v46  ;;  %6384 = vpow2.f32 %v3867_v17  ;;  %v3875_v42 = vmul.f32 1.442695, %v11743_v45  ;;  %v10056_v6 = vadd.f32 %v11745_v11, %v11744_v2  ;;  %v11759_v2 = vld [vmem:[#allocation13_spill] sm:$0xff] }
 0x3e9   : > { %v4191_v25 = vadd.f32 %v9894_v14, %v4190_v16  ;;  %5522 = vmatpush3.bf16.msra.mxu0 %v11746_v21  ;;  %6386 = vpow2.f32 %v3869_v37  ;;  %v11748_v20 = vsub.f32 %v11709_v5, %v9873_v3  ;;  %v3881_v49 = vmul.f32 1.442695, %v11749_v53  ;;  %v10088_v37 = vpop.eup %6376  ;;  %v11763_v53 = vld [vmem:[#allocation23_spill] sm:$0xff] }
 0x3ea   : > { %5523 = vmatprep.subr.bf16.mxu0 %v4378_v35  ;;  %6388 = vpow2.f32 %v3871_v18  ;;  %v965_v9 = vpack.c.bf16 %v11750_v47, %v11750_v47  ;;  %v970_v5 = vpack.c.bf16 %v10056_v6, %v10056_v6  ;;  %v11752_v36 = vpack.c.bf16 %v9831_v40, %v9821_v8  ;;  %v5422_v18 = vpop.f32.mrb[138].mxu0 }
 0x3eb   : > { %v4192_v14 = vadd.f32 %v9900_v15, %v4191_v25  ;;  %v3879_v17 = vmul.f32 1.442695, %v11748_v20  ;;  %6390 = vpow2.f32 %v3873_v50  ;;  %v11751_v15 = vsub.f32 %v11712_v55, %v9873_v3  ;;  %v5423_v25 = vpop.f32.mrb[139].mxu0  ;;  %v11762_v20 = vld [vmem:[#allocation105_spill] sm:$0xff] }
 0x3ec   : > { %6392 = vpow2.f32 %v3875_v42  ;;  %v3885_v59 = vmul.f32 1.442695, %v11753_v32  ;;  %v11755_v16 = vsub.f32 %v11716_v7, %v9873_v3  ;;  %v11756_v8 = vsub.f32 %v11719_v38, %v9873_v3 }
 0x3ed   : > { %v4193_v27 = vadd.f32 %v9908_v0, %v4192_v14  ;;  %v3883_v35 = vmul.f32 1.442695, %v11751_v15  ;;  %5524 = vmatpush3.bf16.msra.mxu0 %v11752_v36  ;;  %6394 = vpow2.f32 %v3877_v41  ;;  %v11754_v0 = vsub.f32 %v11714_v63, %v9873_v3 }
 0x3ee   : > { %6396 = vpow2.f32 %v3879_v17  ;;  %v3889_v46 = vmul.f32 1.442695, %v11755_v16  ;;  %v3891_v40 = vmul.f32 1.442695, %v11756_v8  ;;  %v11757_v63 = vsub.f32 %v11720_v23, %v9873_v3  ;;  %v11760_v23 = vld [vmem:[#allocation71_spill] sm:$0xff] }
 0x3ef   : > { %v3887_v10 = vmul.f32 1.442695, %v11754_v0  ;;  %v4194_v55 = vadd.f32 %v9917_v56, %v4193_v27  ;;  %v10097_v34 = vpop.eup %6378  ;;  %6398 = vpow2.f32 %v3881_v49  ;;  %v11758_v56 = vsub.f32 %v11721_v61, %v9873_v3  ;;  %v11765_v27 = vld [vmem:[#allocation102_spill] sm:$0xff] }
 0x3f0   : > { %v3893_v54 = vmul.f32 1.442695, %v11757_v63  ;;  %v4379_v7 = vpack.c.bf16 %v9996_v33, %v9988_v43  ;;  %v10107_v45 = vpop.eup %6380  ;;  %6400 = vpow2.f32 %v3883_v35  ;;  %v4380_v42 = vpack.c.bf16 %v10019_v31, %v10009_v1  ;;  %v11767_v35 = vld [vmem:[#allocation81_spill] sm:$0xff]  ;;  %v11772_v63 = vld [vmem:[#allocation38_spill] sm:$0xff] }
 0x3f1   : > { %v3895_v50 = vmul.f32 1.442695, %v11758_v56  ;;  %v4195_v38 = vadd.f32 %v9931_v29, %v4194_v55  ;;  %v11761_v11 = vmax.f32 %v9855_v58, %v11760_v23  ;;  %v10116_v4 = vpop.eup %6382  ;;  %6402 = vpow2.f32 %v3885_v59  ;;  %v11768_v59 = vld [vmem:[#allocation4_spill] sm:$0xff]  ;;  %v11769_v55 = vld [vmem:[#allocation111_spill] sm:$0xff] }
 0x3f2   : > { %v4211_v61 = vadd.f32 %v10107_v45, %v10097_v34  ;;  %5525 = vmatprep.subr.bf16.mxu0 %v4379_v7  ;;  %v4381_v41 = vpack.c.bf16 %v10107_v45, %v10097_v34  ;;  %v5421_v29 = vadd.f32 %v5420_v12, %v5419_v26  ;;  %v10122_v14 = vpop.eup %6384  ;;  %6404 = vpow2.f32 %v3887_v10  ;;  %v11773_v7 = vld [vmem:[#allocation77_spill] sm:$0xff]  ;;  %v11800_v34 = vld [vmem:[#allocation108_spill] sm:$0xff] }
 0x3f3   : > { %v3197_v21 = vmax.f32 %v11761_v11, %v11759_v2  ;;  %v4196_v17 = vadd.f32 %v11762_v20, %v4195_v38  ;;  %v11764_v58 = vsub.f32 %v11763_v53, %v9873_v3  ;;  %v11766_v15 = vpack.c.bf16 %v9845_v39, %v11765_v27  ;;  %v10132_v32 = vpop.eup %6386  ;;  %v11770_v39 = vld [vmem:[#allocation37_spill] sm:$0xff] }
 0x3f4   : > { %6406 = vpow2.f32 %v3889_v46  ;;  %v4212_v26 = vadd.f32 %v10116_v4, %v4211_v61  ;;  %v4382_v12 = vpack.c.bf16 %v10122_v14, %v10116_v4  ;;  %v10138_v0 = vmul.f32 %v11768_v59, %v5421_v29  ;;  %v10140_v10 = vpop.eup %6388 }
 0x3f5   : > { %v3897_v49 = vmul.f32 1.442695, %v11764_v58  ;;  %5526 = vmatpush3.bf16.msra.mxu0 %v11766_v15  ;;  %v3198_v36 = vmax.f32 %v3197_v21, %v11767_v35  ;;  %v4197_v16 = vadd.f32 %v11769_v55, %v4196_v17  ;;  %6408 = vpow2.f32 %v3891_v40  ;;  %v10147_v56 = vpop.eup %6390  ;;  %v11775_v40 = vld [vmem:[#allocation113_spill] sm:$0xff]  ;;  %v11778_v17 = vld [vmem:[#allocation24_spill] sm:$0xff] }
 0x3f6   : > { %5527 = vmatprep.subr.bf16.mxu0 %v4380_v42  ;;  %v11771_v8 = vsub.f32 %v11770_v39, %v9873_v3  ;;  %6410 = vpow2.f32 %v3893_v54  ;;  %v11774_v25 = vsub.f32 %v11773_v7, %v9873_v3  ;;  %v4213_v42 = vadd.f32 %v10122_v14, %v4212_v26  ;;  %v10155_v21 = vpop.eup %6392  ;;  %v11782_v55 = vld [vmem:[#allocation40_spill] sm:$0xff] }
 0x3f7   : > { %v3199_v46 = vmax.f32 %v3198_v36, %v11772_v63  ;;  %v4383_v11 = vpack.c.bf16 %v10140_v10, %v10132_v32  ;;  %v4198_v61 = vadd.f32 %v11775_v40, %v4197_v16  ;;  %6412 = vpow2.f32 %v3895_v50  ;;  %v10165_v58 = vpop.eup %6394  ;;  %v11804_v50 = vld [vmem:[#allocation106_spill] sm:$0xff] }
 0x3f8   : > { %v3899_v18 = vmul.f32 1.442695, %v11771_v8  ;;  %v3901_v38 = vmul.f32 1.442695, %v11774_v25  ;;  %v11776_v29 = vsub.f32 %v11726_v44, %v9873_v3  ;;  %v11777_v54 = vpack.c.bf16 %v9867_v19, %v9857_v48  ;;  %v10173_v44 = vpop.eup %6396  ;;  %v11780_v48 = vld [vmem:[#allocation84_spill] sm:$0xff] }
 0x3f9   : > { %v3200_v53 = vmax.f32 %v3199_v46, %v11778_v17  ;;  %6414 = vpow2.f32 %v3897_v49  ;;  %v11779_v27 = vsub.f32 %v11727_v51, %v9873_v3  ;;  %v4214_v36 = vadd.f32 %v10132_v32, %v4213_v42  ;;  %v10180_v16 = vpop.eup %6398  ;;  %v11784_v46 = vld [vmem:[#allocation110_spill] sm:$0xff] }
 0x3fa   : > { %v3903_v20 = vmul.f32 1.442695, %v11776_v29  ;;  %5528 = vmatpush3.bf16.msra.mxu0 %v11777_v54  ;;  %v4199_v26 = vadd.f32 %v9970_v22, %v4198_v61  ;;  %6416 = vpow2.f32 %v3899_v18  ;;  %v11781_v19 = vsub.f32 %v11780_v48, %v9873_v3  ;;  %v10191_v18 = vpop.eup %6400  ;;  %v11789_v54 = vld [vmem:[#allocation76_spill] sm:$0xff] }
 0x3fb   : > { %v3905_v15 = vmul.f32 1.442695, %v11779_v27  ;;  %v3201_v49 = vmax.f32 %v3200_v53, %v11782_v55  ;;  %6418 = vpow2.f32 %v3901_v38  ;;  %v11783_v51 = vsub.f32 %v11729_v24, %v9873_v3  ;;  %v11786_v24 = vld [vmem:[#allocation16_spill] sm:$0xff]  ;;  %v10201_v47 = vpop.eup %6402 }
 0x3fc   : > { %v3907_v59 = vmul.f32 1.442695, %v11781_v19  ;;  %v4215_v8 = vadd.f32 %v10140_v10, %v4214_v36  ;;  %v4200_v7 = vadd.f32 %v11784_v46, %v4199_v26  ;;  %6420 = vpow2.f32 %v3903_v20 }
 0x3fd   : > { %v3909_v39 = vmul.f32 1.442695, %v11783_v51  ;;  %4646 = vmatmul.mubr.bf16.vlgmr.msra.gmra.mrb[148].mxu0 %v965_v9  ;;  %v11785_v25 = vsub.f32 %v11731_v60, %v9873_v3  ;;  %v3202_v42 = vmax.f32 %v3201_v49, %v11786_v24  ;;  %6422 = vpow2.f32 %v3905_v15  ;;  %v10209_v60 = vpop.eup %6404 }
 0x3fe   : > { %4725 = vmatprep.mubr.bf16.mxu0 %v970_v5  ;;  %v11787_v9 = vsub.f32 %v11732_v52, %v9873_v3  ;;  %v4216_v61 = vadd.f32 %v10147_v56, %v4215_v8  ;;  %v4201_v20 = vadd.f32 %v9988_v43, %v4200_v7  ;;  %6424 = vpow2.f32 %v3907_v59  ;;  %v10216_v27 = vpop.eup %6406  ;;  %v11792_v59 = vld [vmem:[#allocation39_spill] sm:$0xff] }
 0x3ff   : > { %v3911_v38 = vmul.f32 1.442695, %v11785_v25  ;;  %v11788_v6 = vsub.f32 %v11647_v57, %v9873_v3  ;;  %v3203_v53 = vmax.f32 %v3202_v42, %v11789_v54  ;;  %6426 = vpow2.f32 %v3909_v39  ;;  %v10224_v43 = vpop.eup %6408 }
 0x400   : > { %v3913_v40 = vmul.f32 1.442695, %v11787_v9  ;;  %v11790_v52 = vsub.f32 %v11653_v30, %v9873_v3  ;;  %v4217_v36 = vadd.f32 %v10155_v21, %v4216_v61  ;;  %v4202_v48 = vadd.f32 %v9996_v33, %v4201_v20  ;;  %v10231_v51 = vpop.eup %6410  ;;  %v11793_v30 = vld [vmem:[#allocation87_spill] sm:$0xff] }
 0x401   : > { %v3915_v5 = vmul.f32 1.442695, %v11788_v6  ;;  %6428 = vpow2.f32 %v3911_v38  ;;  %v11791_v57 = vsub.f32 %v11657_v13, %v9873_v3  ;;  %v3204_v49 = vmax.f32 %v3203_v53, %v11792_v59  ;;  %v10239_v33 = vpop.eup %6412  ;;  %v11795_v38 = vld [vmem:[#allocation101_spill] sm:$0xff] }
 0x402   : > { %v3917_v15 = vmul.f32 1.442695, %v11790_v52  ;;  %6430 = vpow2.f32 %v3913_v40  ;;  %v11794_v39 = vsub.f32 %v11793_v30, %v9873_v3  ;;  %v4218_v46 = vadd.f32 %v10165_v58, %v4217_v36  ;;  %v11798_v52 = vld [vmem:[#allocation115_spill] sm:$0xff] }
 0x403   : > { %v3919_v19 = vmul.f32 1.442695, %v11791_v57  ;;  %v4203_v25 = vadd.f32 %v10009_v1, %v4202_v48  ;;  %6432 = vpow2.f32 %v3915_v5  ;;  %v3923_v13 = vmul.f32 1.442695, %v3444_v28  ;;  %v10246_v9 = vpop.eup %6414  ;;  %v11797_v1 = vld [vmem:[#allocation99_spill] sm:$0xff] }
 0x404   : > { %v3921_v8 = vmul.f32 1.442695, %v11794_v39  ;;  %v3205_v42 = vmax.f32 %v3204_v49, %v11795_v38  ;;  %6434 = vpow2.f32 %v3917_v15  ;;  %v4219_v40 = vadd.f32 %v10173_v44, %v4218_v46  ;;  %v10251_v20 = vpop.eup %6416 }
 0x405   : > { %v4389_v61 = vpack.c.bf16 %v10239_v33, %v10231_v51  ;;  %v10254_v6 = vadd.f32 %v10019_v31, %v4203_v25  ;;  %6436 = vpow2.f32 %v3919_v19  ;;  %v6419_v62 = vpop.eup %6418  ;;  %v4390_v28 = vpack.c.bf16 %v10251_v20, %v10246_v9  ;;  %v11799_v19 = vld [vmem:[#allocation97_spill] sm:$0xff] }
 0x406   : > { %v3206_v5 = vmax.f32 %v3205_v42, %v11797_v1  ;;  %6438 = vpow2.f32 %v3921_v8  ;;  %v4220_v3 = vadd.f32 %v10180_v16, %v4219_v40  ;;  %v6421_v53 = vpop.eup %6420  ;;  %v11801_v40 = vld [vmem:[#allocation95_spill] sm:$0xff] }
 0x407   : > { %11796 = vst [vmem:[#allocation119_spill] sm:$0xff] %v10254_v6  ;;  %5535 = vmatprep.subr.bf16.mxu1 %v4389_v61  ;;  %6440 = vpow2.f32 %v3923_v13  ;;  %v6423_v15 = vpop.eup %6422  ;;  %v4391_v48 = vpack.c.bf16 %v6421_v53, %v6419_v62 }
 0x408   : > { %5536 = vmatpush3.bf16.msra.mxu1 %v4381_v41  ;;  %v3207_v31 = vmax.f32 %v3206_v5, %v11798_v52  ;;  %v4221_v36 = vadd.f32 %v10191_v18, %v4220_v3  ;;  %v6425_v57 = vpop.eup %6424  ;;  %v5441_v5 = vpop.f32.mrb[140].mxu0 }
 0x409   : > { %5537 = vmatprep.subr.bf16.mxu1 %v4390_v28  ;;  %v6427_v30 = vpop.eup %6426  ;;  %v4392_v8 = vpack.c.bf16 %v6425_v57, %v6423_v15  ;;  %v11802_v28 = vld [vmem:[#allocation93_spill] sm:$0xff] }
 0x40a   : > { %v3208_v49 = vmax.f32 %v3207_v31, %v11799_v19  ;;  %v4222_v39 = vadd.f32 %v10201_v47, %v4221_v36  ;;  %v4094_v31 = vrot.slane %v11802_v28, 4 }
 0x40b   : > { %v10267_v46 = vpop.eup %6428 }
 0x40c   : > { %5538 = vmatpush3.bf16.msra.mxu1 %v4382_v12  ;;  %v3209_v45 = vmax.f32 %v3208_v49, %v11800_v34  ;;  %v10273_v41 = vpop.eup %6430  ;;  %v4223_v25 = vadd.f32 %v10209_v60, %v4222_v39  ;;  %v4393_v13 = vpack.c.bf16 %v10267_v46, %v6427_v30  ;;  %v5442_v12 = vpop.f32.mrb[141].mxu0 }
 0x40d   : > { %5539 = vmatprep.subr.bf16.mxu1 %v4391_v48  ;;  %v10277_v42 = vpop.eup %6432  ;;  %v11803_v48 = vld [vmem:[#allocation96_spill] sm:$0xff]  ;;  %v5443_v39 = vadd.f32 %v5442_v12, %v5441_v5  ;;  %v11806_v5 = vld [vmem:[#allocation94_spill] sm:$0xff] }
 0x40e   : > { %v3210_v61 = vmax.f32 %v3209_v45, %v11801_v40  ;;  %v10280_v3 = vpop.eup %6434  ;;  %v4224_v4 = vadd.f32 %v10216_v27, %v4223_v25  ;;  %v4394_v14 = vpack.c.bf16 %v10277_v42, %v10273_v41  ;;  %v5444_v45 = vpop.f32.mrb[142].mxu0 }
 0x40f   : > { %v10286_v36 = vpop.eup %6436  ;;  %v5445_v29 = vpop.f32.mrb[143].mxu0  ;;  %v4742_v32 = vmul.f32 %v10088_v37, %v5443_v39  ;;  %v11808_v39 = vpack.c.bf16 %v10173_v44, %v10165_v58  ;;  %v11810_v58 = vpack.c.bf16 %v10209_v60, %v10201_v47  ;;  %v11814_v47 = vld [vmem:[#allocation34_spill] sm:$0xff] }
 0x410   : > { %5540 = vmatpush3.bf16.msra.mxu1 %v4383_v11  ;;  %v3211_v49 = vmax.f32 %v3210_v61, %v11803_v48  ;;  %v10292_v7 = vpop.eup %6438  ;;  %v4225_v26 = vadd.f32 %v10224_v43, %v4224_v4  ;;  %v4395_v25 = vpack.c.bf16 %v10286_v36, %v10280_v3  ;;  %v4095_v61 = vadd.f32 %v4094_v31, %v11802_v28 }
 0x411   : > { %5541 = vmatprep.subr.bf16.mxu1 %v4392_v8  ;;  %v10297_v22 = vpop.eup %6440  ;;  %v11805_v8 = vpack.c.bf16 %v10155_v21, %v10147_v56  ;;  %v4749_v29 = vpack.c.bf16 %v4742_v32, %v10138_v0  ;;  %v11809_v0 = vpack.c.bf16 %v10191_v18, %v10180_v16 }
 0x412   : > { %v3212_v6 = vmax.f32 %v3211_v49, %v11804_v50  ;;  %v4226_v10 = vadd.f32 %v10231_v51, %v4225_v26  ;;  %v4396_v11 = vpack.c.bf16 %v10297_v22, %v10292_v7  ;;  %v11807_v49 = vld [vmem:[#allocation104_spill] sm:$0xff]  ;;  %v4096_v51 = vrot.slane %v4095_v61, 2 }
 0x414   : > { %5542 = vmatpush3.bf16.msra.mxu1 %v11805_v8  ;;  %v3213_v4 = vmax.f32 %v3212_v6, %v11806_v5  ;;  %v4227_v12 = vadd.f32 %v10239_v33, %v4226_v10  ;;  %v4097_v31 = vadd.f32 %v4096_v51, %v4095_v61  ;;  %v11816_v61 = vld [vmem:[#allocation83_spill] sm:$0xff]  ;;  %v11820_v51 = vld [vmem:[#allocation14_spill] sm:$0xff] }
 0x415   : > { %5543 = vmatprep.subr.bf16.mxu1 %v4393_v13 }
 0x416   : > { %v3214_v37 = vmax.f32 %v3213_v4, %v11807_v49  ;;  %v4228_v26 = vadd.f32 %v10246_v9, %v4227_v12  ;;  %v4098_v32 = vrot.slane %v4097_v31, 1 }
 0x418   : > { %5544 = vmatpush3.bf16.msra.mxu1 %v11808_v39  ;;  %v3215_v28 = vrot.slane %v3214_v37, 4  ;;  %v4229_v56 = vadd.f32 %v10251_v20, %v4228_v26  ;;  %v4099_v18 = vadd.f32 %v4098_v32, %v4097_v31 }
 0x419   : > { %5545 = vmatprep.subr.bf16.mxu1 %v4394_v14 }
 0x41a   : > { %v3216_v21 = vmax.f32 %v3214_v37, %v3215_v28  ;;  %v4230_v6 = vadd.f32 %v6419_v62, %v4229_v56  ;;  %v11811_v62 = vld [vmem:[#allocation68_spill] sm:$0xff]  ;;  %v11819_v37 = vld [vmem:[#allocation11_spill] sm:$0xff]  ;;  %v11821_v28 = vld [vmem:[#allocation22_spill] sm:$0xff]  ;;  %6442 = vrcp.f32 %v4099_v18 }
 0x41b   : > { %v967_v10 = vpack.c.bf16 %v11811_v62, %v11811_v62 }
 0x41c   : > { %5546 = vmatpush3.bf16.msra.mxu1 %v11809_v0  ;;  %v3217_v33 = vrot.slane %v3216_v21, 2  ;;  %v4231_v13 = vadd.f32 %v6421_v53, %v4230_v6  ;;  %v11812_v53 = vpack.c.bf16 %v10224_v43, %v10216_v27  ;;  %v11818_v27 = vld [vmem:[#allocation51_spill] sm:$0xff] }
 0x41d   : > { %5547 = vmatprep.subr.bf16.mxu1 %v4395_v25 }
 0x41e   : > { %v3218_v9 = vmax.f32 %v3216_v21, %v3217_v33  ;;  %v4232_v45 = vadd.f32 %v6423_v15, %v4231_v13  ;;  %v11813_v15 = vld [vmem:[#allocation55_spill] sm:$0xff]  ;;  %v11822_v21 = vld [vmem:[#allocation69_spill] sm:$0xff]  ;;  %v11824_v33 = vld [vmem:[#allocation72_spill] sm:$0xff] }
 0x420   : > { %5548 = vmatpush3.bf16.msra.mxu1 %v11810_v58  ;;  %v3219_v44 = vrot.slane %v3218_v9, 1  ;;  %v4233_v20 = vadd.f32 %v6425_v57, %v4232_v45  ;;  %v11815_v57 = vld [vmem:[#allocation52_spill] sm:$0xff] }
 0x421   : > { %5549 = vmatprep.subr.bf16.mxu1 %v4396_v11 }
 0x422   : > { %v10323_v14 = vmax.f32 %v3218_v9, %v3219_v44  ;;  %v4234_v16 = vadd.f32 %v6427_v30, %v4233_v20  ;;  %v11817_v30 = vld [vmem:[#allocation5_spill] sm:$0xff]  ;;  %v11825_v9 = vld [vmem:[#allocation7_spill] sm:$0xff] }
 0x424   : > { %5550 = vmatpush3.bf16.msra.mxu1 %v11812_v53  ;;  %v3445_v25 = vsub.f32 %v11813_v15, %v10323_v14  ;;  %v3446_v60 = vsub.f32 %v11814_v47, %v10323_v14  ;;  %v3447_v11 = vsub.f32 %v11815_v57, %v10323_v14  ;;  %v3448_v8 = vsub.f32 %v11816_v61, %v10323_v14 }
 0x425   : > { %v4235_v4 = vadd.f32 %v10267_v46, %v4234_v16  ;;  %v3449_v12 = vsub.f32 %v11817_v30, %v10323_v14  ;;  %v3450_v43 = vsub.f32 %v11818_v27, %v10323_v14  ;;  %v3451_v26 = vsub.f32 %v11819_v37, %v10323_v14  ;;  %5875 = vmatprep.subr.bf16.mxu1 %v4749_v29  ;;  %v11823_v46 = vld [vmem:[#allocation26_spill] sm:$0xff] }
 0x426   : > { %v3452_v39 = vsub.f32 %v11820_v51, %v10323_v14  ;;  %v3453_v56 = vsub.f32 %v11821_v28, %v10323_v14  ;;  %v3454_v6 = vsub.f32 %v11822_v21, %v10323_v14  ;;  %v3455_v31 = vsub.f32 %v11823_v46, %v10323_v14 }
 0x427   : > { %v4236_v0 = vadd.f32 %v10273_v41, %v4235_v4  ;;  %v3456_v13 = vsub.f32 %v11824_v33, %v10323_v14  ;;  %v3457_v45 = vsub.f32 %v11825_v9, %v10323_v14  ;;  %v3458_v32 = vsub.f32 %v11760_v23, %v10323_v14  ;;  %4686 = vmatmul.mubr.bf16.vlgmr.msra.gmra.mrb[168].mxu1 %v967_v10 }
 0x428   : > { %v3459_v58 = vsub.f32 %v11759_v2, %v10323_v14  ;;  %v3460_v44 = vsub.f32 %v11767_v35, %v10323_v14  ;;  %v3461_v20 = vsub.f32 %v11772_v63, %v10323_v14  ;;  %v3462_v41 = vsub.f32 %v11778_v17, %v10323_v14  ;;  %5876 = vmatpush3.bf16.msra.mxu1 %v4749_v29 }
 0x429   : > { %v4237_v62 = vadd.f32 %v10277_v42, %v4236_v0  ;;  %v3463_v16 = vsub.f32 %v11782_v55, %v10323_v14  ;;  %v3464_v23 = vsub.f32 %v11786_v24, %v10323_v14  ;;  %v3465_v2 = vsub.f32 %v11789_v54, %v10323_v14 }
 0x42a   : > { %v3466_v35 = vsub.f32 %v11792_v59, %v10323_v14  ;;  %v3467_v63 = vsub.f32 %v11795_v38, %v10323_v14  ;;  %v3468_v17 = vsub.f32 %v11797_v1, %v10323_v14  ;;  %v3469_v42 = vsub.f32 %v11798_v52, %v10323_v14 }
 0x42b   : > { %v4238_v55 = vadd.f32 %v10280_v3, %v4237_v62  ;;  %v3470_v29 = vsub.f32 %v11799_v19, %v10323_v14  ;;  %v3471_v10 = vsub.f32 %v11800_v34, %v10323_v14  ;;  %v3472_v53 = vsub.f32 %v11801_v40, %v10323_v14 }
 0x42c   : > { %v3473_v15 = vsub.f32 %v11803_v48, %v10323_v14  ;;  %v3474_v47 = vsub.f32 %v11804_v50, %v10323_v14  ;;  %v3475_v57 = vsub.f32 %v11806_v5, %v10323_v14  ;;  %v3476_v3 = vsub.f32 %v11807_v49, %v10323_v14 }
 0x42d   : > { %v4239_v61 = vadd.f32 %v10286_v36, %v4238_v55  ;;  %v3925_v4 = vmul.f32 1.442695, %v3445_v25  ;;  %v3927_v30 = vmul.f32 1.442695, %v3446_v60  ;;  %v3929_v27 = vmul.f32 1.442695, %v3447_v11  ;;  %v10403_v11 = vpop.eup %6442 }
 0x42e   : > { %v3931_v37 = vmul.f32 1.442695, %v3448_v8  ;;  %v3933_v28 = vmul.f32 1.442695, %v3449_v12  ;;  %v3935_v21 = vmul.f32 1.442695, %v3450_v43 }
 0x42f   : > { %v4240_v51 = vadd.f32 %v10292_v7, %v4239_v61  ;;  %6444 = vpow2.f32 %v3925_v4  ;;  %v3937_v0 = vmul.f32 1.442695, %v3451_v26  ;;  %v3939_v33 = vmul.f32 1.442695, %v3452_v39 }
 0x430   : > { %6446 = vpow2.f32 %v3927_v30  ;;  %v3941_v36 = vmul.f32 1.442695, %v3453_v56  ;;  %v3943_v25 = vmul.f32 1.442695, %v3454_v6  ;;  %v3945_v60 = vmul.f32 1.442695, %v3455_v31 }
 0x431   : > { %v10401_v46 = vadd.f32 %v10297_v22, %v4240_v51  ;;  %6448 = vpow2.f32 %v3929_v27  ;;  %v3947_v18 = vmul.f32 1.442695, %v3456_v13  ;;  %v3949_v7 = vmul.f32 1.442695, %v3457_v45 }
 0x432   : > { %6450 = vpow2.f32 %v3931_v37  ;;  %v3951_v8 = vmul.f32 1.442695, %v3458_v32  ;;  %v3953_v12 = vmul.f32 1.442695, %v3459_v58  ;;  %v3955_v26 = vmul.f32 1.442695, %v3460_v44 }
 0x433   : > { %6452 = vpow2.f32 %v3933_v28  ;;  %v3957_v56 = vmul.f32 1.442695, %v3461_v20  ;;  %v3959_v9 = vmul.f32 1.442695, %v3462_v41  ;;  %v3961_v32 = vmul.f32 1.442695, %v3463_v16 }
 0x434   : > { %6454 = vpow2.f32 %v3935_v21  ;;  %v3963_v62 = vmul.f32 1.442695, %v3464_v23  ;;  %v3965_v41 = vmul.f32 1.442695, %v3465_v2  ;;  %v3967_v24 = vmul.f32 1.442695, %v3466_v35 }
 0x435   : > { %6456 = vpow2.f32 %v3937_v0  ;;  %v3969_v54 = vmul.f32 1.442695, %v3467_v63  ;;  %v3971_v59 = vmul.f32 1.442695, %v3468_v17  ;;  %v3973_v38 = vmul.f32 1.442695, %v3469_v42 }
 0x436   : > { %6458 = vpow2.f32 %v3939_v33  ;;  %v3975_v1 = vmul.f32 1.442695, %v3470_v29  ;;  %v3977_v52 = vmul.f32 1.442695, %v3471_v10  ;;  %v3979_v19 = vmul.f32 1.442695, %v3472_v53 }
 0x437   : > { %6460 = vpow2.f32 %v3941_v36  ;;  %v3981_v34 = vmul.f32 1.442695, %v3473_v15  ;;  %v3983_v40 = vmul.f32 1.442695, %v3474_v47  ;;  %v3985_v36 = vmul.f32 1.442695, %v3475_v57 }
 0x438   : > { %6462 = vpow2.f32 %v3943_v25  ;;  %v3987_v50 = vmul.f32 1.442695, %v3476_v3 }
 0x439   : > { %v10405_v22 = vpop.eup %6444  ;;  %6464 = vpow2.f32 %v3945_v60  ;;  %v11826_v60 = vld [vmem:[#allocation62_spill] sm:$0xff] }
 0x43a   : > { %v10407_v43 = vpop.eup %6446  ;;  %6466 = vpow2.f32 %v3947_v18  ;;  %v4131_v18 = vrot.slane %v11826_v60, 4 }
 0x43b   : > { %v10409_v39 = vpop.eup %6448  ;;  %6468 = vpow2.f32 %v3949_v7  ;;  %v4248_v6 = vadd.f32 %v10407_v43, %v10405_v22  ;;  %v4397_v31 = vpack.c.bf16 %v10407_v43, %v10405_v22 }
 0x43c   : > { %v10415_v13 = vpop.eup %6450  ;;  %6470 = vpow2.f32 %v3951_v8  ;;  %v4132_v49 = vadd.f32 %v4131_v18, %v11826_v60 }
 0x43d   : > { %v10417_v45 = vpop.eup %6452  ;;  %6472 = vpow2.f32 %v3953_v12  ;;  %v4249_v58 = vadd.f32 %v10409_v39, %v4248_v6  ;;  %v4398_v44 = vpack.c.bf16 %v10415_v13, %v10409_v39 }
 0x43e   : > { %v10422_v20 = vpop.eup %6454  ;;  %6474 = vpow2.f32 %v3955_v26  ;;  %v4133_v43 = vrot.slane %v4132_v49, 2 }
 0x43f   : > { %v10427_v55 = vpop.eup %6456  ;;  %6476 = vpow2.f32 %v3957_v56  ;;  %v4250_v16 = vadd.f32 %v10415_v13, %v4249_v58  ;;  %v4399_v61 = vpack.c.bf16 %v10422_v20, %v10417_v45 }
 0x440   : > { %v10435_v4 = vpop.eup %6458  ;;  %6478 = vpow2.f32 %v3959_v9  ;;  %v4134_v39 = vadd.f32 %v4133_v43, %v4132_v49 }
 0x441   : > { %v10440_v23 = vpop.eup %6460  ;;  %6480 = vpow2.f32 %v3961_v32  ;;  %v4251_v2 = vadd.f32 %v10417_v45, %v4250_v16  ;;  %v4400_v30 = vpack.c.bf16 %v10435_v4, %v10427_v55 }
 0x442   : > { %v10448_v27 = vpop.eup %6462  ;;  %6482 = vpow2.f32 %v3963_v62 }
 0x443   : > { %v10453_v35 = vpop.eup %6464  ;;  %6484 = vpow2.f32 %v3965_v41  ;;  %v4252_v63 = vadd.f32 %v10422_v20, %v4251_v2  ;;  %v4401_v37 = vpack.c.bf16 %v10448_v27, %v10440_v23 }
 0x444   : > { %v10461_v51 = vpop.eup %6466  ;;  %6486 = vpow2.f32 %v3967_v24 }
 0x445   : > { %v10466_v17 = vpop.eup %6468  ;;  %6488 = vpow2.f32 %v3969_v54  ;;  %v4253_v42 = vadd.f32 %v10427_v55, %v4252_v63  ;;  %v4402_v28 = vpack.c.bf16 %v10461_v51, %v10453_v35 }
 0x446   : > { %v10474_v21 = vpop.eup %6470  ;;  %6490 = vpow2.f32 %v3971_v59 }
 0x447   : > { %v10479_v29 = vpop.eup %6472  ;;  %6492 = vpow2.f32 %v3973_v38  ;;  %v4254_v10 = vadd.f32 %v10435_v4, %v4253_v42  ;;  %v4403_v0 = vpack.c.bf16 %v10474_v21, %v10466_v17 }
 0x448   : > { %v10487_v33 = vpop.eup %6474  ;;  %6494 = vpow2.f32 %v3975_v1 }
 0x449   : > { %v6477_v53 = vpop.eup %6476  ;;  %6496 = vpow2.f32 %v3977_v52  ;;  %v4255_v48 = vadd.f32 %v10440_v23, %v4254_v10  ;;  %v4404_v15 = vpack.c.bf16 %v10487_v33, %v10479_v29 }
 0x44a   : > { %v6479_v25 = vpop.eup %6478  ;;  %6498 = vpow2.f32 %v3979_v19  ;;  %v5463_v9 = vpop.f32.mrb[160].mxu1 }
 0x44b   : > { %v6481_v47 = vpop.eup %6480  ;;  %6500 = vpow2.f32 %v3981_v34  ;;  %v4256_v7 = vadd.f32 %v10448_v27, %v4255_v48  ;;  %v4405_v8 = vpack.c.bf16 %v6479_v25, %v6477_v53  ;;  %v5464_v58 = vpop.f32.mrb[161].mxu1 }
 0x44c   : > { %v6483_v5 = vpop.eup %6482  ;;  %6502 = vpow2.f32 %v3983_v40  ;;  %v5465_v24 = vadd.f32 %v5464_v58, %v5463_v9  ;;  %v5466_v54 = vpop.f32.mrb[162].mxu1  ;;  %v11829_v9 = vld [vmem:[#allocation119_spill] sm:$0xff] }
 0x44d   : > { %v6485_v57 = vpop.eup %6484  ;;  %6504 = vpow2.f32 %v3985_v36  ;;  %v4257_v12 = vadd.f32 %v10453_v35, %v4256_v7  ;;  %5557 = vmatprep.subr.bf16.mxu0 %v4405_v8  ;;  %v4406_v26 = vpack.c.bf16 %v6483_v5, %v6481_v47  ;;  %v5467_v22 = vpop.f32.mrb[163].mxu1 }
 0x44e   : > { %v6487_v56 = vpop.eup %6486  ;;  %6506 = vpow2.f32 %v3987_v50  ;;  %5558 = vmatpush3.bf16.msra.mxu0 %v4397_v31  ;;  %v4743_v63 = vmul.f32 %v10403_v11, %v5465_v24  ;;  %v4135_v11 = vrot.slane %v4134_v39, 1 }
 0x44f   : > { %v6489_v14 = vpop.eup %6488  ;;  %v4258_v3 = vadd.f32 %v10461_v51, %v4257_v12  ;;  %5559 = vmatprep.subr.bf16.mxu0 %v4406_v26  ;;  %v4407_v6 = vpack.c.bf16 %v6487_v56, %v6485_v57 }
 0x450   : > { %v6491_v32 = vpop.eup %6490  ;;  %v4136_v45 = vadd.f32 %v4135_v11, %v4134_v39 }
 0x451   : > { %v6493_v62 = vpop.eup %6492  ;;  %v4259_v41 = vadd.f32 %v10466_v17, %v4258_v3  ;;  %v4408_v16 = vpack.c.bf16 %v6491_v32, %v6489_v14 }
 0x452   : > { %v6495_v2 = vpop.eup %6494  ;;  %5560 = vmatpush3.bf16.msra.mxu0 %v4398_v44  ;;  %6508 = vrcp.f32 %v4136_v45 }
 0x453   : > { %v6497_v31 = vpop.eup %6496  ;;  %v4260_v59 = vadd.f32 %v10474_v21, %v4259_v41  ;;  %5561 = vmatprep.subr.bf16.mxu0 %v4407_v6  ;;  %v4409_v38 = vpack.c.bf16 %v6495_v2, %v6493_v62 }
 0x454   : > { %v6499_v1 = vpop.eup %6498 }
 0x455   : > { %v6501_v52 = vpop.eup %6500  ;;  %v4261_v42 = vadd.f32 %v10479_v29, %v4260_v59  ;;  %v4410_v19 = vpack.c.bf16 %v6499_v1, %v6497_v31  ;;  %v5986_v59 = vld [vmem:[%s10613_s6] sm:$0xff]  }
 0x456   : > { %v6503_v34 = vpop.eup %6502  ;;  %5562 = vmatpush3.bf16.msra.mxu0 %v4399_v61  ;;  %5883 = vmatprep.mubr.msk.bf16.mxu1 %vm524_vm0, %v5986_v59 }
 0x457   : > { %v6505_v13 = vpop.eup %6504  ;;  %v4262_v44 = vadd.f32 %v10487_v33, %v4261_v42  ;;  %5563 = vmatprep.subr.bf16.mxu0 %v4408_v16  ;;  %v4411_v10 = vpack.c.bf16 %v6503_v34, %v6501_v52  ;;  %v11828_v33 = vld [vmem:[#allocation112_spill] sm:$0xff] }
 0x458   : > { %v6507_v40 = vpop.eup %6506 }
 0x459   : > { %v4263_v36 = vadd.f32 %v6477_v53, %v4262_v44  ;;  %v4412_v48 = vpack.c.bf16 %v6507_v40, %v6505_v13 }
 0x45a   : > { %5564 = vmatpush3.bf16.msra.mxu0 %v4400_v30 }
 0x45b   : > { %v4264_v60 = vadd.f32 %v6479_v25, %v4263_v36  ;;  %5565 = vmatprep.subr.bf16.mxu0 %v4409_v38 }
 0x45c   : > { %v6509_v50 = vpop.eup %6508 }
 0x45d   : > { %v4265_v18 = vadd.f32 %v6481_v47, %v4264_v60 }
 0x45e   : > { %5566 = vmatpush3.bf16.msra.mxu0 %v4401_v37  ;;  %v11827_v37 = vld [vmem:[#allocation89_spill] sm:$0xff] }
 0x45f   : > { %v4266_v20 = vadd.f32 %v6483_v5, %v4265_v18  ;;  %5567 = vmatprep.subr.bf16.mxu0 %v4410_v19  ;;  %v969_v35 = vpack.c.bf16 %v11827_v37, %v11827_v37 }
 0x461   : > { %v4267_v61 = vadd.f32 %v6485_v57, %v4266_v20 }
 0x462   : > { %5568 = vmatpush3.bf16.msra.mxu0 %v4402_v28 }
 0x463   : > { %v4268_v53 = vadd.f32 %v6487_v56, %v4267_v61  ;;  %5569 = vmatprep.subr.bf16.mxu0 %v4411_v10 }
 0x465   : > { %v4269_v55 = vadd.f32 %v6489_v14, %v4268_v53  ;;  %v5485_v30 = vpop.f32.mrb[144].mxu0 }
 0x466   : > { %5570 = vmatpush3.bf16.msra.mxu0 %v4403_v0  ;;  %v5486_v27 = vpop.f32.mrb[145].mxu0 }
 0x467   : > { %v4270_v4 = vadd.f32 %v6491_v32, %v4269_v55  ;;  %5571 = vmatprep.subr.bf16.mxu0 %v4412_v48  ;;  %v5487_v28 = vadd.f32 %v5486_v27, %v5485_v30  ;;  %v5488_v25 = vpop.f32.mrb[146].mxu0  ;;  %v4205_v32 = vrot.slane %v11829_v9, 4 }
 0x468   : > { %v5489_v47 = vpop.f32.mrb[147].mxu0 }
 0x469   : > { %v4271_v23 = vadd.f32 %v6493_v62, %v4270_v4  ;;  %v4744_v17 = vmul.f32 %v6509_v50, %v5487_v28  ;;  %v4206_v54 = vadd.f32 %v4205_v32, %v11829_v9 }
 0x46a   : > { %5572 = vmatpush3.bf16.msra.mxu0 %v4404_v15  ;;  %v4168_v15 = vrot.slane %v11828_v33, 4 }
 0x46b   : > { %v4272_v51 = vadd.f32 %v6495_v2, %v4271_v23  ;;  %v4750_v0 = vpack.c.bf16 %v4744_v17, %v4743_v63  ;;  %v4207_v2 = vrot.slane %v4206_v54, 2  ;;  %v5987_v17 = vld [vmem:[%s10613_s6 + $0x8] sm:$0xff]  }
 0x46c   : > { %v4169_v12 = vadd.f32 %v4168_v15, %v11828_v33 }
 0x46d   : > { %v4273_v7 = vadd.f32 %v6497_v31, %v4272_v51  ;;  %4726 = vmatmul.mubr.bf16.vlgmr.msra.gmra.mrb[152].mxu0 %v969_v35  ;;  %5877 = vmatprep.subr.bf16.mxu1 %v4750_v0  ;;  %v4208_v22 = vadd.f32 %v4207_v2, %v4206_v54 }
 0x46e   : > { %5878 = vmatpush3.bf16.msra.mxu1 %v4750_v0  ;;  %v4170_v26 = vrot.slane %v4169_v12, 2  ;;  %v5989_v0 = vld [vmem:[%s10613_s6 + $0x18] sm:$0xff]  }
 0x46f   : > { %v4274_v21 = vadd.f32 %v6499_v1, %v4273_v7  ;;  %v4209_v43 = vrot.slane %v4208_v22, 1 }
 0x470   : > { %v4171_v56 = vadd.f32 %v4170_v26, %v4169_v12 }
 0x471   : > { %v4275_v8 = vadd.f32 %v6501_v52, %v4274_v21  ;;  %v4210_v31 = vadd.f32 %v4209_v43, %v4208_v22  ;;  %v5988_v21 = vld [vmem:[%s10613_s6 + $0x10] sm:$0xff]  }
 0x472   : > { %v4172_v49 = vrot.slane %v4171_v56, 1 }
 0x473   : > { %v4276_v5 = vadd.f32 %v6503_v34, %v4275_v8  ;;  %v4772_v8 = vpop.permute.xlu0 %4771 }
 0x474   : > { %v4173_v14 = vadd.f32 %v4172_v49, %v4171_v56 }
 0x475   : > { %v4277_v57 = vadd.f32 %v6505_v13, %v4276_v5  ;;  %v4242_v13 = vrot.slane %v10401_v46, 4  ;;  %v4777_v5 = vpop.permute.xlu1 %4776 }
 0x476   : > { %6510 = vrcp.f32 %v4173_v14 }
 0x477   : > { %v4278_v29 = vadd.f32 %v6507_v40, %v4277_v57  ;;  %6512 = vrcp.f32 %v4210_v31  ;;  %v4243_v44 = vadd.f32 %v4242_v13, %v10401_v46  ;;  %v4782_v57 = vpop.permute.xlu0 %4781 }
 0x479   : > { %v4244_v10 = vrot.slane %v4243_v44, 2  ;;  %v4279_v55 = vrot.slane %v4278_v29, 4 }
 0x47b   : > { %v4245_v40 = vadd.f32 %v4244_v10, %v4243_v44  ;;  %v4280_v4 = vadd.f32 %v4279_v55, %v4278_v29  ;;  %v4787_v29 = vpop.permute.xlu1 %4786  ;;  %v4792_v26 = vpop.permute.xlu0 %4791 }
 0x47d   : > { %v4246_v36 = vrot.slane %v4245_v40, 1  ;;  %v4281_v23 = vrot.slane %v4280_v4, 2 }
 0x47f   : > { %v4247_v48 = vadd.f32 %v4246_v36, %v4245_v40  ;;  %v4282_v30 = vadd.f32 %v4281_v23, %v4280_v4  ;;  %v4802_v32 = vpop.permute.xlu0 %4801 }
 0x480   : > { %v6511_v41 = vpop.eup %6510 }
 0x481   : > { %v6513_v42 = vpop.eup %6512  ;;  %6514 = vrcp.f32 %v4247_v48  ;;  %v4283_v27 = vrot.slane %v4282_v30, 1 }
 0x483   : > { %v4284_v37 = vadd.f32 %v4283_v27, %v4282_v30 }
 0x485   : > { %6516 = vrcp.f32 %v4284_v37 }
 0x48b   : > { %v6515_v20 = vpop.eup %6514 }
 0x48f   : > { %v6517_v25 = vpop.eup %6516 }
 0x4ad   : > { %v5507_v3 = vpop.f32.mrb[164].mxu1 }
 0x4ae   : > { %v5508_v6 = vpop.f32.mrb[165].mxu1 }
 0x4af   : > { %v5509_v58 = vadd.f32 %v5508_v6, %v5507_v3  ;;  %v5510_v62 = vpop.f32.mrb[166].mxu1  ;;  %v4797_v6 = vpop.permute.xlu1 %4796 }
 0x4b0   : > { %v5511_v16 = vpop.f32.mrb[167].mxu1 }
 0x4b1   : > { %v4745_v24 = vmul.f32 %v6511_v41, %v5509_v58 }
 0x4b3   : > { %v4807_v16 = vpop.permute.xlu1 %4806 }
 0x4d0   : > { %v5529_v38 = vpop.f32.mrb[148].mxu0 }
 0x4d1   : > { %v5530_v63 = vpop.f32.mrb[149].mxu0 }
 0x4d2   : > { %v5531_v1 = vadd.f32 %v5530_v63, %v5529_v38  ;;  %v5532_v52 = vpop.f32.mrb[150].mxu0 }
 0x4d3   : > { %v5533_v19 = vpop.f32.mrb[151].mxu0 }
 0x4d4   : > { %v4746_v34 = vmul.f32 %v6513_v42, %v5531_v1 }
 0x4d6   : > { %v4751_v39 = vpack.c.bf16 %v4746_v34, %v4745_v24 }
 0x4d8   : > { %5879 = vmatprep.subr.bf16.mxu1 %v4751_v39 }
 0x4d9   : > { %5880 = vmatpush3.bf16.msra.mxu1 %v4751_v39 }
 0x4fa   : > { %v5551_v11 = vpop.f32.mrb[168].mxu1 }
 0x4fb   : > { %v5552_v60 = vpop.f32.mrb[169].mxu1 }
 0x4fc   : > { %v5553_v18 = vadd.f32 %v5552_v60, %v5551_v11  ;;  %v5554_v45 = vpop.f32.mrb[170].mxu1 }
 0x4fd   : > { %v5555_v61 = vpop.f32.mrb[171].mxu1 }
 0x4fe   : > { %v4747_v53 = vmul.f32 %v6515_v20, %v5553_v18 }
 0x540   : > { %v5573_v46 = vpop.f32.mrb[152].mxu0 }
 0x541   : > { %v5574_v35 = vpop.f32.mrb[153].mxu0 }
 0x542   : > { %v5575_v51 = vadd.f32 %v5574_v35, %v5573_v46  ;;  %v5576_v28 = vpop.f32.mrb[154].mxu0 }
 0x543   : > { %v5577_v50 = vpop.f32.mrb[155].mxu0 }
 0x544   : > { %v4748_v47 = vmul.f32 %v6517_v25, %v5575_v51 }
 0x546   : > { %v4752_v7 = vpack.c.bf16 %v4748_v47, %v4747_v53 }
 0x548   : > { %5881 = vmatprep.subr.bf16.mxu1 %v4752_v7 }
 0x549   : > { %5882 = vmatpush3.bf16.msra.mxu1 %v4752_v7 }
 0x54c   : > { %5884 = vmatmul.mubr.msk.bf16.vlgmr.msra.gmra.mrb[172].mxu1 %vm524_vm0, %v5987_v17 }
 0x54d   : > { %5887 = vmatprep.mubr.msk.bf16.mxu1 %vm524_vm0, %v5988_v21 }
 0x554   : > { %5888 = vmatmul.mubr.msk.bf16.gmra.mrb[176].mxu1 %vm524_vm0, %v5989_v0 }
 0x61f   : > { %v5885_v33 = vpop.f32.mrb[172].mxu1 }
 0x620   : > { %v4884_v15 = vadd.f32 %v5885_v33, %v4782_v57  ;;  %v4875_v12 = vpop.f32.mrb[173].mxu1 }
 0x621   : > { %v4876_v56 = vadd.f32 %v4875_v12, %v4772_v8  ;;  %v5886_v49 = vpop.f32.mrb[174].mxu1 }
 0x622   : > { %4908 = vst [vmem:[%s10561_s24 + $0x10] sm:$0xff] %v4884_v15  ;;  %v4887_v14 = vadd.f32 %v5886_v49, %v4787_v29  ;;  %v4878_v3 = vpop.f32.mrb[175].mxu1 }
 0x623   : > { %4906 = vst [vmem:[%s10561_s24] sm:$0xff] %v4876_v56  ;;  %v4879_v9 = vadd.f32 %v4878_v3, %v4777_v5 }
 0x624   : > { %4909 = vst [vmem:[%s10561_s24 + $0x18] sm:$0xff] %v4887_v14 }
 0x625   : > { %4907 = vst [vmem:[%s10561_s24 + $0x8] sm:$0xff] %v4879_v9 }
 0x627   : > { %v5889_v58 = vpop.f32.mrb[176].mxu1  ;;  %4920 = sbr.rel (!%p6668_p6) target bundleno = 1590 (0x636), region = 97 }
 0x628   : > { %v4900_v62 = vadd.f32 %v5889_v58, %v4802_v32  ;;  %v4891_v41 = vpop.f32.mrb[177].mxu1 }
 0x629   : > { %v4892_v24 = vadd.f32 %v4891_v41, %v4792_v26  ;;  %v5890_v54 = vpop.f32.mrb[178].mxu1  ;;  %v4970_v38 = vld [vmem:[%s10561_s24 + $0x10] sm:$0xff] (%p6668_p6) }
 0x62a   : > { %4912 = vst [vmem:[%s10561_s24 + $0x30] sm:$0xff] %v4900_v62  ;;  %v4903_v2 = vadd.f32 %v5890_v54, %v4807_v16  ;;  %v4894_v22 = vpop.f32.mrb[179].mxu1  ;;  %v4966_v31 = vld [vmem:[%s10561_s24] sm:$0xff] (%p6668_p6)  ;;  %4971 = vst [vmem:[%s4924_s14 + $0x20] sm:$0xff] (%p6668_p6), %v4970_v38 }
 0x62b   : > { %4910 = vst [vmem:[%s10561_s24 + $0x20] sm:$0xff] %v4892_v24  ;;  %v4895_v43 = vadd.f32 %v4894_v22, %v4797_v6  ;;  %v4972_v63 = vld [vmem:[%s10561_s24 + $0x18] sm:$0xff] (%p6668_p6)  ;;  %4967 = vst [vmem:[%s4924_s14] sm:$0xff] (%p6668_p6), %v4966_v31 }
 0x62c   : > { %4913 = vst [vmem:[%s10561_s24 + $0x38] sm:$0xff] %v4903_v2  ;;  %v4968_v59 = vld [vmem:[%s10561_s24 + $0x8] sm:$0xff] (%p6668_p6)  ;;  %4973 = vst [vmem:[%s4924_s14 + $0x30] sm:$0xff] (%p6668_p6), %v4972_v63 }
 0x62d   : > { %4911 = vst [vmem:[%s10561_s24 + $0x28] sm:$0xff] %v4895_v43  ;;  %4969 = vst [vmem:[%s4924_s14 + $0x10] sm:$0xff] (%p6668_p6), %v4968_v59 }
 0x631   : > { %v4978_v42 = vld [vmem:[%s10561_s24 + $0x30] sm:$0xff] }
 0x632   : > { %v4974_v1 = vld [vmem:[%s10561_s24 + $0x20] sm:$0xff]  ;;  %4979 = vst [vmem:[%s4924_s14 + $0x60] sm:$0xff] %v4978_v42 }
 0x633   : > { %v4980_v19 = vld [vmem:[%s10561_s24 + $0x38] sm:$0xff]  ;;  %4975 = vst [vmem:[%s4924_s14 + $0x40] sm:$0xff] %v4974_v1 }
 0x634   : > { %v4976_v52 = vld [vmem:[%s10561_s24 + $0x28] sm:$0xff]  ;;  %4981 = vst [vmem:[%s4924_s14 + $0x70] sm:$0xff] %v4980_v19 }
 0x635   : > { %4977 = vst [vmem:[%s4924_s14 + $0x50] sm:$0xff] %v4976_v52 }
 0x636 PF: > { %s18_s11 = sadd.s32 1, %s6572_s11   ;;  %s11830_s27 = smov %s6552_s28 }
 0x637   : > { %p15_p13 = scmp.ge.s32.totalorder %s18_s11, 6   ;;  %s11831_s28 = smov %s6676_s20 }
 0x638   : > { %s11832_s29 = smov %s6564_s9  ;;  %s11833_s30 = smov %s6568_s10 }
 0x639   : > { %s11834_s9 = smov %s11837_s12  ;;  %s11835_s10 = smov %s11841_s13 }
 0x63a   :  { %17 = sbr.rel (!%p15_p13) target bundleno = 4 (0x4), region = 169 }

// kernel: cross_attention.1
= control target key start
LH: loop header
LB: loop body
LE: loop exit
PB: predicated region body
PF: predicated region fallthrough
CT: control target
= control target key end

     0   :  { %s6628_s27 = smov 0   ;;  %s6630_s28 = smov 0   ;;  %s9829_s0 = inlined_call_operand.vmem [shape: bf16[2,64,256], index: 0, kind: input, shape index: {}]   ;;  %s9830_s1 = inlined_call_operand.vmem [shape: bf16[2,64,256], index: 1, kind: input, shape index: {}]   ;;  %s9831_s2 = inlined_call_operand.vmem [shape: bf16[64,64], index: 2, kind: input, shape index: {}]   ;;  %s9832_s3 = inlined_call_operand.vmem [shape: f32[64,1], index: 3, kind: input, shape index: {}]   ;;  %s9833_s4 = inlined_call_operand.vmem [shape: bf16[128,64], index: 4, kind: input, shape index: {}]   ;;  %s9834_s5 = inlined_call_operand.vmem [shape: f32[128,1], index: 5, kind: input, shape index: {}]   ;;  %s9835_s6 = inlined_call_operand.vmem [shape: bf16[64,64], index: 6, kind: input, shape index: {}]   ;;  %s9836_s7 = inlined_call_operand.vmem [shape: f32[64,1], index: 7, kind: input, shape index: {}]   ;;  %s9837_s8 = inlined_call_operand.vmem [shape: f32[2,64,256], index: 8, kind: output, shape index: {}]  }
   0x1   :  { %s6632_s29 = smov 0   ;;  %s6634_s30 = smov 0  }
   0x2   :  { %s6636_s9 = smov 0   ;;  %s6638_s10 = smov 0  }
   0x3   :  { %s6640_s11 = smov 0  }
   0x4 LB: > { %s27_s12 = sadd.s32 1, %s6572_s9  ;;  %s30_s13 = sadd.s32 1, %s6576_s10  ;;  %s6580_s11 = sphi %s6640_s11, %s18_s11   ;;  %s6576_s10 = sphi %s6638_s10, %s10102_s10   ;;  %s6572_s9 = sphi %s6636_s9, %s10101_s9   ;;  %s6568_s30 = sphi %s6634_s30, %s10100_s30   ;;  %s6564_s29 = sphi %s6632_s29, %s10099_s29   ;;  %s6560_s28 = sphi %s6630_s28, %s10098_s28   ;;  %s6556_s27 = sphi %s6628_s27, %s10097_s27  }
   0x5   : > { %p28_p0 = scmp.ge.s32.totalorder %s27_s12, 2  ;;  %s5069_s14 = sadd.s32 4294967295, %s6580_s11  }
   0x6   : > { %p46_p1 = scmp.ne.s32.totalorder %s6560_s28, %s6556_s27  ;;  %p47_p2 = scmp.eq.s32.totalorder %s6580_s11, 0 }
   0x7   : > { %s10104_s12 = smov (%p28_p0, %s27_s12), 0  ;;  %s10106_s13 = smov (!%p28_p0, %s30_s13), %s6576_s10 }
   0x8   : > { %p32_p3 = scmp.ge.s32.totalorder %s10106_s13, 2  ;;  %p230_p4 = scmp.eq.s32.totalorder %s5069_s14, 3 }
   0x9   : > { %s35_s15 = ssub.s32 %s6572_s9, %s10104_s12  ;;  %p48_p5 = por %p47_p2, %p46_p1 }
   0xa   : > { %s10108_s13 = smov (%p32_p3, %s10106_s13), 0  ;;  %p6676_p6 = por %p230_p4, %p46_p1 }
   0xb   : > { %s34_s17 = ssub.s32 %s6576_s10, %s10108_s13  ;;  %s39_s19 = sadd.s32 1, %s6560_s28 }
   0xc   : > { %s36_s18 = sor.u32 %s35_s15, %s34_s17  ;;  %p5072_p8 = scmp.ge.s32.totalorder %s6580_s11, 4 }
   0xd   : > { %p37_p7 = scmp.eq.s32.totalorder %s36_s18, 0 }
   0xe   : > { %270 = sbr.rel (%p5072_p8) target bundleno = 32 (0x20), region = 40 }
   0xf   : > { %s6684_s20 = scalar_select %p37_p7, %s6560_s28, %s39_s19  }
  0x15   : > { %273 = sbr.rel (!%p48_p5) target bundleno = 32 (0x20), region = 44  ;;  %s275_s21 = sand.u32 (%p48_p5), 1, %s6560_s28  }
  0x16   : > { %s5074_s22 = sshll.u32 (%p48_p5), %s6576_s10, 4  ;;  %s5073_s23 = sshll.u32 (%p48_p5), %s275_s21, 5 }
  0x17   : > { %s279_s24 = sadd.s32 (%p48_p5), %s6572_s9, %s5074_s22  ;;  %s277_s17 = scalar_lea.vmem (%p48_p5), [#allocation2], %s5073_s23 }
  0x18   : > { %s5075_s25 = sshll.u32 (%p48_p5), %s279_s24, 2 }
  0x19   : > { %s281_s15 = scalar_lea.vmem (%p48_p5), %s9829_s0, %s5075_s25 }
  0x1a   : > { %v297_v0 = vld [vmem:[%s281_s15] sm:$0xf] (%p48_p5)  ;;  %v299_v1 = vld [vmem:[%s281_s15 + $0x8] sm:$0xf] (%p48_p5)  ;;  %v301_v2 = vld [vmem:[%s281_s15 + $0x10] sm:$0xf] (%p48_p5) }
  0x1b   : > { %298 = vst [vmem:[%s277_s17] sm:$0xf] (%p48_p5), %v297_v0  ;;  %300 = vst [vmem:[%s277_s17 + $0x4] sm:$0xf] (%p48_p5), %v299_v1  ;;  %v303_v3 = vld [vmem:[%s281_s15 + $0x18] sm:$0xf] (%p48_p5) }
  0x1c   : > { %302 = vst [vmem:[%s277_s17 + $0x8] sm:$0xf] %v301_v2  ;;  %v305_v4 = vld [vmem:[%s281_s15 + $0x20] sm:$0xf]  ;;  %v307_v5 = vld [vmem:[%s281_s15 + $0x28] sm:$0xf] }
  0x1d   : > { %304 = vst [vmem:[%s277_s17 + $0xc] sm:$0xf] %v303_v3  ;;  %306 = vst [vmem:[%s277_s17 + $0x10] sm:$0xf] %v305_v4  ;;  %v309_v6 = vld [vmem:[%s281_s15 + $0x30] sm:$0xf] }
  0x1e   : > { %308 = vst [vmem:[%s277_s17 + $0x14] sm:$0xf] %v307_v5  ;;  %v311_v7 = vld [vmem:[%s281_s15 + $0x38] sm:$0xf]  ;;  %310 = vst [vmem:[%s277_s17 + $0x18] sm:$0xf] %v309_v6 }
  0x1f   : > { %312 = vst [vmem:[%s277_s17 + $0x1c] sm:$0xf] %v311_v7 }
  0x20 PF: > { %p5076_p9 = scmp.ge.s32.totalorder %s6580_s11, 1  ;;  %p358_p10 = scmp.lt.s32.totalorder %s6580_s11, 5 }
  0x22   : > { %p359_p11 = pnand %p5076_p9, %p358_p10 }
  0x24   : > { %362 = sbr.rel (%p359_p11) target bundleno = 3795 (0xed3), region = 89 }
  0x2b   : > { %s365_s18 = sand.u32 1, %s6556_s27   ;;  %p402_p12 = scmp.lt.s32.totalorder %s6568_s30, 1  ;;  %v5979_v8 = vld [vmem:[%s9831_s2] sm:$0xff]   ;;  %vm524_vm0 = vcmask 523264   ;;  %v6582_v10 = vmov 0   ;;  %v5982_v21 = vld [vmem:[%s9831_s2 + $0x8] sm:$0xff]  }
  0x2c   : > { %s5077_s19 = sshll.u32 %s365_s18, 5  ;;  %5595 = vmatprep.mubr.msk.bf16.mxu0 %vm524_vm0, %v5979_v8  ;;  %860 = vmatprep.mubr.bf16.mxu1 %v6582_v10  ;;  %v5985_v23 = vld [vmem:[%s9831_s2 + $0x10] sm:$0xff]   ;;  %v618_v24 = vld [vmem:[%s9834_s5] sm:$0xff]  ;;  %v5984_v25 = vld [vmem:[%s9833_s4 + $0x8] sm:$0xff]   ;;  %vm1017_vm1 = vcmask 1043456   ;;  %vm968_vm2 = vcmask 64512  }
  0x2d   : > { %s367_s23 = scalar_lea.vmem [#allocation2], %s5077_s19  ;;  %5964 = vset.pattern.permute.xlu0 %v6582_v10  ;;  %v432_v26 = vld [vmem:[%s9832_s3] sm:$0xff]  ;;  %v5986_v27 = vld [vmem:[%s9831_s2 + $0x18] sm:$0xff]   ;;  %v619_v28 = vld [vmem:[%s9834_s5 + $0x8] sm:$0xff]  ;;  %s5254_s27 = sshll.u32 (%p6676_p6), %s6568_s30, 4 }
  0x2e   : > { %v5966_v9 = vld [vmem:[%s367_s23] sm:$0xff]   ;;  %s403_s24 = scalar_select %p402_p12, %s6568_s30, 1  ;;  %v5969_v11 = vld [vmem:[%s367_s23 + $0x8] sm:$0xff]   ;;  %v5973_v12 = vld [vmem:[%s367_s23 + $0x10] sm:$0xff]   ;;  %636 = vperm.xlu0 %5964, %v618_v24  }
  0x2f   : > { %5587 = vmatprep.subr.bf16.mxu0 %v5966_v9  ;;  %v5977_v17 = vld [vmem:[%s367_s23 + $0x18] sm:$0xff]   ;;  %v5987_v29 = vld [vmem:[%s9833_s4 + $0x10] sm:$0xff]   ;;  %v626_v30 = vld [vmem:[%s9834_s5 + $0x40] sm:$0xff]  ;;  %s5078_s23 = sshll.u32 %s365_s18, 6  ;;  %s4922_s18 = sadd.s32 (%p6676_p6), %s6564_s29, %s5254_s27 }
  0x30   : > { %s5258_s25 = sshll.u32 %s403_s24, 6  ;;  %5588 = vmatpush3.bf16.msra.mxu0 %v5966_v9  ;;  %v5988_v31 = vld [vmem:[%s9833_s4] sm:$0xff]   ;;  %v433_v32 = vld [vmem:[%s9832_s3 + $0x8] sm:$0xff]  ;;  %v5989_v33 = vld [vmem:[%s9833_s4 + $0x18] sm:$0xff]   ;;  %s9783_s24 = scalar_lea.vmem [#allocation3], %s5078_s23 }
  0x31   : > { %s406_s15 = scalar_lea.vmem %s9830_s1, %s5258_s25  ;;  %5589 = vmatprep.subr.bf16.mxu0 %v5969_v11  ;;  %v5990_v34 = vld [vmem:[%s9833_s4 + $0x20] sm:$0xff]   ;;  %v5991_v35 = vld [vmem:[%s9833_s4 + $0x28] sm:$0xff]   ;;  %v5992_v36 = vld [vmem:[%s9833_s4 + $0x30] sm:$0xff]   ;;  %s5255_s16 = sshll.u32 (%p6676_p6), %s4922_s18, 3 }
  0x32   : > { %v5967_v13 = vld [vmem:[%s406_s15 + $0x4] ss:$8 sps:$4 sm:$0xff]   ;;  %v5970_v14 = vld [vmem:[%s406_s15] ss:$8 sps:$4 sm:$0xff]   ;;  %v5971_v15 = vld [vmem:[%s406_s15 + $0x14] ss:$8 sps:$4 sm:$0xff]   ;;  %442 = vperm.xlu0 %5964, %v432_v26   ;;  %s4924_s14 = scalar_lea.vmem (%p6676_p6), %s9837_s8, %s5255_s16 }
  0x33   : > { %5891 = vmatprep.subr.bf16.mxu1 %v5967_v13  ;;  %v5974_v16 = vld [vmem:[%s406_s15 + $0x10] ss:$8 sps:$4 sm:$0xff]   ;;  %v5975_v18 = vld [vmem:[%s406_s15 + $0x24] ss:$8 sps:$4 sm:$0xff]   ;;  %v5978_v19 = vld [vmem:[%s406_s15 + $0x20] ss:$8 sps:$4 sm:$0xff]  }
  0x34   : > { %5895 = vmatpush1.bf16.msra.mxu1 %v5970_v14  ;;  %5590 = vmatpush3.bf16.msra.mxu0 %v5969_v11  ;;  %v5980_v20 = vld [vmem:[%s406_s15 + $0x34] ss:$8 sps:$4 sm:$0xff]   ;;  %v5983_v22 = vld [vmem:[%s406_s15 + $0x30] ss:$8 sps:$4 sm:$0xff]  }
  0x35   : > { %5892 = vmatprep.subr.bf16.mxu1 %v5971_v15  ;;  %5591 = vmatprep.subr.bf16.mxu0 %v5973_v12  ;;  %v5993_v37 = vld [vmem:[%s9833_s4 + $0x38] sm:$0xff]  }
  0x36   : > { %641 = vperm.xlu0 %5964, %v619_v28  }
  0x38   : > { %5896 = vmatpush1.bf16.msra.mxu1 %v5974_v16  ;;  %5592 = vmatpush3.bf16.msra.mxu0 %v5973_v12 }
  0x39   : > { %5893 = vmatprep.subr.bf16.mxu1 %v5975_v18  ;;  %5593 = vmatprep.subr.bf16.mxu0 %v5977_v17 }
  0x3a   : > { %676 = vperm.xlu0 %5964, %v626_v30  }
  0x3c   : > { %5897 = vmatpush1.bf16.msra.mxu1 %v5978_v19  ;;  %5594 = vmatpush3.bf16.msra.mxu0 %v5977_v17  ;;  %v434_v17 = vld [vmem:[%s9832_s3 + $0x10] sm:$0xff] }
  0x3d   : > { %5894 = vmatprep.subr.bf16.mxu1 %v5980_v20  ;;  %818 = vmatprep.subr.bf16.mxu0 %v5967_v13 }
  0x3e   : > { %447 = vperm.xlu0 %5964, %v433_v32  }
  0x3f   : > { %5596 = vmatmul.mubr.msk.bf16.vlgmr.msra.gmra.mrb[0].mxu0 %vm524_vm0, %v5982_v21 }
  0x40   : > { %5898 = vmatpush1.bf16.msra.mxu1 %v5983_v22  ;;  %819 = vmatpush1.bf16.msra.mxu0 %v5970_v14 }
  0x41   : > { %820 = vmatprep.subr.bf16.mxu0 %v5971_v15  ;;  %5599 = vmatprep.mubr.msk.bf16.mxu0 %vm524_vm0, %v5985_v23 }
  0x43   : > { %5110 = vmatmul.mubr.msk.bf16.vlgmr.msra.gmra.mrb[0].mxu1 %vm524_vm0, %v5984_v25 }
  0x44   : > { %821 = vmatpush1.bf16.msra.mxu0 %v5974_v16  ;;  %870 = vmatprep.mubr.bf16.mxu1 %v6582_v10  ;;  %v620_v16 = vld [vmem:[%s9834_s5 + $0x10] sm:$0xff] }
  0x45   : > { %822 = vmatprep.subr.bf16.mxu0 %v5975_v18 }
  0x47   : > { %5600 = vmatmul.mubr.msk.bf16.gmra.mrb[4].mxu0 %vm524_vm0, %v5986_v27 }
  0x48   : > { %823 = vmatpush1.bf16.msra.mxu0 %v5978_v19  ;;  %850 = vmatprep.mubr.bf16.mxu0 %v6582_v10 }
  0x49   : > { %824 = vmatprep.subr.bf16.mxu0 %v5980_v20  ;;  %v627_v20 = vld [vmem:[%s9834_s5 + $0x48] sm:$0xff] }
  0x4b   : > { %5111 = vmatmul.mubr.msk.bf16.gmra.mrb[4].mxu1 %vm524_vm0, %v5987_v29 }
  0x4c   : > { %825 = vmatpush1.bf16.msra.mxu0 %v5983_v22  ;;  %880 = vmatprep.mubr.bf16.mxu1 %v6582_v10 }
  0x4f   : > { %5109 = vmatmul.mubr.msk.bf16.vlgmr.msra.gmra.mrb[8].mxu0 %vm524_vm0, %v5988_v31 }
  0x53   : > { %5112 = vmatmul.mubr.msk.bf16.gmra.mrb[8].mxu1 %vm524_vm0, %v5989_v33 }
  0x54   : > { %890 = vmatprep.mubr.bf16.mxu1 %v6582_v10 }
  0x5b   : > { %5113 = vmatmul.mubr.msk.bf16.gmra.mrb[12].mxu1 %vm524_vm0, %v5990_v34 }
  0x5c   : > { %900 = vmatprep.mubr.bf16.mxu1 %v6582_v10 }
  0x63   : > { %5114 = vmatmul.mubr.msk.bf16.gmra.mrb[16].mxu1 %vm524_vm0, %v5991_v35 }
  0x64   : > { %910 = vmatprep.mubr.bf16.mxu1 %v6582_v10 }
  0x6b   : > { %5115 = vmatmul.mubr.msk.bf16.gmra.mrb[20].mxu1 %vm524_vm0, %v5992_v36 }
  0x6c   : > { %920 = vmatprep.mubr.bf16.mxu1 %v6582_v10 }
  0x73   : > { %5116 = vmatmul.mubr.msk.bf16.gmra.mrb[24].mxu1 %vm524_vm0, %v5993_v37 }
  0xad   : > { %v637_v38 = vpop.permute.xlu0 %636 }
  0xb1   : > { %v443_v40 = vpop.permute.xlu0 %442 }
  0xb5   : > { %v642_v62 = vpop.permute.xlu0 %641 }
  0xb9   : > { %v6817_v9 = vpop.permute.xlu0 %676 }
  0xbd   : > { %v6833_v24 = vpop.permute.xlu0 %447 }
 0x112   : > { %v6775_v39 = vpop.f32.mrb[0].mxu0 }
 0x113   : > { %9840 = vst [vmem:[#allocation4_spill] sm:$0xff] %v6775_v39  ;;  %v571_v41 = vpop.f32.mrb[1].mxu0 }
 0x114   : > { %v572_v42 = vadd.f32 %v571_v41, %v443_v40  ;;  %v6777_v43 = vpop.f32.mrb[2].mxu0 }
 0x115   : > { %9841 = vst [vmem:[#allocation5_spill] sm:$0xff] %v6777_v43  ;;  %v6779_v44 = vpop.f32.mrb[3].mxu0 }
 0x116   : > { %v931_v45 = vpack.c.bf16 %v572_v42, %v572_v42  ;;  %v6781_v46 = vpop.f32.mrb[0].mxu1 }
 0x117   : > { %v6783_v47 = vpop.f32.mrb[1].mxu1 }
 0x118   : > { %v1019_v48 = vsel %vm1017_vm1, %v931_v45, 0  ;;  %5899 = vmatprep.subr.msk.bf16.mxu0 %vm1017_vm1, %v931_v45  ;;  %v6787_v49 = vpop.f32.mrb[2].mxu1 }
 0x119   : > { %5604 = vmatpush3.bf16.msra.mxu0 %v1019_v48  ;;  %v6789_v50 = vpop.f32.mrb[3].mxu1 }
 0x11a   : > { %v6791_v51 = vpop.f32.mrb[4].mxu0 }
 0x11b   : > { %9842 = vst [vmem:[#allocation6_spill] sm:$0xff] %v6791_v51  ;;  %v6793_v52 = vpop.f32.mrb[5].mxu0 }
 0x11c   : > { %9843 = vst [vmem:[#allocation7_spill] sm:$0xff] %v6793_v52  ;;  %v6795_v53 = vpop.f32.mrb[6].mxu0 }
 0x11d   : > { %9844 = vst [vmem:[#allocation8_spill] sm:$0xff] %v6795_v53  ;;  %v6797_v54 = vpop.f32.mrb[7].mxu0 }
 0x11e   : > { %9845 = vst [vmem:[#allocation9_spill] sm:$0xff] %v6797_v54  ;;  %v6799_v55 = vpop.f32.mrb[4].mxu1 }
 0x11f   : > { %v6801_v56 = vpop.f32.mrb[5].mxu1 }
 0x120   : > { %9846 = vst [vmem:[#allocation10_spill] sm:$0xff] %v6801_v56  ;;  %v6803_v57 = vpop.f32.mrb[6].mxu1 }
 0x121   : > { %9847 = vst [vmem:[#allocation11_spill] sm:$0xff] %v6803_v57  ;;  %v6805_v58 = vpop.f32.mrb[7].mxu1 }
 0x122   : > { %9848 = vst [vmem:[#allocation12_spill] sm:$0xff] %v6805_v58  ;;  %v852_v59 = vpop.f32.mrb[8].mxu0 }
 0x123   : > { %v854_v60 = vpop.f32.mrb[9].mxu0  ;;  %v853_v61 = vadd.f32 %v852_v59, %v637_v38 }
 0x124   : > { %v856_v63 = vpop.f32.mrb[10].mxu0  ;;  %v855_v14 = vadd.f32 %v854_v60, %v637_v38 }
 0x125   : > { %v857_v0 = vadd.f32 %v856_v63, %v642_v62  ;;  %v858_v1 = vpop.f32.mrb[11].mxu0  ;;  %v932_v2 = vpack.c.bf16 %v853_v61, %v853_v61 }
 0x126   : > { %v6807_v3 = vpop.f32.mrb[8].mxu1  ;;  %v933_v15 = vpack.c.bf16 %v855_v14, %v855_v14  ;;  %v859_v18 = vadd.f32 %v858_v1, %v642_v62  ;;  %v628_v1 = vld [vmem:[%s9834_s5 + $0x50] sm:$0xff] }
 0x127   : > { %9849 = vst [vmem:[#allocation13_spill] sm:$0xff] %v6807_v3  ;;  %v1411_v4 = vpack.c.bf16 %v857_v0, %v857_v0  ;;  %936 = vxpose.xlu1.c.b16.start.end [1/1] (short) %v932_v2, 128  ;;  %v6809_v5 = vpop.f32.mrb[9].mxu1  ;;  %v621_v2 = vld [vmem:[%s9834_s5 + $0x18] sm:$0xff] }
 0x128   : > { %9850 = vst [vmem:[#allocation14_spill] sm:$0xff] %v6809_v5  ;;  %v6811_v6 = vpop.f32.mrb[10].mxu1  ;;  %v1412_v19 = vpack.c.bf16 %v859_v18, %v859_v18 }
 0x129   : > { %9851 = vst [vmem:[#allocation15_spill] sm:$0xff] %v6811_v6  ;;  %1415 = vxpose.xlu0.c.b16.start.end [1/1] (short) %v1411_v4, 128  ;;  %v6813_v7 = vpop.f32.mrb[11].mxu1 }
 0x12a   : > { %9852 = vst [vmem:[#allocation16_spill] sm:$0xff] %v6813_v7 }
 0x12e   : > { %v6815_v8 = vpop.f32.mrb[12].mxu1 }
 0x12f   : > { %v894_v11 = vpop.f32.mrb[13].mxu1 }
 0x130   : > { %v895_v12 = vadd.f32 %v894_v11, %v6817_v9 }
 0x132   : > { %v935_v13 = vpack.c.bf16 %v895_v12, %v895_v12 }
 0x134   : > { %1400 = vmatprep.mubr.bf16.mxu1 %v935_v13 }
 0x144   : > { %952 = vxpose.xlu1.c.b16.start.end [1/1] (short) %v933_v15, 128 }
 0x14e   : > { %646 = vperm.xlu0 %5964, %v620_v16  }
 0x152   : > { %452 = vperm.xlu0 %5964, %v434_v17  }
 0x161   : > { %1431 = vxpose.xlu1.c.b16.start.end [1/1] (short) %v1412_v19, 128 }
 0x165   : > { %5965 = vset.pattern.permute.xlu1 %v6582_v10 }
 0x181   : > { %681 = vperm.xlu1 %5965, %v627_v20  }
 0x18d   : > { %v944_v21 = vpop.trf.xlu1 }
 0x18e   : > { %5605 = vmatprep.mubr.msk.bf16.mxu0 %vm968_vm2, %v944_v21 }
 0x18f   : > { %v6836_v26 = vpop.trf.xlu0 }
 0x191   : > { %v945_v22 = vpop.trf.xlu1 }
 0x192   : > { %5606 = vmatmul.mubr.msk.bf16.vlgmr.msra.gmra.mrb[12].mxu0 %vm968_vm2, %v945_v22 }
 0x193   : > { %v6840_v28 = vpop.trf.xlu0 }
 0x195   : > { %v946_v23 = vpop.trf.xlu1 }
 0x196   : > { %5609 = vmatprep.mubr.msk.bf16.mxu0 %vm968_vm2, %v946_v23 }
 0x197   : > { %v6843_v31 = vpop.trf.xlu0 }
 0x199   : > { %v947_v25 = vpop.trf.xlu1 }
 0x19a   : > { %5610 = vmatmul.mubr.msk.bf16.gmra.mrb[16].mxu0 %vm968_vm2, %v947_v25 }
 0x19b   : > { %v6847_v33 = vpop.trf.xlu0 }
 0x19d   : > { %v948_v10 = vpop.trf.xlu1 }
 0x19e   : > { %5613 = vmatprep.mubr.msk.bf16.mxu0 %vm968_vm2, %v948_v10 }
 0x19f   : > { %v6850_v36 = vpop.trf.xlu0 }
 0x1a1   : > { %v949_v27 = vpop.trf.xlu1 }
 0x1a2   : > { %5614 = vmatmul.mubr.msk.bf16.gmra.mrb[20].mxu0 %vm968_vm2, %v949_v27 }
 0x1a3   : > { %v6854_v38 = vpop.trf.xlu0 }
 0x1a5   : > { %v950_v29 = vpop.trf.xlu1 }
 0x1a6   : > { %5617 = vmatprep.mubr.msk.bf16.mxu0 %vm968_vm2, %v950_v29 }
 0x1a7   : > { %v6857_v42 = vpop.trf.xlu0 }
 0x1a9   : > { %v951_v30 = vpop.trf.xlu1 }
 0x1aa   : > { %5618 = vmatmul.mubr.msk.bf16.gmra.mrb[24].mxu0 %vm968_vm2, %v951_v30 }
 0x1ab   : > { %v6861_v48 = vpop.trf.xlu0 }
 0x1ad   : > { %v960_v32 = vpop.trf.xlu1 }
 0x1ae   : > { %5621 = vmatprep.mubr.msk.bf16.mxu0 %vm968_vm2, %v960_v32 }
 0x1b1   : > { %v961_v34 = vpop.trf.xlu1 }
 0x1b2   : > { %5622 = vmatmul.mubr.msk.bf16.gmra.mrb[28].mxu0 %vm968_vm2, %v961_v34 }
 0x1b5   : > { %v962_v35 = vpop.trf.xlu1 }
 0x1b6   : > { %5625 = vmatprep.mubr.msk.bf16.mxu0 %vm968_vm2, %v962_v35 }
 0x1b9   : > { %v963_v37 = vpop.trf.xlu1 }
 0x1ba   : > { %5626 = vmatmul.mubr.msk.bf16.gmra.mrb[32].mxu0 %vm968_vm2, %v963_v37 }
 0x1bd   : > { %v964_v40 = vpop.trf.xlu1 }
 0x1be   : > { %5629 = vmatprep.mubr.msk.bf16.mxu0 %vm968_vm2, %v964_v40 }
 0x1c1   : > { %v965_v41 = vpop.trf.xlu1 }
 0x1c2   : > { %5630 = vmatmul.mubr.msk.bf16.gmra.mrb[36].mxu0 %vm968_vm2, %v965_v41 }
 0x1c5   : > { %v966_v45 = vpop.trf.xlu1 }
 0x1c6   : > { %5633 = vmatprep.mubr.msk.bf16.mxu0 %vm968_vm2, %v966_v45 }
 0x1c9   : > { %v967_v59 = vpop.trf.xlu1 }
 0x1ca   : > { %5634 = vmatmul.mubr.msk.bf16.gmra.mrb[40].mxu0 %vm968_vm2, %v967_v59 }
 0x1cd   : > { %v647_v60 = vpop.permute.xlu0 %646  ;;  %v6883_v13 = vpop.trf.xlu1 }
 0x1ce   : > { %v863_v61 = vadd.f32 %v6781_v46, %v647_v60  ;;  %v865_v62 = vadd.f32 %v6783_v47, %v647_v60  ;;  %v435_v46 = vld [vmem:[%s9832_s3 + $0x18] sm:$0xff] }
 0x1d0   : > { %v1888_v63 = vpack.c.bf16 %v863_v61, %v863_v61  ;;  %v1889_v0 = vpack.c.bf16 %v865_v62, %v865_v62 }
 0x1d1   : > { %v6875_v47 = vpop.permute.xlu0 %452  ;;  %v6887_v15 = vpop.trf.xlu1 }
 0x1d2   : > { %1892 = vxpose.xlu0.c.b16.start.end [1/1] (short) %v1888_v63, 128  ;;  %1908 = vxpose.xlu1.c.b16.start.end [1/1] (short) %v1889_v0, 128  ;;  %9853 = vst [vmem:[#allocation17_spill] sm:$0xff] %v6875_v47  ;;  %9858 = vst [vmem:[#allocation22_spill] sm:$0xff] %v6887_v15 }
 0x1d5   : > { %v6891_v17 = vpop.trf.xlu1 }
 0x1d6   : > { %9860 = vst [vmem:[#allocation24_spill] sm:$0xff] %v6891_v17 }
 0x1d9   : > { %v6893_v18 = vpop.trf.xlu1 }
 0x1da   : > { %9861 = vst [vmem:[#allocation25_spill] sm:$0xff] %v6893_v18 }
 0x1dd   : > { %v6905_v25 = vpop.trf.xlu1 }
 0x1de   : > { %9863 = vst [vmem:[#allocation27_spill] sm:$0xff] %v6905_v25 }
 0x1e1   : > { %v6919_v35 = vpop.trf.xlu1 }
 0x1e2   : > { %9865 = vst [vmem:[#allocation29_spill] sm:$0xff] %v6919_v35 }
 0x1e5   : > { %v6931_v60 = vpop.trf.xlu1 }
 0x1e6   : > { %9867 = vst [vmem:[#allocation31_spill] sm:$0xff] %v6931_v60 }
 0x1f2   : > { %686 = vperm.xlu1 %5965, %v628_v1  }
 0x1f7   : > { %651 = vperm.xlu0 %5964, %v621_v2  }
 0x1fb   : > { %457 = vperm.xlu0 %5964, %v435_v46  }
 0x238   : > { %v6877_v4 = vpop.trf.xlu0 }
 0x239   : > { %9854 = vst [vmem:[#allocation18_spill] sm:$0xff] %v6877_v4 }
 0x23c   : > { %v6879_v11 = vpop.trf.xlu0 }
 0x23d   : > { %9855 = vst [vmem:[#allocation19_spill] sm:$0xff] %v6879_v11 }
 0x240   : > { %v6881_v12 = vpop.trf.xlu0 }
 0x241   : > { %9856 = vst [vmem:[#allocation20_spill] sm:$0xff] %v6881_v12 }
 0x244   : > { %v6885_v14 = vpop.trf.xlu0 }
 0x245   : > { %9857 = vst [vmem:[#allocation21_spill] sm:$0xff] %v6885_v14 }
 0x248   : > { %v6889_v16 = vpop.trf.xlu0 }
 0x249   : > { %9859 = vst [vmem:[#allocation23_spill] sm:$0xff] %v6889_v16 }
 0x24c   : > { %v6895_v19 = vpop.trf.xlu0 }
 0x24d   : > { %9862 = vst [vmem:[#allocation26_spill] sm:$0xff] %v6895_v19 }
 0x250   : > { %v6907_v10 = vpop.trf.xlu0 }
 0x251   : > { %9864 = vst [vmem:[#allocation28_spill] sm:$0xff] %v6907_v10 }
 0x254   : > { %v6925_v41 = vpop.trf.xlu0 }
 0x255   : > { %9866 = vst [vmem:[#allocation30_spill] sm:$0xff] %v6925_v41 }
 0x265   : > { %v6897_v20 = vpop.f32.mrb[12].mxu0 }
 0x266   : > { %v6899_v21 = vpop.f32.mrb[13].mxu0 }
 0x267   : > { %v6901_v22 = vpop.f32.mrb[14].mxu0 }
 0x268   : > { %v6903_v23 = vpop.f32.mrb[15].mxu0 }
 0x26d   : > { %v6909_v27 = vpop.f32.mrb[16].mxu0 }
 0x26e   : > { %v1184_v29 = vmax.f32 %v6897_v20, %v6909_v27  ;;  %v6913_v30 = vpop.f32.mrb[17].mxu0 }
 0x26f   : > { %v1182_v32 = vmax.f32 %v6899_v21, %v6913_v30  ;;  %v6917_v34 = vpop.f32.mrb[18].mxu0 }
 0x270   : > { %v1185_v37 = vmax.f32 %v6901_v22, %v6917_v34  ;;  %v6923_v40 = vpop.f32.mrb[19].mxu0 }
 0x271   : > { %v1183_v45 = vmax.f32 %v6903_v23, %v6923_v40 }
 0x275   : > { %v6929_v59 = vpop.f32.mrb[20].mxu0 }
 0x276   : > { %v1188_v61 = vmax.f32 %v1184_v29, %v6929_v59  ;;  %v652_v62 = vpop.permute.xlu0 %651  ;;  %v6934_v63 = vpop.f32.mrb[21].mxu0 }
 0x277   : > { %v867_v0 = vadd.f32 %v6787_v49, %v652_v62  ;;  %v869_v1 = vadd.f32 %v6789_v50, %v652_v62  ;;  %v1186_v2 = vmax.f32 %v1182_v32, %v6934_v63  ;;  %v6939_v46 = vpop.f32.mrb[22].mxu0  ;;  %v6945_v29 = vpop.trf.xlu1 }
 0x278   : > { %v1189_v53 = vmax.f32 %v1185_v37, %v6939_v46  ;;  %v6942_v51 = vpop.f32.mrb[23].mxu0  ;;  %9868 = vst [vmem:[#allocation32_spill] sm:$0xff] %v6945_v29 }
 0x279   : > { %v2365_v54 = vpack.c.bf16 %v867_v0, %v867_v0  ;;  %v2366_v52 = vpack.c.bf16 %v869_v1, %v869_v1  ;;  %v1187_v43 = vmax.f32 %v1183_v45, %v6942_v51 }
 0x27b   : > { %2385 = vxpose.xlu0.c.b16.start.end [1/1] (short) %v2366_v52, 128  ;;  %2369 = vxpose.xlu1.c.b16.start.end [1/1] (short) %v2365_v54, 128  ;;  %v896_v52 = vpop.f32.mrb[14].mxu1  ;;  %v682_v54 = vpop.permute.xlu1 %681 }
 0x27c   : > { %v898_v1 = vpop.f32.mrb[15].mxu1  ;;  %v6959_v6 = vadd.f32 %v896_v52, %v682_v54 }
 0x27d   : > { %v6947_v7 = vpop.f32.mrb[24].mxu0  ;;  %v899_v41 = vadd.f32 %v898_v1, %v682_v54 }
 0x27e   : > { %v1192_v49 = vmax.f32 %v1188_v61, %v6947_v7  ;;  %v6950_v50 = vpop.f32.mrb[25].mxu0  ;;  %9869 = vst [vmem:[#allocation33_spill] sm:$0xff] %v6959_v6 }
 0x27f   : > { %v1190_v32 = vmax.f32 %v1186_v2, %v6950_v50  ;;  %v6953_v62 = vpop.f32.mrb[26].mxu0  ;;  %v1414_v61 = vpack.c.bf16 %v899_v41, %v899_v41 }
 0x280   : > { %v1193_v37 = vmax.f32 %v1189_v53, %v6953_v62  ;;  %v6956_v0 = vpop.f32.mrb[27].mxu0 }
 0x281   : > { %v1191_v45 = vmax.f32 %v1187_v43, %v6956_v0  ;;  %1877 = vmatprep.mubr.bf16.mxu0 %v1414_v61 }
 0x285   : > { %v6961_v10 = vpop.f32.mrb[28].mxu0 }
 0x286   : > { %v1196_v19 = vmax.f32 %v1192_v49, %v6961_v10  ;;  %v6964_v2 = vpop.f32.mrb[29].mxu0 }
 0x287   : > { %v1194_v16 = vmax.f32 %v1190_v32, %v6964_v2  ;;  %v6967_v53 = vpop.f32.mrb[30].mxu0 }
 0x288   : > { %v1197_v43 = vmax.f32 %v1193_v37, %v6967_v53  ;;  %v6970_v14 = vpop.f32.mrb[31].mxu0 }
 0x289   : > { %v1195_v52 = vmax.f32 %v1191_v45, %v6970_v14 }
 0x28d   : > { %v6973_v12 = vpop.f32.mrb[32].mxu0 }
 0x28e   : > { %v1200_v54 = vmax.f32 %v1196_v19, %v6973_v12  ;;  %v6976_v41 = vpop.f32.mrb[33].mxu0 }
 0x28f   : > { %v1198_v49 = vmax.f32 %v1194_v16, %v6976_v41  ;;  %v6979_v1 = vpop.f32.mrb[34].mxu0 }
 0x290   : > { %v1201_v32 = vmax.f32 %v1197_v43, %v6979_v1  ;;  %v6982_v11 = vpop.f32.mrb[35].mxu0  ;;  %v629_v43 = vld [vmem:[%s9834_s5 + $0x58] sm:$0xff] }
 0x291   : > { %v1199_v37 = vmax.f32 %v1195_v52, %v6982_v11 }
 0x295   : > { %v6985_v61 = vpop.f32.mrb[36].mxu0 }
 0x296   : > { %v1204_v45 = vmax.f32 %v1200_v54, %v6985_v61  ;;  %v6988_v5 = vpop.f32.mrb[37].mxu0  ;;  %v436_v54 = vld [vmem:[%s9832_s3 + $0x20] sm:$0xff] }
 0x297   : > { %v1202_v19 = vmax.f32 %v1198_v49, %v6988_v5  ;;  %v6991_v3 = vpop.f32.mrb[38].mxu0  ;;  %v622_v49 = vld [vmem:[%s9834_s5 + $0x20] sm:$0xff] }
 0x298   : > { %v1205_v16 = vmax.f32 %v1201_v32, %v6991_v3  ;;  %v6994_v4 = vpop.f32.mrb[39].mxu0 }
 0x299   : > { %v1203_v52 = vmax.f32 %v1199_v37, %v6994_v4 }
 0x29b   : > { %691 = vperm.xlu1 %5965, %v629_v43  }
 0x29d   : > { %v7003_v6 = vpop.f32.mrb[40].mxu0 }
 0x29e   : > { %v1208_v32 = vmax.f32 %v1204_v45, %v7003_v6  ;;  %v7009_v39 = vpop.f32.mrb[41].mxu0 }
 0x29f   : > { %v1206_v47 = vmax.f32 %v1202_v19, %v7009_v39  ;;  %462 = vperm.xlu1 %5965, %v436_v54   ;;  %v7012_v58 = vpop.f32.mrb[42].mxu0 }
 0x2a0   : > { %v1209_v37 = vmax.f32 %v1205_v16, %v7012_v58  ;;  %656 = vperm.xlu0 %5964, %v622_v49   ;;  %v7015_v43 = vpop.f32.mrb[43].mxu0 }
 0x2a1   : > { %v1207_v57 = vmax.f32 %v1203_v52, %v7015_v43 }
 0x2a2   : > { %v1211_v29 = vmax.f32 %v1208_v32, %v1209_v37 }
 0x2a3   : > { %v1210_v60 = vmax.f32 %v1206_v47, %v1207_v57 }
 0x2a5   : > { %v1212_v35 = vmax.f32 %v1210_v60, %v1211_v29 }
 0x2a7   : > { %v1213_v25 = vrot.slane %v1212_v35, 4 }
 0x2a9   : > { %v1214_v18 = vmax.f32 %v1212_v35, %v1213_v25 }
 0x2ab   : > { %v1215_v45 = vrot.slane %v1214_v18, 2 }
 0x2ad   : > { %v1216_v17 = vmax.f32 %v1214_v18, %v1215_v45 }
 0x2af   : > { %v1217_v15 = vrot.slane %v1216_v17, 1 }
 0x2b1   : > { %v7018_v56 = vmax.f32 %v1216_v17, %v1217_v15 }
 0x2b3   : > { %v1219_v19 = vsub.f32 %v6899_v21, %v7018_v56  ;;  %v1220_v16 = vsub.f32 %v6903_v23, %v7018_v56  ;;  %v1221_v54 = vsub.f32 %v6897_v20, %v7018_v56  ;;  %v1222_v57 = vsub.f32 %v6901_v22, %v7018_v56  ;;  %v7036_v21 = vpop.trf.xlu1 }
 0x2b4   : > { %v1223_v47 = vsub.f32 %v6913_v30, %v7018_v56  ;;  %v1224_v18 = vsub.f32 %v6923_v40, %v7018_v56  ;;  %v1225_v15 = vsub.f32 %v6909_v27, %v7018_v56  ;;  %v1226_v17 = vsub.f32 %v6917_v34, %v7018_v56 }
 0x2b5   : > { %v1227_v20 = vsub.f32 %v6934_v63, %v7018_v56  ;;  %v1228_v22 = vsub.f32 %v6942_v51, %v7018_v56  ;;  %v1229_v23 = vsub.f32 %v6929_v59, %v7018_v56  ;;  %v1230_v25 = vsub.f32 %v6939_v46, %v7018_v56 }
 0x2b6   : > { %v1231_v27 = vsub.f32 %v6950_v50, %v7018_v56  ;;  %v1232_v30 = vsub.f32 %v6956_v0, %v7018_v56  ;;  %v1233_v34 = vsub.f32 %v6947_v7, %v7018_v56  ;;  %v1234_v35 = vsub.f32 %v6953_v62, %v7018_v56 }
 0x2b7   : > { %v1235_v51 = vsub.f32 %v6964_v2, %v7018_v56  ;;  %v1236_v40 = vsub.f32 %v6970_v14, %v7018_v56  ;;  %v1237_v59 = vsub.f32 %v6961_v10, %v7018_v56  ;;  %v1238_v60 = vsub.f32 %v6967_v53, %v7018_v56  ;;  %v7086_v49 = vpop.trf.xlu1 }
 0x2b8   : > { %v1239_v63 = vsub.f32 %v6976_v41, %v7018_v56  ;;  %v1240_v7 = vsub.f32 %v6982_v11, %v7018_v56  ;;  %v1241_v46 = vsub.f32 %v6973_v12, %v7018_v56  ;;  %v1251_v32 = vmul.f32 1.442695, %v1219_v19 }
 0x2b9   : > { %v1253_v37 = vmul.f32 1.442695, %v1220_v16  ;;  %v1255_v45 = vmul.f32 1.442695, %v1221_v54  ;;  %v1257_v50 = vmul.f32 1.442695, %v1222_v57  ;;  %v9871_v11 = vsub.f32 %v6979_v1, %v7018_v56 }
 0x2ba   : > { %5998 = vpow2.f32 %v1251_v32  ;;  %v1259_v62 = vmul.f32 1.442695, %v1223_v47  ;;  %v1261_v10 = vmul.f32 1.442695, %v1224_v18  ;;  %v1263_v0 = vmul.f32 1.442695, %v1225_v15 }
 0x2bb   : > { %6000 = vpow2.f32 %v1253_v37  ;;  %v1265_v2 = vmul.f32 1.442695, %v1226_v17  ;;  %v7088_v14 = vpop.trf.xlu1  ;;  %v1267_v53 = vmul.f32 1.442695, %v1227_v20  ;;  %v1269_v52 = vmul.f32 1.442695, %v1228_v22 }
 0x2bc   : > { %6002 = vpow2.f32 %v1255_v45  ;;  %v1271_v29 = vmul.f32 1.442695, %v1229_v23  ;;  %v1273_v19 = vmul.f32 1.442695, %v1230_v25  ;;  %v1275_v16 = vmul.f32 1.442695, %v1231_v27 }
 0x2bd   : > { %6004 = vpow2.f32 %v1257_v50  ;;  %v1277_v54 = vmul.f32 1.442695, %v1232_v30  ;;  %v1279_v18 = vmul.f32 1.442695, %v1233_v34  ;;  %v1281_v17 = vmul.f32 1.442695, %v1234_v35 }
 0x2be   : > { %6006 = vpow2.f32 %v1259_v62  ;;  %v1283_v22 = vmul.f32 1.442695, %v1235_v51  ;;  %v1285_v30 = vmul.f32 1.442695, %v1236_v40  ;;  %v1287_v34 = vmul.f32 1.442695, %v1237_v59 }
 0x2bf   : > { %6008 = vpow2.f32 %v1261_v10  ;;  %v7090_v57 = vpop.trf.xlu1  ;;  %v1289_v50 = vmul.f32 1.442695, %v1238_v60  ;;  %v1291_v40 = vmul.f32 1.442695, %v1239_v63  ;;  %v1293_v60 = vmul.f32 1.442695, %v1240_v7 }
 0x2c0   : > { %6010 = vpow2.f32 %v1263_v0  ;;  %v1295_v41 = vmul.f32 1.442695, %v1241_v46  ;;  %v1297_v7 = vmul.f32 1.442695, %v9871_v11  ;;  %v9873_v12 = vsub.f32 %v6988_v5, %v7018_v56 }
 0x2c1   : > { %6012 = vpow2.f32 %v1265_v2  ;;  %v9874_v1 = vsub.f32 %v6994_v4, %v7018_v56  ;;  %v9875_v5 = vsub.f32 %v6985_v61, %v7018_v56  ;;  %v9876_v4 = vsub.f32 %v6991_v3, %v7018_v56 }
 0x2c2   : > { %6014 = vpow2.f32 %v1267_v53  ;;  %v7121_v53 = vpop.f32.mrb[16].mxu1  ;;  %v1299_v46 = vmul.f32 1.442695, %v9873_v12 }
 0x2c3   : > { %6016 = vpow2.f32 %v1269_v52  ;;  %v7111_v62 = vpop.trf.xlu1  ;;  %9870 = vst [vmem:[#allocation34_spill] sm:$0xff] %v7121_v53  ;;  %v7128_v32 = vpop.f32.mrb[17].mxu1 }
 0x2c4   : > { %v7092_v47 = vpop.eup %5998  ;;  %6018 = vpow2.f32 %v1271_v29 }
 0x2c5   : > { %v7094_v15 = vpop.eup %6000  ;;  %6020 = vpow2.f32 %v1273_v19  ;;  %v7138_v19 = vpop.f32.mrb[18].mxu1 }
 0x2c6   : > { %v7096_v20 = vpop.eup %6002  ;;  %6022 = vpow2.f32 %v1275_v16  ;;  %v1315_v23 = vadd.f32 %v7094_v15, %v7092_v47  ;;  %v1352_v25 = vpack.c.bf16 %v7094_v15, %v7092_v47 }
 0x2c7   : > { %v7102_v27 = vpop.eup %6004  ;;  %6024 = vpow2.f32 %v1277_v54  ;;  %v7145_v54 = vpop.f32.mrb[19].mxu1 }
 0x2c8   : > { %v7104_v29 = vpop.eup %6006  ;;  %6026 = vpow2.f32 %v1279_v18  ;;  %v1316_v35 = vadd.f32 %v7096_v20, %v1315_v23  ;;  %v1353_v10 = vpack.c.bf16 %v7102_v27, %v7096_v20  ;;  %9872 = vst [vmem:[#allocation35_spill] sm:$0xff] %v7145_v54 }
 0x2c9   : > { %v7109_v51 = vpop.eup %6008  ;;  %6028 = vpow2.f32 %v1281_v17 }
 0x2ca   : > { %v7113_v0 = vpop.eup %6010  ;;  %6030 = vpow2.f32 %v1283_v22  ;;  %v1317_v59 = vadd.f32 %v7102_v27, %v1316_v35  ;;  %v1354_v2 = vpack.c.bf16 %v7109_v51, %v7104_v29 }
 0x2cb   : > { %v7123_v52 = vpop.eup %6012  ;;  %6032 = vpow2.f32 %v1285_v30  ;;  %v1301_v30 = vmul.f32 1.442695, %v9874_v1 }
 0x2cc   : > { %v7130_v37 = vpop.eup %6014  ;;  %6034 = vpow2.f32 %v1287_v34  ;;  %v1318_v63 = vadd.f32 %v7104_v29, %v1317_v59  ;;  %v7160_v34 = vpop.trf.xlu1 }
 0x2cd   : > { %v7140_v16 = vpop.eup %6016  ;;  %6036 = vpow2.f32 %v1289_v50  ;;  %v1303_v50 = vmul.f32 1.442695, %v9875_v5  ;;  %v7224_v29 = vpop.permute.xlu0 %457 }
 0x2ce   : > { %v7147_v18 = vpop.eup %6018  ;;  %6038 = vpow2.f32 %v1291_v40  ;;  %v1319_v17 = vadd.f32 %v7109_v51, %v1318_v63 }
 0x2cf   : > { %v7155_v23 = vpop.eup %6020  ;;  %6040 = vpow2.f32 %v1293_v60  ;;  %v1305_v60 = vmul.f32 1.442695, %v9876_v4 }
 0x2d0   : > { %v7162_v35 = vpop.eup %6022  ;;  %6042 = vpow2.f32 %v1295_v41  ;;  %v1320_v40 = vadd.f32 %v7113_v0, %v1319_v17  ;;  %v9877_v41 = vsub.f32 %v7009_v39, %v7018_v56  ;;  %v7197_v59 = vpop.trf.xlu1 }
 0x2d1   : > { %v7170_v63 = vpop.eup %6024  ;;  %6044 = vpow2.f32 %v1297_v7  ;;  %v9878_v7 = vsub.f32 %v7015_v43, %v7018_v56 }
 0x2d2   : > { %v7175_v11 = vpop.eup %6026  ;;  %6046 = vpow2.f32 %v1299_v46  ;;  %v1307_v61 = vmul.f32 1.442695, %v9877_v41  ;;  %v1321_v12 = vadd.f32 %v7123_v52, %v1320_v40  ;;  %v9879_v46 = vsub.f32 %v7003_v6, %v7018_v56 }
 0x2d3   : > { %v7183_v1 = vpop.eup %6028  ;;  %6048 = vpow2.f32 %v1301_v30  ;;  %v1309_v3 = vmul.f32 1.442695, %v9878_v7  ;;  %v9880_v30 = vsub.f32 %v7012_v58, %v7018_v56 }
 0x2d4   : > { %v6031_v5 = vpop.eup %6030  ;;  %6050 = vpow2.f32 %v1303_v50  ;;  %v1311_v4 = vmul.f32 1.442695, %v9879_v46  ;;  %v1322_v39 = vadd.f32 %v7130_v37, %v1321_v12 }
 0x2d5   : > { %v6033_v41 = vpop.eup %6032  ;;  %6052 = vpow2.f32 %v1305_v60  ;;  %v1313_v17 = vmul.f32 1.442695, %v9880_v30  ;;  %v7205_v30 = vpop.trf.xlu1 }
 0x2d6   : > { %v6035_v43 = vpop.eup %6034  ;;  %6054 = vpow2.f32 %v1307_v61  ;;  %v1323_v50 = vadd.f32 %v7140_v16, %v1322_v39  ;;  %v1360_v7 = vpack.c.bf16 %v6033_v41, %v6031_v5  ;;  %9881 = vst [vmem:[#allocation36_spill] sm:$0xff] %v7205_v30  ;;  %v9882_v30 = vpack.c.bf16 %v7123_v52, %v7113_v0 }
 0x2d7   : > { %v6037_v6 = vpop.eup %6036  ;;  %6056 = vpow2.f32 %v1309_v3  ;;  %v9885_v0 = vpack.c.bf16 %v7155_v23, %v7147_v18 }
 0x2d8   : > { %v6039_v46 = vpop.eup %6038  ;;  %6058 = vpow2.f32 %v1311_v4  ;;  %v1324_v12 = vadd.f32 %v7147_v18, %v1323_v50  ;;  %5284 = vmatprep.subr.bf16.mxu1 %v1360_v7  ;;  %v1361_v40 = vpack.c.bf16 %v6037_v6, %v6035_v43 }
 0x2d9   : > { %v6041_v60 = vpop.eup %6040  ;;  %6060 = vpow2.f32 %v1313_v17  ;;  %5285 = vmatpush3.bf16.msra.mxu1 %v1352_v25 }
 0x2da   : > { %v6043_v56 = vpop.eup %6042  ;;  %v1325_v58 = vadd.f32 %v7155_v23, %v1324_v12  ;;  %5286 = vmatprep.subr.bf16.mxu1 %v1361_v40  ;;  %v1362_v61 = vpack.c.bf16 %v6041_v60, %v6039_v46 }
 0x2db   : > { %v6045_v39 = vpop.eup %6044 }
 0x2dc   : > { %v6047_v3 = vpop.eup %6046  ;;  %v1326_v4 = vadd.f32 %v7162_v35, %v1325_v58  ;;  %v1363_v50 = vpack.c.bf16 %v6045_v39, %v6043_v56  ;;  %v7216_v58 = vpop.permute.xlu1 %686 }
 0x2dd   : > { %v6049_v7 = vpop.eup %6048  ;;  %5287 = vmatpush3.bf16.msra.mxu1 %v1353_v10 }
 0x2de   : > { %v6051_v17 = vpop.eup %6050  ;;  %v1327_v47 = vadd.f32 %v7170_v63, %v1326_v4  ;;  %5288 = vmatprep.subr.bf16.mxu1 %v1362_v61  ;;  %v1364_v15 = vpack.c.bf16 %v6049_v7, %v6047_v3 }
 0x2df   : > { %v6053_v25 = vpop.eup %6052 }
 0x2e0   : > { %v6055_v40 = vpop.eup %6054  ;;  %v1328_v12 = vadd.f32 %v7175_v11, %v1327_v47  ;;  %v1365_v22 = vpack.c.bf16 %v6053_v25, %v6051_v17 }
 0x2e1   : > { %v6057_v45 = vpop.eup %6056  ;;  %5289 = vmatpush3.bf16.msra.mxu1 %v1354_v2  ;;  %v7222_v54 = vpop.trf.xlu1  ;;  %v9883_v2 = vpack.c.bf16 %v7140_v16, %v7130_v37  ;;  %v9887_v37 = vpack.c.bf16 %v7170_v63, %v7162_v35  ;;  %v893_v16 = vadd.f32 %v6815_v8, %v6817_v9 }
 0x2e2   : > { %v6059_v53 = vpop.eup %6058  ;;  %v1329_v20 = vadd.f32 %v7183_v1, %v1328_v12  ;;  %5290 = vmatprep.subr.bf16.mxu1 %v1363_v50  ;;  %v1366_v27 = vpack.c.bf16 %v6057_v45, %v6055_v40 }
 0x2e3   : > { %v6061_v10 = vpop.eup %6060 }
 0x2e4   : > { %v1330_v61 = vadd.f32 %v6031_v5, %v1329_v20  ;;  %v1367_v4 = vpack.c.bf16 %v6061_v10, %v6059_v53  ;;  %v7229_v5 = vpop.trf.xlu0 }
 0x2e5   : > { %5291 = vmatpush3.bf16.msra.mxu1 %v9882_v30  ;;  %9884 = vst [vmem:[#allocation37_spill] sm:$0xff] %v7229_v5  ;;  %v7234_v52 = vpop.trf.xlu1 }
 0x2e6   : > { %v1331_v47 = vadd.f32 %v6033_v41, %v1330_v61  ;;  %5292 = vmatprep.subr.bf16.mxu1 %v1364_v15  ;;  %9886 = vst [vmem:[#allocation38_spill] sm:$0xff] %v7234_v52 }
 0x2e8   : > { %v1332_v51 = vadd.f32 %v6035_v43, %v1331_v47  ;;  %v575_v43 = vadd.f32 %v6779_v44, %v6833_v24  ;;  %v934_v44 = vpack.c.bf16 %v893_v16, %v893_v16  ;;  %v9916_v16 = vld [vmem:[#allocation32_spill] sm:$0xff] }
 0x2e9   : > { %5293 = vmatpush3.bf16.msra.mxu1 %v9883_v2  ;;  %v7245_v18 = vpop.trf.xlu1  ;;  %v9909_v2 = vld [vmem:[#allocation10_spill] sm:$0xff] }
 0x2ea   : > { %v1333_v50 = vadd.f32 %v6037_v6, %v1332_v51  ;;  %5294 = vmatprep.subr.bf16.mxu1 %v1365_v22  ;;  %v7243_v6 = vpop.trf.xlu0  ;;  %9889 = vst [vmem:[#allocation40_spill] sm:$0xff] %v7245_v18  ;;  %v1410_v23 = vpack.c.bf16 %v575_v43, %v575_v43  ;;  %v9911_v43 = vld [vmem:[#allocation24_spill] sm:$0xff] }
 0x2eb   : > { %9888 = vst [vmem:[#allocation39_spill] sm:$0xff] %v7243_v6 }
 0x2ec   : > { %v1334_v12 = vadd.f32 %v6039_v46, %v1333_v50  ;;  %v1496_v35 = vsel %vm1017_vm1, %v1410_v23, 0 }
 0x2ed   : > { %5295 = vmatpush3.bf16.msra.mxu1 %v9885_v0  ;;  %v7256_v9 = vpop.trf.xlu1 }
 0x2ee   : > { %v1335_v41 = vadd.f32 %v6041_v60, %v1334_v12  ;;  %5296 = vmatprep.subr.bf16.mxu1 %v1366_v27  ;;  %v9890_v60 = vpack.c.bf16 %v7183_v1, %v7175_v11  ;;  %v7252_v8 = vpop.trf.xlu0  ;;  %9892 = vst [vmem:[#allocation42_spill] sm:$0xff] %v7256_v9 }
 0x2ef   : > { %9891 = vst [vmem:[#allocation41_spill] sm:$0xff] %v7252_v8 }
 0x2f0   : > { %v1336_v30 = vadd.f32 %v6043_v56, %v1335_v41  ;;  %v9910_v41 = vld [vmem:[#allocation22_spill] sm:$0xff] }
 0x2f1   : > { %5297 = vmatpush3.bf16.msra.mxu1 %v9887_v37 }
 0x2f2   : > { %v1337_v22 = vadd.f32 %v6045_v39, %v1336_v30  ;;  %5298 = vmatprep.subr.bf16.mxu1 %v1367_v4  ;;  %v7258_v1 = vpop.trf.xlu0  ;;  %v905_v30 = vadd.f32 %v7128_v32, %v7216_v58 }
 0x2f3   : > { %9893 = vst [vmem:[#allocation43_spill] sm:$0xff] %v7258_v1 }
 0x2f4   : > { %v1338_v46 = vadd.f32 %v6047_v3, %v1337_v22  ;;  %v7260_v3 = vpop.trf.xlu1  ;;  %v1891_v37 = vpack.c.bf16 %v905_v30, %v905_v30  ;;  %v630_v22 = vld [vmem:[%s9834_s5 + $0x60] sm:$0xff] }
 0x2f5   : > { %5299 = vmatpush3.bf16.msra.mxu1 %v9890_v60  ;;  %9894 = vst [vmem:[#allocation44_spill] sm:$0xff] %v7260_v3 }
 0x2f6   : > { %v1339_v24 = vadd.f32 %v6049_v7, %v1338_v46  ;;  %5900 = vmatprep.subr.msk.bf16.mxu1 %vm1017_vm1, %v1410_v23  ;;  %v7266_v15 = vpop.trf.xlu0  ;;  %v623_v23 = vld [vmem:[%s9834_s5 + $0x28] sm:$0xff] }
 0x2f7   : > { %9895 = vst [vmem:[#allocation45_spill] sm:$0xff] %v7266_v15  ;;  %v437_v46 = vld [vmem:[%s9832_s3 + $0x28] sm:$0xff] }
 0x2f8   : > { %v1340_v63 = vadd.f32 %v6051_v17, %v1339_v24  ;;  %1401 = vmatmul.mubr.bf16.vlgmr.msra.gmra.mrb[28].mxu1 %v934_v44 }
 0x2f9   : > { %5638 = vmatpush3.bf16.msra.mxu1 %v1496_v35  ;;  %5639 = vmatprep.mubr.msk.bf16.mxu1 %vm968_vm2, %v6836_v26  ;;  %v7268_v26 = vpop.trf.xlu1 }
 0x2fa   : > { %v1341_v56 = vadd.f32 %v6053_v25, %v1340_v63  ;;  %9896 = vst [vmem:[#allocation46_spill] sm:$0xff] %v7268_v26  ;;  %v7278_v25 = vpop.trf.xlu0 }
 0x2fb   : > { %9899 = vst [vmem:[#allocation49_spill] sm:$0xff] %v7278_v25 }
 0x2fc   : > { %v1342_v39 = vadd.f32 %v6055_v40, %v1341_v56 }
 0x2fe   : > { %v1343_v11 = vadd.f32 %v6057_v45, %v1342_v39  ;;  %v7272_v45 = vpop.f32.mrb[20].mxu1  ;;  %v7288_v20 = vpop.trf.xlu0 }
 0x2ff   : > { %9897 = vst [vmem:[#allocation47_spill] sm:$0xff] %v7272_v45  ;;  %9902 = vst [vmem:[#allocation52_spill] sm:$0xff] %v7288_v20 }
 0x300   : > { %v1344_v7 = vadd.f32 %v6059_v53, %v1343_v11  ;;  %5640 = vmatmul.mubr.msk.bf16.vlgmr.msra.gmra.mrb[32].mxu1 %vm968_vm2, %v6840_v28  ;;  %v7276_v53 = vpop.f32.mrb[21].mxu1 }
 0x301   : > { %5643 = vmatprep.mubr.msk.bf16.mxu1 %vm968_vm2, %v6843_v31  ;;  %9898 = vst [vmem:[#allocation48_spill] sm:$0xff] %v7276_v53  ;;  %v7280_v28 = vpop.f32.mrb[22].mxu1  ;;  %v7282_v31 = vpop.trf.xlu1 }
 0x302   : > { %v1345_v17 = vadd.f32 %v6061_v10, %v1344_v7  ;;  %9900 = vst [vmem:[#allocation50_spill] sm:$0xff] %v7282_v31  ;;  %v7284_v40 = vpop.f32.mrb[23].mxu1  ;;  %v7302_v4 = vpop.trf.xlu0 }
 0x303   : > { %9901 = vst [vmem:[#allocation51_spill] sm:$0xff] %v7284_v40  ;;  %9907 = vst [vmem:[#allocation57_spill] sm:$0xff] %v7302_v4 }
 0x304   : > { %v1346_v35 = vrot.slane %v1345_v17, 4 }
 0x306   : > { %v1347_v56 = vadd.f32 %v1346_v35, %v1345_v17 }
 0x308   : > { %5644 = vmatmul.mubr.msk.bf16.gmra.mrb[36].mxu1 %vm968_vm2, %v6847_v33  ;;  %v7290_v33 = vpop.f32.mrb[24].mxu1  ;;  %v1348_v11 = vrot.slane %v1347_v56, 2 }
 0x309   : > { %5647 = vmatprep.mubr.msk.bf16.mxu1 %vm968_vm2, %v6850_v36  ;;  %9903 = vst [vmem:[#allocation53_spill] sm:$0xff] %v7290_v33  ;;  %v7294_v36 = vpop.trf.xlu1  ;;  %v7296_v27 = vpop.f32.mrb[25].mxu1  ;;  %v631_v33 = vld [vmem:[%s9834_s5 + $0x68] sm:$0xff] }
 0x30a   : > { %9904 = vst [vmem:[#allocation54_spill] sm:$0xff] %v7294_v36  ;;  %9905 = vst [vmem:[#allocation55_spill] sm:$0xff] %v7296_v27  ;;  %v7298_v10 = vpop.f32.mrb[26].mxu1  ;;  %v1349_v7 = vadd.f32 %v1348_v11, %v1347_v56 }
 0x30b   : > { %v7300_v61 = vpop.f32.mrb[27].mxu1 }
 0x30c   : > { %9906 = vst [vmem:[#allocation56_spill] sm:$0xff] %v7300_v61 }
 0x310   : > { %5648 = vmatmul.mubr.msk.bf16.gmra.mrb[40].mxu1 %vm968_vm2, %v6854_v38 }
 0x311   : > { %5651 = vmatprep.mubr.msk.bf16.mxu1 %vm968_vm2, %v6857_v42 }
 0x318   : > { %5652 = vmatmul.mubr.msk.bf16.gmra.mrb[44].mxu1 %vm968_vm2, %v6861_v48  ;;  %v9912_v48 = vld [vmem:[#allocation25_spill] sm:$0xff] }
 0x319   : > { %5655 = vmatprep.mubr.msk.bf16.mxu1 %vm968_vm2, %v6883_v13  ;;  %v9914_v13 = vld [vmem:[#allocation29_spill] sm:$0xff] }
 0x31a   : > { %v7304_v47 = vpop.permute.xlu1 %691 }
 0x31b   : > { %v7310_v38 = vadd.f32 %v7138_v19, %v7304_v47  ;;  %v9913_v19 = vld [vmem:[#allocation27_spill] sm:$0xff] }
 0x31d   : > { %9908 = vst [vmem:[#allocation58_spill] sm:$0xff] %v7310_v38 }
 0x31e   : > { %v7442_v38 = vpop.permute.xlu1 %462 }
 0x31f   : > { %v657_v42 = vpop.permute.xlu0 %656 }
 0x320   : > { %v873_v51 = vadd.f32 %v6799_v55, %v657_v42  ;;  %v875_v50 = vadd.f32 %v9909_v2, %v657_v42  ;;  %5656 = vmatmul.mubr.msk.bf16.gmra.mrb[48].mxu1 %vm968_vm2, %v9910_v41  ;;  %v9915_v55 = vld [vmem:[#allocation31_spill] sm:$0xff] }
 0x321   : > { %5659 = vmatprep.mubr.msk.bf16.mxu1 %vm968_vm2, %v9911_v43  ;;  %v9926_v43 = vld [vmem:[#allocation12_spill] sm:$0xff] }
 0x322   : > { %v2842_v12 = vpack.c.bf16 %v873_v51, %v873_v51  ;;  %v2843_v0 = vpack.c.bf16 %v875_v50, %v875_v50  ;;  %v1350_v51 = vrot.slane %v1349_v7, 1 }
 0x324   : > { %2846 = vxpose.xlu0.c.b16.start.end [1/1] (short) %v2842_v12, 128  ;;  %2862 = vxpose.xlu1.c.b16.start.end [1/1] (short) %v2843_v0, 128  ;;  %v1351_v50 = vadd.f32 %v1350_v51, %v1349_v7  ;;  %v9925_v0 = vld [vmem:[#allocation11_spill] sm:$0xff] }
 0x325   : > { %9927 = vst [vmem:[#allocation11_spill] sm:$0xff] %v7442_v38 }
 0x326   : > { %6062 = vrcp.f32 %v1351_v50 }
 0x328   : > { %5660 = vmatmul.mubr.msk.bf16.gmra.mrb[52].mxu1 %vm968_vm2, %v9912_v48 }
 0x329   : > { %5663 = vmatprep.mubr.msk.bf16.mxu1 %vm968_vm2, %v9913_v19 }
 0x330   : > { %5664 = vmatmul.mubr.msk.bf16.gmra.mrb[56].mxu1 %vm968_vm2, %v9914_v13 }
 0x331   : > { %5667 = vmatprep.mubr.msk.bf16.mxu1 %vm968_vm2, %v9915_v55 }
 0x338   : > { %5668 = vmatmul.mubr.msk.bf16.gmra.mrb[60].mxu1 %vm968_vm2, %v9916_v16  ;;  %v6063_v16 = vpop.eup %6062 }
 0x339   : > { %2354 = vmatprep.mubr.bf16.mxu1 %v1891_v37 }
 0x344   : > { %696 = vperm.xlu1 %5965, %v630_v22  }
 0x349   : > { %661 = vperm.xlu0 %5964, %v623_v23  }
 0x34d   : > { %467 = vperm.xlu0 %5964, %v437_v46  }
 0x38a   : > { %v7341_v32 = vpop.trf.xlu0 }
 0x38b   : > { %9917 = vst [vmem:[#allocation10_spill] sm:$0xff] %v7341_v32 }
 0x38e   : > { %v7343_v60 = vpop.trf.xlu0 }
 0x38f   : > { %9918 = vst [vmem:[#allocation22_spill] sm:$0xff] %v7343_v60 }
 0x392   : > { %v7345_v44 = vpop.trf.xlu0 }
 0x393   : > { %9919 = vst [vmem:[#allocation24_spill] sm:$0xff] %v7345_v44 }
 0x396   : > { %v7347_v24 = vpop.trf.xlu0 }
 0x397   : > { %9920 = vst [vmem:[#allocation25_spill] sm:$0xff] %v7347_v24 }
 0x39a   : > { %v7349_v63 = vpop.trf.xlu0 }
 0x39b   : > { %9921 = vst [vmem:[#allocation27_spill] sm:$0xff] %v7349_v63 }
 0x39e   : > { %v7351_v39 = vpop.trf.xlu0 }
 0x39f   : > { %9922 = vst [vmem:[#allocation29_spill] sm:$0xff] %v7351_v39 }
 0x3a2   : > { %v7353_v42 = vpop.trf.xlu0 }
 0x3a3   : > { %9923 = vst [vmem:[#allocation31_spill] sm:$0xff] %v7353_v42 }
 0x3a6   : > { %v7355_v2 = vpop.trf.xlu0 }
 0x3a7   : > { %9924 = vst [vmem:[#allocation32_spill] sm:$0xff] %v7355_v2 }
 0x3c8   : > { %v662_v12 = vpop.permute.xlu0 %661 }
 0x3c9   : > { %v877_v41 = vadd.f32 %v9925_v0, %v662_v12  ;;  %v879_v48 = vadd.f32 %v9926_v43, %v662_v12 }
 0x3cb   : > { %v3319_v19 = vpack.c.bf16 %v877_v41, %v877_v41  ;;  %v3320_v13 = vpack.c.bf16 %v879_v48, %v879_v48  ;;  %v5300_v17 = vpop.f32.mrb[28].mxu1 }
 0x3cc   : > { %v5301_v55 = vpop.f32.mrb[29].mxu1 }
 0x3cd   : > { %3339 = vxpose.xlu0.c.b16.start.end [1/1] (short) %v3320_v13, 128  ;;  %3323 = vxpose.xlu1.c.b16.start.end [1/1] (short) %v3319_v19, 128  ;;  %v5302_v30 = vadd.f32 %v5301_v55, %v5300_v17  ;;  %v5303_v37 = vpop.f32.mrb[30].mxu1 }
 0x3ce   : > { %v5304_v22 = vpop.f32.mrb[31].mxu1 }
 0x3cf   : > { %v7359_v23 = vmul.f32 %v6063_v16, %v5302_v30 }
 0x3d3   : > { %v7361_v46 = vpop.f32.mrb[32].mxu1 }
 0x3d4   : > { %v7363_v35 = vpop.f32.mrb[33].mxu1 }
 0x3d5   : > { %v7365_v56 = vpop.f32.mrb[34].mxu1 }
 0x3d6   : > { %v7367_v11 = vpop.f32.mrb[35].mxu1 }
 0x3db   : > { %v7369_v7 = vpop.f32.mrb[36].mxu1 }
 0x3dc   : > { %v1661_v51 = vmax.f32 %v7361_v46, %v7369_v7  ;;  %v7373_v50 = vpop.f32.mrb[37].mxu1 }
 0x3dd   : > { %v1659_v12 = vmax.f32 %v7363_v35, %v7373_v50  ;;  %v7377_v0 = vpop.f32.mrb[38].mxu1 }
 0x3de   : > { %v1662_v41 = vmax.f32 %v7365_v56, %v7377_v0  ;;  %v7381_v43 = vpop.f32.mrb[39].mxu1 }
 0x3df   : > { %v1660_v48 = vmax.f32 %v7367_v11, %v7381_v43 }
 0x3e3   : > { %v7385_v19 = vpop.f32.mrb[40].mxu1 }
 0x3e4   : > { %v1665_v13 = vmax.f32 %v1661_v51, %v7385_v19  ;;  %v7388_v17 = vpop.f32.mrb[41].mxu1  ;;  %v438_v51 = vld [vmem:[%s9832_s3 + $0x30] sm:$0xff] }
 0x3e5   : > { %v1663_v55 = vmax.f32 %v1659_v12, %v7388_v17  ;;  %v7391_v30 = vpop.f32.mrb[42].mxu1 }
 0x3e6   : > { %v1666_v37 = vmax.f32 %v1662_v41, %v7391_v30  ;;  %v7394_v16 = vpop.f32.mrb[43].mxu1  ;;  %v624_v41 = vld [vmem:[%s9834_s5 + $0x30] sm:$0xff] }
 0x3e7   : > { %v1664_v22 = vmax.f32 %v1660_v48, %v7394_v16 }
 0x3eb   : > { %v7400_v61 = vpop.f32.mrb[44].mxu1 }
 0x3ec   : > { %v1669_v12 = vmax.f32 %v1665_v13, %v7400_v61  ;;  %v7406_v27 = vpop.f32.mrb[45].mxu1 }
 0x3ed   : > { %701 = vperm.xlu1 %5965, %v631_v33   ;;  %v1667_v48 = vmax.f32 %v1663_v55, %v7406_v27  ;;  %v7412_v45 = vpop.f32.mrb[46].mxu1 }
 0x3ee   : > { %v1670_v33 = vmax.f32 %v1666_v37, %v7412_v45  ;;  %v7415_v40 = vpop.f32.mrb[47].mxu1 }
 0x3ef   : > { %v1668_v2 = vmax.f32 %v1664_v22, %v7415_v40 }
 0x3f1   : > { %472 = vperm.xlu1 %5965, %v438_v51  }
 0x3f2   : > { %666 = vperm.xlu0 %5964, %v624_v41  }
 0x3f3   : > { %v7418_v42 = vpop.f32.mrb[48].mxu1 }
 0x3f4   : > { %v1673_v13 = vmax.f32 %v1669_v12, %v7418_v42  ;;  %v7421_v39 = vpop.f32.mrb[49].mxu1 }
 0x3f5   : > { %v1671_v63 = vmax.f32 %v1667_v48, %v7421_v39  ;;  %v7424_v24 = vpop.f32.mrb[50].mxu1 }
 0x3f6   : > { %v1674_v55 = vmax.f32 %v1670_v33, %v7424_v24  ;;  %v7427_v44 = vpop.f32.mrb[51].mxu1 }
 0x3f7   : > { %v1672_v37 = vmax.f32 %v1668_v2, %v7427_v44 }
 0x3fb   : > { %v7430_v51 = vpop.f32.mrb[52].mxu1 }
 0x3fc   : > { %v1677_v22 = vmax.f32 %v1673_v13, %v7430_v51  ;;  %v7433_v41 = vpop.f32.mrb[53].mxu1  ;;  %v7449_v13 = vpop.trf.xlu1 }
 0x3fd   : > { %v1675_v12 = vmax.f32 %v1671_v63, %v7433_v41  ;;  %v7436_v60 = vpop.f32.mrb[54].mxu1  ;;  %9928 = vst [vmem:[#allocation12_spill] sm:$0xff] %v7449_v13 }
 0x3fe   : > { %v1678_v48 = vmax.f32 %v1674_v55, %v7436_v60  ;;  %v7439_v32 = vpop.f32.mrb[55].mxu1 }
 0x3ff   : > { %v1676_v33 = vmax.f32 %v1672_v37, %v7439_v32 }
 0x400   : > { %v7458_v15 = vpop.trf.xlu1 }
 0x401   : > { %9929 = vst [vmem:[#allocation59_spill] sm:$0xff] %v7458_v15 }
 0x403   : > { %v7444_v4 = vpop.f32.mrb[56].mxu1 }
 0x404   : > { %v1681_v2 = vmax.f32 %v1677_v22, %v7444_v4  ;;  %v7447_v53 = vpop.f32.mrb[57].mxu1 }
 0x405   : > { %v1679_v63 = vmax.f32 %v1675_v12, %v7447_v53  ;;  %v7452_v20 = vpop.f32.mrb[58].mxu1 }
 0x406   : > { %v1682_v55 = vmax.f32 %v1678_v48, %v7452_v20  ;;  %v7455_v25 = vpop.f32.mrb[59].mxu1 }
 0x407   : > { %v1680_v37 = vmax.f32 %v1676_v33, %v7455_v25  ;;  %v7472_v33 = vpop.trf.xlu1 }
 0x40b   : > { %v7460_v38 = vpop.f32.mrb[60].mxu1  ;;  %v7474_v26 = vpop.trf.xlu1 }
 0x40c   : > { %v1685_v22 = vmax.f32 %v1681_v2, %v7460_v38  ;;  %v7463_v1 = vpop.f32.mrb[61].mxu1 }
 0x40d   : > { %v1683_v13 = vmax.f32 %v1679_v63, %v7463_v1  ;;  %v7466_v8 = vpop.f32.mrb[62].mxu1 }
 0x40e   : > { %v1686_v12 = vmax.f32 %v1682_v55, %v7466_v8  ;;  %v7469_v6 = vpop.f32.mrb[63].mxu1 }
 0x40f   : > { %v1684_v48 = vmax.f32 %v1680_v37, %v7469_v6  ;;  %v7476_v63 = vpop.trf.xlu1 }
 0x410   : > { %v1688_v5 = vmax.f32 %v1685_v22, %v1686_v12 }
 0x411   : > { %v1687_v15 = vmax.f32 %v1683_v13, %v1684_v48 }
 0x413   : > { %v1689_v36 = vmax.f32 %v1687_v15, %v1688_v5 }
 0x415   : > { %v1690_v31 = vrot.slane %v1689_v36, 4 }
 0x417   : > { %v1691_v2 = vmax.f32 %v1689_v36, %v1690_v31  ;;  %v7496_v36 = vpop.trf.xlu1 }
 0x419   : > { %v1692_v3 = vrot.slane %v1691_v2, 2 }
 0x41b   : > { %v1693_v9 = vmax.f32 %v1691_v2, %v1692_v3  ;;  %v7546_v2 = vpop.trf.xlu1 }
 0x41d   : > { %v1694_v18 = vrot.slane %v1693_v9, 1 }
 0x41f   : > { %v7478_v52 = vmax.f32 %v1693_v9, %v1694_v18 }
 0x421   : > { %v1696_v55 = vsub.f32 %v7363_v35, %v7478_v52  ;;  %v1697_v37 = vsub.f32 %v7367_v11, %v7478_v52  ;;  %v1698_v5 = vsub.f32 %v7361_v46, %v7478_v52  ;;  %v1699_v15 = vsub.f32 %v7365_v56, %v7478_v52 }
 0x422   : > { %v1700_v3 = vsub.f32 %v7373_v50, %v7478_v52  ;;  %v1701_v31 = vsub.f32 %v7381_v43, %v7478_v52  ;;  %v1702_v18 = vsub.f32 %v7369_v7, %v7478_v52  ;;  %v1703_v9 = vsub.f32 %v7377_v0, %v7478_v52 }
 0x423   : > { %v1704_v46 = vsub.f32 %v7388_v17, %v7478_v52  ;;  %v1705_v35 = vsub.f32 %v7394_v16, %v7478_v52  ;;  %v1706_v56 = vsub.f32 %v7385_v19, %v7478_v52  ;;  %v1707_v11 = vsub.f32 %v7391_v30, %v7478_v52 }
 0x424   : > { %v1708_v7 = vsub.f32 %v7406_v27, %v7478_v52  ;;  %v1709_v50 = vsub.f32 %v7415_v40, %v7478_v52  ;;  %v1710_v0 = vsub.f32 %v7400_v61, %v7478_v52  ;;  %v1711_v43 = vsub.f32 %v7412_v45, %v7478_v52  ;;  %v7548_v61 = vpop.trf.xlu1 }
 0x425   : > { %v1712_v17 = vsub.f32 %v7421_v39, %v7478_v52  ;;  %v1713_v19 = vsub.f32 %v7427_v44, %v7478_v52  ;;  %v1714_v30 = vsub.f32 %v7418_v42, %v7478_v52  ;;  %v1715_v27 = vsub.f32 %v7424_v24, %v7478_v52 }
 0x426   : > { %v1728_v42 = vmul.f32 1.442695, %v1696_v55  ;;  %v1730_v44 = vmul.f32 1.442695, %v1697_v37  ;;  %v1732_v24 = vmul.f32 1.442695, %v1698_v5 }
 0x427   : > { %v1734_v39 = vmul.f32 1.442695, %v1699_v15  ;;  %v1736_v16 = vmul.f32 1.442695, %v1700_v3  ;;  %v1738_v45 = vmul.f32 1.442695, %v1701_v31 }
 0x428   : > { %6064 = vpow2.f32 %v1728_v42  ;;  %v1740_v13 = vmul.f32 1.442695, %v1702_v18  ;;  %v1742_v22 = vmul.f32 1.442695, %v1703_v9  ;;  %v1744_v12 = vmul.f32 1.442695, %v1704_v46  ;;  %v7552_v3 = vpop.permute.xlu1 %696 }
 0x429   : > { %6066 = vpow2.f32 %v1730_v44  ;;  %v1746_v48 = vmul.f32 1.442695, %v1705_v35  ;;  %v1748_v40 = vmul.f32 1.442695, %v1706_v56  ;;  %v1750_v55 = vmul.f32 1.442695, %v1707_v11  ;;  %v7573_v44 = vpop.permute.xlu0 %467 }
 0x42a   : > { %6068 = vpow2.f32 %v1732_v24  ;;  %v1752_v37 = vmul.f32 1.442695, %v1708_v7  ;;  %v1754_v5 = vmul.f32 1.442695, %v1709_v50  ;;  %v1756_v31 = vmul.f32 1.442695, %v1710_v0 }
 0x42b   : > { %6070 = vpow2.f32 %v1734_v39  ;;  %v1758_v9 = vmul.f32 1.442695, %v1711_v43  ;;  %v1760_v35 = vmul.f32 1.442695, %v1712_v17  ;;  %v1762_v50 = vmul.f32 1.442695, %v1713_v19 }
 0x42c   : > { %6072 = vpow2.f32 %v1736_v16  ;;  %v1764_v0 = vmul.f32 1.442695, %v1714_v30  ;;  %v1766_v42 = vmul.f32 1.442695, %v1715_v27  ;;  %v9930_v19 = vsub.f32 %v7433_v41, %v7478_v52 }
 0x42d   : > { %6074 = vpow2.f32 %v1738_v45 }
 0x42e   : > { %6076 = vpow2.f32 %v1740_v13  ;;  %v1768_v30 = vmul.f32 1.442695, %v9930_v19 }
 0x42f   : > { %6078 = vpow2.f32 %v1742_v22 }
 0x430   : > { %6080 = vpow2.f32 %v1744_v12  ;;  %v9931_v12 = vsub.f32 %v7439_v32, %v7478_v52 }
 0x431   : > { %6082 = vpow2.f32 %v1746_v48 }
 0x432   : > { %v7550_v15 = vpop.eup %6064  ;;  %6084 = vpow2.f32 %v1748_v40  ;;  %v1770_v48 = vmul.f32 1.442695, %v9931_v12 }
 0x433   : > { %v7554_v18 = vpop.eup %6066  ;;  %6086 = vpow2.f32 %v1750_v55  ;;  %v7569_v17 = vpop.trf.xlu1  ;;  %v9932_v55 = vsub.f32 %v7430_v51, %v7478_v52  ;;  %v9935_v51 = vsub.f32 %v7447_v53, %v7478_v52  ;;  %v9938_v53 = vsub.f32 %v7444_v4, %v7478_v52 }
 0x434   : > { %v7556_v46 = vpop.eup %6068  ;;  %6088 = vpow2.f32 %v1752_v37  ;;  %v1792_v56 = vadd.f32 %v7554_v18, %v7550_v15  ;;  %v1829_v11 = vpack.c.bf16 %v7554_v18, %v7550_v15 }
 0x435   : > { %v7562_v7 = vpop.eup %6070  ;;  %6090 = vpow2.f32 %v1754_v5  ;;  %v1772_v41 = vmul.f32 1.442695, %v9932_v55 }
 0x436   : > { %v7564_v40 = vpop.eup %6072  ;;  %6092 = vpow2.f32 %v1756_v31  ;;  %v1793_v43 = vadd.f32 %v7556_v46, %v1792_v56  ;;  %v1830_v45 = vpack.c.bf16 %v7562_v7, %v7556_v46 }
 0x437   : > { %v7571_v39 = vpop.eup %6074  ;;  %6094 = vpow2.f32 %v1758_v9  ;;  %v9933_v9 = vsub.f32 %v7436_v60, %v7478_v52  ;;  %v7611_v19 = vpop.trf.xlu1  ;;  %v9937_v60 = vsub.f32 %v7455_v25, %v7478_v52 }
 0x438   : > { %v7575_v24 = vpop.eup %6076  ;;  %6096 = vpow2.f32 %v1760_v35  ;;  %v1794_v16 = vadd.f32 %v7562_v7, %v1793_v43  ;;  %v7601_v35 = vpop.trf.xlu0  ;;  %9936 = vst [vmem:[#allocation61_spill] sm:$0xff] %v7611_v19 }
 0x439   : > { %v7583_v22 = vpop.eup %6078  ;;  %6098 = vpow2.f32 %v1762_v50  ;;  %v1774_v32 = vmul.f32 1.442695, %v9933_v9  ;;  %9934 = vst [vmem:[#allocation60_spill] sm:$0xff] %v7601_v35  ;;  %v1776_v50 = vmul.f32 1.442695, %v9935_v51 }
 0x43a   : > { %v7588_v27 = vpop.eup %6080  ;;  %6100 = vpow2.f32 %v1764_v0  ;;  %v1795_v37 = vadd.f32 %v7564_v40, %v1794_v16  ;;  %v1778_v16 = vmul.f32 1.442695, %v9937_v60 }
 0x43b   : > { %v7596_v31 = vpop.eup %6082  ;;  %6102 = vpow2.f32 %v1766_v42 }
 0x43c   : > { %v7603_v56 = vpop.eup %6084  ;;  %6104 = vpow2.f32 %v1768_v30  ;;  %v1796_v0 = vadd.f32 %v7571_v39, %v1795_v37  ;;  %v1780_v30 = vmul.f32 1.442695, %v9938_v53 }
 0x43d   : > { %v7613_v42 = vpop.eup %6086  ;;  %6106 = vpow2.f32 %v1770_v48  ;;  %v9939_v48 = vsub.f32 %v7452_v20, %v7478_v52 }
 0x43e   : > { %v7618_v12 = vpop.eup %6088  ;;  %6108 = vpow2.f32 %v1772_v41  ;;  %v1797_v55 = vadd.f32 %v7575_v24, %v1796_v0  ;;  %v9940_v41 = vsub.f32 %v7463_v1, %v7478_v52  ;;  %v9943_v1 = vsub.f32 %v7460_v38, %v7478_v52  ;;  %v7652_v0 = vpop.trf.xlu1 }
 0x43f   : > { %v7626_v9 = vpop.eup %6090  ;;  %6110 = vpow2.f32 %v1774_v32  ;;  %v1782_v25 = vmul.f32 1.442695, %v9939_v48  ;;  %v9941_v32 = vsub.f32 %v7469_v6, %v7478_v52  ;;  %v7644_v48 = vpop.trf.xlu0  ;;  %9944 = vst [vmem:[#allocation63_spill] sm:$0xff] %v7652_v0  ;;  %v9945_v6 = vsub.f32 %v7466_v8, %v7478_v52 }
 0x440   : > { %v7631_v51 = vpop.eup %6092  ;;  %6112 = vpow2.f32 %v1776_v50  ;;  %v1784_v4 = vmul.f32 1.442695, %v9940_v41  ;;  %v1798_v60 = vadd.f32 %v7583_v22, %v1797_v55  ;;  %9942 = vst [vmem:[#allocation62_spill] sm:$0xff] %v7644_v48  ;;  %v1788_v50 = vmul.f32 1.442695, %v9943_v1 }
 0x441   : > { %v7639_v53 = vpop.eup %6094  ;;  %6114 = vpow2.f32 %v1778_v16  ;;  %v1786_v20 = vmul.f32 1.442695, %v9941_v32  ;;  %v1790_v32 = vmul.f32 1.442695, %v9945_v6 }
 0x442   : > { %v6097_v37 = vpop.eup %6096  ;;  %6116 = vpow2.f32 %v1780_v30  ;;  %v1799_v55 = vadd.f32 %v7588_v27, %v1798_v60 }
 0x443   : > { %v6099_v16 = vpop.eup %6098  ;;  %6118 = vpow2.f32 %v1782_v25  ;;  %v7662_v52 = vpop.trf.xlu0 }
 0x444   : > { %v6101_v43 = vpop.eup %6100  ;;  %6120 = vpow2.f32 %v1784_v4  ;;  %v1800_v30 = vadd.f32 %v7596_v31, %v1799_v55  ;;  %v1837_v5 = vpack.c.bf16 %v6099_v16, %v6097_v37  ;;  %9946 = vst [vmem:[#allocation64_spill] sm:$0xff] %v7662_v52 }
 0x445   : > { %v6103_v38 = vpop.eup %6102  ;;  %6122 = vpow2.f32 %v1786_v20  ;;  %v7665_v20 = vpop.trf.xlu1 }
 0x446   : > { %v6105_v1 = vpop.eup %6104  ;;  %6124 = vpow2.f32 %v1788_v50  ;;  %v1801_v60 = vadd.f32 %v7603_v56, %v1800_v30  ;;  %5323 = vmatprep.subr.bf16.mxu0 %v1837_v5  ;;  %v1838_v41 = vpack.c.bf16 %v6103_v38, %v6101_v43  ;;  %9947 = vst [vmem:[#allocation65_spill] sm:$0xff] %v7665_v20  ;;  %v9950_v20 = vpack.c.bf16 %v7571_v39, %v7564_v40 }
 0x447   : > { %v6107_v13 = vpop.eup %6106  ;;  %6126 = vpow2.f32 %v1790_v32  ;;  %5324 = vmatpush3.bf16.msra.mxu0 %v1829_v11  ;;  %v9953_v39 = vpack.c.bf16 %v7596_v31, %v7588_v27  ;;  %v9959_v27 = vpack.c.bf16 %v7626_v9, %v7618_v12 }
 0x448   : > { %v6109_v8 = vpop.eup %6108  ;;  %v1802_v25 = vadd.f32 %v7613_v42, %v1801_v60  ;;  %5325 = vmatprep.subr.bf16.mxu0 %v1838_v41  ;;  %v1839_v4 = vpack.c.bf16 %v6107_v13, %v6105_v1  ;;  %v7672_v41 = vpop.trf.xlu0 }
 0x449   : > { %v6111_v50 = vpop.eup %6110  ;;  %9948 = vst [vmem:[#allocation66_spill] sm:$0xff] %v7672_v41  ;;  %v7675_v35 = vpop.trf.xlu1  ;;  %v9951_v41 = vpack.c.bf16 %v7583_v22, %v7575_v24  ;;  %v9956_v24 = vpack.c.bf16 %v7613_v42, %v7603_v56  ;;  %v9963_v56 = vld [vmem:[#allocation33_spill] sm:$0xff] }
 0x44a   : > { %v6113_v55 = vpop.eup %6112  ;;  %v1803_v5 = vadd.f32 %v7618_v12, %v1802_v25  ;;  %v1840_v6 = vpack.c.bf16 %v6111_v50, %v6109_v8  ;;  %9949 = vst [vmem:[#allocation67_spill] sm:$0xff] %v7675_v35  ;;  %v1413_v42 = vpack.c.bf16 %v9963_v56, %v9963_v56  ;;  %v9986_v56 = vld [vmem:[#allocation15_spill] sm:$0xff] }
 0x44b   : > { %v6115_v30 = vpop.eup %6114  ;;  %5326 = vmatpush3.bf16.msra.mxu0 %v1830_v45 }
 0x44c   : > { %v6117_v15 = vpop.eup %6116  ;;  %v1804_v18 = vadd.f32 %v7626_v9, %v1803_v5  ;;  %5327 = vmatprep.subr.bf16.mxu0 %v1839_v4  ;;  %v1841_v11 = vpack.c.bf16 %v6115_v30, %v6113_v55 }
 0x44d   : > { %v6119_v32 = vpop.eup %6118  ;;  %v7686_v19 = vpop.trf.xlu1 }
 0x44e   : > { %v6121_v60 = vpop.eup %6120  ;;  %v1805_v52 = vadd.f32 %v7631_v51, %v1804_v18  ;;  %v1842_v48 = vpack.c.bf16 %v6119_v32, %v6117_v15  ;;  %v7684_v18 = vpop.trf.xlu0 }
 0x44f   : > { %v6123_v25 = vpop.eup %6122  ;;  %5328 = vmatpush3.bf16.msra.mxu0 %v9950_v20  ;;  %9952 = vst [vmem:[#allocation68_spill] sm:$0xff] %v7684_v18 }
 0x450   : > { %v6125_v46 = vpop.eup %6124  ;;  %v1806_v7 = vadd.f32 %v7639_v53, %v1805_v52  ;;  %5329 = vmatprep.subr.bf16.mxu0 %v1840_v6  ;;  %v1843_v45 = vpack.c.bf16 %v6123_v25, %v6121_v60 }
 0x451   : > { %v6127_v4 = vpop.eup %6126  ;;  %v7693_v6 = vpop.trf.xlu1 }
 0x452   : > { %v1807_v5 = vadd.f32 %v6097_v37, %v1806_v7  ;;  %v1844_v0 = vpack.c.bf16 %v6127_v4, %v6125_v46  ;;  %v7691_v20 = vpop.trf.xlu0  ;;  %9955 = vst [vmem:[#allocation70_spill] sm:$0xff] %v7693_v6 }
 0x453   : > { %5330 = vmatpush3.bf16.msra.mxu0 %v9951_v41  ;;  %9954 = vst [vmem:[#allocation69_spill] sm:$0xff] %v7691_v20 }
 0x454   : > { %v1808_v35 = vadd.f32 %v6099_v16, %v1807_v5  ;;  %5331 = vmatprep.subr.bf16.mxu0 %v1841_v11  ;;  %v9957_v16 = vld [vmem:[#allocation17_spill] sm:$0xff]  ;;  %v9958_v11 = vld [vmem:[#allocation4_spill] sm:$0xff] }
 0x455   : > { %v9967_v5 = vld [vmem:[#allocation13_spill] sm:$0xff] }
 0x456   : > { %v1809_v40 = vadd.f32 %v6101_v43, %v1808_v35  ;;  %v580_v35 = vadd.f32 %v9958_v11, %v9957_v16  ;;  %v7703_v31 = vpop.trf.xlu0  ;;  %v9970_v16 = vld [vmem:[#allocation20_spill] sm:$0xff] }
 0x457   : > { %5332 = vmatpush3.bf16.msra.mxu0 %v9953_v39  ;;  %9960 = vst [vmem:[#allocation17_spill] sm:$0xff] %v7703_v31  ;;  %v9968_v39 = vld [vmem:[#allocation14_spill] sm:$0xff] }
 0x458   : > { %v1810_v52 = vadd.f32 %v6103_v38, %v1809_v40  ;;  %5333 = vmatprep.subr.bf16.mxu0 %v1842_v48  ;;  %v7705_v38 = vpop.trf.xlu1 }
 0x459   : > { %9961 = vst [vmem:[#allocation4_spill] sm:$0xff] %v7705_v38 }
 0x45a   : > { %v1811_v37 = vadd.f32 %v6105_v1, %v1810_v52  ;;  %v1887_v1 = vpack.c.bf16 %v580_v35, %v580_v35  ;;  %v7713_v12 = vpop.trf.xlu0  ;;  %v625_v35 = vld [vmem:[%s9834_s5 + $0x38] sm:$0xff] }
 0x45b   : > { %5334 = vmatpush3.bf16.msra.mxu0 %v9956_v24  ;;  %9964 = vst [vmem:[#allocation33_spill] sm:$0xff] %v7713_v12 }
 0x45c   : > { %v1812_v22 = vadd.f32 %v6107_v13, %v1811_v37  ;;  %5335 = vmatprep.subr.bf16.mxu0 %v1843_v45  ;;  %v9962_v13 = vpack.c.bf16 %v7639_v53, %v7631_v51  ;;  %v1973_v9 = vsel %vm1017_vm1, %v1887_v1, 0  ;;  %v9969_v37 = vld [vmem:[#allocation19_spill] sm:$0xff] }
 0x45e   : > { %v1813_v43 = vadd.f32 %v6109_v8, %v1812_v22 }
 0x45f   : > { %5336 = vmatpush3.bf16.msra.mxu0 %v9959_v27  ;;  %v9977_v27 = vld [vmem:[#allocation36_spill] sm:$0xff] }
 0x460   : > { %v1814_v48 = vadd.f32 %v6111_v50, %v1813_v43  ;;  %5337 = vmatprep.subr.bf16.mxu0 %v1844_v0 }
 0x462   : > { %v1815_v41 = vadd.f32 %v6113_v55, %v1814_v48  ;;  %v9965_v55 = vld [vmem:[#allocation18_spill] sm:$0xff] }
 0x463   : > { %5338 = vmatpush3.bf16.msra.mxu0 %v9962_v13 }
 0x464   : > { %v1816_v8 = vadd.f32 %v6115_v30, %v1815_v41  ;;  %5901 = vmatprep.subr.msk.bf16.mxu0 %vm1017_vm1, %v1887_v1 }
 0x466   : > { %v1817_v50 = vadd.f32 %v6117_v15, %v1816_v8  ;;  %1878 = vmatmul.mubr.bf16.vlgmr.msra.gmra.mrb[44].mxu0 %v1413_v42  ;;  %v9987_v8 = vld [vmem:[#allocation16_spill] sm:$0xff] }
 0x467   : > { %5672 = vmatpush3.bf16.msra.mxu0 %v1973_v9  ;;  %5673 = vmatprep.mubr.msk.bf16.mxu0 %vm968_vm2, %v9965_v55 }
 0x468   : > { %v1818_v53 = vadd.f32 %v6119_v32, %v1817_v50  ;;  %v9972_v32 = vld [vmem:[#allocation23_spill] sm:$0xff] }
 0x46a   : > { %v1819_v30 = vadd.f32 %v6121_v60, %v1818_v53  ;;  %v9973_v60 = vld [vmem:[#allocation26_spill] sm:$0xff] }
 0x46c   : > { %v7716_v0 = vpop.permute.xlu1 %701  ;;  %v1820_v45 = vadd.f32 %v6123_v25, %v1819_v30  ;;  %v9974_v25 = vld [vmem:[#allocation28_spill] sm:$0xff] }
 0x46d   : > { %v7722_v51 = vadd.f32 %v7280_v28, %v7716_v0  ;;  %v9971_v28 = vld [vmem:[#allocation21_spill] sm:$0xff] }
 0x46e   : > { %v1821_v15 = vadd.f32 %v6125_v46, %v1820_v45  ;;  %5674 = vmatmul.mubr.msk.bf16.vlgmr.msra.gmra.mrb[48].mxu0 %vm968_vm2, %v9969_v37  ;;  %v9975_v46 = vld [vmem:[#allocation30_spill] sm:$0xff]  ;;  %v4762_v37 = vld [vmem:[%s9836_s7 + $0x8] sm:$0xff] }
 0x46f   : > { %9966 = vst [vmem:[#allocation18_spill] sm:$0xff] %v7722_v51  ;;  %5677 = vmatprep.mubr.msk.bf16.mxu0 %vm968_vm2, %v9970_v16  ;;  %v633_v16 = vld [vmem:[%s9834_s5 + $0x78] sm:$0xff] }
 0x470   : > { %v1822_v11 = vadd.f32 %v6127_v4, %v1821_v15  ;;  %v632_v4 = vld [vmem:[%s9834_s5 + $0x70] sm:$0xff] }
 0x471   : > { %v667_v7 = vpop.permute.xlu0 %666 }
 0x472   : > { %v883_v40 = vadd.f32 %v9967_v5, %v667_v7  ;;  %v885_v52 = vadd.f32 %v9968_v39, %v667_v7  ;;  %v1823_v53 = vrot.slane %v1822_v11, 4  ;;  %v4761_v39 = vld [vmem:[%s9836_s7] sm:$0xff] }
 0x474   : > { %v3796_v24 = vpack.c.bf16 %v883_v40, %v883_v40  ;;  %v3797_v22 = vpack.c.bf16 %v885_v52, %v885_v52  ;;  %v1824_v30 = vadd.f32 %v1823_v53, %v1822_v11 }
 0x476   : > { %3800 = vxpose.xlu0.c.b16.start.end [1/1] (short) %v3796_v24, 128  ;;  %3816 = vxpose.xlu1.c.b16.start.end [1/1] (short) %v3797_v22, 128  ;;  %v1825_v7 = vrot.slane %v1824_v30, 2 }
 0x477   : > { %5678 = vmatmul.mubr.msk.bf16.gmra.mrb[52].mxu0 %vm968_vm2, %v9971_v28 }
 0x478   : > { %5681 = vmatprep.mubr.msk.bf16.mxu0 %vm968_vm2, %v9972_v32  ;;  %v1826_v45 = vadd.f32 %v1825_v7, %v1824_v30 }
 0x47a   : > { %v1827_v5 = vrot.slane %v1826_v45, 1 }
 0x47c   : > { %v1828_v40 = vadd.f32 %v1827_v5, %v1826_v45 }
 0x47e   : > { %6128 = vrcp.f32 %v1828_v40 }
 0x47f   : > { %5682 = vmatmul.mubr.msk.bf16.gmra.mrb[56].mxu0 %vm968_vm2, %v9973_v60  ;;  %v4764_v60 = vld [vmem:[%s9836_s7 + $0x18] sm:$0xff] }
 0x480   : > { %5685 = vmatprep.mubr.msk.bf16.mxu0 %vm968_vm2, %v9974_v25  ;;  %v4763_v25 = vld [vmem:[%s9836_s7 + $0x10] sm:$0xff] }
 0x487   : > { %5686 = vmatmul.mubr.msk.bf16.gmra.mrb[60].mxu0 %vm968_vm2, %v9975_v46 }
 0x488   : > { %5689 = vmatprep.mubr.msk.bf16.mxu0 %vm968_vm2, %v7036_v21  ;;  %v439_v21 = vld [vmem:[%s9832_s3 + $0x38] sm:$0xff]  ;;  %v6129_v11 = vpop.eup %6128 }
 0x48f   : > { %5690 = vmatmul.mubr.msk.bf16.gmra.mrb[64].mxu0 %vm968_vm2, %v7086_v49 }
 0x490   : > { %5693 = vmatprep.mubr.msk.bf16.mxu0 %vm968_vm2, %v7088_v14  ;;  %v9976_v14 = vld [vmem:[#allocation35_spill] sm:$0xff] }
 0x491   : > { %v909_v49 = vadd.f32 %v9976_v14, %v7304_v47  ;;  %v4765_v14 = vld [vmem:[%s9836_s7 + $0x20] sm:$0xff] }
 0x493   : > { %v2368_v43 = vpack.c.bf16 %v909_v49, %v909_v49 }
 0x496   : > { %706 = vperm.xlu1 %5965, %v632_v4  }
 0x497   : > { %5694 = vmatmul.mubr.msk.bf16.gmra.mrb[68].mxu0 %vm968_vm2, %v7090_v57 }
 0x498   : > { %5697 = vmatprep.mubr.msk.bf16.mxu0 %vm968_vm2, %v7111_v62 }
 0x49b   : > { %671 = vperm.xlu0 %5964, %v625_v35   ;;  %v4766_v35 = vld [vmem:[%s9836_s7 + $0x28] sm:$0xff] }
 0x49f   : > { %477 = vperm.xlu0 %5964, %v439_v21   ;;  %5698 = vmatmul.mubr.msk.bf16.gmra.mrb[72].mxu0 %vm968_vm2, %v7160_v34 }
 0x4a0   : > { %5701 = vmatprep.mubr.msk.bf16.mxu0 %vm968_vm2, %v7197_v59 }
 0x4a7   : > { %5702 = vmatmul.mubr.msk.bf16.gmra.mrb[76].mxu0 %vm968_vm2, %v9977_v27  ;;  %v4767_v27 = vld [vmem:[%s9836_s7 + $0x30] sm:$0xff] }
 0x4a8   : > { %2831 = vmatprep.mubr.bf16.mxu0 %v2368_v43  ;;  %v4768_v43 = vld [vmem:[%s9836_s7 + $0x38] sm:$0xff] }
 0x4dc   : > { %v7767_v57 = vpop.trf.xlu0 }
 0x4dd   : > { %9978 = vst [vmem:[#allocation13_spill] sm:$0xff] %v7767_v57 }
 0x4e0   : > { %v7769_v48 = vpop.trf.xlu0 }
 0x4e1   : > { %9979 = vst [vmem:[#allocation14_spill] sm:$0xff] %v7769_v48 }
 0x4e4   : > { %v7771_v62 = vpop.trf.xlu0 }
 0x4e5   : > { %9980 = vst [vmem:[#allocation19_spill] sm:$0xff] %v7771_v62 }
 0x4e8   : > { %v7773_v1 = vpop.trf.xlu0 }
 0x4e9   : > { %9981 = vst [vmem:[#allocation20_spill] sm:$0xff] %v7773_v1 }
 0x4ec   : > { %v7775_v34 = vpop.trf.xlu0 }
 0x4ed   : > { %9982 = vst [vmem:[#allocation21_spill] sm:$0xff] %v7775_v34 }
 0x4f0   : > { %v7777_v41 = vpop.trf.xlu0 }
 0x4f1   : > { %9983 = vst [vmem:[#allocation23_spill] sm:$0xff] %v7777_v41 }
 0x4f4   : > { %v7779_v59 = vpop.trf.xlu0 }
 0x4f5   : > { %9984 = vst [vmem:[#allocation26_spill] sm:$0xff] %v7779_v59 }
 0x4f8   : > { %v7781_v47 = vpop.trf.xlu0 }
 0x4f9   : > { %9985 = vst [vmem:[#allocation28_spill] sm:$0xff] %v7781_v47 }
 0x51a   : > { %v672_v13 = vpop.permute.xlu0 %671 }
 0x51b   : > { %v887_v42 = vadd.f32 %v9986_v56, %v672_v13  ;;  %v889_v9 = vadd.f32 %v9987_v8, %v672_v13 }
 0x51d   : > { %v4273_v50 = vpack.c.bf16 %v887_v42, %v887_v42  ;;  %v4274_v55 = vpack.c.bf16 %v889_v9, %v889_v9 }
 0x51e   : > { %v7911_v18 = vpop.permute.xlu0 %477 }
 0x51f   : > { %4293 = vxpose.xlu0.c.b16.start.end [1/1] (short) %v4274_v55, 128  ;;  %4277 = vxpose.xlu1.c.b16.start.end [1/1] (short) %v4273_v50, 128 }
 0x539   : > { %v5339_v52 = vpop.f32.mrb[44].mxu0 }
 0x53a   : > { %v5340_v15 = vpop.f32.mrb[45].mxu0 }
 0x53b   : > { %v5341_v24 = vadd.f32 %v5340_v15, %v5339_v52  ;;  %v5342_v22 = vpop.f32.mrb[46].mxu0 }
 0x53c   : > { %v5343_v28 = vpop.f32.mrb[47].mxu0 }
 0x53d   : > { %v1886_v32 = vmul.f32 %v6129_v11, %v5341_v24 }
 0x53f   : > { %4771 = vperm.xlu1 %5965, %v4761_v39  }
 0x541   : > { %v7800_v46 = vpop.f32.mrb[48].mxu0 }
 0x542   : > { %v7802_v4 = vpop.f32.mrb[49].mxu0 }
 0x543   : > { %4776 = vperm.xlu1 %5965, %v4762_v37   ;;  %v7807_v21 = vpop.f32.mrb[50].mxu0  ;;  %v7849_v37 = vpack.c.bf16 %v1886_v32, %v7359_v23 }
 0x544   : > { %711 = vperm.xlu0 %5964, %v633_v16   ;;  %v7812_v49 = vpop.f32.mrb[51].mxu0 }
 0x545   : > { %9988 = vst [vmem:[#allocation30_spill] sm:$0xff] %v7849_v37 }
 0x547   : > { %4786 = vperm.xlu1 %5965, %v4764_v60  }
 0x548   : > { %4781 = vperm.xlu0 %5964, %v4763_v25  }
 0x54a   : > { %v7820_v13 = vpop.f32.mrb[52].mxu0 }
 0x54b   : > { %4796 = vperm.xlu1 %5965, %v4766_v35   ;;  %v2138_v56 = vmax.f32 %v7800_v46, %v7820_v13  ;;  %v7824_v42 = vpop.f32.mrb[53].mxu0 }
 0x54c   : > { %4791 = vperm.xlu0 %5964, %v4765_v14   ;;  %v2136_v8 = vmax.f32 %v7802_v4, %v7824_v42  ;;  %v7828_v9 = vpop.f32.mrb[54].mxu0 }
 0x54d   : > { %v2139_v50 = vmax.f32 %v7807_v21, %v7828_v9  ;;  %v7832_v55 = vpop.f32.mrb[55].mxu0 }
 0x54e   : > { %v2137_v53 = vmax.f32 %v7812_v49, %v7832_v55 }
 0x54f   : > { %4806 = vperm.xlu1 %5965, %v4768_v43  }
 0x550   : > { %4801 = vperm.xlu0 %5964, %v4767_v27  }
 0x552   : > { %v7836_v30 = vpop.f32.mrb[56].mxu0 }
 0x553   : > { %v2142_v7 = vmax.f32 %v2138_v56, %v7836_v30  ;;  %v7839_v45 = vpop.f32.mrb[57].mxu0 }
 0x554   : > { %v2140_v5 = vmax.f32 %v2136_v8, %v7839_v45  ;;  %v7842_v40 = vpop.f32.mrb[58].mxu0 }
 0x555   : > { %v2143_v39 = vmax.f32 %v2139_v50, %v7842_v40  ;;  %v7845_v52 = vpop.f32.mrb[59].mxu0 }
 0x556   : > { %v2141_v15 = vmax.f32 %v2137_v53, %v7845_v52 }
 0x55a   : > { %v7851_v24 = vpop.f32.mrb[60].mxu0 }
 0x55b   : > { %v2146_v22 = vmax.f32 %v2142_v7, %v7851_v24  ;;  %v7854_v16 = vpop.f32.mrb[61].mxu0 }
 0x55c   : > { %v2144_v11 = vmax.f32 %v2140_v5, %v7854_v16  ;;  %v7857_v28 = vpop.f32.mrb[62].mxu0 }
 0x55d   : > { %v2147_v60 = vmax.f32 %v2143_v39, %v7857_v28  ;;  %v7860_v25 = vpop.f32.mrb[63].mxu0 }
 0x55e   : > { %v2145_v35 = vmax.f32 %v2141_v15, %v7860_v25 }
 0x562   : > { %v7863_v14 = vpop.f32.mrb[64].mxu0 }
 0x563   : > { %v2150_v23 = vmax.f32 %v2146_v22, %v7863_v14  ;;  %v7866_v32 = vpop.f32.mrb[65].mxu0 }
 0x564   : > { %v2148_v43 = vmax.f32 %v2144_v11, %v7866_v32  ;;  %v7869_v27 = vpop.f32.mrb[66].mxu0 }
 0x565   : > { %v2151_v56 = vmax.f32 %v2147_v60, %v7869_v27  ;;  %v7872_v8 = vpop.f32.mrb[67].mxu0 }
 0x566   : > { %v2149_v50 = vmax.f32 %v2145_v35, %v7872_v8 }
 0x56a   : > { %v7875_v53 = vpop.f32.mrb[68].mxu0 }
 0x56b   : > { %v2154_v7 = vmax.f32 %v2150_v23, %v7875_v53  ;;  %v7878_v5 = vpop.f32.mrb[69].mxu0 }
 0x56c   : > { %v2152_v39 = vmax.f32 %v2148_v43, %v7878_v5  ;;  %v7881_v15 = vpop.f32.mrb[70].mxu0 }
 0x56d   : > { %v2155_v22 = vmax.f32 %v2151_v56, %v7881_v15  ;;  %v7884_v11 = vpop.f32.mrb[71].mxu0 }
 0x56e   : > { %v2153_v60 = vmax.f32 %v2149_v50, %v7884_v11 }
 0x572   : > { %v7887_v37 = vpop.f32.mrb[72].mxu0 }
 0x573   : > { %v2158_v35 = vmax.f32 %v2154_v7, %v7887_v37  ;;  %v7890_v47 = vpop.f32.mrb[73].mxu0 }
 0x574   : > { %v2156_v23 = vmax.f32 %v2152_v39, %v7890_v47  ;;  %v7893_v59 = vpop.f32.mrb[74].mxu0 }
 0x575   : > { %v2159_v43 = vmax.f32 %v2155_v22, %v7893_v59  ;;  %v7896_v41 = vpop.f32.mrb[75].mxu0 }
 0x576   : > { %v2157_v56 = vmax.f32 %v2153_v60, %v7896_v41 }
 0x57a   : > { %v7899_v34 = vpop.f32.mrb[76].mxu0 }
 0x57b   : > { %v2162_v50 = vmax.f32 %v2158_v35, %v7899_v34  ;;  %v7902_v1 = vpop.f32.mrb[77].mxu0 }
 0x57c   : > { %v2160_v7 = vmax.f32 %v2156_v23, %v7902_v1  ;;  %v7905_v62 = vpop.f32.mrb[78].mxu0 }
 0x57d   : > { %v2163_v39 = vmax.f32 %v2159_v43, %v7905_v62  ;;  %v7908_v48 = vpop.f32.mrb[79].mxu0 }
 0x57e   : > { %v2161_v22 = vmax.f32 %v2157_v56, %v7908_v48 }
 0x57f   : > { %v2165_v57 = vmax.f32 %v2162_v50, %v2163_v39 }
 0x580   : > { %v2164_v51 = vmax.f32 %v2160_v7, %v2161_v22 }
 0x582   : > { %v2166_v12 = vmax.f32 %v2164_v51, %v2165_v57 }
 0x584   : > { %v2167_v60 = vrot.slane %v2166_v12, 4 }
 0x585   : > { %v7915_v23 = vpop.trf.xlu0 }
 0x586   : > { %v2168_v31 = vmax.f32 %v2166_v12, %v2167_v60 }
 0x588   : > { %v2169_v20 = vrot.slane %v2168_v31, 2 }
 0x58a   : > { %v2170_v35 = vmax.f32 %v2168_v31, %v2169_v20 }
 0x58c   : > { %v2171_v38 = vrot.slane %v2170_v35, 1 }
 0x58e   : > { %v7913_v6 = vmax.f32 %v2170_v35, %v2171_v38 }
 0x590   : > { %v2173_v43 = vsub.f32 %v7802_v4, %v7913_v6  ;;  %v2174_v56 = vsub.f32 %v7812_v49, %v7913_v6  ;;  %v2175_v51 = vsub.f32 %v7800_v46, %v7913_v6  ;;  %v2176_v12 = vsub.f32 %v7807_v21, %v7913_v6 }
 0x591   : > { %v2177_v20 = vsub.f32 %v7824_v42, %v7913_v6  ;;  %v2178_v31 = vsub.f32 %v7832_v55, %v7913_v6  ;;  %v2179_v38 = vsub.f32 %v7820_v13, %v7913_v6  ;;  %v2180_v57 = vsub.f32 %v7828_v9, %v7913_v6 }
 0x592   : > { %v2181_v4 = vsub.f32 %v7839_v45, %v7913_v6  ;;  %v2182_v46 = vsub.f32 %v7845_v52, %v7913_v6  ;;  %v2183_v21 = vsub.f32 %v7836_v30, %v7913_v6  ;;  %v2184_v49 = vsub.f32 %v7842_v40, %v7913_v6 }
 0x593   : > { %v2185_v42 = vsub.f32 %v7854_v16, %v7913_v6  ;;  %v2186_v13 = vsub.f32 %v7860_v25, %v7913_v6  ;;  %v2187_v9 = vsub.f32 %v7851_v24, %v7913_v6  ;;  %v2188_v55 = vsub.f32 %v7857_v28, %v7913_v6  ;;  %v7957_v16 = vpop.trf.xlu0 }
 0x594   : > { %v2189_v45 = vsub.f32 %v7866_v32, %v7913_v6  ;;  %v2190_v30 = vsub.f32 %v7872_v8, %v7913_v6  ;;  %v2191_v40 = vsub.f32 %v7863_v14, %v7913_v6  ;;  %v2192_v52 = vsub.f32 %v7869_v27, %v7913_v6  ;;  %9989 = vst [vmem:[#allocation35_spill] sm:$0xff] %v7957_v16 }
 0x595   : > { %v2193_v24 = vsub.f32 %v7878_v5, %v7913_v6  ;;  %v2194_v28 = vsub.f32 %v7884_v11, %v7913_v6  ;;  %v2205_v60 = vmul.f32 1.442695, %v2173_v43  ;;  %v2207_v35 = vmul.f32 1.442695, %v2174_v56 }
 0x596   : > { %v2209_v27 = vmul.f32 1.442695, %v2175_v51  ;;  %v2211_v14 = vmul.f32 1.442695, %v2176_v12  ;;  %v2213_v8 = vmul.f32 1.442695, %v2177_v20  ;;  %v9995_v11 = vsub.f32 %v7881_v15, %v7913_v6 }
 0x597   : > { %6130 = vpow2.f32 %v2205_v60  ;;  %v7983_v32 = vpop.trf.xlu0  ;;  %v2215_v5 = vmul.f32 1.442695, %v2178_v31  ;;  %v2217_v50 = vmul.f32 1.442695, %v2179_v38  ;;  %v2219_v7 = vmul.f32 1.442695, %v2180_v57 }
 0x598   : > { %9990 = vst [vmem:[#allocation36_spill] sm:$0xff] %v7983_v32  ;;  %6132 = vpow2.f32 %v2207_v35  ;;  %v2221_v25 = vmul.f32 1.442695, %v2181_v4  ;;  %v2223_v39 = vmul.f32 1.442695, %v2182_v46 }
 0x599   : > { %6134 = vpow2.f32 %v2209_v27  ;;  %v2225_v22 = vmul.f32 1.442695, %v2183_v21  ;;  %v2227_v56 = vmul.f32 1.442695, %v2184_v49  ;;  %v2229_v51 = vmul.f32 1.442695, %v2185_v42 }
 0x59a   : > { %6136 = vpow2.f32 %v2211_v14  ;;  %v2231_v12 = vmul.f32 1.442695, %v2186_v13  ;;  %v2233_v31 = vmul.f32 1.442695, %v2187_v9  ;;  %v2235_v57 = vmul.f32 1.442695, %v2188_v55 }
 0x59b   : > { %6138 = vpow2.f32 %v2213_v8  ;;  %v7985_v43 = vpop.trf.xlu0  ;;  %v2237_v46 = vmul.f32 1.442695, %v2189_v45  ;;  %v2239_v9 = vmul.f32 1.442695, %v2190_v30  ;;  %v2241_v55 = vmul.f32 1.442695, %v2191_v40 }
 0x59c   : > { %6140 = vpow2.f32 %v2215_v5  ;;  %9991 = vst [vmem:[#allocation15_spill] sm:$0xff] %v7985_v43  ;;  %v2243_v8 = vmul.f32 1.442695, %v2192_v52  ;;  %v2247_v40 = vmul.f32 1.442695, %v2194_v28  ;;  %v9993_v52 = vsub.f32 %v7875_v53, %v7913_v6 }
 0x59d   : > { %6142 = vpow2.f32 %v2217_v50  ;;  %v2245_v50 = vmul.f32 1.442695, %v2193_v24  ;;  %v2251_v28 = vmul.f32 1.442695, %v9995_v11  ;;  %v9996_v53 = vsub.f32 %v7890_v47, %v7913_v6 }
 0x59e   : > { %6144 = vpow2.f32 %v2219_v7  ;;  %v2249_v60 = vmul.f32 1.442695, %v9993_v52 }
 0x59f   : > { %6146 = vpow2.f32 %v2221_v25  ;;  %v7997_v42 = vpop.trf.xlu0 }
 0x5a0   : > { %6148 = vpow2.f32 %v2223_v39  ;;  %9992 = vst [vmem:[#allocation16_spill] sm:$0xff] %v7997_v42 }
 0x5a1   : > { %v7987_v20 = vpop.eup %6130  ;;  %6150 = vpow2.f32 %v2225_v22 }
 0x5a2   : > { %v7989_v38 = vpop.eup %6132  ;;  %6152 = vpow2.f32 %v2227_v56 }
 0x5a3   : > { %v7991_v4 = vpop.eup %6134  ;;  %6154 = vpow2.f32 %v2229_v51  ;;  %v2269_v21 = vadd.f32 %v7989_v38, %v7987_v20  ;;  %v2306_v49 = vpack.c.bf16 %v7989_v38, %v7987_v20  ;;  %v8026_v56 = vpop.trf.xlu0 }
 0x5a4   : > { %v7999_v13 = vpop.eup %6136  ;;  %6156 = vpow2.f32 %v2231_v12  ;;  %9994 = vst [vmem:[#allocation71_spill] sm:$0xff] %v8026_v56 }
 0x5a5   : > { %v8001_v25 = vpop.eup %6138  ;;  %6158 = vpow2.f32 %v2233_v31  ;;  %v2270_v14 = vadd.f32 %v7991_v4, %v2269_v21  ;;  %v2307_v45 = vpack.c.bf16 %v7999_v13, %v7991_v4  ;;  %v2253_v31 = vmul.f32 1.442695, %v9996_v53 }
 0x5a6   : > { %v8006_v27 = vpop.eup %6140  ;;  %6160 = vpow2.f32 %v2235_v57 }
 0x5a7   : > { %v8008_v5 = vpop.eup %6142  ;;  %6162 = vpow2.f32 %v2237_v46  ;;  %v2271_v7 = vadd.f32 %v7999_v13, %v2270_v14  ;;  %v2308_v30 = vpack.c.bf16 %v8006_v27, %v8001_v25  ;;  %v9998_v14 = vsub.f32 %v7887_v37, %v7913_v6  ;;  %v8067_v53 = vpop.trf.xlu0 }
 0x5a8   : > { %v8013_v39 = vpop.eup %6144  ;;  %6164 = vpow2.f32 %v2239_v9  ;;  %v9997_v9 = vsub.f32 %v7896_v41, %v7913_v6  ;;  %10001 = vst [vmem:[#allocation72_spill] sm:$0xff] %v8067_v53 }
 0x5a9   : > { %v8018_v22 = vpop.eup %6146  ;;  %6166 = vpow2.f32 %v2241_v55  ;;  %v2272_v24 = vadd.f32 %v8001_v25, %v2271_v7  ;;  %v2257_v47 = vmul.f32 1.442695, %v9998_v14 }
 0x5aa   : > { %v8028_v51 = vpop.eup %6148  ;;  %6168 = vpow2.f32 %v2243_v8  ;;  %v2255_v15 = vmul.f32 1.442695, %v9997_v9 }
 0x5ab   : > { %v8033_v12 = vpop.eup %6150  ;;  %6170 = vpow2.f32 %v2245_v50  ;;  %v2273_v57 = vadd.f32 %v8006_v27, %v2272_v24 }
 0x5ac   : > { %v8041_v21 = vpop.eup %6152  ;;  %6172 = vpow2.f32 %v2247_v40  ;;  %v9999_v40 = vsub.f32 %v7893_v59, %v7913_v6  ;;  %v10002_v59 = vsub.f32 %v7908_v48, %v7913_v6 }
 0x5ad   : > { %v8046_v55 = vpop.eup %6154  ;;  %6174 = vpow2.f32 %v2249_v60  ;;  %v2274_v8 = vadd.f32 %v8008_v5, %v2273_v57  ;;  %v10000_v60 = vsub.f32 %v7902_v1, %v7913_v6  ;;  %v10003_v1 = vsub.f32 %v7899_v34, %v7913_v6 }
 0x5ae   : > { %v8054_v7 = vpop.eup %6156  ;;  %6176 = vpow2.f32 %v2251_v28  ;;  %v2259_v41 = vmul.f32 1.442695, %v9999_v40  ;;  %v2263_v28 = vmul.f32 1.442695, %v10002_v59 }
 0x5af   : > { %v8059_v52 = vpop.eup %6158  ;;  %6178 = vpow2.f32 %v2253_v31  ;;  %v2261_v37 = vmul.f32 1.442695, %v10000_v60  ;;  %v2275_v24 = vadd.f32 %v8013_v39, %v2274_v8  ;;  %v2265_v31 = vmul.f32 1.442695, %v10003_v1  ;;  %v8085_v8 = vpop.trf.xlu0 }
 0x5b0   : > { %v8069_v57 = vpop.eup %6160  ;;  %6180 = vpow2.f32 %v2255_v15  ;;  %v10004_v15 = vsub.f32 %v7905_v62, %v7913_v6  ;;  %10005 = vst [vmem:[#allocation73_spill] sm:$0xff] %v8085_v8  ;;  %v10008_v8 = vpack.c.bf16 %v8028_v51, %v8018_v22 }
 0x5b1   : > { %v6163_v9 = vpop.eup %6162  ;;  %6182 = vpow2.f32 %v2257_v47  ;;  %v2276_v14 = vadd.f32 %v8018_v22, %v2275_v24  ;;  %v10012_v22 = vld [vmem:[#allocation34_spill] sm:$0xff] }
 0x5b2   : > { %v6165_v40 = vpop.eup %6164  ;;  %6184 = vpow2.f32 %v2259_v41  ;;  %v2267_v60 = vmul.f32 1.442695, %v10004_v15 }
 0x5b3   : > { %v6167_v11 = vpop.eup %6166  ;;  %6186 = vpow2.f32 %v2261_v37  ;;  %v2277_v48 = vadd.f32 %v8028_v51, %v2276_v14  ;;  %v2314_v47 = vpack.c.bf16 %v6165_v40, %v6163_v9  ;;  %v903_v51 = vadd.f32 %v10012_v22, %v7216_v58 }
 0x5b4   : > { %v6169_v59 = vpop.eup %6168  ;;  %6188 = vpow2.f32 %v2263_v28 }
 0x5b5   : > { %v6171_v34 = vpop.eup %6170  ;;  %6190 = vpow2.f32 %v2265_v31  ;;  %v2278_v24 = vadd.f32 %v8033_v12, %v2277_v48  ;;  %5362 = vmatprep.subr.bf16.mxu1 %v2314_v47  ;;  %v2315_v1 = vpack.c.bf16 %v6169_v59, %v6167_v11 }
 0x5b6   : > { %v6173_v41 = vpop.eup %6172  ;;  %6192 = vpow2.f32 %v2267_v60  ;;  %5363 = vmatpush3.bf16.msra.mxu1 %v2306_v49 }
 0x5b7   : > { %v6175_v6 = vpop.eup %6174  ;;  %v2279_v62 = vadd.f32 %v8041_v21, %v2278_v24  ;;  %5364 = vmatprep.subr.bf16.mxu1 %v2315_v1  ;;  %v2316_v37 = vpack.c.bf16 %v6173_v41, %v6171_v34 }
 0x5b8   : > { %v6177_v28 = vpop.eup %6176 }
 0x5b9   : > { %v6179_v14 = vpop.eup %6178  ;;  %v2280_v31 = vadd.f32 %v8046_v55, %v2279_v62  ;;  %v2317_v15 = vpack.c.bf16 %v6177_v28, %v6175_v6 }
 0x5ba   : > { %v6181_v48 = vpop.eup %6180  ;;  %5365 = vmatpush3.bf16.msra.mxu1 %v2307_v45 }
 0x5bb   : > { %v6183_v60 = vpop.eup %6182  ;;  %v2281_v47 = vadd.f32 %v8054_v7, %v2280_v31  ;;  %5366 = vmatprep.subr.bf16.mxu1 %v2316_v37  ;;  %v2318_v20 = vpack.c.bf16 %v6181_v48, %v6179_v14 }
 0x5bc   : > { %v6185_v49 = vpop.eup %6184 }
 0x5bd   : > { %v6187_v1 = vpop.eup %6186  ;;  %v2282_v62 = vadd.f32 %v8059_v52, %v2281_v47  ;;  %v2319_v50 = vpack.c.bf16 %v6185_v49, %v6183_v60 }
 0x5be   : > { %v6189_v46 = vpop.eup %6188  ;;  %5367 = vmatpush3.bf16.msra.mxu1 %v2308_v30  ;;  %v10009_v30 = vpack.c.bf16 %v8041_v21, %v8033_v12  ;;  %v10013_v12 = vpack.c.bf16 %v8069_v57, %v8059_v52  ;;  %v1890_v21 = vpack.c.bf16 %v903_v51, %v903_v51  ;;  %v10015_v52 = vld [vmem:[#allocation40_spill] sm:$0xff] }
 0x5bf   : > { %v6191_v4 = vpop.eup %6190  ;;  %v2283_v13 = vadd.f32 %v8069_v57, %v2282_v62  ;;  %5368 = vmatprep.subr.bf16.mxu1 %v2317_v15  ;;  %v2320_v45 = vpack.c.bf16 %v6189_v46, %v6187_v1  ;;  %v10010_v15 = vld [vmem:[#allocation5_spill] sm:$0xff]  ;;  %v10027_v62 = vld [vmem:[#allocation52_spill] sm:$0xff] }
 0x5c0   : > { %v6193_v37 = vpop.eup %6192 }
 0x5c1   : > { %v2284_v31 = vadd.f32 %v6163_v9, %v2283_v13  ;;  %v2321_v35 = vpack.c.bf16 %v6193_v37, %v6191_v4 }
 0x5c3   : > { %v8096_v38 = vpop.permute.xlu0 %711 }
 0x5c4   : > { %v8100_v24 = vadd.f32 %v7298_v10, %v8096_v38  ;;  %v10007_v10 = vpack.c.bf16 %v8013_v39, %v8008_v5  ;;  %v583_v5 = vadd.f32 %v10010_v15, %v7224_v29 }
 0x5c6   : > { %10006 = vst [vmem:[#allocation74_spill] sm:$0xff] %v8100_v24  ;;  %5369 = vmatpush3.bf16.msra.mxu1 %v10007_v10  ;;  %v2285_v24 = vadd.f32 %v6165_v40, %v2284_v31 }
 0x5c7   : > { %5370 = vmatprep.subr.bf16.mxu1 %v2318_v20  ;;  %v10023_v20 = vld [vmem:[#allocation41_spill] sm:$0xff] }
 0x5c8   : > { %v2286_v47 = vadd.f32 %v6167_v11, %v2285_v24  ;;  %v10011_v11 = vpack.c.bf16 %v8054_v7, %v8046_v55  ;;  %v10025_v24 = vld [vmem:[#allocation45_spill] sm:$0xff] }
 0x5ca   : > { %5371 = vmatpush3.bf16.msra.mxu1 %v10008_v8  ;;  %v2287_v25 = vadd.f32 %v6169_v59, %v2286_v47 }
 0x5cb   : > { %5372 = vmatprep.subr.bf16.mxu1 %v2319_v50  ;;  %v2364_v50 = vpack.c.bf16 %v583_v5, %v583_v5 }
 0x5cc   : > { %v2288_v27 = vadd.f32 %v6171_v34, %v2287_v25 }
 0x5cd   : > { %v2450_v55 = vsel %vm1017_vm1, %v2364_v50, 0 }
 0x5ce   : > { %5373 = vmatpush3.bf16.msra.mxu1 %v10009_v30  ;;  %v2289_v9 = vadd.f32 %v6173_v41, %v2288_v27  ;;  %v10014_v41 = vld [vmem:[#allocation38_spill] sm:$0xff] }
 0x5cf   : > { %5374 = vmatprep.subr.bf16.mxu1 %v2320_v45 }
 0x5d0   : > { %v2290_v39 = vadd.f32 %v6175_v6, %v2289_v9  ;;  %v10016_v6 = vld [vmem:[#allocation42_spill] sm:$0xff] }
 0x5d2   : > { %5375 = vmatpush3.bf16.msra.mxu1 %v10011_v11  ;;  %v2291_v8 = vadd.f32 %v6177_v28, %v2290_v39  ;;  %v10017_v28 = vld [vmem:[#allocation44_spill] sm:$0xff] }
 0x5d3   : > { %5376 = vmatprep.subr.bf16.mxu1 %v2321_v35 }
 0x5d4   : > { %v2292_v40 = vadd.f32 %v6179_v14, %v2291_v8  ;;  %v10018_v14 = vld [vmem:[#allocation46_spill] sm:$0xff] }
 0x5d6   : > { %5377 = vmatpush3.bf16.msra.mxu1 %v10013_v12  ;;  %v2293_v59 = vadd.f32 %v6181_v48, %v2292_v40  ;;  %v10021_v48 = vld [vmem:[#allocation37_spill] sm:$0xff] }
 0x5d7   : > { %5902 = vmatprep.subr.msk.bf16.mxu1 %vm1017_vm1, %v2364_v50 }
 0x5d8   : > { %v2294_v29 = vadd.f32 %v6183_v60, %v2293_v59  ;;  %v10022_v60 = vld [vmem:[#allocation39_spill] sm:$0xff] }
 0x5d9   : > { %2355 = vmatmul.mubr.bf16.vlgmr.msra.gmra.mrb[64].mxu1 %v1890_v21 }
 0x5da   : > { %5706 = vmatpush3.bf16.msra.mxu1 %v2450_v55  ;;  %5707 = vmatprep.mubr.msk.bf16.mxu1 %vm968_vm2, %v7222_v54  ;;  %v2295_v58 = vadd.f32 %v6185_v49, %v2294_v29  ;;  %v10019_v54 = vld [vmem:[#allocation50_spill] sm:$0xff]  ;;  %v10024_v49 = vld [vmem:[#allocation43_spill] sm:$0xff] }
 0x5dc   : > { %v2296_v35 = vadd.f32 %v6187_v1, %v2295_v58  ;;  %v10026_v1 = vld [vmem:[#allocation49_spill] sm:$0xff] }
 0x5de   : > { %v2297_v7 = vadd.f32 %v6189_v46, %v2296_v35  ;;  %v10020_v46 = vld [vmem:[#allocation54_spill] sm:$0xff] }
 0x5e0   : > { %v2298_v34 = vadd.f32 %v6191_v4, %v2297_v7  ;;  %v10028_v4 = vld [vmem:[#allocation48_spill] sm:$0xff] }
 0x5e1   : > { %5708 = vmatmul.mubr.msk.bf16.vlgmr.msra.gmra.mrb[68].mxu1 %vm968_vm2, %v10014_v41  ;;  %v915_v13 = vadd.f32 %v10028_v4, %v7552_v3 }
 0x5e2   : > { %5711 = vmatprep.mubr.msk.bf16.mxu1 %vm968_vm2, %v10015_v52  ;;  %v2299_v57 = vadd.f32 %v6193_v37, %v2298_v34  ;;  %v10029_v37 = vld [vmem:[#allocation57_spill] sm:$0xff] }
 0x5e3   : > { %v2845_v45 = vpack.c.bf16 %v915_v13, %v915_v13 }
 0x5e4   : > { %v2300_v31 = vrot.slane %v2299_v57, 4 }
 0x5e6   : > { %v2301_v10 = vadd.f32 %v2300_v31, %v2299_v57 }
 0x5e8   : > { %v2302_v47 = vrot.slane %v2301_v10, 2 }
 0x5e9   : > { %5712 = vmatmul.mubr.msk.bf16.gmra.mrb[72].mxu1 %vm968_vm2, %v10016_v6 }
 0x5ea   : > { %5715 = vmatprep.mubr.msk.bf16.mxu1 %vm968_vm2, %v10017_v28  ;;  %v2303_v25 = vadd.f32 %v2302_v47, %v2301_v10 }
 0x5ec   : > { %v2304_v27 = vrot.slane %v2303_v25, 1 }
 0x5ee   : > { %v2305_v30 = vadd.f32 %v2304_v27, %v2303_v25 }
 0x5f0   : > { %6194 = vrcp.f32 %v2305_v30 }
 0x5f1   : > { %5716 = vmatmul.mubr.msk.bf16.gmra.mrb[76].mxu1 %vm968_vm2, %v10018_v14 }
 0x5f2   : > { %5719 = vmatprep.mubr.msk.bf16.mxu1 %vm968_vm2, %v10019_v54 }
 0x5f9   : > { %5720 = vmatmul.mubr.msk.bf16.gmra.mrb[80].mxu1 %vm968_vm2, %v10020_v46 }
 0x5fa   : > { %5723 = vmatprep.mubr.msk.bf16.mxu1 %vm968_vm2, %v10021_v48  ;;  %v6195_v11 = vpop.eup %6194 }
 0x601   : > { %5724 = vmatmul.mubr.msk.bf16.gmra.mrb[84].mxu1 %vm968_vm2, %v10022_v60 }
 0x602   : > { %5727 = vmatprep.mubr.msk.bf16.mxu1 %vm968_vm2, %v10023_v20 }
 0x609   : > { %5728 = vmatmul.mubr.msk.bf16.gmra.mrb[88].mxu1 %vm968_vm2, %v10024_v49 }
 0x60a   : > { %5731 = vmatprep.mubr.msk.bf16.mxu1 %vm968_vm2, %v10025_v24 }
 0x611   : > { %5732 = vmatmul.mubr.msk.bf16.gmra.mrb[92].mxu1 %vm968_vm2, %v10026_v1 }
 0x612   : > { %5735 = vmatprep.mubr.msk.bf16.mxu1 %vm968_vm2, %v10027_v62 }
 0x619   : > { %5736 = vmatmul.mubr.msk.bf16.gmra.mrb[96].mxu1 %vm968_vm2, %v10029_v37 }
 0x61a   : > { %3308 = vmatprep.mubr.bf16.mxu1 %v2845_v45 }
 0x6ac   : > { %v5378_v9 = vpop.f32.mrb[64].mxu1 }
 0x6ad   : > { %v5379_v15 = vpop.f32.mrb[65].mxu1 }
 0x6ae   : > { %v5380_v5 = vadd.f32 %v5379_v15, %v5378_v9  ;;  %v5381_v39 = vpop.f32.mrb[66].mxu1 }
 0x6af   : > { %v5382_v22 = vpop.f32.mrb[67].mxu1 }
 0x6b0   : > { %v8162_v51 = vmul.f32 %v6195_v11, %v5380_v5 }
 0x6b4   : > { %v8164_v8 = vpop.f32.mrb[68].mxu1 }
 0x6b5   : > { %v8166_v50 = vpop.f32.mrb[69].mxu1 }
 0x6b6   : > { %v8168_v40 = vpop.f32.mrb[70].mxu1 }
 0x6b7   : > { %v8170_v12 = vpop.f32.mrb[71].mxu1 }
 0x6bc   : > { %v8172_v21 = vpop.f32.mrb[72].mxu1 }
 0x6bd   : > { %v2615_v59 = vmax.f32 %v8164_v8, %v8172_v21  ;;  %v8176_v29 = vpop.f32.mrb[73].mxu1 }
 0x6be   : > { %v2613_v55 = vmax.f32 %v8166_v50, %v8176_v29  ;;  %v8180_v58 = vpop.f32.mrb[74].mxu1 }
 0x6bf   : > { %v2616_v35 = vmax.f32 %v8168_v40, %v8180_v58  ;;  %v8184_v7 = vpop.f32.mrb[75].mxu1 }
 0x6c0   : > { %v2614_v34 = vmax.f32 %v8170_v12, %v8184_v7 }
 0x6c4   : > { %v8188_v41 = vpop.f32.mrb[76].mxu1 }
 0x6c5   : > { %v2619_v52 = vmax.f32 %v2615_v59, %v8188_v41  ;;  %v8191_v57 = vpop.f32.mrb[77].mxu1 }
 0x6c6   : > { %v2617_v6 = vmax.f32 %v2613_v55, %v8191_v57  ;;  %v8194_v28 = vpop.f32.mrb[78].mxu1 }
 0x6c7   : > { %v2620_v14 = vmax.f32 %v2616_v35, %v8194_v28  ;;  %v8197_v54 = vpop.f32.mrb[79].mxu1 }
 0x6c8   : > { %v2618_v46 = vmax.f32 %v2614_v34, %v8197_v54 }
 0x6cc   : > { %v8200_v48 = vpop.f32.mrb[80].mxu1 }
 0x6cd   : > { %v2623_v60 = vmax.f32 %v2619_v52, %v8200_v48  ;;  %v8203_v20 = vpop.f32.mrb[81].mxu1 }
 0x6ce   : > { %v2621_v49 = vmax.f32 %v2617_v6, %v8203_v20  ;;  %v8206_v24 = vpop.f32.mrb[82].mxu1 }
 0x6cf   : > { %v2624_v1 = vmax.f32 %v2620_v14, %v8206_v24  ;;  %v8209_v62 = vpop.f32.mrb[83].mxu1 }
 0x6d0   : > { %v2622_v4 = vmax.f32 %v2618_v46, %v8209_v62 }
 0x6d4   : > { %v8212_v13 = vpop.f32.mrb[84].mxu1 }
 0x6d5   : > { %v2627_v45 = vmax.f32 %v2623_v60, %v8212_v13  ;;  %v8215_v37 = vpop.f32.mrb[85].mxu1 }
 0x6d6   : > { %v2625_v31 = vmax.f32 %v2621_v49, %v8215_v37  ;;  %v8218_v10 = vpop.f32.mrb[86].mxu1 }
 0x6d7   : > { %v2628_v47 = vmax.f32 %v2624_v1, %v8218_v10  ;;  %v8221_v25 = vpop.f32.mrb[87].mxu1 }
 0x6d8   : > { %v2626_v27 = vmax.f32 %v2622_v4, %v8221_v25 }
 0x6dc   : > { %v8224_v30 = vpop.f32.mrb[88].mxu1 }
 0x6dd   : > { %v2631_v9 = vmax.f32 %v2627_v45, %v8224_v30  ;;  %v8227_v15 = vpop.f32.mrb[89].mxu1 }
 0x6de   : > { %v2629_v5 = vmax.f32 %v2625_v31, %v8227_v15  ;;  %v8230_v39 = vpop.f32.mrb[90].mxu1 }
 0x6df   : > { %v2632_v11 = vmax.f32 %v2628_v47, %v8230_v39  ;;  %v8233_v22 = vpop.f32.mrb[91].mxu1 }
 0x6e0   : > { %v2630_v59 = vmax.f32 %v2626_v27, %v8233_v22 }
 0x6e4   : > { %v8236_v55 = vpop.f32.mrb[92].mxu1 }
 0x6e5   : > { %v2635_v35 = vmax.f32 %v2631_v9, %v8236_v55  ;;  %v8239_v34 = vpop.f32.mrb[93].mxu1 }
 0x6e6   : > { %v2633_v52 = vmax.f32 %v2629_v5, %v8239_v34  ;;  %v8242_v6 = vpop.f32.mrb[94].mxu1 }
 0x6e7   : > { %v2636_v14 = vmax.f32 %v2632_v11, %v8242_v6  ;;  %v8245_v46 = vpop.f32.mrb[95].mxu1 }
 0x6e8   : > { %v2634_v60 = vmax.f32 %v2630_v59, %v8245_v46 }
 0x6ec   : > { %v8248_v49 = vpop.f32.mrb[96].mxu1 }
 0x6ed   : > { %v2639_v1 = vmax.f32 %v2635_v35, %v8248_v49  ;;  %v8251_v4 = vpop.f32.mrb[97].mxu1 }
 0x6ee   : > { %v2637_v45 = vmax.f32 %v2633_v52, %v8251_v4  ;;  %v8254_v31 = vpop.f32.mrb[98].mxu1 }
 0x6ef   : > { %v2640_v47 = vmax.f32 %v2636_v14, %v8254_v31  ;;  %v8257_v27 = vpop.f32.mrb[99].mxu1 }
 0x6f0   : > { %v2638_v9 = vmax.f32 %v2634_v60, %v8257_v27 }
 0x6f1   : > { %v2642_v5 = vmax.f32 %v2639_v1, %v2640_v47 }
 0x6f2   : > { %v2641_v11 = vmax.f32 %v2637_v45, %v2638_v9 }
 0x6f4   : > { %v2643_v53 = vmax.f32 %v2641_v11, %v2642_v5 }
 0x6f6   : > { %v2644_v59 = vrot.slane %v2643_v53, 4 }
 0x6f8   : > { %v2645_v56 = vmax.f32 %v2643_v53, %v2644_v59 }
 0x6fa   : > { %v2646_v42 = vrot.slane %v2645_v56, 2 }
 0x6fc   : > { %v2647_v43 = vmax.f32 %v2645_v56, %v2646_v42 }
 0x6fe   : > { %v2648_v35 = vrot.slane %v2647_v43, 1 }
 0x700   : > { %v8260_v32 = vmax.f32 %v2647_v43, %v2648_v35 }
 0x702   : > { %v2650_v52 = vsub.f32 %v8166_v50, %v8260_v32  ;;  %v2651_v14 = vsub.f32 %v8170_v12, %v8260_v32  ;;  %v2652_v16 = vsub.f32 %v8164_v8, %v8260_v32  ;;  %v2653_v60 = vsub.f32 %v8168_v40, %v8260_v32 }
 0x703   : > { %v2654_v53 = vsub.f32 %v8176_v29, %v8260_v32  ;;  %v2655_v42 = vsub.f32 %v8184_v7, %v8260_v32  ;;  %v2656_v43 = vsub.f32 %v8172_v21, %v8260_v32  ;;  %v2657_v56 = vsub.f32 %v8180_v58, %v8260_v32 }
 0x704   : > { %v2658_v50 = vsub.f32 %v8191_v57, %v8260_v32  ;;  %v2659_v8 = vsub.f32 %v8197_v54, %v8260_v32  ;;  %v2660_v40 = vsub.f32 %v8188_v41, %v8260_v32  ;;  %v2661_v12 = vsub.f32 %v8194_v28, %v8260_v32 }
 0x705   : > { %v2662_v29 = vsub.f32 %v8203_v20, %v8260_v32  ;;  %v2663_v21 = vsub.f32 %v8209_v62, %v8260_v32  ;;  %v2664_v58 = vsub.f32 %v8200_v48, %v8260_v32  ;;  %v2665_v7 = vsub.f32 %v8206_v24, %v8260_v32 }
 0x706   : > { %v2666_v57 = vsub.f32 %v8215_v37, %v8260_v32  ;;  %v2667_v41 = vsub.f32 %v8221_v25, %v8260_v32  ;;  %v2668_v28 = vsub.f32 %v8212_v13, %v8260_v32  ;;  %v2669_v54 = vsub.f32 %v8218_v10, %v8260_v32 }
 0x707   : > { %v2670_v20 = vsub.f32 %v8227_v15, %v8260_v32  ;;  %v2671_v48 = vsub.f32 %v8233_v22, %v8260_v32  ;;  %v2672_v24 = vsub.f32 %v8224_v30, %v8260_v32  ;;  %v2673_v62 = vsub.f32 %v8230_v39, %v8260_v32 }
 0x708   : > { %v2674_v37 = vsub.f32 %v8239_v34, %v8260_v32  ;;  %v2682_v9 = vmul.f32 1.442695, %v2650_v52  ;;  %v2684_v5 = vmul.f32 1.442695, %v2651_v14  ;;  %v2686_v11 = vmul.f32 1.442695, %v2652_v16 }
 0x709   : > { %v2688_v59 = vmul.f32 1.442695, %v2653_v60  ;;  %v2690_v35 = vmul.f32 1.442695, %v2654_v53  ;;  %v2692_v25 = vmul.f32 1.442695, %v2655_v42 }
 0x70a   : > { %6196 = vpow2.f32 %v2682_v9  ;;  %v2694_v10 = vmul.f32 1.442695, %v2656_v43  ;;  %v2696_v15 = vmul.f32 1.442695, %v2657_v56  ;;  %v2698_v1 = vmul.f32 1.442695, %v2658_v50 }
 0x70b   : > { %6198 = vpow2.f32 %v2684_v5  ;;  %v2700_v13 = vmul.f32 1.442695, %v2659_v8  ;;  %v2702_v45 = vmul.f32 1.442695, %v2660_v40  ;;  %v2704_v47 = vmul.f32 1.442695, %v2661_v12 }
 0x70c   : > { %6200 = vpow2.f32 %v2686_v11  ;;  %v2706_v52 = vmul.f32 1.442695, %v2662_v29  ;;  %v2708_v16 = vmul.f32 1.442695, %v2663_v21  ;;  %v2710_v60 = vmul.f32 1.442695, %v2664_v58 }
 0x70d   : > { %6202 = vpow2.f32 %v2688_v59  ;;  %v2712_v42 = vmul.f32 1.442695, %v2665_v7  ;;  %v2714_v56 = vmul.f32 1.442695, %v2666_v57  ;;  %v2716_v12 = vmul.f32 1.442695, %v2667_v41 }
 0x70e   : > { %6204 = vpow2.f32 %v2690_v35  ;;  %v2718_v21 = vmul.f32 1.442695, %v2668_v28  ;;  %v2724_v28 = vmul.f32 1.442695, %v2671_v48  ;;  %v2728_v22 = vmul.f32 1.442695, %v2673_v62 }
 0x70f   : > { %6206 = vpow2.f32 %v2692_v25  ;;  %v2722_v25 = vmul.f32 1.442695, %v2670_v20  ;;  %v2730_v30 = vmul.f32 1.442695, %v2674_v37  ;;  %v10030_v59 = vsub.f32 %v8245_v46, %v8260_v32 }
 0x710   : > { %6208 = vpow2.f32 %v2694_v10  ;;  %v10031_v35 = vsub.f32 %v8236_v55, %v8260_v32 }
 0x711   : > { %6210 = vpow2.f32 %v2696_v15  ;;  %v2732_v39 = vmul.f32 1.442695, %v10030_v59 }
 0x712   : > { %6212 = vpow2.f32 %v2698_v1  ;;  %v2734_v34 = vmul.f32 1.442695, %v10031_v35 }
 0x713   : > { %6214 = vpow2.f32 %v2700_v13  ;;  %v2720_v13 = vmul.f32 1.442695, %v2669_v54  ;;  %v2726_v54 = vmul.f32 1.442695, %v2672_v24 }
 0x714   : > { %v8326_v14 = vpop.eup %6196  ;;  %6216 = vpow2.f32 %v2702_v45 }
 0x715   : > { %v8328_v53 = vpop.eup %6198  ;;  %6218 = vpow2.f32 %v2704_v47 }
 0x716   : > { %v8330_v43 = vpop.eup %6200  ;;  %6220 = vpow2.f32 %v2706_v52  ;;  %v2746_v50 = vadd.f32 %v8328_v53, %v8326_v14  ;;  %v2783_v8 = vpack.c.bf16 %v8328_v53, %v8326_v14 }
 0x717   : > { %v8336_v40 = vpop.eup %6202  ;;  %6222 = vpow2.f32 %v2708_v16 }
 0x718   : > { %v8338_v29 = vpop.eup %6204  ;;  %6224 = vpow2.f32 %v2710_v60  ;;  %v2747_v58 = vadd.f32 %v8330_v43, %v2746_v50  ;;  %v2784_v7 = vpack.c.bf16 %v8336_v40, %v8330_v43  ;;  %v10032_v60 = vsub.f32 %v8242_v6, %v8260_v32 }
 0x719   : > { %v8343_v57 = vpop.eup %6206  ;;  %6226 = vpow2.f32 %v2712_v42 }
 0x71a   : > { %v8345_v10 = vpop.eup %6208  ;;  %6228 = vpow2.f32 %v2714_v56  ;;  %v2748_v15 = vadd.f32 %v8336_v40, %v2747_v58  ;;  %v2785_v41 = vpack.c.bf16 %v8343_v57, %v8338_v29  ;;  %v2736_v46 = vmul.f32 1.442695, %v10032_v60 }
 0x71b   : > { %v8350_v1 = vpop.eup %6210  ;;  %6230 = vpow2.f32 %v2716_v12  ;;  %v10033_v56 = vsub.f32 %v8251_v4, %v8260_v32  ;;  %v10034_v58 = vsub.f32 %v8257_v27, %v8260_v32 }
 0x71c   : > { %v8355_v45 = vpop.eup %6212  ;;  %6232 = vpow2.f32 %v2718_v21  ;;  %v2749_v20 = vadd.f32 %v8338_v29, %v2748_v15  ;;  %v2786_v47 = vpack.c.bf16 %v8350_v1, %v8345_v10 }
 0x71d   : > { %v8363_v9 = vpop.eup %6214  ;;  %6234 = vpow2.f32 %v2720_v13  ;;  %v2738_v55 = vmul.f32 1.442695, %v10033_v56  ;;  %v2740_v6 = vmul.f32 1.442695, %v10034_v58 }
 0x71e   : > { %v8368_v48 = vpop.eup %6216  ;;  %6236 = vpow2.f32 %v2722_v25  ;;  %v2750_v24 = vadd.f32 %v8343_v57, %v2749_v20  ;;  %v2787_v5 = vpack.c.bf16 %v8363_v9, %v8355_v45  ;;  %v10035_v25 = vsub.f32 %v8248_v49, %v8260_v32 }
 0x71f   : > { %v8376_v11 = vpop.eup %6218  ;;  %6238 = vpow2.f32 %v2724_v28  ;;  %v10036_v20 = vsub.f32 %v8254_v31, %v8260_v32 }
 0x720   : > { %v8381_v62 = vpop.eup %6220  ;;  %6240 = vpow2.f32 %v2726_v54  ;;  %v2751_v37 = vadd.f32 %v8345_v10, %v2750_v24  ;;  %v2788_v52 = vpack.c.bf16 %v8376_v11, %v8368_v48  ;;  %v2742_v15 = vmul.f32 1.442695, %v10035_v25 }
 0x721   : > { %v8389_v16 = vpop.eup %6222  ;;  %6242 = vpow2.f32 %v2728_v22  ;;  %v2744_v22 = vmul.f32 1.442695, %v10036_v20 }
 0x722   : > { %v8394_v42 = vpop.eup %6224  ;;  %6244 = vpow2.f32 %v2730_v30  ;;  %v2752_v50 = vadd.f32 %v8350_v1, %v2751_v37  ;;  %v2789_v12 = vpack.c.bf16 %v8389_v16, %v8381_v62 }
 0x723   : > { %v8402_v21 = vpop.eup %6226  ;;  %6246 = vpow2.f32 %v2732_v39 }
 0x724   : > { %v6229_v13 = vpop.eup %6228  ;;  %6248 = vpow2.f32 %v2734_v34  ;;  %v2753_v4 = vadd.f32 %v8355_v45, %v2752_v50  ;;  %v2790_v28 = vpack.c.bf16 %v8402_v21, %v8394_v42 }
 0x725   : > { %v6231_v54 = vpop.eup %6230  ;;  %6250 = vpow2.f32 %v2736_v46 }
 0x726   : > { %v6233_v30 = vpop.eup %6232  ;;  %6252 = vpow2.f32 %v2738_v55  ;;  %v2754_v27 = vadd.f32 %v8363_v9, %v2753_v4  ;;  %v2791_v24 = vpack.c.bf16 %v6231_v54, %v6229_v13 }
 0x727   : > { %v6235_v59 = vpop.eup %6234  ;;  %6254 = vpow2.f32 %v2740_v6 }
 0x728   : > { %v6237_v49 = vpop.eup %6236  ;;  %6256 = vpow2.f32 %v2742_v15  ;;  %v2755_v39 = vadd.f32 %v8368_v48, %v2754_v27  ;;  %5401 = vmatprep.subr.bf16.mxu0 %v2791_v24  ;;  %v2792_v35 = vpack.c.bf16 %v6235_v59, %v6233_v30  ;;  %v10039_v48 = vld [vmem:[#allocation58_spill] sm:$0xff] }
 0x729   : > { %v6239_v34 = vpop.eup %6238  ;;  %6258 = vpow2.f32 %v2744_v22  ;;  %5402 = vmatpush3.bf16.msra.mxu0 %v2783_v8 }
 0x72a   : > { %v6241_v32 = vpop.eup %6240  ;;  %v2756_v31 = vadd.f32 %v8376_v11, %v2755_v39  ;;  %5403 = vmatprep.subr.bf16.mxu0 %v2792_v35  ;;  %v2793_v37 = vpack.c.bf16 %v6239_v34, %v6237_v49  ;;  %v10038_v35 = vld [vmem:[#allocation7_spill] sm:$0xff] }
 0x72b   : > { %v6243_v60 = vpop.eup %6242 }
 0x72c   : > { %v6245_v46 = vpop.eup %6244  ;;  %v2757_v56 = vadd.f32 %v8381_v62, %v2756_v31  ;;  %v2794_v55 = vpack.c.bf16 %v6243_v60, %v6241_v32  ;;  %v10040_v62 = vld [vmem:[#allocation10_spill] sm:$0xff]  ;;  %v10046_v31 = vld [vmem:[#allocation31_spill] sm:$0xff] }
 0x72d   : > { %v6247_v50 = vpop.eup %6246  ;;  %5404 = vmatpush3.bf16.msra.mxu0 %v2784_v7 }
 0x72e   : > { %v6249_v58 = vpop.eup %6248  ;;  %v2758_v6 = vadd.f32 %v8389_v16, %v2757_v56  ;;  %5405 = vmatprep.subr.bf16.mxu0 %v2793_v37  ;;  %v2795_v14 = vpack.c.bf16 %v6247_v50, %v6245_v46  ;;  %v10047_v37 = vld [vmem:[#allocation32_spill] sm:$0xff]  ;;  %v10050_v56 = vld [vmem:[#allocation51_spill] sm:$0xff] }
 0x72f   : > { %v6251_v53 = vpop.eup %6250 }
 0x730   : > { %v6253_v8 = vpop.eup %6252  ;;  %v2759_v25 = vadd.f32 %v8394_v42, %v2758_v6  ;;  %v2796_v15 = vpack.c.bf16 %v6251_v53, %v6249_v58  ;;  %v10041_v42 = vld [vmem:[#allocation22_spill] sm:$0xff] }
 0x731   : > { %v6255_v4 = vpop.eup %6254  ;;  %5406 = vmatpush3.bf16.msra.mxu0 %v2785_v41 }
 0x732   : > { %v6257_v20 = vpop.eup %6256  ;;  %v2760_v22 = vadd.f32 %v8402_v21, %v2759_v25  ;;  %5407 = vmatprep.subr.bf16.mxu0 %v2794_v55  ;;  %v2797_v43 = vpack.c.bf16 %v6255_v4, %v6253_v8  ;;  %v10042_v21 = vld [vmem:[#allocation24_spill] sm:$0xff]  ;;  %v919_v55 = vadd.f32 %v10050_v56, %v7716_v0 }
 0x733   : > { %v6259_v40 = vpop.eup %6258 }
 0x734   : > { %v2761_v7 = vadd.f32 %v6229_v13, %v2760_v22  ;;  %v2798_v27 = vpack.c.bf16 %v6259_v40, %v6257_v20  ;;  %v10037_v13 = vld [vmem:[#allocation11_spill] sm:$0xff] }
 0x735   : > { %5408 = vmatpush3.bf16.msra.mxu0 %v2786_v47  ;;  %v588_v10 = vadd.f32 %v10038_v35, %v10037_v13 }
 0x736   : > { %v2762_v24 = vadd.f32 %v6231_v54, %v2761_v7  ;;  %5409 = vmatprep.subr.bf16.mxu0 %v2795_v14 }
 0x737   : > { %v2841_v45 = vpack.c.bf16 %v588_v10, %v588_v10 }
 0x738   : > { %v2763_v39 = vadd.f32 %v6233_v30, %v2762_v24 }
 0x739   : > { %5410 = vmatpush3.bf16.msra.mxu0 %v2787_v5  ;;  %v2367_v5 = vpack.c.bf16 %v10039_v48, %v10039_v48 }
 0x73a   : > { %v2764_v29 = vadd.f32 %v6235_v59, %v2763_v39  ;;  %5411 = vmatprep.subr.bf16.mxu0 %v2796_v15 }
 0x73c   : > { %v2765_v57 = vadd.f32 %v6237_v49, %v2764_v29  ;;  %v10043_v49 = vld [vmem:[#allocation25_spill] sm:$0xff] }
 0x73d   : > { %5412 = vmatpush3.bf16.msra.mxu0 %v2788_v52  ;;  %v2927_v52 = vsel %vm1017_vm1, %v2841_v45, 0 }
 0x73e   : > { %v2766_v41 = vadd.f32 %v6239_v34, %v2765_v57  ;;  %5413 = vmatprep.subr.bf16.mxu0 %v2797_v43  ;;  %v10044_v34 = vld [vmem:[#allocation27_spill] sm:$0xff] }
 0x740   : > { %v2767_v1 = vadd.f32 %v6241_v32, %v2766_v41  ;;  %v10045_v32 = vld [vmem:[#allocation29_spill] sm:$0xff] }
 0x741   : > { %5414 = vmatpush3.bf16.msra.mxu0 %v2789_v12 }
 0x742   : > { %v2768_v47 = vadd.f32 %v6243_v60, %v2767_v1  ;;  %5415 = vmatprep.subr.bf16.mxu0 %v2798_v27  ;;  %v10048_v60 = vld [vmem:[#allocation12_spill] sm:$0xff] }
 0x744   : > { %v2769_v9 = vadd.f32 %v6245_v46, %v2768_v47  ;;  %v10049_v46 = vld [vmem:[#allocation59_spill] sm:$0xff] }
 0x745   : > { %5416 = vmatpush3.bf16.msra.mxu0 %v2790_v28 }
 0x746   : > { %v2770_v11 = vadd.f32 %v6247_v50, %v2769_v9  ;;  %5903 = vmatprep.subr.msk.bf16.mxu0 %vm1017_vm1, %v2841_v45  ;;  %v3322_v50 = vpack.c.bf16 %v919_v55, %v919_v55 }
 0x748   : > { %v2771_v54 = vadd.f32 %v6249_v58, %v2770_v11  ;;  %2832 = vmatmul.mubr.bf16.vlgmr.msra.gmra.mrb[80].mxu0 %v2367_v5 }
 0x749   : > { %5740 = vmatpush3.bf16.msra.mxu0 %v2927_v52  ;;  %5741 = vmatprep.mubr.msk.bf16.mxu0 %vm968_vm2, %v10040_v62 }
 0x74a   : > { %v2772_v16 = vadd.f32 %v6251_v53, %v2771_v54 }
 0x74c   : > { %v2773_v12 = vadd.f32 %v6253_v8, %v2772_v16 }
 0x74e   : > { %v2774_v30 = vadd.f32 %v6255_v4, %v2773_v12 }
 0x750   : > { %v2775_v59 = vadd.f32 %v6257_v20, %v2774_v30  ;;  %5742 = vmatmul.mubr.msk.bf16.vlgmr.msra.gmra.mrb[84].mxu0 %vm968_vm2, %v10041_v42 }
 0x751   : > { %5745 = vmatprep.mubr.msk.bf16.mxu0 %vm968_vm2, %v10042_v21 }
 0x752   : > { %v2776_v28 = vadd.f32 %v6259_v40, %v2775_v59 }
 0x758   : > { %5746 = vmatmul.mubr.msk.bf16.gmra.mrb[88].mxu0 %vm968_vm2, %v10043_v49 }
 0x759   : > { %5749 = vmatprep.mubr.msk.bf16.mxu0 %vm968_vm2, %v10044_v34 }
 0x760   : > { %5750 = vmatmul.mubr.msk.bf16.gmra.mrb[92].mxu0 %vm968_vm2, %v10045_v32 }
 0x761   : > { %5753 = vmatprep.mubr.msk.bf16.mxu0 %vm968_vm2, %v10046_v31 }
 0x768   : > { %5754 = vmatmul.mubr.msk.bf16.gmra.mrb[96].mxu0 %vm968_vm2, %v10047_v37 }
 0x769   : > { %5757 = vmatprep.mubr.msk.bf16.mxu0 %vm968_vm2, %v10048_v60 }
 0x770   : > { %5758 = vmatmul.mubr.msk.bf16.gmra.mrb[100].mxu0 %vm968_vm2, %v10049_v46 }
 0x771   : > { %5761 = vmatprep.mubr.msk.bf16.mxu0 %vm968_vm2, %v7472_v33  ;;  %v2777_v33 = vrot.slane %v2776_v28, 4 }
 0x773   : > { %v2778_v58 = vadd.f32 %v2777_v33, %v2776_v28 }
 0x778   : > { %5762 = vmatmul.mubr.msk.bf16.gmra.mrb[104].mxu0 %vm968_vm2, %v7474_v26  ;;  %v2779_v26 = vrot.slane %v2778_v58, 2 }
 0x779   : > { %5765 = vmatprep.mubr.msk.bf16.mxu0 %vm968_vm2, %v7476_v63 }
 0x77a   : > { %v2780_v6 = vadd.f32 %v2779_v26, %v2778_v58 }
 0x77c   : > { %v2781_v14 = vrot.slane %v2780_v6, 1 }
 0x77e   : > { %v2782_v63 = vadd.f32 %v2781_v14, %v2780_v6 }
 0x780   : > { %5766 = vmatmul.mubr.msk.bf16.gmra.mrb[108].mxu0 %vm968_vm2, %v7496_v36  ;;  %6260 = vrcp.f32 %v2782_v63 }
 0x781   : > { %5769 = vmatprep.mubr.msk.bf16.mxu0 %vm968_vm2, %v7546_v2 }
 0x788   : > { %5770 = vmatmul.mubr.msk.bf16.gmra.mrb[112].mxu0 %vm968_vm2, %v7548_v61 }
 0x789   : > { %3785 = vmatprep.mubr.bf16.mxu0 %v3322_v50 }
 0x78a   : > { %v6261_v2 = vpop.eup %6260 }
 0x81b   : > { %v5417_v53 = vpop.f32.mrb[80].mxu0 }
 0x81c   : > { %v5418_v36 = vpop.f32.mrb[81].mxu0 }
 0x81d   : > { %v5419_v8 = vadd.f32 %v5418_v36, %v5417_v53  ;;  %v5420_v25 = vpop.f32.mrb[82].mxu0 }
 0x81e   : > { %v5421_v15 = vpop.f32.mrb[83].mxu0 }
 0x81f   : > { %v2840_v4 = vmul.f32 %v6261_v2, %v5419_v8 }
 0x821   : > { %v8488_v0 = vpack.c.bf16 %v2840_v4, %v8162_v51 }
 0x823   : > { %v8490_v20 = vpop.f32.mrb[84].mxu0 }
 0x824   : > { %v8492_v61 = vpop.f32.mrb[85].mxu0 }
 0x825   : > { %v8494_v22 = vpop.f32.mrb[86].mxu0 }
 0x826   : > { %v8496_v43 = vpop.f32.mrb[87].mxu0 }
 0x82b   : > { %v8498_v40 = vpop.f32.mrb[88].mxu0 }
 0x82c   : > { %v3092_v7 = vmax.f32 %v8490_v20, %v8498_v40  ;;  %v8502_v27 = vpop.f32.mrb[89].mxu0 }
 0x82d   : > { %v3090_v24 = vmax.f32 %v8492_v61, %v8502_v27  ;;  %v8506_v51 = vpop.f32.mrb[90].mxu0 }
 0x82e   : > { %v3093_v39 = vmax.f32 %v8494_v22, %v8506_v51  ;;  %v8510_v29 = vpop.f32.mrb[91].mxu0 }
 0x82f   : > { %v3091_v57 = vmax.f32 %v8496_v43, %v8510_v29 }
 0x833   : > { %v8514_v41 = vpop.f32.mrb[92].mxu0 }
 0x834   : > { %v3096_v13 = vmax.f32 %v3092_v7, %v8514_v41  ;;  %v8517_v35 = vpop.f32.mrb[93].mxu0 }
 0x835   : > { %v3094_v10 = vmax.f32 %v3090_v24, %v8517_v35  ;;  %v8520_v1 = vpop.f32.mrb[94].mxu0 }
 0x836   : > { %v3097_v47 = vmax.f32 %v3093_v39, %v8520_v1  ;;  %v8523_v45 = vpop.f32.mrb[95].mxu0 }
 0x837   : > { %v3095_v9 = vmax.f32 %v3091_v57, %v8523_v45 }
 0x83b   : > { %v8526_v48 = vpop.f32.mrb[96].mxu0 }
 0x83c   : > { %v3100_v5 = vmax.f32 %v3096_v13, %v8526_v48  ;;  %v8529_v11 = vpop.f32.mrb[97].mxu0 }
 0x83d   : > { %v3098_v52 = vmax.f32 %v3094_v10, %v8529_v11  ;;  %v8532_v54 = vpop.f32.mrb[98].mxu0 }
 0x83e   : > { %v3101_v62 = vmax.f32 %v3097_v47, %v8532_v54  ;;  %v8535_v16 = vpop.f32.mrb[99].mxu0 }
 0x83f   : > { %v3099_v12 = vmax.f32 %v3095_v9, %v8535_v16 }
 0x843   : > { %v8538_v30 = vpop.f32.mrb[100].mxu0 }
 0x844   : > { %v3104_v59 = vmax.f32 %v3100_v5, %v8538_v30  ;;  %v8541_v42 = vpop.f32.mrb[101].mxu0 }
 0x845   : > { %v3102_v21 = vmax.f32 %v3098_v52, %v8541_v42  ;;  %v8544_v28 = vpop.f32.mrb[102].mxu0 }
 0x846   : > { %v3105_v49 = vmax.f32 %v3101_v62, %v8544_v28  ;;  %v8547_v34 = vpop.f32.mrb[103].mxu0 }
 0x847   : > { %v3103_v32 = vmax.f32 %v3099_v12, %v8547_v34 }
 0x84b   : > { %v8550_v31 = vpop.f32.mrb[104].mxu0 }
 0x84c   : > { %v3108_v37 = vmax.f32 %v3104_v59, %v8550_v31  ;;  %v8553_v60 = vpop.f32.mrb[105].mxu0 }
 0x84d   : > { %v3106_v46 = vmax.f32 %v3102_v21, %v8553_v60  ;;  %v8556_v56 = vpop.f32.mrb[106].mxu0 }
 0x84e   : > { %v3109_v55 = vmax.f32 %v3105_v49, %v8556_v56  ;;  %v8559_v50 = vpop.f32.mrb[107].mxu0 }
 0x84f   : > { %v3107_v33 = vmax.f32 %v3103_v32, %v8559_v50 }
 0x853   : > { %v8562_v58 = vpop.f32.mrb[108].mxu0 }
 0x854   : > { %v3112_v26 = vmax.f32 %v3108_v37, %v8562_v58  ;;  %v8565_v6 = vpop.f32.mrb[109].mxu0 }
 0x855   : > { %v3110_v14 = vmax.f32 %v3106_v46, %v8565_v6  ;;  %v8568_v63 = vpop.f32.mrb[110].mxu0 }
 0x856   : > { %v3113_v53 = vmax.f32 %v3109_v55, %v8568_v63  ;;  %v8571_v36 = vpop.f32.mrb[111].mxu0 }
 0x857   : > { %v3111_v8 = vmax.f32 %v3107_v33, %v8571_v36 }
 0x85b   : > { %v8574_v25 = vpop.f32.mrb[112].mxu0 }
 0x85c   : > { %v3116_v2 = vmax.f32 %v3112_v26, %v8574_v25  ;;  %v8577_v15 = vpop.f32.mrb[113].mxu0 }
 0x85d   : > { %v3114_v4 = vmax.f32 %v3110_v14, %v8577_v15  ;;  %v8580_v7 = vpop.f32.mrb[114].mxu0 }
 0x85e   : > { %v3117_v24 = vmax.f32 %v3113_v53, %v8580_v7  ;;  %v8583_v39 = vpop.f32.mrb[115].mxu0 }
 0x85f   : > { %v3115_v57 = vmax.f32 %v3111_v8, %v8583_v39 }
 0x860   : > { %v3119_v13 = vmax.f32 %v3116_v2, %v3117_v24 }
 0x861   : > { %v3118_v10 = vmax.f32 %v3114_v4, %v3115_v57 }
 0x863   : > { %v3120_v47 = vmax.f32 %v3118_v10, %v3119_v13 }
 0x865   : > { %v3121_v9 = vrot.slane %v3120_v47, 4 }
 0x867   : > { %v3122_v5 = vmax.f32 %v3120_v47, %v3121_v9 }
 0x869   : > { %v3123_v52 = vrot.slane %v3122_v5, 2 }
 0x86b   : > { %v3124_v62 = vmax.f32 %v3122_v5, %v3123_v52 }
 0x86d   : > { %v3125_v12 = vrot.slane %v3124_v62, 1 }
 0x86f   : > { %v8586_v59 = vmax.f32 %v3124_v62, %v3125_v12 }
 0x871   : > { %v3127_v21 = vsub.f32 %v8492_v61, %v8586_v59  ;;  %v3128_v49 = vsub.f32 %v8496_v43, %v8586_v59  ;;  %v3129_v32 = vsub.f32 %v8490_v20, %v8586_v59  ;;  %v3130_v37 = vsub.f32 %v8494_v22, %v8586_v59 }
 0x872   : > { %v3131_v46 = vsub.f32 %v8502_v27, %v8586_v59  ;;  %v3132_v55 = vsub.f32 %v8510_v29, %v8586_v59  ;;  %v3133_v33 = vsub.f32 %v8498_v40, %v8586_v59  ;;  %v3134_v61 = vsub.f32 %v8506_v51, %v8586_v59 }
 0x873   : > { %v3135_v43 = vsub.f32 %v8517_v35, %v8586_v59  ;;  %v3136_v20 = vsub.f32 %v8523_v45, %v8586_v59  ;;  %v3137_v22 = vsub.f32 %v8514_v41, %v8586_v59  ;;  %v3138_v27 = vsub.f32 %v8520_v1, %v8586_v59 }
 0x874   : > { %v3139_v29 = vsub.f32 %v8529_v11, %v8586_v59  ;;  %v3140_v40 = vsub.f32 %v8535_v16, %v8586_v59  ;;  %v3141_v51 = vsub.f32 %v8526_v48, %v8586_v59  ;;  %v3142_v35 = vsub.f32 %v8532_v54, %v8586_v59 }
 0x875   : > { %v3143_v45 = vsub.f32 %v8541_v42, %v8586_v59  ;;  %v3144_v41 = vsub.f32 %v8547_v34, %v8586_v59  ;;  %v3145_v1 = vsub.f32 %v8538_v30, %v8586_v59  ;;  %v3146_v11 = vsub.f32 %v8544_v28, %v8586_v59 }
 0x876   : > { %v3147_v16 = vsub.f32 %v8553_v60, %v8586_v59  ;;  %v3148_v48 = vsub.f32 %v8559_v50, %v8586_v59  ;;  %v3149_v54 = vsub.f32 %v8550_v31, %v8586_v59  ;;  %v3150_v42 = vsub.f32 %v8556_v56, %v8586_v59 }
 0x877   : > { %v3151_v34 = vsub.f32 %v8565_v6, %v8586_v59  ;;  %v3152_v30 = vsub.f32 %v8571_v36, %v8586_v59  ;;  %v3153_v28 = vsub.f32 %v8562_v58, %v8586_v59  ;;  %v3154_v60 = vsub.f32 %v8568_v63, %v8586_v59 }
 0x878   : > { %v3155_v26 = vsub.f32 %v8577_v15, %v8586_v59  ;;  %v3156_v14 = vsub.f32 %v8583_v39, %v8586_v59  ;;  %v3157_v53 = vsub.f32 %v8574_v25, %v8586_v59  ;;  %v3158_v8 = vsub.f32 %v8580_v7, %v8586_v59 }
 0x879   : > { %v3159_v2 = vmul.f32 1.442695, %v3127_v21  ;;  %v3161_v4 = vmul.f32 1.442695, %v3128_v49  ;;  %v3163_v24 = vmul.f32 1.442695, %v3129_v32 }
 0x87a   : > { %v3165_v57 = vmul.f32 1.442695, %v3130_v37  ;;  %v3167_v13 = vmul.f32 1.442695, %v3131_v46  ;;  %v3169_v10 = vmul.f32 1.442695, %v3132_v55 }
 0x87b   : > { %6262 = vpow2.f32 %v3159_v2  ;;  %v3171_v47 = vmul.f32 1.442695, %v3133_v33  ;;  %v3173_v9 = vmul.f32 1.442695, %v3134_v61  ;;  %v3175_v5 = vmul.f32 1.442695, %v3135_v43 }
 0x87c   : > { %6264 = vpow2.f32 %v3161_v4  ;;  %v3177_v52 = vmul.f32 1.442695, %v3136_v20  ;;  %v3179_v62 = vmul.f32 1.442695, %v3137_v22  ;;  %v3181_v12 = vmul.f32 1.442695, %v3138_v27 }
 0x87d   : > { %6266 = vpow2.f32 %v3163_v24  ;;  %v3183_v21 = vmul.f32 1.442695, %v3139_v29  ;;  %v3185_v49 = vmul.f32 1.442695, %v3140_v40  ;;  %v3187_v37 = vmul.f32 1.442695, %v3141_v51 }
 0x87e   : > { %6268 = vpow2.f32 %v3165_v57  ;;  %v3189_v55 = vmul.f32 1.442695, %v3142_v35  ;;  %v3191_v61 = vmul.f32 1.442695, %v3143_v45  ;;  %v3193_v27 = vmul.f32 1.442695, %v3144_v41 }
 0x87f   : > { %6270 = vpow2.f32 %v3167_v13  ;;  %v3195_v40 = vmul.f32 1.442695, %v3145_v1  ;;  %v3197_v2 = vmul.f32 1.442695, %v3146_v11  ;;  %v3199_v24 = vmul.f32 1.442695, %v3147_v16 }
 0x880   : > { %6272 = vpow2.f32 %v3169_v10  ;;  %v3201_v1 = vmul.f32 1.442695, %v3148_v48  ;;  %v3203_v11 = vmul.f32 1.442695, %v3149_v54  ;;  %v3205_v50 = vmul.f32 1.442695, %v3150_v42 }
 0x881   : > { %6274 = vpow2.f32 %v3171_v47  ;;  %v3207_v31 = vmul.f32 1.442695, %v3151_v34  ;;  %v3209_v56 = vmul.f32 1.442695, %v3152_v30  ;;  %v3211_v6 = vmul.f32 1.442695, %v3153_v28 }
 0x882   : > { %6276 = vpow2.f32 %v3173_v9  ;;  %v3213_v36 = vmul.f32 1.442695, %v3154_v60  ;;  %v3215_v58 = vmul.f32 1.442695, %v3155_v26  ;;  %v3217_v63 = vmul.f32 1.442695, %v3156_v14 }
 0x883   : > { %6278 = vpow2.f32 %v3175_v5 }
 0x884   : > { %6280 = vpow2.f32 %v3177_v52 }
 0x885   : > { %v8652_v32 = vpop.eup %6262  ;;  %6282 = vpow2.f32 %v3179_v62 }
 0x886   : > { %v8654_v46 = vpop.eup %6264  ;;  %6284 = vpow2.f32 %v3181_v12 }
 0x887   : > { %v8656_v33 = vpop.eup %6266  ;;  %6286 = vpow2.f32 %v3183_v21  ;;  %v3223_v43 = vadd.f32 %v8654_v46, %v8652_v32  ;;  %v3260_v20 = vpack.c.bf16 %v8654_v46, %v8652_v32 }
 0x888   : > { %v8662_v22 = vpop.eup %6268  ;;  %6288 = vpow2.f32 %v3185_v49 }
 0x889   : > { %v8664_v29 = vpop.eup %6270  ;;  %6290 = vpow2.f32 %v3187_v37  ;;  %v3224_v51 = vadd.f32 %v8656_v33, %v3223_v43  ;;  %v3261_v35 = vpack.c.bf16 %v8662_v22, %v8656_v33  ;;  %v3219_v37 = vmul.f32 1.442695, %v3157_v53 }
 0x88a   : > { %v8669_v45 = vpop.eup %6272  ;;  %6292 = vpow2.f32 %v3189_v55 }
 0x88b   : > { %v8671_v4 = vpop.eup %6274  ;;  %6294 = vpow2.f32 %v3191_v61  ;;  %v3225_v57 = vadd.f32 %v8662_v22, %v3224_v51  ;;  %v3262_v41 = vpack.c.bf16 %v8669_v45, %v8664_v29  ;;  %v3221_v61 = vmul.f32 1.442695, %v3158_v8 }
 0x88c   : > { %v8676_v13 = vpop.eup %6276  ;;  %6296 = vpow2.f32 %v3193_v27 }
 0x88d   : > { %v8681_v10 = vpop.eup %6278  ;;  %6298 = vpow2.f32 %v3195_v40  ;;  %v3226_v16 = vadd.f32 %v8664_v29, %v3225_v57  ;;  %v3263_v47 = vpack.c.bf16 %v8676_v13, %v8671_v4 }
 0x88e   : > { %v8689_v9 = vpop.eup %6280  ;;  %6300 = vpow2.f32 %v3197_v2 }
 0x88f   : > { %v8694_v48 = vpop.eup %6282  ;;  %6302 = vpow2.f32 %v3199_v24  ;;  %v3227_v54 = vadd.f32 %v8669_v45, %v3226_v16  ;;  %v3264_v5 = vpack.c.bf16 %v8689_v9, %v8681_v10 }
 0x890   : > { %v8702_v52 = vpop.eup %6284  ;;  %6304 = vpow2.f32 %v3201_v1 }
 0x891   : > { %v8707_v42 = vpop.eup %6286  ;;  %6306 = vpow2.f32 %v3203_v11  ;;  %v3228_v34 = vadd.f32 %v8671_v4, %v3227_v54  ;;  %v3265_v62 = vpack.c.bf16 %v8702_v52, %v8694_v48 }
 0x892   : > { %v8715_v12 = vpop.eup %6288  ;;  %6308 = vpow2.f32 %v3205_v50 }
 0x893   : > { %v8720_v30 = vpop.eup %6290  ;;  %6310 = vpow2.f32 %v3207_v31  ;;  %v3229_v28 = vadd.f32 %v8676_v13, %v3228_v34  ;;  %v3266_v21 = vpack.c.bf16 %v8715_v12, %v8707_v42 }
 0x894   : > { %v8728_v49 = vpop.eup %6292  ;;  %6312 = vpow2.f32 %v3209_v56 }
 0x895   : > { %v6295_v60 = vpop.eup %6294  ;;  %6314 = vpow2.f32 %v3211_v6  ;;  %v3230_v15 = vadd.f32 %v8681_v10, %v3229_v28  ;;  %v3267_v26 = vpack.c.bf16 %v8728_v49, %v8720_v30  ;;  %v10052_v10 = vld [vmem:[#allocation47_spill] sm:$0xff] }
 0x896   : > { %v6297_v55 = vpop.eup %6296  ;;  %6316 = vpow2.f32 %v3213_v36 }
 0x897   : > { %v6299_v43 = vpop.eup %6298  ;;  %6318 = vpow2.f32 %v3215_v58  ;;  %v3231_v39 = vadd.f32 %v8689_v9, %v3230_v15  ;;  %v3268_v14 = vpack.c.bf16 %v6297_v55, %v6295_v60  ;;  %v10054_v15 = vld [vmem:[#allocation63_spill] sm:$0xff] }
 0x898   : > { %v6301_v27 = vpop.eup %6300  ;;  %6320 = vpow2.f32 %v3217_v63  ;;  %v10051_v63 = vld [vmem:[#allocation9_spill] sm:$0xff] }
 0x899   : > { %v6303_v25 = vpop.eup %6302  ;;  %6322 = vpow2.f32 %v3219_v37  ;;  %v3232_v53 = vadd.f32 %v8694_v48, %v3231_v39  ;;  %5440 = vmatprep.subr.bf16.mxu1 %v3268_v14  ;;  %v3269_v40 = vpack.c.bf16 %v6301_v27, %v6299_v43  ;;  %v591_v4 = vadd.f32 %v10051_v63, %v7573_v44  ;;  %v10057_v39 = vld [vmem:[#allocation70_spill] sm:$0xff] }
 0x89a   : > { %v6305_v51 = vpop.eup %6304  ;;  %6324 = vpow2.f32 %v3221_v61  ;;  %5441 = vmatpush3.bf16.msra.mxu1 %v3260_v20  ;;  %v10055_v61 = vld [vmem:[#allocation65_spill] sm:$0xff] }
 0x89b   : > { %v6307_v7 = vpop.eup %6306  ;;  %v3233_v59 = vadd.f32 %v8702_v52, %v3232_v53  ;;  %5442 = vmatprep.subr.bf16.mxu1 %v3269_v40  ;;  %v3270_v8 = vpack.c.bf16 %v6305_v51, %v6303_v25  ;;  %v10059_v53 = vld [vmem:[#allocation60_spill] sm:$0xff] }
 0x89c   : > { %v6309_v2 = vpop.eup %6308 }
 0x89d   : > { %v6311_v24 = vpop.eup %6310  ;;  %v3234_v57 = vadd.f32 %v8707_v42, %v3233_v59  ;;  %v3271_v1 = vpack.c.bf16 %v6309_v2, %v6307_v7  ;;  %v8781_v42 = vpop.permute.xlu1 %472  ;;  %v10062_v59 = vld [vmem:[#allocation66_spill] sm:$0xff] }
 0x89e   : > { %v6313_v11 = vpop.eup %6312  ;;  %5443 = vmatpush3.bf16.msra.mxu1 %v3261_v35 }
 0x89f   : > { %v6315_v16 = vpop.eup %6314  ;;  %v3235_v50 = vadd.f32 %v8715_v12, %v3234_v57  ;;  %5444 = vmatprep.subr.bf16.mxu1 %v3270_v8  ;;  %v3272_v32 = vpack.c.bf16 %v6313_v11, %v6311_v24  ;;  %v10063_v8 = vld [vmem:[#allocation68_spill] sm:$0xff]  ;;  %v10064_v57 = vld [vmem:[#allocation69_spill] sm:$0xff] }
 0x8a0   : > { %v6317_v46 = vpop.eup %6316 }
 0x8a1   : > { %v6319_v20 = vpop.eup %6318  ;;  %v3236_v31 = vadd.f32 %v8720_v30, %v3235_v50  ;;  %v3273_v54 = vpack.c.bf16 %v6317_v46, %v6315_v16  ;;  %v8783_v37 = vpop.trf.xlu1 }
 0x8a2   : > { %v6321_v56 = vpop.eup %6320  ;;  %5445 = vmatpush3.bf16.msra.mxu1 %v3262_v41 }
 0x8a3   : > { %v6323_v6 = vpop.eup %6322  ;;  %v3237_v34 = vadd.f32 %v8728_v49, %v3236_v31  ;;  %5446 = vmatprep.subr.bf16.mxu1 %v3271_v1  ;;  %v3274_v33 = vpack.c.bf16 %v6321_v56, %v6319_v20  ;;  %v10053_v49 = vld [vmem:[#allocation61_spill] sm:$0xff] }
 0x8a4   : > { %v6325_v22 = vpop.eup %6324  ;;  %v10065_v1 = vld [vmem:[#allocation17_spill] sm:$0xff] }
 0x8a5   : > { %v3238_v35 = vadd.f32 %v6295_v60, %v3237_v34  ;;  %v3275_v36 = vpack.c.bf16 %v6325_v22, %v6323_v6 }
 0x8a6   : > { %5447 = vmatpush3.bf16.msra.mxu1 %v3263_v47  ;;  %v913_v47 = vadd.f32 %v10052_v10, %v7552_v3 }
 0x8a7   : > { %v3239_v58 = vadd.f32 %v6297_v55, %v3238_v35  ;;  %5448 = vmatprep.subr.bf16.mxu1 %v3272_v32  ;;  %v8789_v55 = vpop.trf.xlu1  ;;  %v10067_v32 = vld [vmem:[#allocation33_spill] sm:$0xff] }
 0x8a8   : > { %v2844_v48 = vpack.c.bf16 %v913_v47, %v913_v47 }
 0x8a9   : > { %v3240_v28 = vadd.f32 %v6299_v43, %v3239_v58 }
 0x8aa   : > { %5449 = vmatpush3.bf16.msra.mxu1 %v3264_v5  ;;  %v3318_v5 = vpack.c.bf16 %v591_v4, %v591_v4 }
 0x8ab   : > { %v3241_v29 = vadd.f32 %v6301_v27, %v3240_v28  ;;  %5450 = vmatprep.subr.bf16.mxu1 %v3273_v54  ;;  %v8795_v43 = vpop.trf.xlu1 }
 0x8ac   : > { %v3404_v44 = vsel %vm1017_vm1, %v3318_v5, 0 }
 0x8ad   : > { %v3242_v45 = vadd.f32 %v6303_v25, %v3241_v29  ;;  %v10058_v25 = vld [vmem:[#allocation4_spill] sm:$0xff] }
 0x8ae   : > { %5451 = vmatpush3.bf16.msra.mxu1 %v3265_v62 }
 0x8af   : > { %v3243_v41 = vadd.f32 %v6305_v51, %v3242_v45  ;;  %5452 = vmatprep.subr.bf16.mxu1 %v3274_v33  ;;  %v8801_v14 = vpop.trf.xlu1  ;;  %v10060_v51 = vld [vmem:[#allocation62_spill] sm:$0xff] }
 0x8b1   : > { %v3244_v13 = vadd.f32 %v6307_v7, %v3243_v41  ;;  %v10061_v7 = vld [vmem:[#allocation64_spill] sm:$0xff] }
 0x8b2   : > { %5453 = vmatpush3.bf16.msra.mxu1 %v3266_v21 }
 0x8b3   : > { %v3245_v9 = vadd.f32 %v6309_v2, %v3244_v13  ;;  %5454 = vmatprep.subr.bf16.mxu1 %v3275_v36  ;;  %v8803_v27 = vpop.trf.xlu1 }
 0x8b5   : > { %v3246_v60 = vadd.f32 %v6311_v24, %v3245_v9 }
 0x8b6   : > { %5455 = vmatpush3.bf16.msra.mxu1 %v3267_v26 }
 0x8b7   : > { %v3247_v52 = vadd.f32 %v6313_v11, %v3246_v60  ;;  %5904 = vmatprep.subr.msk.bf16.mxu1 %vm1017_vm1, %v3318_v5  ;;  %v8809_v40 = vpop.trf.xlu1  ;;  %v10066_v11 = vld [vmem:[#allocation55_spill] sm:$0xff] }
 0x8b9   : > { %v3248_v62 = vadd.f32 %v6315_v16, %v3247_v52  ;;  %3309 = vmatmul.mubr.bf16.vlgmr.msra.gmra.mrb[100].mxu1 %v2844_v48 }
 0x8ba   : > { %5774 = vmatpush3.bf16.msra.mxu1 %v3404_v44  ;;  %5775 = vmatprep.mubr.msk.bf16.mxu1 %vm968_vm2, %v7569_v17  ;;  %v10056_v17 = vld [vmem:[#allocation67_spill] sm:$0xff] }
 0x8bb   : > { %v3249_v3 = vadd.f32 %v6317_v46, %v3248_v62 }
 0x8bd   : > { %v3250_v12 = vadd.f32 %v6319_v20, %v3249_v3 }
 0x8bf   : > { %v3251_v21 = vadd.f32 %v6321_v56, %v3250_v12 }
 0x8c1   : > { %v3252_v30 = vadd.f32 %v6323_v6, %v3251_v21  ;;  %5776 = vmatmul.mubr.msk.bf16.vlgmr.msra.gmra.mrb[104].mxu1 %vm968_vm2, %v10053_v49 }
 0x8c2   : > { %5779 = vmatprep.mubr.msk.bf16.mxu1 %vm968_vm2, %v10054_v15 }
 0x8c3   : > { %v3253_v26 = vadd.f32 %v6325_v22, %v3252_v30 }
 0x8c5   : > { %v3254_v46 = vrot.slane %v3253_v26, 4 }
 0x8c7   : > { %v3255_v20 = vadd.f32 %v3254_v46, %v3253_v26 }
 0x8c9   : > { %5780 = vmatmul.mubr.msk.bf16.gmra.mrb[108].mxu1 %vm968_vm2, %v10055_v61  ;;  %v3256_v31 = vrot.slane %v3255_v20, 2 }
 0x8ca   : > { %5783 = vmatprep.mubr.msk.bf16.mxu1 %vm968_vm2, %v10056_v17 }
 0x8cb   : > { %v3257_v54 = vadd.f32 %v3256_v31, %v3255_v20 }
 0x8cd   : > { %v3258_v56 = vrot.slane %v3257_v54, 1 }
 0x8cf   : > { %v3259_v6 = vadd.f32 %v3258_v56, %v3257_v54 }
 0x8d1   : > { %5784 = vmatmul.mubr.msk.bf16.gmra.mrb[112].mxu1 %vm968_vm2, %v7686_v19  ;;  %v8815_v19 = vpop.trf.xlu1  ;;  %6326 = vrcp.f32 %v3259_v6 }
 0x8d2   : > { %5787 = vmatprep.mubr.msk.bf16.mxu1 %vm968_vm2, %v10057_v39 }
 0x8d5   : > { %v8821_v2 = vpop.trf.xlu1 }
 0x8d9   : > { %5788 = vmatmul.mubr.msk.bf16.gmra.mrb[116].mxu1 %vm968_vm2, %v10058_v25  ;;  %v8823_v24 = vpop.permute.xlu1 %706 }
 0x8da   : > { %5791 = vmatprep.mubr.msk.bf16.mxu1 %vm968_vm2, %v10059_v53  ;;  %v925_v16 = vadd.f32 %v10066_v11, %v8823_v24 }
 0x8db   : > { %v6327_v36 = vpop.eup %6326 }
 0x8dc   : > { %v3799_v50 = vpack.c.bf16 %v925_v16, %v925_v16 }
 0x8e1   : > { %5792 = vmatmul.mubr.msk.bf16.gmra.mrb[120].mxu1 %vm968_vm2, %v10060_v51 }
 0x8e2   : > { %5795 = vmatprep.mubr.msk.bf16.mxu1 %vm968_vm2, %v10061_v7 }
 0x8e9   : > { %5796 = vmatmul.mubr.msk.bf16.gmra.mrb[124].mxu1 %vm968_vm2, %v10062_v59 }
 0x8ea   : > { %5799 = vmatprep.mubr.msk.bf16.mxu1 %vm968_vm2, %v10063_v8 }
 0x8f1   : > { %5800 = vmatmul.mubr.msk.bf16.gmra.mrb[128].mxu1 %vm968_vm2, %v10064_v57 }
 0x8f2   : > { %5803 = vmatprep.mubr.msk.bf16.mxu1 %vm968_vm2, %v10065_v1 }
 0x8f9   : > { %5804 = vmatmul.mubr.msk.bf16.gmra.mrb[132].mxu1 %vm968_vm2, %v10067_v32 }
 0x8fa   : > { %4262 = vmatprep.mubr.bf16.mxu1 %v3799_v50 }
 0x98c   : > { %v5456_v34 = vpop.f32.mrb[100].mxu1 }
 0x98d   : > { %v5457_v33 = vpop.f32.mrb[101].mxu1 }
 0x98e   : > { %v5458_v22 = vadd.f32 %v5457_v33, %v5456_v34  ;;  %v5459_v35 = vpop.f32.mrb[102].mxu1 }
 0x98f   : > { %v5460_v58 = vpop.f32.mrb[103].mxu1 }
 0x990   : > { %v8833_v28 = vmul.f32 %v6327_v36, %v5458_v22 }
 0x994   : > { %v8835_v29 = vpop.f32.mrb[104].mxu1 }
 0x995   : > { %v8837_v45 = vpop.f32.mrb[105].mxu1 }
 0x996   : > { %v8839_v41 = vpop.f32.mrb[106].mxu1 }
 0x997   : > { %v8841_v63 = vpop.f32.mrb[107].mxu1 }
 0x99c   : > { %v8843_v4 = vpop.f32.mrb[108].mxu1 }
 0x99d   : > { %v3569_v13 = vmax.f32 %v8835_v29, %v8843_v4  ;;  %v8847_v10 = vpop.f32.mrb[109].mxu1 }
 0x99e   : > { %v3567_v47 = vmax.f32 %v8837_v45, %v8847_v10  ;;  %v8851_v9 = vpop.f32.mrb[110].mxu1 }
 0x99f   : > { %v3570_v5 = vmax.f32 %v8839_v41, %v8851_v9  ;;  %v8855_v60 = vpop.f32.mrb[111].mxu1 }
 0x9a0   : > { %v3568_v48 = vmax.f32 %v8841_v63, %v8855_v60 }
 0x9a4   : > { %v8859_v52 = vpop.f32.mrb[112].mxu1 }
 0x9a5   : > { %v3573_v44 = vmax.f32 %v3569_v13, %v8859_v52  ;;  %v8862_v62 = vpop.f32.mrb[113].mxu1 }
 0x9a6   : > { %v3571_v3 = vmax.f32 %v3567_v47, %v8862_v62  ;;  %v8865_v12 = vpop.f32.mrb[114].mxu1 }
 0x9a7   : > { %v3574_v21 = vmax.f32 %v3570_v5, %v8865_v12  ;;  %v8868_v30 = vpop.f32.mrb[115].mxu1 }
 0x9a8   : > { %v3572_v49 = vmax.f32 %v3568_v48, %v8868_v30 }
 0x9ac   : > { %v8871_v15 = vpop.f32.mrb[116].mxu1 }
 0x9ad   : > { %v3577_v26 = vmax.f32 %v3573_v44, %v8871_v15  ;;  %v8874_v61 = vpop.f32.mrb[117].mxu1 }
 0x9ae   : > { %v3575_v17 = vmax.f32 %v3571_v3, %v8874_v61  ;;  %v8877_v39 = vpop.f32.mrb[118].mxu1 }
 0x9af   : > { %v3578_v25 = vmax.f32 %v3574_v21, %v8877_v39  ;;  %v8880_v53 = vpop.f32.mrb[119].mxu1 }
 0x9b0   : > { %v3576_v51 = vmax.f32 %v3572_v49, %v8880_v53 }
 0x9b4   : > { %v8883_v7 = vpop.f32.mrb[120].mxu1 }
 0x9b5   : > { %v3581_v59 = vmax.f32 %v3577_v26, %v8883_v7  ;;  %v8886_v8 = vpop.f32.mrb[121].mxu1 }
 0x9b6   : > { %v3579_v57 = vmax.f32 %v3575_v17, %v8886_v8  ;;  %v8889_v1 = vpop.f32.mrb[122].mxu1 }
 0x9b7   : > { %v3582_v11 = vmax.f32 %v3578_v25, %v8889_v1  ;;  %v8892_v16 = vpop.f32.mrb[123].mxu1 }
 0x9b8   : > { %v3580_v50 = vmax.f32 %v3576_v51, %v8892_v16 }
 0x9bc   : > { %v8895_v32 = vpop.f32.mrb[124].mxu1 }
 0x9bd   : > { %v3585_v46 = vmax.f32 %v3581_v59, %v8895_v32  ;;  %v8898_v20 = vpop.f32.mrb[125].mxu1 }
 0x9be   : > { %v3583_v31 = vmax.f32 %v3579_v57, %v8898_v20  ;;  %v8901_v54 = vpop.f32.mrb[126].mxu1 }
 0x9bf   : > { %v3586_v56 = vmax.f32 %v3582_v11, %v8901_v54  ;;  %v8904_v6 = vpop.f32.mrb[127].mxu1 }
 0x9c0   : > { %v3584_v34 = vmax.f32 %v3580_v50, %v8904_v6 }
 0x9c4   : > { %v8907_v33 = vpop.f32.mrb[128].mxu1 }
 0x9c5   : > { %v3589_v22 = vmax.f32 %v3585_v46, %v8907_v33  ;;  %v8910_v35 = vpop.f32.mrb[129].mxu1 }
 0x9c6   : > { %v3587_v36 = vmax.f32 %v3583_v31, %v8910_v35  ;;  %v8913_v58 = vpop.f32.mrb[130].mxu1 }
 0x9c7   : > { %v3590_v13 = vmax.f32 %v3586_v56, %v8913_v58  ;;  %v8916_v47 = vpop.f32.mrb[131].mxu1 }
 0x9c8   : > { %v3588_v5 = vmax.f32 %v3584_v34, %v8916_v47 }
 0x9cc   : > { %v8919_v48 = vpop.f32.mrb[132].mxu1 }
 0x9cd   : > { %v3593_v44 = vmax.f32 %v3589_v22, %v8919_v48  ;;  %v8922_v3 = vpop.f32.mrb[133].mxu1 }
 0x9ce   : > { %v3591_v21 = vmax.f32 %v3587_v36, %v8922_v3  ;;  %v8925_v49 = vpop.f32.mrb[134].mxu1 }
 0x9cf   : > { %v3594_v26 = vmax.f32 %v3590_v13, %v8925_v49  ;;  %v8928_v17 = vpop.f32.mrb[135].mxu1 }
 0x9d0   : > { %v3592_v25 = vmax.f32 %v3588_v5, %v8928_v17 }
 0x9d1   : > { %v3596_v51 = vmax.f32 %v3593_v44, %v3594_v26 }
 0x9d2   : > { %v3595_v59 = vmax.f32 %v3591_v21, %v3592_v25 }
 0x9d4   : > { %v3597_v57 = vmax.f32 %v3595_v59, %v3596_v51 }
 0x9d6   : > { %v3598_v11 = vrot.slane %v3597_v57, 4 }
 0x9d8   : > { %v3599_v50 = vmax.f32 %v3597_v57, %v3598_v11 }
 0x9da   : > { %v3600_v46 = vrot.slane %v3599_v50, 2 }
 0x9dc   : > { %v3601_v31 = vmax.f32 %v3599_v50, %v3600_v46 }
 0x9de   : > { %v3602_v56 = vrot.slane %v3601_v31, 1 }
 0x9e0   : > { %v8931_v34 = vmax.f32 %v3601_v31, %v3602_v56 }
 0x9e2   : > { %v3604_v22 = vsub.f32 %v8837_v45, %v8931_v34  ;;  %v3605_v36 = vsub.f32 %v8841_v63, %v8931_v34  ;;  %v3606_v13 = vsub.f32 %v8835_v29, %v8931_v34  ;;  %v3607_v5 = vsub.f32 %v8839_v41, %v8931_v34 }
 0x9e3   : > { %v3608_v44 = vsub.f32 %v8847_v10, %v8931_v34  ;;  %v3609_v21 = vsub.f32 %v8855_v60, %v8931_v34  ;;  %v3610_v26 = vsub.f32 %v8843_v4, %v8931_v34  ;;  %v3611_v45 = vsub.f32 %v8851_v9, %v8931_v34 }
 0x9e4   : > { %v3612_v63 = vsub.f32 %v8862_v62, %v8931_v34  ;;  %v3613_v29 = vsub.f32 %v8868_v30, %v8931_v34  ;;  %v3614_v41 = vsub.f32 %v8859_v52, %v8931_v34  ;;  %v3615_v10 = vsub.f32 %v8865_v12, %v8931_v34 }
 0x9e5   : > { %v3616_v60 = vsub.f32 %v8874_v61, %v8931_v34  ;;  %v3617_v4 = vsub.f32 %v8880_v53, %v8931_v34  ;;  %v3618_v9 = vsub.f32 %v8871_v15, %v8931_v34  ;;  %v3619_v62 = vsub.f32 %v8877_v39, %v8931_v34 }
 0x9e6   : > { %v3620_v30 = vsub.f32 %v8886_v8, %v8931_v34  ;;  %v3621_v52 = vsub.f32 %v8892_v16, %v8931_v34  ;;  %v3622_v12 = vsub.f32 %v8883_v7, %v8931_v34  ;;  %v3623_v61 = vsub.f32 %v8889_v1, %v8931_v34 }
 0x9e7   : > { %v3624_v53 = vsub.f32 %v8898_v20, %v8931_v34  ;;  %v3625_v15 = vsub.f32 %v8904_v6, %v8931_v34  ;;  %v3626_v39 = vsub.f32 %v8895_v32, %v8931_v34  ;;  %v3627_v8 = vsub.f32 %v8901_v54, %v8931_v34 }
 0x9e8   : > { %v3628_v16 = vsub.f32 %v8910_v35, %v8931_v34  ;;  %v3636_v11 = vmul.f32 1.442695, %v3604_v22  ;;  %v3638_v50 = vmul.f32 1.442695, %v3605_v36  ;;  %v3640_v46 = vmul.f32 1.442695, %v3606_v13 }
 0x9e9   : > { %v3642_v31 = vmul.f32 1.442695, %v3607_v5  ;;  %v3644_v56 = vmul.f32 1.442695, %v3608_v44  ;;  %v3646_v20 = vmul.f32 1.442695, %v3609_v21 }
 0x9ea   : > { %6328 = vpow2.f32 %v3636_v11  ;;  %v3648_v1 = vmul.f32 1.442695, %v3610_v26  ;;  %v3650_v25 = vmul.f32 1.442695, %v3611_v45  ;;  %v3652_v51 = vmul.f32 1.442695, %v3612_v63 }
 0x9eb   : > { %6330 = vpow2.f32 %v3638_v50  ;;  %v3654_v7 = vmul.f32 1.442695, %v3613_v29  ;;  %v3656_v59 = vmul.f32 1.442695, %v3614_v41  ;;  %v3658_v57 = vmul.f32 1.442695, %v3615_v10 }
 0x9ec   : > { %6332 = vpow2.f32 %v3640_v46  ;;  %v3660_v22 = vmul.f32 1.442695, %v3616_v60  ;;  %v3662_v36 = vmul.f32 1.442695, %v3617_v4  ;;  %v3664_v5 = vmul.f32 1.442695, %v3618_v9 }
 0x9ed   : > { %6334 = vpow2.f32 %v3642_v31  ;;  %v3666_v21 = vmul.f32 1.442695, %v3619_v62  ;;  %v3668_v45 = vmul.f32 1.442695, %v3620_v30  ;;  %v3670_v10 = vmul.f32 1.442695, %v3621_v52 }
 0x9ee   : > { %6336 = vpow2.f32 %v3644_v56  ;;  %v3672_v4 = vmul.f32 1.442695, %v3622_v12  ;;  %v3678_v12 = vmul.f32 1.442695, %v3625_v15  ;;  %v3682_v6 = vmul.f32 1.442695, %v3627_v8 }
 0x9ef   : > { %6338 = vpow2.f32 %v3646_v20  ;;  %v3676_v20 = vmul.f32 1.442695, %v3624_v53  ;;  %v3684_v32 = vmul.f32 1.442695, %v3628_v16  ;;  %v10068_v31 = vsub.f32 %v8916_v47, %v8931_v34 }
 0x9f0   : > { %6340 = vpow2.f32 %v3648_v1  ;;  %v10069_v56 = vsub.f32 %v8907_v33, %v8931_v34 }
 0x9f1   : > { %6342 = vpow2.f32 %v3650_v25  ;;  %v3686_v54 = vmul.f32 1.442695, %v10068_v31 }
 0x9f2   : > { %6344 = vpow2.f32 %v3652_v51  ;;  %v3688_v35 = vmul.f32 1.442695, %v10069_v56 }
 0x9f3   : > { %6346 = vpow2.f32 %v3654_v7  ;;  %v3674_v7 = vmul.f32 1.442695, %v3623_v61  ;;  %v3680_v61 = vmul.f32 1.442695, %v3626_v39 }
 0x9f4   : > { %v8997_v13 = vpop.eup %6328  ;;  %6348 = vpow2.f32 %v3656_v59 }
 0x9f5   : > { %v8999_v44 = vpop.eup %6330  ;;  %6350 = vpow2.f32 %v3658_v57 }
 0x9f6   : > { %v9001_v26 = vpop.eup %6332  ;;  %6352 = vpow2.f32 %v3660_v22  ;;  %v3700_v63 = vadd.f32 %v8999_v44, %v8997_v13  ;;  %v3737_v29 = vpack.c.bf16 %v8999_v44, %v8997_v13 }
 0x9f7   : > { %v9007_v41 = vpop.eup %6334  ;;  %6354 = vpow2.f32 %v3662_v36 }
 0x9f8   : > { %v9009_v60 = vpop.eup %6336  ;;  %6356 = vpow2.f32 %v3664_v5  ;;  %v3701_v9 = vadd.f32 %v9001_v26, %v3700_v63  ;;  %v3738_v62 = vpack.c.bf16 %v9007_v41, %v9001_v26  ;;  %v10070_v5 = vsub.f32 %v8913_v58, %v8931_v34 }
 0x9f9   : > { %v9014_v30 = vpop.eup %6338  ;;  %6358 = vpow2.f32 %v3666_v21 }
 0x9fa   : > { %v9016_v1 = vpop.eup %6340  ;;  %6360 = vpow2.f32 %v3668_v45  ;;  %v3702_v25 = vadd.f32 %v9007_v41, %v3701_v9  ;;  %v3739_v52 = vpack.c.bf16 %v9014_v30, %v9009_v60  ;;  %v3690_v47 = vmul.f32 1.442695, %v10070_v5 }
 0x9fb   : > { %v9021_v51 = vpop.eup %6342  ;;  %6362 = vpow2.f32 %v3670_v10  ;;  %v10071_v45 = vsub.f32 %v8922_v3, %v8931_v34  ;;  %v10072_v9 = vsub.f32 %v8928_v17, %v8931_v34 }
 0x9fc   : > { %v9026_v59 = vpop.eup %6344  ;;  %6364 = vpow2.f32 %v3672_v4  ;;  %v3703_v53 = vadd.f32 %v9009_v60, %v3702_v25  ;;  %v3740_v57 = vpack.c.bf16 %v9021_v51, %v9016_v1 }
 0x9fd   : > { %v9034_v11 = vpop.eup %6346  ;;  %6366 = vpow2.f32 %v3674_v7  ;;  %v3692_v33 = vmul.f32 1.442695, %v10071_v45  ;;  %v3694_v58 = vmul.f32 1.442695, %v10072_v9 }
 0x9fe   : > { %v9039_v15 = vpop.eup %6348  ;;  %6368 = vpow2.f32 %v3676_v20  ;;  %v3704_v39 = vadd.f32 %v9014_v30, %v3703_v53  ;;  %v3741_v50 = vpack.c.bf16 %v9034_v11, %v9026_v59  ;;  %v10073_v20 = vsub.f32 %v8919_v48, %v8931_v34 }
 0x9ff   : > { %v9047_v46 = vpop.eup %6350  ;;  %6370 = vpow2.f32 %v3678_v12  ;;  %v10074_v53 = vsub.f32 %v8925_v49, %v8931_v34 }
 0xa00   : > { %v9052_v8 = vpop.eup %6352  ;;  %6372 = vpow2.f32 %v3680_v61  ;;  %v3705_v16 = vadd.f32 %v9016_v1, %v3704_v39  ;;  %v3742_v22 = vpack.c.bf16 %v9047_v46, %v9039_v15  ;;  %v3696_v25 = vmul.f32 1.442695, %v10073_v20 }
 0xa01   : > { %v9060_v36 = vpop.eup %6354  ;;  %6374 = vpow2.f32 %v3682_v6  ;;  %v3698_v6 = vmul.f32 1.442695, %v10074_v53 }
 0xa02   : > { %v9065_v21 = vpop.eup %6356  ;;  %6376 = vpow2.f32 %v3684_v32  ;;  %v3706_v63 = vadd.f32 %v9021_v51, %v3705_v16  ;;  %v3743_v10 = vpack.c.bf16 %v9060_v36, %v9052_v8 }
 0xa03   : > { %v9073_v4 = vpop.eup %6358  ;;  %6378 = vpow2.f32 %v3686_v54 }
 0xa04   : > { %v6361_v7 = vpop.eup %6360  ;;  %6380 = vpow2.f32 %v3688_v35  ;;  %v3707_v3 = vadd.f32 %v9026_v59, %v3706_v63  ;;  %v3744_v12 = vpack.c.bf16 %v9073_v4, %v9065_v21 }
 0xa05   : > { %v6363_v61 = vpop.eup %6362  ;;  %6382 = vpow2.f32 %v3690_v47 }
 0xa06   : > { %v6365_v32 = vpop.eup %6364  ;;  %6384 = vpow2.f32 %v3692_v33  ;;  %v3708_v17 = vadd.f32 %v9034_v11, %v3707_v3  ;;  %v3745_v39 = vpack.c.bf16 %v6363_v61, %v6361_v7 }
 0xa07   : > { %v6367_v31 = vpop.eup %6366  ;;  %6386 = vpow2.f32 %v3694_v58 }
 0xa08   : > { %v6369_v48 = vpop.eup %6368  ;;  %6388 = vpow2.f32 %v3696_v25  ;;  %v3709_v54 = vadd.f32 %v9039_v15, %v3708_v17  ;;  %5479 = vmatprep.subr.bf16.mxu0 %v3745_v39  ;;  %v3746_v56 = vpack.c.bf16 %v6367_v31, %v6365_v32  ;;  %v10076_v15 = vld [vmem:[#allocation18_spill] sm:$0xff] }
 0xa09   : > { %v6371_v35 = vpop.eup %6370  ;;  %6390 = vpow2.f32 %v3698_v6  ;;  %5480 = vmatpush3.bf16.msra.mxu0 %v3737_v29 }
 0xa0a   : > { %v6373_v49 = vpop.eup %6372  ;;  %v3710_v34 = vadd.f32 %v9047_v46, %v3709_v54  ;;  %5481 = vmatprep.subr.bf16.mxu0 %v3746_v56  ;;  %v3747_v16 = vpack.c.bf16 %v6371_v35, %v6369_v48  ;;  %v10082_v56 = vld [vmem:[#allocation23_spill] sm:$0xff] }
 0xa0b   : > { %v6375_v5 = vpop.eup %6374 }
 0xa0c   : > { %v6377_v47 = vpop.eup %6376  ;;  %v3711_v45 = vadd.f32 %v9052_v8, %v3710_v34  ;;  %v3748_v33 = vpack.c.bf16 %v6375_v5, %v6373_v49  ;;  %v10077_v8 = vld [vmem:[#allocation13_spill] sm:$0xff] }
 0xa0d   : > { %v6379_v63 = vpop.eup %6378  ;;  %5482 = vmatpush3.bf16.msra.mxu0 %v3738_v62 }
 0xa0e   : > { %v6381_v9 = vpop.eup %6380  ;;  %v3712_v58 = vadd.f32 %v9060_v36, %v3711_v45  ;;  %5483 = vmatprep.subr.bf16.mxu0 %v3747_v16  ;;  %v3749_v13 = vpack.c.bf16 %v6379_v63, %v6377_v47 }
 0xa0f   : > { %v6383_v44 = vpop.eup %6382 }
 0xa10   : > { %v6385_v29 = vpop.eup %6384  ;;  %v3713_v20 = vadd.f32 %v9065_v21, %v3712_v58  ;;  %v3750_v25 = vpack.c.bf16 %v6383_v44, %v6381_v9  ;;  %v10078_v21 = vld [vmem:[#allocation14_spill] sm:$0xff] }
 0xa11   : > { %v6387_v3 = vpop.eup %6386  ;;  %5484 = vmatpush3.bf16.msra.mxu0 %v3739_v52 }
 0xa12   : > { %v6389_v53 = vpop.eup %6388  ;;  %v3714_v6 = vadd.f32 %v9073_v4, %v3713_v20  ;;  %5485 = vmatprep.subr.bf16.mxu0 %v3748_v33  ;;  %v3751_v26 = vpack.c.bf16 %v6387_v3, %v6385_v29  ;;  %v10079_v4 = vld [vmem:[#allocation19_spill] sm:$0xff] }
 0xa13   : > { %v6391_v41 = vpop.eup %6390 }
 0xa14   : > { %v3715_v62 = vadd.f32 %v6361_v7, %v3714_v6  ;;  %v3752_v17 = vpack.c.bf16 %v6391_v41, %v6389_v53  ;;  %v10075_v7 = vld [vmem:[#allocation6_spill] sm:$0xff] }
 0xa15   : > { %5486 = vmatpush3.bf16.msra.mxu0 %v3740_v57  ;;  %v596_v1 = vadd.f32 %v10075_v7, %v8781_v42 }
 0xa16   : > { %v3716_v39 = vadd.f32 %v6363_v61, %v3715_v62  ;;  %5487 = vmatprep.subr.bf16.mxu0 %v3749_v13 }
 0xa17   : > { %v3795_v59 = vpack.c.bf16 %v596_v1, %v596_v1 }
 0xa18   : > { %v3717_v54 = vadd.f32 %v6365_v32, %v3716_v39 }
 0xa19   : > { %5488 = vmatpush3.bf16.msra.mxu0 %v3741_v50  ;;  %v3321_v50 = vpack.c.bf16 %v10076_v15, %v10076_v15  ;;  %v3881_v42 = vsel %vm1017_vm1, %v3795_v59, 0 }
 0xa1a   : > { %v3718_v60 = vadd.f32 %v6367_v31, %v3717_v54  ;;  %5489 = vmatprep.subr.bf16.mxu0 %v3750_v25  ;;  %v10080_v31 = vld [vmem:[#allocation20_spill] sm:$0xff] }
 0xa1c   : > { %v3719_v30 = vadd.f32 %v6369_v48, %v3718_v60  ;;  %v10081_v48 = vld [vmem:[#allocation21_spill] sm:$0xff] }
 0xa1d   : > { %5490 = vmatpush3.bf16.msra.mxu0 %v3742_v22 }
 0xa1e   : > { %v3720_v52 = vadd.f32 %v6371_v35, %v3719_v30  ;;  %5491 = vmatprep.subr.bf16.mxu0 %v3751_v26  ;;  %v10083_v35 = vld [vmem:[#allocation26_spill] sm:$0xff] }
 0xa20   : > { %v3721_v51 = vadd.f32 %v6373_v49, %v3720_v52  ;;  %v10084_v49 = vld [vmem:[#allocation28_spill] sm:$0xff] }
 0xa21   : > { %5492 = vmatpush3.bf16.msra.mxu0 %v3743_v10 }
 0xa22   : > { %v3722_v57 = vadd.f32 %v6375_v5, %v3721_v51  ;;  %5493 = vmatprep.subr.bf16.mxu0 %v3752_v17 }
 0xa24   : > { %v3723_v11 = vadd.f32 %v6377_v47, %v3722_v57 }
 0xa25   : > { %5494 = vmatpush3.bf16.msra.mxu0 %v3744_v12 }
 0xa26   : > { %v3724_v46 = vadd.f32 %v6379_v63, %v3723_v11  ;;  %5905 = vmatprep.subr.msk.bf16.mxu0 %vm1017_vm1, %v3795_v59 }
 0xa28   : > { %v3725_v22 = vadd.f32 %v6381_v9, %v3724_v46  ;;  %3786 = vmatmul.mubr.bf16.vlgmr.msra.gmra.mrb[116].mxu0 %v3321_v50 }
 0xa29   : > { %5808 = vmatpush3.bf16.msra.mxu0 %v3881_v42  ;;  %5809 = vmatprep.mubr.msk.bf16.mxu0 %vm968_vm2, %v10077_v8 }
 0xa2a   : > { %v3726_v36 = vadd.f32 %v6383_v44, %v3725_v22 }
 0xa2c   : > { %v3727_v10 = vadd.f32 %v6385_v29, %v3726_v36 }
 0xa2e   : > { %v3728_v61 = vadd.f32 %v6387_v3, %v3727_v10 }
 0xa30   : > { %v3729_v32 = vadd.f32 %v6389_v53, %v3728_v61  ;;  %5810 = vmatmul.mubr.msk.bf16.vlgmr.msra.gmra.mrb[120].mxu0 %vm968_vm2, %v10078_v21 }
 0xa31   : > { %5813 = vmatprep.mubr.msk.bf16.mxu0 %vm968_vm2, %v10079_v4 }
 0xa32   : > { %v3730_v12 = vadd.f32 %v6391_v41, %v3729_v32 }
 0xa38   : > { %5814 = vmatmul.mubr.msk.bf16.gmra.mrb[124].mxu0 %vm968_vm2, %v10080_v31 }
 0xa39   : > { %5817 = vmatprep.mubr.msk.bf16.mxu0 %vm968_vm2, %v10081_v48 }
 0xa40   : > { %5818 = vmatmul.mubr.msk.bf16.gmra.mrb[128].mxu0 %vm968_vm2, %v10082_v56 }
 0xa41   : > { %5821 = vmatprep.mubr.msk.bf16.mxu0 %vm968_vm2, %v10083_v35 }
 0xa48   : > { %5822 = vmatmul.mubr.msk.bf16.gmra.mrb[132].mxu0 %vm968_vm2, %v10084_v49 }
 0xa49   : > { %5825 = vmatprep.mubr.msk.bf16.mxu0 %vm968_vm2, %v8783_v37  ;;  %v10085_v37 = vld [vmem:[#allocation56_spill] sm:$0xff] }
 0xa4a   : > { %v929_v34 = vadd.f32 %v10085_v37, %v8096_v38 }
 0xa4c   : > { %v4276_v16 = vpack.c.bf16 %v929_v34, %v929_v34 }
 0xa50   : > { %5826 = vmatmul.mubr.msk.bf16.gmra.mrb[136].mxu0 %vm968_vm2, %v8789_v55  ;;  %v3731_v55 = vrot.slane %v3730_v12, 4 }
 0xa51   : > { %5829 = vmatprep.mubr.msk.bf16.mxu0 %vm968_vm2, %v8795_v43 }
 0xa52   : > { %v3732_v43 = vadd.f32 %v3731_v55, %v3730_v12 }
 0xa58   : > { %5830 = vmatmul.mubr.msk.bf16.gmra.mrb[140].mxu0 %vm968_vm2, %v8801_v14  ;;  %v3733_v14 = vrot.slane %v3732_v43, 2 }
 0xa59   : > { %5833 = vmatprep.mubr.msk.bf16.mxu0 %vm968_vm2, %v8803_v27 }
 0xa5a   : > { %v3734_v5 = vadd.f32 %v3733_v14, %v3732_v43 }
 0xa5c   : > { %v3735_v47 = vrot.slane %v3734_v5, 1 }
 0xa5e   : > { %v3736_v27 = vadd.f32 %v3735_v47, %v3734_v5 }
 0xa60   : > { %5834 = vmatmul.mubr.msk.bf16.gmra.mrb[144].mxu0 %vm968_vm2, %v8809_v40  ;;  %6392 = vrcp.f32 %v3736_v27 }
 0xa61   : > { %5837 = vmatprep.mubr.msk.bf16.mxu0 %vm968_vm2, %v8815_v19 }
 0xa68   : > { %5838 = vmatmul.mubr.msk.bf16.gmra.mrb[148].mxu0 %vm968_vm2, %v8821_v2 }
 0xa69   : > { %4739 = vmatprep.mubr.bf16.mxu0 %v4276_v16 }
 0xa6a   : > { %v6393_v19 = vpop.eup %6392 }
 0xafb   : > { %v5495_v45 = vpop.f32.mrb[116].mxu0 }
 0xafc   : > { %v5496_v40 = vpop.f32.mrb[117].mxu0 }
 0xafd   : > { %v5497_v33 = vadd.f32 %v5496_v40, %v5495_v45  ;;  %v5498_v63 = vpop.f32.mrb[118].mxu0 }
 0xafe   : > { %v5499_v9 = vpop.f32.mrb[119].mxu0 }
 0xaff   : > { %v3794_v58 = vmul.f32 %v6393_v19, %v5497_v33 }
 0xb01   : > { %v9159_v38 = vpack.c.bf16 %v3794_v58, %v8833_v28 }
 0xb03   : > { %v9161_v13 = vpop.f32.mrb[120].mxu0 }
 0xb04   : > { %v9163_v2 = vpop.f32.mrb[121].mxu0 }
 0xb05   : > { %v9165_v44 = vpop.f32.mrb[122].mxu0 }
 0xb06   : > { %v9167_v29 = vpop.f32.mrb[123].mxu0 }
 0xb0b   : > { %v9169_v20 = vpop.f32.mrb[124].mxu0 }
 0xb0c   : > { %v4046_v25 = vmax.f32 %v9161_v13, %v9169_v20  ;;  %v9173_v3 = vpop.f32.mrb[125].mxu0 }
 0xb0d   : > { %v4044_v53 = vmax.f32 %v9163_v2, %v9173_v3  ;;  %v9177_v28 = vpop.f32.mrb[126].mxu0 }
 0xb0e   : > { %v4047_v6 = vmax.f32 %v9165_v44, %v9177_v28  ;;  %v9181_v26 = vpop.f32.mrb[127].mxu0 }
 0xb0f   : > { %v4045_v41 = vmax.f32 %v9167_v29, %v9181_v26 }
 0xb13   : > { %v9185_v62 = vpop.f32.mrb[128].mxu0 }
 0xb14   : > { %v4050_v17 = vmax.f32 %v4046_v25, %v9185_v62  ;;  %v9188_v39 = vpop.f32.mrb[129].mxu0 }
 0xb15   : > { %v4048_v54 = vmax.f32 %v4044_v53, %v9188_v39  ;;  %v9191_v60 = vpop.f32.mrb[130].mxu0 }
 0xb16   : > { %v4051_v30 = vmax.f32 %v4047_v6, %v9191_v60  ;;  %v9194_v52 = vpop.f32.mrb[131].mxu0 }
 0xb17   : > { %v4049_v7 = vmax.f32 %v4045_v41, %v9194_v52 }
 0xb1b   : > { %v9197_v1 = vpop.f32.mrb[132].mxu0 }
 0xb1c   : > { %v4054_v51 = vmax.f32 %v4050_v17, %v9197_v1  ;;  %v9200_v57 = vpop.f32.mrb[133].mxu0 }
 0xb1d   : > { %v4052_v59 = vmax.f32 %v4048_v54, %v9200_v57  ;;  %v9203_v11 = vpop.f32.mrb[134].mxu0 }
 0xb1e   : > { %v4055_v15 = vmax.f32 %v4051_v30, %v9203_v11  ;;  %v9206_v50 = vpop.f32.mrb[135].mxu0 }
 0xb1f   : > { %v4053_v46 = vmax.f32 %v4049_v7, %v9206_v50 }
 0xb23   : > { %v9209_v42 = vpop.f32.mrb[136].mxu0 }
 0xb24   : > { %v4058_v22 = vmax.f32 %v4054_v51, %v9209_v42  ;;  %v9212_v8 = vpop.f32.mrb[137].mxu0 }
 0xb25   : > { %v4056_v36 = vmax.f32 %v4052_v59, %v9212_v8  ;;  %v9215_v10 = vpop.f32.mrb[138].mxu0 }
 0xb26   : > { %v4059_v61 = vmax.f32 %v4055_v15, %v9215_v10  ;;  %v9218_v32 = vpop.f32.mrb[139].mxu0 }
 0xb27   : > { %v4057_v21 = vmax.f32 %v4053_v46, %v9218_v32 }
 0xb2b   : > { %v9221_v4 = vpop.f32.mrb[140].mxu0 }
 0xb2c   : > { %v4062_v12 = vmax.f32 %v4058_v22, %v9221_v4  ;;  %v9224_v31 = vpop.f32.mrb[141].mxu0 }
 0xb2d   : > { %v4060_v48 = vmax.f32 %v4056_v36, %v9224_v31  ;;  %v9227_v56 = vpop.f32.mrb[142].mxu0 }
 0xb2e   : > { %v4063_v35 = vmax.f32 %v4059_v61, %v9227_v56  ;;  %v9230_v49 = vpop.f32.mrb[143].mxu0 }
 0xb2f   : > { %v4061_v37 = vmax.f32 %v4057_v21, %v9230_v49 }
 0xb33   : > { %v9233_v34 = vpop.f32.mrb[144].mxu0 }
 0xb34   : > { %v4066_v16 = vmax.f32 %v4062_v12, %v9233_v34  ;;  %v9236_v55 = vpop.f32.mrb[145].mxu0 }
 0xb35   : > { %v4064_v43 = vmax.f32 %v4060_v48, %v9236_v55  ;;  %v9239_v14 = vpop.f32.mrb[146].mxu0 }
 0xb36   : > { %v4067_v5 = vmax.f32 %v4063_v35, %v9239_v14  ;;  %v9242_v47 = vpop.f32.mrb[147].mxu0 }
 0xb37   : > { %v4065_v27 = vmax.f32 %v4061_v37, %v9242_v47 }
 0xb3b   : > { %v9245_v45 = vpop.f32.mrb[148].mxu0 }
 0xb3c   : > { %v4070_v40 = vmax.f32 %v4066_v16, %v9245_v45  ;;  %v9248_v33 = vpop.f32.mrb[149].mxu0 }
 0xb3d   : > { %v4068_v63 = vmax.f32 %v4064_v43, %v9248_v33  ;;  %v9251_v19 = vpop.f32.mrb[150].mxu0 }
 0xb3e   : > { %v4071_v9 = vmax.f32 %v4067_v5, %v9251_v19  ;;  %v9254_v58 = vpop.f32.mrb[151].mxu0 }
 0xb3f   : > { %v4069_v25 = vmax.f32 %v4065_v27, %v9254_v58 }
 0xb40   : > { %v4073_v53 = vmax.f32 %v4070_v40, %v4071_v9 }
 0xb41   : > { %v4072_v6 = vmax.f32 %v4068_v63, %v4069_v25 }
 0xb43   : > { %v4074_v41 = vmax.f32 %v4072_v6, %v4073_v53 }
 0xb45   : > { %v4075_v17 = vrot.slane %v4074_v41, 4 }
 0xb47   : > { %v4076_v54 = vmax.f32 %v4074_v41, %v4075_v17 }
 0xb49   : > { %v4077_v30 = vrot.slane %v4076_v54, 2 }
 0xb4b   : > { %v4078_v7 = vmax.f32 %v4076_v54, %v4077_v30 }
 0xb4d   : > { %v4079_v51 = vrot.slane %v4078_v7, 1 }
 0xb4f   : > { %v9257_v59 = vmax.f32 %v4078_v7, %v4079_v51 }
 0xb51   : > { %v4081_v15 = vsub.f32 %v9163_v2, %v9257_v59  ;;  %v4082_v46 = vsub.f32 %v9167_v29, %v9257_v59  ;;  %v4083_v22 = vsub.f32 %v9161_v13, %v9257_v59  ;;  %v4084_v36 = vsub.f32 %v9165_v44, %v9257_v59 }
 0xb52   : > { %v4085_v61 = vsub.f32 %v9173_v3, %v9257_v59  ;;  %v4086_v21 = vsub.f32 %v9181_v26, %v9257_v59  ;;  %v4087_v12 = vsub.f32 %v9169_v20, %v9257_v59  ;;  %v4088_v2 = vsub.f32 %v9177_v28, %v9257_v59 }
 0xb53   : > { %v4089_v29 = vsub.f32 %v9188_v39, %v9257_v59  ;;  %v4090_v13 = vsub.f32 %v9194_v52, %v9257_v59  ;;  %v4091_v44 = vsub.f32 %v9185_v62, %v9257_v59  ;;  %v4092_v3 = vsub.f32 %v9191_v60, %v9257_v59 }
 0xb54   : > { %v4093_v26 = vsub.f32 %v9200_v57, %v9257_v59  ;;  %v4094_v20 = vsub.f32 %v9206_v50, %v9257_v59  ;;  %v4095_v28 = vsub.f32 %v9197_v1, %v9257_v59  ;;  %v4096_v39 = vsub.f32 %v9203_v11, %v9257_v59 }
 0xb55   : > { %v4097_v52 = vsub.f32 %v9212_v8, %v9257_v59  ;;  %v4098_v62 = vsub.f32 %v9218_v32, %v9257_v59  ;;  %v4099_v60 = vsub.f32 %v9209_v42, %v9257_v59  ;;  %v4100_v57 = vsub.f32 %v9215_v10, %v9257_v59 }
 0xb56   : > { %v4101_v50 = vsub.f32 %v9224_v31, %v9257_v59  ;;  %v4102_v1 = vsub.f32 %v9230_v49, %v9257_v59  ;;  %v4103_v11 = vsub.f32 %v9221_v4, %v9257_v59  ;;  %v4104_v8 = vsub.f32 %v9227_v56, %v9257_v59 }
 0xb57   : > { %v4105_v32 = vsub.f32 %v9236_v55, %v9257_v59  ;;  %v4106_v42 = vsub.f32 %v9242_v47, %v9257_v59  ;;  %v4107_v10 = vsub.f32 %v9233_v34, %v9257_v59  ;;  %v4108_v31 = vsub.f32 %v9239_v14, %v9257_v59 }
 0xb58   : > { %v4109_v48 = vsub.f32 %v9248_v33, %v9257_v59  ;;  %v4110_v35 = vsub.f32 %v9254_v58, %v9257_v59  ;;  %v4111_v37 = vsub.f32 %v9245_v45, %v9257_v59  ;;  %v4112_v16 = vsub.f32 %v9251_v19, %v9257_v59 }
 0xb59   : > { %v4113_v43 = vmul.f32 1.442695, %v4081_v15  ;;  %v4115_v5 = vmul.f32 1.442695, %v4082_v46  ;;  %v4117_v27 = vmul.f32 1.442695, %v4083_v22 }
 0xb5a   : > { %v4119_v40 = vmul.f32 1.442695, %v4084_v36  ;;  %v4121_v63 = vmul.f32 1.442695, %v4085_v61  ;;  %v4123_v9 = vmul.f32 1.442695, %v4086_v21 }
 0xb5b   : > { %6394 = vpow2.f32 %v4113_v43  ;;  %v4125_v25 = vmul.f32 1.442695, %v4087_v12  ;;  %v4127_v53 = vmul.f32 1.442695, %v4088_v2  ;;  %v4129_v6 = vmul.f32 1.442695, %v4089_v29 }
 0xb5c   : > { %6396 = vpow2.f32 %v4115_v5  ;;  %v4131_v41 = vmul.f32 1.442695, %v4090_v13  ;;  %v4133_v17 = vmul.f32 1.442695, %v4091_v44  ;;  %v4135_v54 = vmul.f32 1.442695, %v4092_v3 }
 0xb5d   : > { %6398 = vpow2.f32 %v4117_v27  ;;  %v4137_v30 = vmul.f32 1.442695, %v4093_v26  ;;  %v4139_v7 = vmul.f32 1.442695, %v4094_v20  ;;  %v4141_v15 = vmul.f32 1.442695, %v4095_v28 }
 0xb5e   : > { %6400 = vpow2.f32 %v4119_v40  ;;  %v4143_v22 = vmul.f32 1.442695, %v4096_v39  ;;  %v4145_v61 = vmul.f32 1.442695, %v4097_v52  ;;  %v4147_v29 = vmul.f32 1.442695, %v4098_v62 }
 0xb5f   : > { %6402 = vpow2.f32 %v4121_v63  ;;  %v4149_v44 = vmul.f32 1.442695, %v4099_v60  ;;  %v4151_v28 = vmul.f32 1.442695, %v4100_v57  ;;  %v4153_v52 = vmul.f32 1.442695, %v4101_v50 }
 0xb60   : > { %6404 = vpow2.f32 %v4123_v9  ;;  %v4155_v60 = vmul.f32 1.442695, %v4102_v1  ;;  %v4157_v57 = vmul.f32 1.442695, %v4103_v11  ;;  %v4159_v49 = vmul.f32 1.442695, %v4104_v8 }
 0xb61   : > { %6406 = vpow2.f32 %v4125_v25  ;;  %v4161_v4 = vmul.f32 1.442695, %v4105_v32  ;;  %v4163_v56 = vmul.f32 1.442695, %v4106_v42  ;;  %v4165_v55 = vmul.f32 1.442695, %v4107_v10 }
 0xb62   : > { %6408 = vpow2.f32 %v4127_v53  ;;  %v4167_v47 = vmul.f32 1.442695, %v4108_v31  ;;  %v4169_v34 = vmul.f32 1.442695, %v4109_v48  ;;  %v4171_v14 = vmul.f32 1.442695, %v4110_v35 }
 0xb63   : > { %6410 = vpow2.f32 %v4129_v6 }
 0xb64   : > { %6412 = vpow2.f32 %v4131_v41 }
 0xb65   : > { %v9323_v51 = vpop.eup %6394  ;;  %6414 = vpow2.f32 %v4133_v17 }
 0xb66   : > { %v9325_v46 = vpop.eup %6396  ;;  %6416 = vpow2.f32 %v4135_v54  ;;  %v4173_v54 = vmul.f32 1.442695, %v4111_v37 }
 0xb67   : > { %v9327_v36 = vpop.eup %6398  ;;  %6418 = vpow2.f32 %v4137_v30  ;;  %v4177_v21 = vadd.f32 %v9325_v46, %v9323_v51  ;;  %v4214_v12 = vpack.c.bf16 %v9325_v46, %v9323_v51 }
 0xb68   : > { %v9333_v2 = vpop.eup %6400  ;;  %6420 = vpow2.f32 %v4139_v7  ;;  %v4175_v7 = vmul.f32 1.442695, %v4112_v16 }
 0xb69   : > { %v9335_v13 = vpop.eup %6402  ;;  %6422 = vpow2.f32 %v4141_v15  ;;  %v4178_v3 = vadd.f32 %v9327_v36, %v4177_v21  ;;  %v4215_v26 = vpack.c.bf16 %v9333_v2, %v9327_v36 }
 0xb6a   : > { %v9340_v20 = vpop.eup %6404  ;;  %6424 = vpow2.f32 %v4143_v22 }
 0xb6b   : > { %v9342_v39 = vpop.eup %6406  ;;  %6426 = vpow2.f32 %v4145_v61  ;;  %v4179_v43 = vadd.f32 %v9333_v2, %v4178_v3  ;;  %v4216_v62 = vpack.c.bf16 %v9340_v20, %v9335_v13 }
 0xb6c   : > { %v9347_v5 = vpop.eup %6408  ;;  %6428 = vpow2.f32 %v4147_v29 }
 0xb6d   : > { %v9352_v27 = vpop.eup %6410  ;;  %6430 = vpow2.f32 %v4149_v44  ;;  %v4180_v50 = vadd.f32 %v9335_v13, %v4179_v43  ;;  %v4217_v40 = vpack.c.bf16 %v9347_v5, %v9342_v39 }
 0xb6e   : > { %v9360_v63 = vpop.eup %6412  ;;  %6432 = vpow2.f32 %v4151_v28 }
 0xb6f   : > { %v9365_v1 = vpop.eup %6414  ;;  %6434 = vpow2.f32 %v4153_v52  ;;  %v4181_v11 = vadd.f32 %v9340_v20, %v4180_v50  ;;  %v4218_v9 = vpack.c.bf16 %v9360_v63, %v9352_v27  ;;  %v4285_v20 = vpop.trf.xlu1 }
 0xb70   : > { %v9373_v25 = vpop.eup %6416  ;;  %6436 = vpow2.f32 %v4155_v60 }
 0xb71   : > { %v9378_v8 = vpop.eup %6418  ;;  %6438 = vpow2.f32 %v4157_v57  ;;  %v4182_v32 = vadd.f32 %v9342_v39, %v4181_v11  ;;  %v4219_v53 = vpack.c.bf16 %v9373_v25, %v9365_v1  ;;  %v10086_v39 = vld [vmem:[#allocation8_spill] sm:$0xff] }
 0xb72   : > { %v9386_v6 = vpop.eup %6420  ;;  %6440 = vpow2.f32 %v4159_v49 }
 0xb73   : > { %v9391_v42 = vpop.eup %6422  ;;  %6442 = vpow2.f32 %v4161_v4  ;;  %v4183_v10 = vadd.f32 %v9347_v5, %v4182_v32  ;;  %v4220_v41 = vpack.c.bf16 %v9386_v6, %v9378_v8  ;;  %v599_v5 = vadd.f32 %v10086_v39, %v7911_v18 }
 0xb74   : > { %v9399_v17 = vpop.eup %6424  ;;  %6444 = vpow2.f32 %v4163_v56 }
 0xb75   : > { %v6427_v31 = vpop.eup %6426  ;;  %6446 = vpow2.f32 %v4165_v55  ;;  %v4184_v33 = vadd.f32 %v9352_v27, %v4183_v10  ;;  %v4221_v48 = vpack.c.bf16 %v9399_v17, %v9391_v42  ;;  %v10087_v27 = vld [vmem:[#allocation53_spill] sm:$0xff]  ;;  %v4272_v10 = vpack.c.bf16 %v599_v5, %v599_v5 }
 0xb76   : > { %v6429_v30 = vpop.eup %6428  ;;  %6448 = vpow2.f32 %v4167_v47 }
 0xb77   : > { %v6431_v15 = vpop.eup %6430  ;;  %6450 = vpow2.f32 %v4169_v34  ;;  %v4185_v58 = vadd.f32 %v9360_v63, %v4184_v33  ;;  %v4222_v35 = vpack.c.bf16 %v6429_v30, %v6427_v31  ;;  %v923_v63 = vadd.f32 %v10087_v27, %v8823_v24 }
 0xb78   : > { %v6433_v22 = vpop.eup %6432  ;;  %6452 = vpow2.f32 %v4171_v14  ;;  %v4358_v18 = vsel %vm1017_vm1, %v4272_v10, 0 }
 0xb79   : > { %v6435_v45 = vpop.eup %6434  ;;  %6454 = vpow2.f32 %v4173_v54  ;;  %v4186_v37 = vadd.f32 %v9365_v1, %v4185_v58  ;;  %5518 = vmatprep.subr.bf16.mxu1 %v4222_v35  ;;  %v4223_v61 = vpack.c.bf16 %v6433_v22, %v6431_v15  ;;  %v3798_v1 = vpack.c.bf16 %v923_v63, %v923_v63  ;;  %v10090_v58 = vld [vmem:[#allocation15_spill] sm:$0xff]  ;;  %v10091_v35 = vld [vmem:[#allocation16_spill] sm:$0xff] }
 0xb7a   : > { %v6437_v21 = vpop.eup %6436  ;;  %6456 = vpow2.f32 %v4175_v7  ;;  %5519 = vmatpush3.bf16.msra.mxu1 %v4214_v12  ;;  %v10088_v7 = vld [vmem:[#allocation35_spill] sm:$0xff] }
 0xb7b   : > { %v6439_v19 = vpop.eup %6438  ;;  %v4187_v59 = vadd.f32 %v9373_v25, %v4186_v37  ;;  %5520 = vmatprep.subr.bf16.mxu1 %v4223_v61  ;;  %v4224_v16 = vpack.c.bf16 %v6437_v21, %v6435_v45  ;;  %v10094_v37 = vld [vmem:[#allocation73_spill] sm:$0xff] }
 0xb7c   : > { %v6441_v29 = vpop.eup %6440 }
 0xb7d   : > { %v6443_v44 = vpop.eup %6442  ;;  %v4188_v3 = vadd.f32 %v9378_v8, %v4187_v59  ;;  %v4225_v28 = vpack.c.bf16 %v6441_v29, %v6439_v19 }
 0xb7e   : > { %v6445_v52 = vpop.eup %6444  ;;  %5521 = vmatpush3.bf16.msra.mxu1 %v4215_v26 }
 0xb7f   : > { %v6447_v43 = vpop.eup %6446  ;;  %v4189_v60 = vadd.f32 %v9386_v6, %v4188_v3  ;;  %5522 = vmatprep.subr.bf16.mxu1 %v4224_v16  ;;  %v4226_v51 = vpack.c.bf16 %v6445_v52, %v6443_v44 }
 0xb80   : > { %v6449_v46 = vpop.eup %6448 }
 0xb81   : > { %v6451_v12 = vpop.eup %6450  ;;  %v4190_v57 = vadd.f32 %v9391_v42, %v4189_v60  ;;  %v4227_v50 = vpack.c.bf16 %v6449_v46, %v6447_v43 }
 0xb82   : > { %v6453_v49 = vpop.eup %6452  ;;  %5523 = vmatpush3.bf16.msra.mxu1 %v4216_v62 }
 0xb83   : > { %v6455_v4 = vpop.eup %6454  ;;  %v4191_v11 = vadd.f32 %v9399_v17, %v4190_v57  ;;  %5524 = vmatprep.subr.bf16.mxu1 %v4225_v28  ;;  %v4228_v36 = vpack.c.bf16 %v6453_v49, %v6451_v12 }
 0xb84   : > { %v6457_v2 = vpop.eup %6456 }
 0xb85   : > { %v4192_v26 = vadd.f32 %v6427_v31, %v4191_v11  ;;  %v4229_v56 = vpack.c.bf16 %v6457_v2, %v6455_v4 }
 0xb86   : > { %5525 = vmatpush3.bf16.msra.mxu1 %v4217_v40 }
 0xb87   : > { %v4193_v55 = vadd.f32 %v6429_v30, %v4192_v26  ;;  %5526 = vmatprep.subr.bf16.mxu1 %v4226_v51 }
 0xb89   : > { %v4194_v32 = vadd.f32 %v6431_v15, %v4193_v55  ;;  %v10089_v15 = vld [vmem:[#allocation36_spill] sm:$0xff] }
 0xb8a   : > { %5527 = vmatpush3.bf16.msra.mxu1 %v4218_v9  ;;  %v4286_v9 = vpop.trf.xlu1 }
 0xb8b   : > { %v4195_v13 = vadd.f32 %v6433_v22, %v4194_v32  ;;  %5528 = vmatprep.subr.bf16.mxu1 %v4227_v50  ;;  %v10092_v22 = vld [vmem:[#allocation71_spill] sm:$0xff] }
 0xb8d   : > { %v4196_v62 = vadd.f32 %v6435_v45, %v4195_v13  ;;  %v10093_v45 = vld [vmem:[#allocation72_spill] sm:$0xff] }
 0xb8e   : > { %5529 = vmatpush3.bf16.msra.mxu1 %v4219_v53  ;;  %v4287_v8 = vpop.trf.xlu1 }
 0xb8f   : > { %v4197_v47 = vadd.f32 %v6437_v21, %v4196_v62  ;;  %5530 = vmatprep.subr.bf16.mxu1 %v4228_v36 }
 0xb91   : > { %v4198_v40 = vadd.f32 %v6439_v19, %v4197_v47 }
 0xb92   : > { %5531 = vmatpush3.bf16.msra.mxu1 %v4220_v41  ;;  %v4288_v41 = vpop.trf.xlu1 }
 0xb93   : > { %v4199_v34 = vadd.f32 %v6441_v29, %v4198_v40  ;;  %5532 = vmatprep.subr.bf16.mxu1 %v4229_v56 }
 0xb95   : > { %v4200_v14 = vadd.f32 %v6443_v44, %v4199_v34 }
 0xb96   : > { %5533 = vmatpush3.bf16.msra.mxu1 %v4221_v48  ;;  %v4289_v17 = vpop.trf.xlu1 }
 0xb97   : > { %v4201_v25 = vadd.f32 %v6445_v52, %v4200_v14  ;;  %5906 = vmatprep.subr.msk.bf16.mxu1 %vm1017_vm1, %v4272_v10 }
 0xb99   : > { %v4202_v53 = vadd.f32 %v6447_v43, %v4201_v25  ;;  %4263 = vmatmul.mubr.bf16.vlgmr.msra.gmra.mrb[136].mxu1 %v3798_v1 }
 0xb9a   : > { %5842 = vmatpush3.bf16.msra.mxu1 %v4358_v18  ;;  %5843 = vmatprep.mubr.msk.bf16.mxu1 %vm968_vm2, %v4285_v20  ;;  %v4290_v33 = vpop.trf.xlu1 }
 0xb9b   : > { %v4203_v24 = vadd.f32 %v6449_v46, %v4202_v53 }
 0xb9d   : > { %v4204_v6 = vadd.f32 %v6451_v12, %v4203_v24 }
 0xb9e   : > { %v4291_v48 = vpop.trf.xlu1 }
 0xb9f   : > { %v4205_v31 = vadd.f32 %v6453_v49, %v4204_v6 }
 0xba1   : > { %v4206_v54 = vadd.f32 %v6455_v4, %v4205_v31  ;;  %5844 = vmatmul.mubr.msk.bf16.vlgmr.msra.gmra.mrb[140].mxu1 %vm968_vm2, %v4286_v9 }
 0xba2   : > { %5847 = vmatprep.mubr.msk.bf16.mxu1 %vm968_vm2, %v4287_v8  ;;  %v4292_v30 = vpop.trf.xlu1 }
 0xba3   : > { %v4207_v42 = vadd.f32 %v6457_v2, %v4206_v54 }
 0xba9   : > { %5848 = vmatmul.mubr.msk.bf16.gmra.mrb[144].mxu1 %vm968_vm2, %v4288_v41 }
 0xbaa   : > { %5851 = vmatprep.mubr.msk.bf16.mxu1 %vm968_vm2, %v4289_v17 }
 0xbb1   : > { %5852 = vmatmul.mubr.msk.bf16.gmra.mrb[148].mxu1 %vm968_vm2, %v4290_v33 }
 0xbb2   : > { %5855 = vmatprep.mubr.msk.bf16.mxu1 %vm968_vm2, %v4291_v48 }
 0xbb9   : > { %5856 = vmatmul.mubr.msk.bf16.gmra.mrb[152].mxu1 %vm968_vm2, %v4292_v30 }
 0xbba   : > { %5859 = vmatprep.mubr.msk.bf16.mxu1 %vm968_vm2, %v7915_v23  ;;  %v4208_v23 = vrot.slane %v4207_v42, 4 }
 0xbbc   : > { %v4209_v61 = vadd.f32 %v4208_v23, %v4207_v42 }
 0xbbe   : > { %v4210_v21 = vrot.slane %v4209_v61, 2 }
 0xbc0   : > { %v4211_v19 = vadd.f32 %v4210_v21, %v4209_v61 }
 0xbc1   : > { %5860 = vmatmul.mubr.msk.bf16.gmra.mrb[156].mxu1 %vm968_vm2, %v10088_v7 }
 0xbc2   : > { %5863 = vmatprep.mubr.msk.bf16.mxu1 %vm968_vm2, %v10089_v15  ;;  %v4212_v59 = vrot.slane %v4211_v19, 1 }
 0xbc4   : > { %v4213_v16 = vadd.f32 %v4212_v59, %v4211_v19 }
 0xbc6   : > { %6458 = vrcp.f32 %v4213_v16 }
 0xbc9   : > { %5864 = vmatmul.mubr.msk.bf16.gmra.mrb[160].mxu1 %vm968_vm2, %v10090_v58 }
 0xbca   : > { %5867 = vmatprep.mubr.msk.bf16.mxu1 %vm968_vm2, %v10091_v35 }
 0xbd0   : > { %v6459_v52 = vpop.eup %6458 }
 0xbd1   : > { %5868 = vmatmul.mubr.msk.bf16.gmra.mrb[164].mxu1 %vm968_vm2, %v10092_v22 }
 0xbd2   : > { %5871 = vmatprep.mubr.msk.bf16.mxu1 %vm968_vm2, %v10093_v45 }
 0xbd9   : > { %5872 = vmatmul.mubr.msk.bf16.gmra.mrb[168].mxu1 %vm968_vm2, %v10094_v37 }
 0xc6c   : > { %v5534_v29 = vpop.f32.mrb[136].mxu1 }
 0xc6d   : > { %v5535_v44 = vpop.f32.mrb[137].mxu1 }
 0xc6e   : > { %v5536_v3 = vadd.f32 %v5535_v44, %v5534_v29  ;;  %v5537_v28 = vpop.f32.mrb[138].mxu1 }
 0xc6f   : > { %v5538_v43 = vpop.f32.mrb[139].mxu1 }
 0xc70   : > { %v9474_v60 = vmul.f32 %v6459_v52, %v5536_v3 }
 0xc74   : > { %v9476_v51 = vpop.f32.mrb[140].mxu1 }
 0xc75   : > { %v9478_v46 = vpop.f32.mrb[141].mxu1 }
 0xc76   : > { %v9480_v12 = vpop.f32.mrb[142].mxu1 }
 0xc77   : > { %v9482_v57 = vpop.f32.mrb[143].mxu1 }
 0xc7c   : > { %v9484_v50 = vpop.f32.mrb[144].mxu1 }
 0xc7d   : > { %v4523_v49 = vmax.f32 %v9476_v51, %v9484_v50  ;;  %v9488_v4 = vpop.f32.mrb[145].mxu1 }
 0xc7e   : > { %v4521_v11 = vmax.f32 %v9478_v46, %v9488_v4  ;;  %v9492_v36 = vpop.f32.mrb[146].mxu1 }
 0xc7f   : > { %v4524_v2 = vmax.f32 %v9480_v12, %v9492_v36  ;;  %v9496_v26 = vpop.f32.mrb[147].mxu1 }
 0xc80   : > { %v4522_v56 = vmax.f32 %v9482_v57, %v9496_v26 }
 0xc84   : > { %v9500_v55 = vpop.f32.mrb[148].mxu1 }
 0xc85   : > { %v4527_v32 = vmax.f32 %v4523_v49, %v9500_v55  ;;  %v9503_v13 = vpop.f32.mrb[149].mxu1 }
 0xc86   : > { %v4525_v20 = vmax.f32 %v4521_v11, %v9503_v13  ;;  %v9506_v62 = vpop.f32.mrb[150].mxu1 }
 0xc87   : > { %v4528_v47 = vmax.f32 %v4524_v2, %v9506_v62  ;;  %v9509_v39 = vpop.f32.mrb[151].mxu1 }
 0xc88   : > { %v4526_v5 = vmax.f32 %v4522_v56, %v9509_v39 }
 0xc8c   : > { %v9512_v40 = vpop.f32.mrb[152].mxu1 }
 0xc8d   : > { %v4531_v27 = vmax.f32 %v4527_v32, %v9512_v40  ;;  %v9515_v63 = vpop.f32.mrb[153].mxu1 }
 0xc8e   : > { %v4529_v9 = vmax.f32 %v4525_v20, %v9515_v63  ;;  %v9518_v34 = vpop.f32.mrb[154].mxu1 }
 0xc8f   : > { %v4532_v10 = vmax.f32 %v4528_v47, %v9518_v34  ;;  %v9521_v14 = vpop.f32.mrb[155].mxu1 }
 0xc90   : > { %v4530_v1 = vmax.f32 %v4526_v5, %v9521_v14 }
 0xc94   : > { %v9524_v25 = vpop.f32.mrb[156].mxu1 }
 0xc95   : > { %v4535_v18 = vmax.f32 %v4531_v27, %v9524_v25  ;;  %v9527_v8 = vpop.f32.mrb[157].mxu1 }
 0xc96   : > { %v4533_v53 = vmax.f32 %v4529_v9, %v9527_v8  ;;  %v9530_v24 = vpop.f32.mrb[158].mxu1 }
 0xc97   : > { %v4536_v6 = vmax.f32 %v4532_v10, %v9530_v24  ;;  %v9533_v41 = vpop.f32.mrb[159].mxu1 }
 0xc98   : > { %v4534_v31 = vmax.f32 %v4530_v1, %v9533_v41 }
 0xc9c   : > { %v9536_v54 = vpop.f32.mrb[160].mxu1 }
 0xc9d   : > { %v4539_v42 = vmax.f32 %v4535_v18, %v9536_v54  ;;  %v9539_v17 = vpop.f32.mrb[161].mxu1 }
 0xc9e   : > { %v4537_v33 = vmax.f32 %v4533_v53, %v9539_v17  ;;  %v9542_v48 = vpop.f32.mrb[162].mxu1 }
 0xc9f   : > { %v4540_v30 = vmax.f32 %v4536_v6, %v9542_v48  ;;  %v9545_v7 = vpop.f32.mrb[163].mxu1 }
 0xca0   : > { %v4538_v15 = vmax.f32 %v4534_v31, %v9545_v7 }
 0xca4   : > { %v9548_v58 = vpop.f32.mrb[164].mxu1 }
 0xca5   : > { %v4543_v35 = vmax.f32 %v4539_v42, %v9548_v58  ;;  %v9551_v22 = vpop.f32.mrb[165].mxu1 }
 0xca6   : > { %v4541_v45 = vmax.f32 %v4537_v33, %v9551_v22  ;;  %v9554_v37 = vpop.f32.mrb[166].mxu1 }
 0xca7   : > { %v4544_v23 = vmax.f32 %v4540_v30, %v9554_v37  ;;  %v9557_v61 = vpop.f32.mrb[167].mxu1 }
 0xca8   : > { %v4542_v21 = vmax.f32 %v4538_v15, %v9557_v61 }
 0xcac   : > { %v9560_v19 = vpop.f32.mrb[168].mxu1 }
 0xcad   : > { %v4547_v59 = vmax.f32 %v4543_v35, %v9560_v19  ;;  %v9563_v16 = vpop.f32.mrb[169].mxu1 }
 0xcae   : > { %v4545_v29 = vmax.f32 %v4541_v45, %v9563_v16  ;;  %v9566_v44 = vpop.f32.mrb[170].mxu1 }
 0xcaf   : > { %v4548_v3 = vmax.f32 %v4544_v23, %v9566_v44  ;;  %v9569_v28 = vpop.f32.mrb[171].mxu1 }
 0xcb0   : > { %v4546_v52 = vmax.f32 %v4542_v21, %v9569_v28 }
 0xcb1   : > { %v4550_v43 = vmax.f32 %v4547_v59, %v4548_v3 }
 0xcb2   : > { %v4549_v49 = vmax.f32 %v4545_v29, %v4546_v52 }
 0xcb4   : > { %v4551_v11 = vmax.f32 %v4549_v49, %v4550_v43 }
 0xcb6   : > { %v4552_v2 = vrot.slane %v4551_v11, 4 }
 0xcb8   : > { %v4553_v56 = vmax.f32 %v4551_v11, %v4552_v2 }
 0xcba   : > { %v4554_v32 = vrot.slane %v4553_v56, 2 }
 0xcbc   : > { %v4555_v20 = vmax.f32 %v4553_v56, %v4554_v32 }
 0xcbe   : > { %v4556_v47 = vrot.slane %v4555_v20, 1 }
 0xcc0   : > { %v9572_v5 = vmax.f32 %v4555_v20, %v4556_v47 }
 0xcc2   : > { %v4558_v27 = vsub.f32 %v9478_v46, %v9572_v5  ;;  %v4559_v9 = vsub.f32 %v9482_v57, %v9572_v5  ;;  %v4560_v10 = vsub.f32 %v9476_v51, %v9572_v5  ;;  %v4561_v1 = vsub.f32 %v9480_v12, %v9572_v5 }
 0xcc3   : > { %v4562_v18 = vsub.f32 %v9488_v4, %v9572_v5  ;;  %v4563_v53 = vsub.f32 %v9496_v26, %v9572_v5  ;;  %v4564_v6 = vsub.f32 %v9484_v50, %v9572_v5  ;;  %v4565_v46 = vsub.f32 %v9492_v36, %v9572_v5 }
 0xcc4   : > { %v4566_v57 = vsub.f32 %v9503_v13, %v9572_v5  ;;  %v4567_v51 = vsub.f32 %v9509_v39, %v9572_v5  ;;  %v4568_v12 = vsub.f32 %v9500_v55, %v9572_v5  ;;  %v4569_v4 = vsub.f32 %v9506_v62, %v9572_v5 }
 0xcc5   : > { %v4570_v26 = vsub.f32 %v9515_v63, %v9572_v5  ;;  %v4571_v50 = vsub.f32 %v9521_v14, %v9572_v5  ;;  %v4572_v36 = vsub.f32 %v9512_v40, %v9572_v5  ;;  %v4573_v13 = vsub.f32 %v9518_v34, %v9572_v5 }
 0xcc6   : > { %v4574_v39 = vsub.f32 %v9527_v8, %v9572_v5  ;;  %v4575_v55 = vsub.f32 %v9533_v41, %v9572_v5  ;;  %v4576_v62 = vsub.f32 %v9524_v25, %v9572_v5  ;;  %v4577_v63 = vsub.f32 %v9530_v24, %v9572_v5 }
 0xcc7   : > { %v4578_v14 = vsub.f32 %v9539_v17, %v9572_v5  ;;  %v4579_v40 = vsub.f32 %v9545_v7, %v9572_v5  ;;  %v4580_v34 = vsub.f32 %v9536_v54, %v9572_v5  ;;  %v4581_v8 = vsub.f32 %v9542_v48, %v9572_v5 }
 0xcc8   : > { %v4582_v41 = vsub.f32 %v9551_v22, %v9572_v5  ;;  %v4583_v25 = vsub.f32 %v9557_v61, %v9572_v5  ;;  %v4584_v24 = vsub.f32 %v9548_v58, %v9572_v5  ;;  %v4585_v31 = vsub.f32 %v9554_v37, %v9572_v5 }
 0xcc9   : > { %v4586_v42 = vsub.f32 %v9563_v16, %v9572_v5  ;;  %v4587_v17 = vsub.f32 %v9569_v28, %v9572_v5  ;;  %v4588_v33 = vsub.f32 %v9560_v19, %v9572_v5  ;;  %v4589_v30 = vsub.f32 %v9566_v44, %v9572_v5 }
 0xcca   : > { %v4590_v15 = vmul.f32 1.442695, %v4558_v27  ;;  %v4592_v35 = vmul.f32 1.442695, %v4559_v9  ;;  %v4594_v45 = vmul.f32 1.442695, %v4560_v10 }
 0xccb   : > { %v4596_v23 = vmul.f32 1.442695, %v4561_v1  ;;  %v4598_v21 = vmul.f32 1.442695, %v4562_v18  ;;  %v4600_v59 = vmul.f32 1.442695, %v4563_v53 }
 0xccc   : > { %6460 = vpow2.f32 %v4590_v15  ;;  %v4602_v29 = vmul.f32 1.442695, %v4564_v6  ;;  %v4604_v3 = vmul.f32 1.442695, %v4565_v46  ;;  %v4606_v52 = vmul.f32 1.442695, %v4566_v57 }
 0xccd   : > { %6462 = vpow2.f32 %v4592_v35  ;;  %v4608_v43 = vmul.f32 1.442695, %v4567_v51  ;;  %v4610_v49 = vmul.f32 1.442695, %v4568_v12  ;;  %v4612_v11 = vmul.f32 1.442695, %v4569_v4 }
 0xcce   : > { %6464 = vpow2.f32 %v4594_v45  ;;  %v4614_v2 = vmul.f32 1.442695, %v4570_v26  ;;  %v4616_v56 = vmul.f32 1.442695, %v4571_v50  ;;  %v4618_v20 = vmul.f32 1.442695, %v4572_v36 }
 0xccf   : > { %6466 = vpow2.f32 %v4596_v23  ;;  %v4620_v27 = vmul.f32 1.442695, %v4573_v13  ;;  %v4622_v10 = vmul.f32 1.442695, %v4574_v39  ;;  %v4624_v6 = vmul.f32 1.442695, %v4575_v55 }
 0xcd0   : > { %6468 = vpow2.f32 %v4598_v21  ;;  %v4626_v57 = vmul.f32 1.442695, %v4576_v62  ;;  %v4628_v26 = vmul.f32 1.442695, %v4577_v63  ;;  %v4630_v36 = vmul.f32 1.442695, %v4578_v14 }
 0xcd1   : > { %6470 = vpow2.f32 %v4600_v59  ;;  %v4632_v62 = vmul.f32 1.442695, %v4579_v40  ;;  %v4634_v63 = vmul.f32 1.442695, %v4580_v34  ;;  %v4636_v7 = vmul.f32 1.442695, %v4581_v8 }
 0xcd2   : > { %6472 = vpow2.f32 %v4602_v29  ;;  %v4638_v54 = vmul.f32 1.442695, %v4582_v41  ;;  %v4640_v48 = vmul.f32 1.442695, %v4583_v25  ;;  %v4642_v22 = vmul.f32 1.442695, %v4584_v24 }
 0xcd3   : > { %6474 = vpow2.f32 %v4604_v3  ;;  %v4644_v61 = vmul.f32 1.442695, %v4585_v31  ;;  %v4646_v58 = vmul.f32 1.442695, %v4586_v42  ;;  %v4648_v37 = vmul.f32 1.442695, %v4587_v17 }
 0xcd4   : > { %6476 = vpow2.f32 %v4606_v52 }
 0xcd5   : > { %6478 = vpow2.f32 %v4608_v43  ;;  %v4650_v43 = vmul.f32 1.442695, %v4588_v33 }
 0xcd6   : > { %v9638_v32 = vpop.eup %6460  ;;  %6480 = vpow2.f32 %v4610_v49 }
 0xcd7   : > { %v9640_v47 = vpop.eup %6462  ;;  %6482 = vpow2.f32 %v4612_v11  ;;  %v4652_v11 = vmul.f32 1.442695, %v4589_v30 }
 0xcd8   : > { %v9642_v9 = vpop.eup %6464  ;;  %6484 = vpow2.f32 %v4614_v2  ;;  %v4654_v1 = vadd.f32 %v9640_v47, %v9638_v32  ;;  %v4691_v18 = vpack.c.bf16 %v9640_v47, %v9638_v32 }
 0xcd9   : > { %v9648_v53 = vpop.eup %6466  ;;  %6486 = vpow2.f32 %v4616_v56 }
 0xcda   : > { %v9650_v46 = vpop.eup %6468  ;;  %6488 = vpow2.f32 %v4618_v20  ;;  %v4655_v51 = vadd.f32 %v9642_v9, %v4654_v1  ;;  %v4692_v12 = vpack.c.bf16 %v9648_v53, %v9642_v9 }
 0xcdb   : > { %v9655_v4 = vpop.eup %6470  ;;  %6490 = vpow2.f32 %v4620_v27 }
 0xcdc   : > { %v9657_v50 = vpop.eup %6472  ;;  %6492 = vpow2.f32 %v4622_v10  ;;  %v4656_v13 = vadd.f32 %v9648_v53, %v4655_v51  ;;  %v4693_v39 = vpack.c.bf16 %v9655_v4, %v9650_v46 }
 0xcdd   : > { %v9662_v55 = vpop.eup %6474  ;;  %6494 = vpow2.f32 %v4624_v6 }
 0xcde   : > { %v9667_v15 = vpop.eup %6476  ;;  %6496 = vpow2.f32 %v4626_v57  ;;  %v4657_v14 = vadd.f32 %v9650_v46, %v4656_v13  ;;  %v4694_v35 = vpack.c.bf16 %v9662_v55, %v9657_v50 }
 0xcdf   : > { %v9675_v45 = vpop.eup %6478  ;;  %6498 = vpow2.f32 %v4628_v26 }
 0xce0   : > { %v9680_v40 = vpop.eup %6480  ;;  %6500 = vpow2.f32 %v4630_v36  ;;  %v4658_v34 = vadd.f32 %v9655_v4, %v4657_v14  ;;  %v4695_v23 = vpack.c.bf16 %v9675_v45, %v9667_v15 }
 0xce1   : > { %v9688_v21 = vpop.eup %6482  ;;  %6502 = vpow2.f32 %v4632_v62 }
 0xce2   : > { %v9693_v8 = vpop.eup %6484  ;;  %6504 = vpow2.f32 %v4634_v63  ;;  %v4659_v41 = vadd.f32 %v9657_v50, %v4658_v34  ;;  %v4696_v59 = vpack.c.bf16 %v9688_v21, %v9680_v40 }
 0xce3   : > { %v9701_v29 = vpop.eup %6486  ;;  %6506 = vpow2.f32 %v4636_v7 }
 0xce4   : > { %v9706_v25 = vpop.eup %6488  ;;  %6508 = vpow2.f32 %v4638_v54  ;;  %v4660_v24 = vadd.f32 %v9662_v55, %v4659_v41  ;;  %v4697_v3 = vpack.c.bf16 %v9701_v29, %v9693_v8 }
 0xce5   : > { %v9714_v52 = vpop.eup %6490  ;;  %6510 = vpow2.f32 %v4640_v48 }
 0xce6   : > { %v6493_v31 = vpop.eup %6492  ;;  %6512 = vpow2.f32 %v4642_v22  ;;  %v4661_v16 = vadd.f32 %v9667_v15, %v4660_v24  ;;  %v4698_v42 = vpack.c.bf16 %v9714_v52, %v9706_v25  ;;  %v10095_v15 = vld [vmem:[#allocation74_spill] sm:$0xff] }
 0xce7   : > { %v6495_v49 = vpop.eup %6494  ;;  %6514 = vpow2.f32 %v4644_v61  ;;  %v5994_v61 = vld [vmem:[%s9835_s6] sm:$0xff]  }
 0xce8   : > { %v6497_v2 = vpop.eup %6496  ;;  %6516 = vpow2.f32 %v4646_v58  ;;  %v4662_v28 = vadd.f32 %v9675_v45, %v4661_v16  ;;  %v4699_v17 = vpack.c.bf16 %v6495_v49, %v6493_v31 }
 0xce9   : > { %v6499_v56 = vpop.eup %6498  ;;  %6518 = vpow2.f32 %v4648_v37 }
 0xcea   : > { %v6501_v19 = vpop.eup %6500  ;;  %6520 = vpow2.f32 %v4650_v43  ;;  %v4663_v33 = vadd.f32 %v9680_v40, %v4662_v28  ;;  %5557 = vmatprep.subr.bf16.mxu0 %v4699_v17  ;;  %v4700_v20 = vpack.c.bf16 %v6499_v56, %v6497_v2  ;;  %v5996_v28 = vld [vmem:[%s9835_s6 + $0x10] sm:$0xff]   ;;  %v5997_v17 = vld [vmem:[%s9835_s6 + $0x18] sm:$0xff]  }
 0xceb   : > { %v6503_v27 = vpop.eup %6502  ;;  %6522 = vpow2.f32 %v4652_v11  ;;  %5558 = vmatpush3.bf16.msra.mxu0 %v4691_v18 }
 0xcec   : > { %v6505_v44 = vpop.eup %6504  ;;  %v4664_v5 = vadd.f32 %v9688_v21, %v4663_v33  ;;  %5559 = vmatprep.subr.bf16.mxu0 %v4700_v20  ;;  %v4701_v30 = vpack.c.bf16 %v6503_v27, %v6501_v19 }
 0xced   : > { %v6507_v10 = vpop.eup %6506 }
 0xcee   : > { %v6509_v1 = vpop.eup %6508  ;;  %v4665_v6 = vadd.f32 %v9693_v8, %v4664_v5  ;;  %v4702_v57 = vpack.c.bf16 %v6507_v10, %v6505_v44 }
 0xcef   : > { %v6511_v51 = vpop.eup %6510  ;;  %5560 = vmatpush3.bf16.msra.mxu0 %v4692_v12 }
 0xcf0   : > { %v6513_v26 = vpop.eup %6512  ;;  %v4666_v36 = vadd.f32 %v9701_v29, %v4665_v6  ;;  %5561 = vmatprep.subr.bf16.mxu0 %v4701_v30  ;;  %v4703_v32 = vpack.c.bf16 %v6511_v51, %v6509_v1 }
 0xcf1   : > { %v6515_v47 = vpop.eup %6514 }
 0xcf2   : > { %v6517_v18 = vpop.eup %6516  ;;  %v4667_v13 = vadd.f32 %v9706_v25, %v4666_v36  ;;  %v4704_v62 = vpack.c.bf16 %v6515_v47, %v6513_v26 }
 0xcf3   : > { %v6519_v63 = vpop.eup %6518  ;;  %5562 = vmatpush3.bf16.msra.mxu0 %v4693_v39 }
 0xcf4   : > { %v6521_v14 = vpop.eup %6520  ;;  %v4668_v7 = vadd.f32 %v9714_v52, %v4667_v13  ;;  %5563 = vmatprep.subr.bf16.mxu0 %v4702_v57  ;;  %v4705_v9 = vpack.c.bf16 %v6519_v63, %v6517_v18 }
 0xcf5   : > { %v6523_v53 = vpop.eup %6522 }
 0xcf6   : > { %v4669_v12 = vadd.f32 %v6493_v31, %v4668_v7  ;;  %v4706_v54 = vpack.c.bf16 %v6523_v53, %v6521_v14 }
 0xcf7   : > { %5564 = vmatpush3.bf16.msra.mxu0 %v4694_v35  ;;  %v4275_v35 = vpack.c.bf16 %v10095_v15, %v10095_v15 }
 0xcf8   : > { %v4670_v34 = vadd.f32 %v6495_v49, %v4669_v12  ;;  %5565 = vmatprep.subr.bf16.mxu0 %v4703_v32 }
 0xcfa   : > { %v4671_v48 = vadd.f32 %v6497_v2, %v4670_v34  ;;  %v5995_v2 = vld [vmem:[%s9835_s6 + $0x8] sm:$0xff]  }
 0xcfb   : > { %5566 = vmatpush3.bf16.msra.mxu0 %v4695_v23  ;;  %v10096_v23 = vld [vmem:[#allocation30_spill] sm:$0xff] }
 0xcfc   : > { %v4672_v46 = vadd.f32 %v6499_v56, %v4671_v48  ;;  %5567 = vmatprep.subr.bf16.mxu0 %v4704_v62 }
 0xcfe   : > { %v4673_v4 = vadd.f32 %v6501_v19, %v4672_v46  ;;  %v4782_v19 = vpop.permute.xlu0 %4781 }
 0xcff   : > { %5568 = vmatpush3.bf16.msra.mxu0 %v4696_v59 }
 0xd00   : > { %v4674_v39 = vadd.f32 %v6503_v27, %v4673_v4  ;;  %5569 = vmatprep.subr.bf16.mxu0 %v4705_v9 }
 0xd02   : > { %v4675_v22 = vadd.f32 %v6505_v44, %v4674_v39  ;;  %v4792_v5 = vpop.permute.xlu0 %4791 }
 0xd03   : > { %5570 = vmatpush3.bf16.msra.mxu0 %v4697_v3 }
 0xd04   : > { %v4676_v50 = vadd.f32 %v6507_v10, %v4675_v22  ;;  %5571 = vmatprep.subr.bf16.mxu0 %v4706_v54 }
 0xd06   : > { %v4677_v55 = vadd.f32 %v6509_v1, %v4676_v50 }
 0xd07   : > { %5572 = vmatpush3.bf16.msra.mxu0 %v4698_v42 }
 0xd08   : > { %v4678_v45 = vadd.f32 %v6511_v51, %v4677_v55  ;;  %5875 = vmatprep.subr.bf16.mxu0 %v10096_v23 }
 0xd0a   : > { %v4679_v41 = vadd.f32 %v6513_v26, %v4678_v45  ;;  %4740 = vmatmul.mubr.bf16.vlgmr.msra.gmra.mrb[152].mxu0 %v4275_v35  ;;  %v4802_v26 = vpop.permute.xlu0 %4801 }
 0xd0b   : > { %5876 = vmatpush3.bf16.msra.mxu0 %v10096_v23  ;;  %5883 = vmatprep.mubr.msk.bf16.mxu0 %vm524_vm0, %v5994_v61 }
 0xd0c   : > { %v4680_v40 = vadd.f32 %v6515_v47, %v4679_v41  ;;  %5877 = vmatprep.subr.bf16.mxu0 %v8488_v0 }
 0xd0e   : > { %v4681_v21 = vadd.f32 %v6517_v18, %v4680_v40 }
 0xd0f   : > { %5878 = vmatpush3.bf16.msra.mxu0 %v8488_v0 }
 0xd10   : > { %v4682_v8 = vadd.f32 %v6519_v63, %v4681_v21  ;;  %5879 = vmatprep.subr.bf16.mxu0 %v9159_v38 }
 0xd12   : > { %v4683_v59 = vadd.f32 %v6521_v14, %v4682_v8 }
 0xd13   : > { %5880 = vmatpush3.bf16.msra.mxu0 %v9159_v38 }
 0xd14   : > { %v4684_v29 = vadd.f32 %v6523_v53, %v4683_v59 }
 0xd16   : > { %v4685_v25 = vrot.slane %v4684_v29, 4 }
 0xd18   : > { %v4686_v58 = vadd.f32 %v4685_v25, %v4684_v29 }
 0xd1a   : > { %v4687_v24 = vrot.slane %v4686_v58, 2 }
 0xd1c   : > { %v4688_v3 = vadd.f32 %v4687_v24, %v4686_v58 }
 0xd1e   : > { %v4689_v52 = vrot.slane %v4688_v3, 1 }
 0xd20   : > { %v4690_v37 = vadd.f32 %v4689_v52, %v4688_v3 }
 0xd22   : > { %6524 = vrcp.f32 %v4690_v37 }
 0xd2c   : > { %v6525_v38 = vpop.eup %6524 }
 0xddd   : > { %v5573_v0 = vpop.f32.mrb[152].mxu0 }
 0xdde   : > { %v5574_v31 = vpop.f32.mrb[153].mxu0 }
 0xddf   : > { %v5575_v43 = vadd.f32 %v5574_v31, %v5573_v0  ;;  %v5576_v16 = vpop.f32.mrb[154].mxu0 }
 0xde0   : > { %v5577_v42 = vpop.f32.mrb[155].mxu0 }
 0xde1   : > { %v4748_v49 = vmul.f32 %v6525_v38, %v5575_v43 }
 0xde3   : > { %v4752_v11 = vpack.c.bf16 %v4748_v49, %v9474_v60  ;;  %v4772_v60 = vpop.permute.xlu1 %4771 }
 0xde5   : > { %5881 = vmatprep.subr.bf16.mxu0 %v4752_v11 }
 0xde6   : > { %5882 = vmatpush3.bf16.msra.mxu0 %v4752_v11 }
 0xde7   : > { %v4777_v56 = vpop.permute.xlu1 %4776 }
 0xde9   : > { %5884 = vmatmul.mubr.msk.bf16.vlgmr.msra.gmra.mrb[156].mxu0 %vm524_vm0, %v5995_v2 }
 0xdea   : > { %5887 = vmatprep.mubr.msk.bf16.mxu0 %vm524_vm0, %v5996_v28 }
 0xdeb   : > { %v4787_v33 = vpop.permute.xlu1 %4786 }
 0xdef   : > { %v4797_v57 = vpop.permute.xlu1 %4796 }
 0xdf1   : > { %5888 = vmatmul.mubr.msk.bf16.gmra.mrb[160].mxu0 %vm524_vm0, %v5997_v17 }
 0xdf3   : > { %v4807_v18 = vpop.permute.xlu1 %4806 }
 0xebc   : > { %v5885_v20 = vpop.f32.mrb[156].mxu0 }
 0xebd   : > { %v4884_v27 = vadd.f32 %v5885_v20, %v4782_v19  ;;  %v4875_v44 = vpop.f32.mrb[157].mxu0 }
 0xebe   : > { %v4876_v30 = vadd.f32 %v4875_v44, %v4772_v60  ;;  %v5886_v10 = vpop.f32.mrb[158].mxu0 }
 0xebf   : > { %4908 = vst [vmem:[%s9783_s24 + $0x10] sm:$0xff] %v4884_v27  ;;  %v4887_v1 = vadd.f32 %v5886_v10, %v4787_v33  ;;  %v4878_v6 = vpop.f32.mrb[159].mxu0 }
 0xec0   : > { %4906 = vst [vmem:[%s9783_s24] sm:$0xff] %v4876_v30  ;;  %v4879_v51 = vadd.f32 %v4878_v6, %v4777_v56 }
 0xec1   : > { %4909 = vst [vmem:[%s9783_s24 + $0x18] sm:$0xff] %v4887_v1 }
 0xec2   : > { %4907 = vst [vmem:[%s9783_s24 + $0x8] sm:$0xff] %v4879_v51 }
 0xec4   : > { %v5889_v36 = vpop.f32.mrb[160].mxu0  ;;  %4920 = sbr.rel (!%p6676_p6) target bundleno = 3795 (0xed3), region = 97 }
 0xec5   : > { %v4900_v32 = vadd.f32 %v5889_v36, %v4802_v26  ;;  %v4891_v47 = vpop.f32.mrb[161].mxu0 }
 0xec6   : > { %v4892_v13 = vadd.f32 %v4891_v47, %v4792_v5  ;;  %v5890_v62 = vpop.f32.mrb[162].mxu0  ;;  %v4970_v12 = vld [vmem:[%s9783_s24 + $0x10] sm:$0xff] (%p6676_p6) }
 0xec7   : > { %4912 = vst [vmem:[%s9783_s24 + $0x30] sm:$0xff] %v4900_v32  ;;  %v4903_v63 = vadd.f32 %v5890_v62, %v4807_v18  ;;  %v4894_v14 = vpop.f32.mrb[163].mxu0  ;;  %v4966_v9 = vld [vmem:[%s9783_s24] sm:$0xff] (%p6676_p6)  ;;  %4971 = vst [vmem:[%s4924_s14 + $0x20] sm:$0xff] (%p6676_p6), %v4970_v12 }
 0xec8   : > { %4910 = vst [vmem:[%s9783_s24 + $0x20] sm:$0xff] %v4892_v13  ;;  %v4895_v7 = vadd.f32 %v4894_v14, %v4797_v57  ;;  %v4972_v54 = vld [vmem:[%s9783_s24 + $0x18] sm:$0xff] (%p6676_p6)  ;;  %4967 = vst [vmem:[%s4924_s14] sm:$0xff] (%p6676_p6), %v4966_v9 }
 0xec9   : > { %4913 = vst [vmem:[%s9783_s24 + $0x38] sm:$0xff] %v4903_v63  ;;  %v4968_v53 = vld [vmem:[%s9783_s24 + $0x8] sm:$0xff] (%p6676_p6)  ;;  %4973 = vst [vmem:[%s4924_s14 + $0x30] sm:$0xff] (%p6676_p6), %v4972_v54 }
 0xeca   : > { %4911 = vst [vmem:[%s9783_s24 + $0x28] sm:$0xff] %v4895_v7  ;;  %4969 = vst [vmem:[%s4924_s14 + $0x10] sm:$0xff] (%p6676_p6), %v4968_v53 }
 0xece   : > { %v4978_v46 = vld [vmem:[%s9783_s24 + $0x30] sm:$0xff] }
 0xecf   : > { %v4974_v34 = vld [vmem:[%s9783_s24 + $0x20] sm:$0xff]  ;;  %4979 = vst [vmem:[%s4924_s14 + $0x60] sm:$0xff] %v4978_v46 }
 0xed0   : > { %v4980_v4 = vld [vmem:[%s9783_s24 + $0x38] sm:$0xff]  ;;  %4975 = vst [vmem:[%s4924_s14 + $0x40] sm:$0xff] %v4974_v34 }
 0xed1   : > { %v4976_v48 = vld [vmem:[%s9783_s24 + $0x28] sm:$0xff]  ;;  %4981 = vst [vmem:[%s4924_s14 + $0x70] sm:$0xff] %v4980_v4 }
 0xed2   : > { %4977 = vst [vmem:[%s4924_s14 + $0x50] sm:$0xff] %v4976_v48 }
 0xed3 PF: > { %s18_s11 = sadd.s32 1, %s6580_s11   ;;  %s10097_s27 = smov %s6560_s28 }
 0xed4   : > { %p15_p13 = scmp.ge.s32.totalorder %s18_s11, 6   ;;  %s10098_s28 = smov %s6684_s20 }
 0xed5   : > { %s10099_s29 = smov %s6572_s9  ;;  %s10100_s30 = smov %s6576_s10 }
 0xed6   : > { %s10101_s9 = smov %s10104_s12  ;;  %s10102_s10 = smov %s10108_s13 }
 0xed7   :  { %17 = sbr.rel (!%p15_p13) target bundleno = 4 (0x4), region = 169 }

</bundles_post_ra>
